<compile_context>
chip_gen: v7x
topology: tpu7x:2x2x1
jax: 0.10.0
libtpu: 0.0.40
codegen_flags: <defaults>
</compile_context>

<pallas_src>
import math

import jax
import jax.numpy as jnp
from jax import lax
from jax.experimental import pallas as pl
from jax.experimental.pallas import tpu as pltpu

EPS = 1e-5
D_IN = 192
D_OUT = 768
INV_SQRT2 = 0.7071067811865476


def _fused_kernel(x_ref, w_ref, b_ref, o_ref):
    # x_ref: (TM, D_IN)
    # w_ref: (D_IN, D_OUT)  -- linear weight (transposed) with LN gamma folded in
    # b_ref: (1, D_OUT)     -- linear bias with LN beta folded in
    # o_ref: (TM, D_OUT)
    x = x_ref[...].astype(jnp.float32)

    # LayerNorm (centered two-pass variance, matches torch numerics).
    mean = jnp.mean(x, axis=-1, keepdims=True)
    xc = x - mean
    var = jnp.mean(xc * xc, axis=-1, keepdims=True)
    xn = xc * lax.rsqrt(var + jnp.float32(EPS))

    # Linear (LN affine already folded into w/b): y = xn @ W' + b'
    y = jnp.dot(xn, w_ref[...], preferred_element_type=jnp.float32) + b_ref[...]

    # Exact GELU (approximate='none'): 0.5 * y * (1 + erf(y / sqrt(2)))
    g = 0.5 * y * (1.0 + lax.erf(y * jnp.float32(INV_SQRT2)))

    # Dropout p=0.0 -> identity.
    o_ref[...] = g.astype(o_ref.dtype)


def fold_layernorm_into_linear(w, b, gamma, beta):
    """One-time preprocessing (exact algebraic rewrite):
         LN(x)*gamma + beta) @ W^T + b == LN(x) @ (gamma[:,None]*W^T) + (beta@W^T + b)
    w: (D_OUT, D_IN) torch-layout weight; returns (w_fused (D_IN,D_OUT), b_fused (1,D_OUT)).
    """
    w_t = w.T.astype(jnp.float32)  # (D_IN, D_OUT)
    w_fused = gamma.astype(jnp.float32).reshape(D_IN, 1) * w_t
    b_fused = (beta.astype(jnp.float32) @ w_t + b.astype(jnp.float32)).reshape(1, D_OUT)
    return w_fused, b_fused


def _round_up(a, m):
    return ((a + m - 1) // m) * m


def _pick_tm():
    kind = ""
    try:
        kind = jax.devices()[0].device_kind.lower()
    except Exception:
        pass
    if "7" in kind:
        # v7x: 2 TensorCores/chip -> need >=2 grid steps per core so the
        # per-step DMAs pipeline under compute (784 rows pad to 896 = 4*224).
        return 224
    # v5e/v6e: single TC, HBM-bound -> biggest tile / fewest grid steps.
    return 392


def fused_layernorm_linear_gelu(x, w_fused, b_fused, *, tm=None):
    """x: (..., 192) float32; w_fused/b_fused from fold_layernorm_into_linear.
    Returns same leading dims with last dim 768 (float32)."""
    lead_shape = x.shape[:-1]
    n = math.prod(lead_shape) if lead_shape else 1

    if tm is None:
        tm = _pick_tm()
    tm = min(tm, _round_up(n, 8))          # never exceed (padded) row count
    n_pad = _round_up(n, tm)

    x2 = x.reshape(n, D_IN)
    if n_pad != n:
        # Zero rows are benign through LN/linear/GELU and are sliced off below.
        x2 = jnp.pad(x2, ((0, n_pad - n), (0, 0)))

    grid = (n_pad // tm,)
    out = pl.pallas_call(
        _fused_kernel,
        out_shape=jax.ShapeDtypeStruct((n_pad, D_OUT), jnp.float32),
        grid_spec=pltpu.PrefetchScalarGridSpec(
            num_scalar_prefetch=0,
            grid=grid,
            in_specs=[
                pl.BlockSpec((tm, D_IN), lambda i: (i, 0)),
                # Constant blocks: single buffer, fetched once per call.
                pl.BlockSpec((D_IN, D_OUT), lambda i: (0, 0),
                             pipeline_mode=pl.Buffered(1)),
                pl.BlockSpec((1, D_OUT), lambda i: (0, 0),
                             pipeline_mode=pl.Buffered(1)),
            ],
            out_specs=pl.BlockSpec((tm, D_OUT), lambda i: (i, 0)),
        ),
        compiler_params=pltpu.CompilerParams(
            dimension_semantics=("parallel",)
        ),
    )(x2, w_fused, b_fused)

    if n_pad != n:
        out = out[:n]
    return out.reshape(*lead_shape, D_OUT)


def reference(x, w, b, gamma, beta):
    xf = x.astype(jnp.float32)
    mean = jnp.mean(xf, axis=-1, keepdims=True)
    var = jnp.mean((xf - mean) ** 2, axis=-1, keepdims=True)
    xn = (xf - mean) * lax.rsqrt(var + EPS) * gamma + beta
    y = xn @ w.T + b
    return 0.5 * y * (1.0 + lax.erf(y / jnp.sqrt(2.0)))


if __name__ == "__main__":
    key = jax.random.PRNGKey(0)
    k_x, k_w, k_b, k_g, k_be = jax.random.split(key, 5)

    # Input matching the module: [1, 28, 28, 192]
    x = jax.random.normal(k_x, (1, 28, 28, D_IN), dtype=jnp.float32)

    # LayerNorm affine params (randomized so the folding path is exercised).
    gamma = 1.0 + 0.1 * jax.random.normal(k_g, (D_IN,), dtype=jnp.float32)
    beta = 0.1 * jax.random.normal(k_be, (D_IN,), dtype=jnp.float32)
    # Linear(192, 768): weight (768, 192), bias (768,), PyTorch-style uniform init.
    bound = 1.0 / jnp.sqrt(jnp.float32(D_IN))
    w = jax.random.uniform(k_w, (D_OUT, D_IN), jnp.float32, -bound, bound)
    b = jax.random.uniform(k_b, (D_OUT,), jnp.float32, -bound, bound)

    # One-time preprocessing (outside the hot path).
    w_fused, b_fused = fold_layernorm_into_linear(w, b, gamma, beta)

    # Hot path: single fused pallas_call under jit; fused params are constants.
    run = jax.jit(lambda xx: fused_layernorm_linear_gelu(xx, w_fused, b_fused))

    out = jax.block_until_ready(run(x))

    ref = reference(x, w, b, gamma, beta)
    assert out.shape == (1, 28, 28, D_OUT), out.shape
    assert jnp.allclose(out, ref, atol=1e-4, rtol=1e-4), "mismatch vs reference"

    print("KERNEL_OK")
</pallas_src>

<mosaic_0001>
module attributes {stable_mosaic.version = 11 : i64} {
  func.func @_fused_kernel(%arg0: i32, %arg1: memref<392x192xf32, #tpu.memory_space<vmem>>, %arg2: memref<192x768xf32, #tpu.memory_space<vmem>>, %arg3: memref<1x768xf32, #tpu.memory_space<vmem>>, %arg4: memref<392x768xf32, #tpu.memory_space<vmem>>) attributes {dimension_semantics = [#tpu.dimension_semantics<parallel>], iteration_bounds = array<i64: 2>, scalar_prefetch = 0 : i64, scratch_operands = 0 : i64, tpu.core_type = #tpu.core_type<tc>, window_params = [{transform_indices = @transform_0, window_bounds = array<i64: 392, 192>}, {pipeline_mode = #tpu.pipeline_mode<synchronous>, transform_indices = @transform_1, window_bounds = array<i64: 192, 768>}, {pipeline_mode = #tpu.pipeline_mode<synchronous>, transform_indices = @transform_2, window_bounds = array<i64: 1, 768>}, {transform_indices = @transform_3, window_bounds = array<i64: 392, 768>}]} {
    %c0 = arith.constant 0 : index
    %c0_0 = arith.constant 0 : index
    %0 = vector.load %arg1[%c0, %c0_0] : memref<392x192xf32, #tpu.memory_space<vmem>>, vector<392x192xf32>
    %cst = arith.constant dense<0.000000e+00> : vector<392xf32>
    %1 = vector.multi_reduction <add>, %0, %cst [1] : vector<392x192xf32> to vector<392xf32>
    %2 = vector.shape_cast %1 : vector<392xf32> to vector<392x1xf32>
    %cst_1 = arith.constant 1.920000e+02 : f32
    %3 = vector.broadcast %cst_1 : f32 to vector<392x1xf32>
    %4 = arith.divf %2, %3 : vector<392x1xf32>
    %5 = vector.broadcast %4 : vector<392x1xf32> to vector<392x192xf32>
    %6 = arith.subf %0, %5 : vector<392x192xf32>
    %7 = arith.mulf %6, %6 : vector<392x192xf32>
    %cst_2 = arith.constant dense<0.000000e+00> : vector<392xf32>
    %8 = vector.multi_reduction <add>, %7, %cst_2 [1] : vector<392x192xf32> to vector<392xf32>
    %9 = vector.shape_cast %8 : vector<392xf32> to vector<392x1xf32>
    %cst_3 = arith.constant 1.920000e+02 : f32
    %10 = vector.broadcast %cst_3 : f32 to vector<392x1xf32>
    %11 = arith.divf %9, %10 : vector<392x1xf32>
    %cst_4 = arith.constant 9.99999974E-6 : f32
    %12 = vector.broadcast %cst_4 : f32 to vector<392x1xf32>
    %13 = arith.addf %11, %12 : vector<392x1xf32>
    %14 = math.rsqrt %13 : vector<392x1xf32>
    %15 = vector.broadcast %14 : vector<392x1xf32> to vector<392x192xf32>
    %16 = arith.mulf %6, %15 : vector<392x192xf32>
    %c0_5 = arith.constant 0 : index
    %c0_6 = arith.constant 0 : index
    %17 = vector.load %arg2[%c0_5, %c0_6] : memref<192x768xf32, #tpu.memory_space<vmem>>, vector<192x768xf32>
    %cst_7 = arith.constant dense<0.000000e+00> : vector<392x768xf32>
    %18 = tpu.matmul %16, %17, %cst_7 {dimension_numbers = #tpu.dot_dimension_numbers<[1], [0], [0], [1], [0, 0, 1, 1], [], []>} : vector<392x192xf32>, vector<192x768xf32>, vector<392x768xf32> -> vector<392x768xf32>
    %c0_8 = arith.constant 0 : index
    %c0_9 = arith.constant 0 : index
    %19 = vector.load %arg3[%c0_8, %c0_9] : memref<1x768xf32, #tpu.memory_space<vmem>>, vector<1x768xf32>
    %20 = vector.broadcast %19 : vector<1x768xf32> to vector<392x768xf32>
    %21 = arith.addf %18, %20 : vector<392x768xf32>
    %cst_10 = arith.constant 5.000000e-01 : f32
    %22 = vector.broadcast %cst_10 : f32 to vector<392x768xf32>
    %23 = arith.mulf %22, %21 : vector<392x768xf32>
    %cst_11 = arith.constant 0.707106769 : f32
    %24 = vector.broadcast %cst_11 : f32 to vector<392x768xf32>
    %25 = arith.mulf %21, %24 : vector<392x768xf32>
    %26 = math.erf %25 : vector<392x768xf32>
    %cst_12 = arith.constant 1.000000e+00 : f32
    %27 = vector.broadcast %cst_12 : f32 to vector<392x768xf32>
    %28 = arith.addf %27, %26 : vector<392x768xf32>
    %29 = arith.mulf %23, %28 : vector<392x768xf32>
    %c0_13 = arith.constant 0 : index
    %c0_14 = arith.constant 0 : index
    %30 = vector.load %arg4[%c0_13, %c0_14] : memref<392x768xf32, #tpu.memory_space<vmem>>, vector<392x768xf32>
    tpu.vector_store %arg4[%c0_13, %c0_14], %29 {strides = array<i32>} : memref<392x768xf32, #tpu.memory_space<vmem>>, vector<392x768xf32>,
    return
  }
  func.func @transform_0(%arg0: i32) -> (i32, i32) {
    %c0_i32 = arith.constant 0 : i32
    %c0_i32_0 = arith.constant 0 : i32
    return %arg0, %c0_i32 : i32, i32
  }
  func.func @transform_1(%arg0: i32) -> (i32, i32) {
    %c0_i32 = arith.constant 0 : i32
    %c0_i32_0 = arith.constant 0 : i32
    %c0_i32_1 = arith.constant 0 : i32
    return %c0_i32, %c0_i32_0 : i32, i32
  }
  func.func @transform_2(%arg0: i32) -> (i32, i32) {
    %c0_i32 = arith.constant 0 : i32
    %c0_i32_0 = arith.constant 0 : i32
    %c0_i32_1 = arith.constant 0 : i32
    return %c0_i32, %c0_i32_0 : i32, i32
  }
  func.func @transform_3(%arg0: i32) -> (i32, i32) {
    %c0_i32 = arith.constant 0 : i32
    %c0_i32_0 = arith.constant 0 : i32
    return %arg0, %c0_i32 : i32, i32
  }
}

</mosaic_0001>

<bundles_post_ra>
// kernel: _lambda_.1
= control target key start
LH: loop header
LB: loop body
LE: loop exit
PB: predicated region body
PF: predicated region fallthrough
CT: control target
= control target key end

     0   :  { %s5461_s12 = smov 0   ;;  %s10209_s0 = inlined_call_operand.vmem [shape: f32[784,192], index: 0, kind: input, shape index: {}]   ;;  %s10210_s1 = inlined_call_operand.vmem [shape: f32[192,768], index: 1, kind: input, shape index: {}]   ;;  %s10211_s2 = inlined_call_operand.vmem [shape: f32[1,768], index: 2, kind: input, shape index: {}]   ;;  %s10212_s3 = inlined_call_operand.vmem [shape: f32[784,768], index: 3, kind: output, shape index: {}]  }
   0x1 LB: > { %s4383_s13 = sadd.s32 4294967295, %s5439_s12   ;;  %p4387_p0 = scmp.ge.s32.totalorder %s5439_s12, 1  ;;  %s5439_s12 = sphi %s5461_s12, %s13_s12  }
   0x2   : > { %p139_p1 = scmp.lt.s32.totalorder %s5439_s12, 3 }
   0x4   : > { %p140_p2 = pnand %p4387_p0, %p139_p1 }
   0x6   : > { %143 = sbr.rel (%p140_p2) target bundleno = 1010 (0x3f2), region = 32 }
   0xd   : > { %s165_s14 = smul.u32 49, %s4383_s13  ;;  %vm277_vm0 = vcmask 523264  }
   0xf   : > { %p166_p3 = scmp.lt.s32.totalorder %s165_s14, 97 }
  0x11   : > { %s10814_s14 = smov (!%p166_p3, %s165_s14), 97 }
  0x12   : > { %s4540_s15 = sshll.u32 %s10814_s14, 4  ;;  %s4709_s10 = smul.u32 48, %s10814_s14 }
  0x13   : > { %s5475_s18 = scalar_lea.vmem %s10209_s0, %s4540_s15 }
  0x14   : > { %v5478_v0 = vld [vmem:[%s5475_s18] sm:$0xff]  ;;  %v5481_v1 = vld [vmem:[%s5475_s18 + $0x8] sm:$0xff]  ;;  %v5484_v2 = vld [vmem:[%s5475_s18 + $0x190] sm:$0xff]  ;;  %s7652_s15 = scalar_lea.vmem %s10212_s3, %s4709_s10 }
  0x15   : > { %v278_v3 = vsel %vm277_vm0, %v5481_v1, 0.0  ;;  %v5489_v4 = vld [vmem:[%s5475_s18 + $0x198] sm:$0xff]  ;;  %v5492_v5 = vld [vmem:[%s5475_s18 + $0x10] sm:$0xff]  ;;  %v5503_v10 = vld [vmem:[%s5475_s18 + $0x20] sm:$0xff] }
  0x16   : > { %v5495_v6 = vld [vmem:[%s5475_s18 + $0x18] sm:$0xff]  ;;  %v279_v7 = vadd.f32 %v278_v3, %v5478_v0  ;;  %v378_v8 = vsel %vm277_vm0, %v5489_v4, 0.0  ;;  %v5506_v11 = vld [vmem:[%s5475_s18 + $0x28] sm:$0xff]  ;;  %v5520_v18 = vld [vmem:[%s5475_s18 + $0x1a0] sm:$0xff] }
  0x17   : > { %v282_v9 = vsel %vm277_vm0, %v5495_v6, 0.0  ;;  %v379_v12 = vadd.f32 %v378_v8, %v5484_v2  ;;  %v286_v13 = vsel %vm277_vm0, %v5506_v11, 0.0  ;;  %v5512_v14 = vld [vmem:[%s5475_s18 + $0x1a8] sm:$0xff]  ;;  %v5515_v15 = vld [vmem:[%s5475_s18 + $0x38] sm:$0xff]  ;;  %v5525_v20 = vld [vmem:[%s5475_s18 + $0x30] sm:$0xff] }
  0x18   : > { %280 = vadd.xlane.f32.xlu0 %v279_v7  ;;  %v283_v16 = vadd.f32 %v282_v9, %v5492_v5  ;;  %v287_v17 = vadd.f32 %v286_v13, %v5503_v10  ;;  %v382_v19 = vsel %vm277_vm0, %v5512_v14, 0.0  ;;  %v290_v21 = vsel %vm277_vm0, %v5515_v15, 0.0  ;;  %v5530_v22 = vld [vmem:[%s5475_s18 + $0x1b8] sm:$0xff]  ;;  %v5533_v23 = vld [vmem:[%s5475_s18 + $0x48] sm:$0xff]  ;;  %v5538_v26 = vld [vmem:[%s5475_s18 + $0x1b0] sm:$0xff] }
  0x19   : > { %380 = vadd.xlane.f32.xlu1 %v379_v12  ;;  %v383_v24 = vadd.f32 %v382_v19, %v5520_v18  ;;  %v291_v25 = vadd.f32 %v290_v21, %v5525_v20  ;;  %v386_v27 = vsel %vm277_vm0, %v5530_v22, 0.0  ;;  %v5543_v28 = vld [vmem:[%s5475_s18 + $0x40] sm:$0xff]  ;;  %v294_v29 = vsel %vm277_vm0, %v5533_v23, 0.0  ;;  %v5548_v30 = vld [vmem:[%s5475_s18 + $0x1c8] sm:$0xff]  ;;  %v5551_v31 = vld [vmem:[%s5475_s18 + $0x58] sm:$0xff] }
  0x1a   : > { %v387_v32 = vadd.f32 %v386_v27, %v5538_v26  ;;  %v295_v33 = vadd.f32 %v294_v29, %v5543_v28  ;;  %v5556_v34 = vld [vmem:[%s5475_s18 + $0x1c0] sm:$0xff]  ;;  %v390_v35 = vsel %vm277_vm0, %v5548_v30, 0.0  ;;  %v5561_v36 = vld [vmem:[%s5475_s18 + $0x50] sm:$0xff]  ;;  %v298_v37 = vsel %vm277_vm0, %v5551_v31, 0.0  ;;  %v5566_v38 = vld [vmem:[%s5475_s18 + $0x1d8] sm:$0xff] }
  0x1b   : > { %v5569_v39 = vld [vmem:[%s5475_s18 + $0x68] sm:$0xff]  ;;  %v391_v40 = vadd.f32 %v390_v35, %v5556_v34  ;;  %v299_v41 = vadd.f32 %v298_v37, %v5561_v36  ;;  %v5574_v42 = vld [vmem:[%s5475_s18 + $0x1d0] sm:$0xff]  ;;  %v394_v43 = vsel %vm277_vm0, %v5566_v38, 0.0  ;;  %v5579_v44 = vld [vmem:[%s5475_s18 + $0x60] sm:$0xff] }
  0x1c   : > { %284 = vadd.xlane.f32.xlu0 %v283_v16  ;;  %v302_v45 = vsel %vm277_vm0, %v5569_v39, 0.0  ;;  %v5584_v46 = vld [vmem:[%s5475_s18 + $0x1e8] sm:$0xff]  ;;  %v5587_v47 = vld [vmem:[%s5475_s18 + $0x78] sm:$0xff]  ;;  %v395_v48 = vadd.f32 %v394_v43, %v5574_v42  ;;  %v5592_v50 = vld [vmem:[%s5475_s18 + $0x1e0] sm:$0xff] }
  0x1d   : > { %288 = vadd.xlane.f32.xlu1 %v287_v17  ;;  %v303_v49 = vadd.f32 %v302_v45, %v5579_v44  ;;  %v398_v51 = vsel %vm277_vm0, %v5584_v46, 0.0  ;;  %v5597_v52 = vld [vmem:[%s5475_s18 + $0x70] sm:$0xff]  ;;  %v306_v53 = vsel %vm277_vm0, %v5587_v47, 0.0  ;;  %v5602_v54 = vld [vmem:[%s5475_s18 + $0x1f8] sm:$0xff]  ;;  %v5605_v55 = vld [vmem:[%s5475_s18 + $0x88] sm:$0xff] }
  0x1e   : > { %v399_v56 = vadd.f32 %v398_v51, %v5592_v50  ;;  %v307_v57 = vadd.f32 %v306_v53, %v5597_v52  ;;  %v5610_v58 = vld [vmem:[%s5475_s18 + $0x1f0] sm:$0xff]  ;;  %v402_v59 = vsel %vm277_vm0, %v5602_v54, 0.0  ;;  %v5615_v60 = vld [vmem:[%s5475_s18 + $0x80] sm:$0xff]  ;;  %v310_v61 = vsel %vm277_vm0, %v5605_v55, 0.0  ;;  %v5620_v62 = vld [vmem:[%s5475_s18 + $0x208] sm:$0xff] }
  0x1f   : > { %v5623_v63 = vld [vmem:[%s5475_s18 + $0x98] sm:$0xff]  ;;  %v403_v3 = vadd.f32 %v402_v59, %v5610_v58  ;;  %v311_v7 = vadd.f32 %v310_v61, %v5615_v60  ;;  %v5628_v8 = vld [vmem:[%s5475_s18 + $0x200] sm:$0xff]  ;;  %v406_v9 = vsel %vm277_vm0, %v5620_v62, 0.0  ;;  %v5633_v12 = vld [vmem:[%s5475_s18 + $0x90] sm:$0xff] }
  0x20   : > { %384 = vadd.xlane.f32.xlu0 %v383_v24  ;;  %v314_v13 = vsel %vm277_vm0, %v5623_v63, 0.0  ;;  %v5638_v16 = vld [vmem:[%s5475_s18 + $0x218] sm:$0xff]  ;;  %v5641_v17 = vld [vmem:[%s5475_s18 + $0xa8] sm:$0xff]  ;;  %v407_v19 = vadd.f32 %v406_v9, %v5628_v8  ;;  %v5646_v24 = vld [vmem:[%s5475_s18 + $0x210] sm:$0xff] }
  0x21   : > { %292 = vadd.xlane.f32.xlu1 %v291_v25  ;;  %v315_v21 = vadd.f32 %v314_v13, %v5633_v12  ;;  %v410_v25 = vsel %vm277_vm0, %v5638_v16, 0.0  ;;  %v5651_v27 = vld [vmem:[%s5475_s18 + $0xa0] sm:$0xff]  ;;  %v318_v29 = vsel %vm277_vm0, %v5641_v17, 0.0  ;;  %v5669_v43 = vld [vmem:[%s5475_s18 + $0xb0] sm:$0xff] }
  0x22   : > { %v411_v35 = vadd.f32 %v410_v25, %v5646_v24  ;;  %v319_v37 = vadd.f32 %v318_v29, %v5651_v27  ;;  %v5687_v59 = vld [vmem:[%s5475_s18 + $0xc0] sm:$0xff]  ;;  %v5705_v25 = vld [vmem:[%s5475_s18 + $0xd0] sm:$0xff] }
  0x23   : > { %10376 = vst [vmem:[#allocation5_spill] sm:$0xff] %v5687_v59  ;;  %10380 = vst [vmem:[#allocation9_spill] sm:$0xff] %v5705_v25 }
  0x24   : > { %388 = vadd.xlane.f32.xlu0 %v387_v32  ;;  %v5656_v32 = vld [vmem:[%s5475_s18 + $0x228] sm:$0xff] }
  0x25   : > { %296 = vadd.xlane.f32.xlu1 %v295_v33  ;;  %v5659_v33 = vld [vmem:[%s5475_s18 + $0xb8] sm:$0xff] }
  0x26   : > { %v322_v45 = vsel %vm277_vm0, %v5659_v33, 0.0 }
  0x27   : > { %v323_v53 = vadd.f32 %v322_v45, %v5669_v43 }
  0x28   : > { %392 = vadd.xlane.f32.xlu0 %v391_v40  ;;  %v5664_v40 = vld [vmem:[%s5475_s18 + $0x220] sm:$0xff] }
  0x29   : > { %300 = vadd.xlane.f32.xlu1 %v299_v41  ;;  %v414_v41 = vsel %vm277_vm0, %v5656_v32, 0.0 }
  0x2a   : > { %v415_v51 = vadd.f32 %v414_v41, %v5664_v40 }
  0x2c   : > { %396 = vadd.xlane.f32.xlu0 %v395_v48  ;;  %v5674_v48 = vld [vmem:[%s5475_s18 + $0x238] sm:$0xff] }
  0x2d   : > { %304 = vadd.xlane.f32.xlu1 %v303_v49  ;;  %10373 = vst [vmem:[#allocation2_spill] sm:$0xff] %v5674_v48  ;;  %v5677_v49 = vld [vmem:[%s5475_s18 + $0xc8] sm:$0xff] }
  0x2e   : > { %10374 = vst [vmem:[#allocation3_spill] sm:$0xff] %v5677_v49  ;;  %v326_v61 = vsel %vm277_vm0, %v5677_v49, 0.0  ;;  %v270_v49 = vld [vmem:[%s5475_s18 + $0x2d8] sm:$0xff] }
  0x2f   : > { %v327_v13 = vadd.f32 %v326_v61, %v5687_v59 }
  0x30   : > { %400 = vadd.xlane.f32.xlu0 %v399_v56  ;;  %v5682_v56 = vld [vmem:[%s5475_s18 + $0x230] sm:$0xff] }
  0x31   : > { %308 = vadd.xlane.f32.xlu1 %v307_v57  ;;  %10375 = vst [vmem:[#allocation4_spill] sm:$0xff] %v5682_v56  ;;  %v418_v57 = vsel %vm277_vm0, %v5674_v48, 0.0  ;;  %v225_v48 = vld [vmem:[%s5475_s18 + $0x170] sm:$0xff] }
  0x32   : > { %v419_v9 = vadd.f32 %v418_v57, %v5682_v56  ;;  %v5723_v57 = vld [vmem:[%s5475_s18 + $0xe0] sm:$0xff] }
  0x33   : > { %10384 = vst [vmem:[#allocation13_spill] sm:$0xff] %v5723_v57 }
  0x34   : > { %404 = vadd.xlane.f32.xlu0 %v403_v3  ;;  %v5692_v3 = vld [vmem:[%s5475_s18 + $0x248] sm:$0xff] }
  0x35   : > { %312 = vadd.xlane.f32.xlu1 %v311_v7  ;;  %10377 = vst [vmem:[#allocation6_spill] sm:$0xff] %v5692_v3  ;;  %v5695_v7 = vld [vmem:[%s5475_s18 + $0xd8] sm:$0xff] }
  0x36   : > { %10378 = vst [vmem:[#allocation7_spill] sm:$0xff] %v5695_v7  ;;  %v330_v29 = vsel %vm277_vm0, %v5695_v7, 0.0  ;;  %v5728_v7 = vld [vmem:[%s5475_s18 + $0x268] sm:$0xff] }
  0x37   : > { %v331_v45 = vadd.f32 %v330_v29, %v5705_v25  ;;  %10385 = vst [vmem:[#allocation14_spill] sm:$0xff] %v5728_v7  ;;  %v5736_v29 = vld [vmem:[%s5475_s18 + $0x260] sm:$0xff] }
  0x38   : > { %408 = vadd.xlane.f32.xlu0 %v407_v19  ;;  %v5700_v19 = vld [vmem:[%s5475_s18 + $0x240] sm:$0xff]  ;;  %10387 = vst [vmem:[#allocation16_spill] sm:$0xff] %v5736_v29 }
  0x39   : > { %316 = vadd.xlane.f32.xlu1 %v315_v21  ;;  %10379 = vst [vmem:[#allocation8_spill] sm:$0xff] %v5700_v19  ;;  %v422_v21 = vsel %vm277_vm0, %v5692_v3, 0.0  ;;  %v5746_v3 = vld [vmem:[%s5475_s18 + $0x278] sm:$0xff] }
  0x3a   : > { %v423_v41 = vadd.f32 %v422_v21, %v5700_v19  ;;  %10389 = vst [vmem:[#allocation18_spill] sm:$0xff] %v5746_v3  ;;  %v218_v19 = vld [vmem:[%s5475_s18 + $0x138] sm:$0xff] }
  0x3c   : > { %412 = vadd.xlane.f32.xlu0 %v411_v35  ;;  %v5710_v35 = vld [vmem:[%s5475_s18 + $0x258] sm:$0xff] }
  0x3d   : > { %320 = vadd.xlane.f32.xlu1 %v319_v37  ;;  %10381 = vst [vmem:[#allocation10_spill] sm:$0xff] %v5710_v35  ;;  %v5713_v37 = vld [vmem:[%s5475_s18 + $0xe8] sm:$0xff] }
  0x3e   : > { %10382 = vst [vmem:[#allocation11_spill] sm:$0xff] %v5713_v37  ;;  %v334_v61 = vsel %vm277_vm0, %v5713_v37, 0.0  ;;  %v5741_v37 = vld [vmem:[%s5475_s18 + $0xf0] sm:$0xff] }
  0x3f   : > { %v335_v21 = vadd.f32 %v334_v61, %v5723_v57  ;;  %10388 = vst [vmem:[#allocation17_spill] sm:$0xff] %v5741_v37  ;;  %v5754_v61 = vld [vmem:[%s5475_s18 + $0x270] sm:$0xff] }
  0x40   : > { %416 = vadd.xlane.f32.xlu0 %v415_v51  ;;  %v5718_v51 = vld [vmem:[%s5475_s18 + $0x250] sm:$0xff]  ;;  %10391 = vst [vmem:[#allocation20_spill] sm:$0xff] %v5754_v61 }
  0x41   : > { %324 = vadd.xlane.f32.xlu1 %v323_v53  ;;  %10383 = vst [vmem:[#allocation12_spill] sm:$0xff] %v5718_v51  ;;  %v426_v53 = vsel %vm277_vm0, %v5710_v35, 0.0  ;;  %v430_v35 = vsel %vm277_vm0, %v5728_v7, 0.0  ;;  %v434_v7 = vsel %vm277_vm0, %v5746_v3, 0.0 }
  0x44   : > { %420 = vadd.xlane.f32.xlu0 %v419_v9  ;;  %v5731_v9 = vld [vmem:[%s5475_s18 + $0xf8] sm:$0xff] }
  0x45   : > { %328 = vadd.xlane.f32.xlu1 %v327_v13  ;;  %10386 = vst [vmem:[#allocation15_spill] sm:$0xff] %v5731_v9  ;;  %v427_v13 = vadd.f32 %v426_v53, %v5718_v51  ;;  %v338_v25 = vsel %vm277_vm0, %v5731_v9, 0.0  ;;  %v5759_v9 = vld [vmem:[%s5475_s18 + $0x100] sm:$0xff]  ;;  %v5764_v51 = vld [vmem:[%s5475_s18 + $0x288] sm:$0xff] }
  0x46   : > { %v339_v53 = vadd.f32 %v338_v25, %v5741_v37  ;;  %10392 = vst [vmem:[#allocation21_spill] sm:$0xff] %v5759_v9  ;;  %10393 = vst [vmem:[#allocation22_spill] sm:$0xff] %v5764_v51  ;;  %v435_v25 = vadd.f32 %v434_v7, %v5754_v61  ;;  %v438_v3 = vsel %vm277_vm0, %v5764_v51, 0.0  ;;  %v264_v61 = vld [vmem:[%s5475_s18 + $0x2a8] sm:$0xff] }
  0x48   : > { %424 = vadd.xlane.f32.xlu0 %v423_v41  ;;  %v5749_v41 = vld [vmem:[%s5475_s18 + $0x108] sm:$0xff] }
  0x49   : > { %332 = vadd.xlane.f32.xlu1 %v331_v45  ;;  %10390 = vst [vmem:[#allocation19_spill] sm:$0xff] %v5749_v41  ;;  %v431_v45 = vadd.f32 %v430_v35, %v5736_v29  ;;  %v342_v57 = vsel %vm277_vm0, %v5749_v41, 0.0  ;;  %v5777_v41 = vld [vmem:[%s5475_s18 + $0x110] sm:$0xff]  ;;  %v262_v29 = vld [vmem:[%s5475_s18 + $0x298] sm:$0xff] }
  0x4a   : > { %v343_v35 = vadd.f32 %v342_v57, %v5759_v9  ;;  %10396 = vst [vmem:[#allocation25_spill] sm:$0xff] %v5777_v41  ;;  %v442_v51 = vsel %vm277_vm0, %v262_v29, 0.0  ;;  %v5790_v9 = vld [vmem:[%s5475_s18 + $0x120] sm:$0xff]  ;;  %v217_v29 = vld [vmem:[%s5475_s18 + $0x130] sm:$0xff] }
  0x4b   : > { %10398 = vst [vmem:[#allocation27_spill] sm:$0xff] %v5790_v9 }
  0x4c   : > { %428 = vadd.xlane.f32.xlu0 %v427_v13  ;;  %v5767_v13 = vld [vmem:[%s5475_s18 + $0x118] sm:$0xff] }
  0x4d   : > { %336 = vadd.xlane.f32.xlu1 %v335_v21  ;;  %10394 = vst [vmem:[#allocation23_spill] sm:$0xff] %v5767_v13  ;;  %v5772_v21 = vld [vmem:[%s5475_s18 + $0x280] sm:$0xff]  ;;  %v346_v37 = vsel %vm277_vm0, %v5767_v13, 0.0 }
  0x4e   : > { %10395 = vst [vmem:[#allocation24_spill] sm:$0xff] %v5772_v21  ;;  %v439_v7 = vadd.f32 %v438_v3, %v5772_v21  ;;  %v347_v57 = vadd.f32 %v346_v37, %v5777_v41  ;;  %v354_v41 = vsel %vm277_vm0, %v218_v19, 0.0  ;;  %v266_v21 = vld [vmem:[%s5475_s18 + $0x2b8] sm:$0xff] }
  0x50   : > { %432 = vadd.xlane.f32.xlu0 %v431_v45  ;;  %v216_v45 = vld [vmem:[%s5475_s18 + $0x128] sm:$0xff] }
  0x51   : > { %340 = vadd.xlane.f32.xlu1 %v339_v53  ;;  %v5786_v53 = vld [vmem:[%s5475_s18 + $0x290] sm:$0xff]  ;;  %v350_v13 = vsel %vm277_vm0, %v216_v45, 0.0  ;;  %v220_v45 = vld [vmem:[%s5475_s18 + $0x148] sm:$0xff] }
  0x52   : > { %10397 = vst [vmem:[#allocation26_spill] sm:$0xff] %v5786_v53  ;;  %v443_v3 = vadd.f32 %v442_v51, %v5786_v53  ;;  %v351_v37 = vadd.f32 %v350_v13, %v5790_v9  ;;  %v355_v51 = vadd.f32 %v354_v41, %v217_v29  ;;  %v450_v13 = vsel %vm277_vm0, %v266_v21, 0.0  ;;  %v219_v9 = vld [vmem:[%s5475_s18 + $0x140] sm:$0xff]  ;;  %v222_v21 = vld [vmem:[%s5475_s18 + $0x158] sm:$0xff]  ;;  %v272_v29 = vld [vmem:[%s5475_s18 + $0x2e8] sm:$0xff] }
  0x53   : > { %v358_v53 = vsel %vm277_vm0, %v220_v45, 0.0 }
  0x54   : > { %436 = vadd.xlane.f32.xlu0 %v435_v25  ;;  %v263_v25 = vld [vmem:[%s5475_s18 + $0x2a0] sm:$0xff] }
  0x55   : > { %344 = vadd.xlane.f32.xlu1 %v343_v35  ;;  %v446_v35 = vsel %vm277_vm0, %v264_v61, 0.0  ;;  %v268_v61 = vld [vmem:[%s5475_s18 + $0x2c8] sm:$0xff] }
  0x56   : > { %v454_v41 = vsel %vm277_vm0, %v268_v61, 0.0  ;;  %v274_v61 = vld [vmem:[%s5475_s18 + $0x2f8] sm:$0xff] }
  0x58   : > { %440 = vadd.xlane.f32.xlu0 %v439_v7  ;;  %v447_v7 = vadd.f32 %v446_v35, %v263_v25  ;;  %v269_v25 = vld [vmem:[%s5475_s18 + $0x2d0] sm:$0xff]  ;;  %v458_v35 = vsel %vm277_vm0, %v270_v49, 0.0 }
  0x59   : > { %348 = vadd.xlane.f32.xlu1 %v347_v57  ;;  %v265_v57 = vld [vmem:[%s5475_s18 + $0x2b0] sm:$0xff] }
  0x5a   : > { %v451_v19 = vadd.f32 %v450_v13, %v265_v57  ;;  %v462_v57 = vsel %vm277_vm0, %v272_v29, 0.0  ;;  %v224_v13 = vld [vmem:[%s5475_s18 + $0x168] sm:$0xff] }
  0x5c   : > { %444 = vadd.xlane.f32.xlu0 %v443_v3  ;;  %v359_v3 = vadd.f32 %v358_v53, %v219_v9  ;;  %v362_v9 = vsel %vm277_vm0, %v222_v21, 0.0  ;;  %v271_v53 = vld [vmem:[%s5475_s18 + $0x2e0] sm:$0xff]  ;;  %v276_v21 = vld [vmem:[%s5475_s18 + $0x308] sm:$0xff] }
  0x5d   : > { %352 = vadd.xlane.f32.xlu1 %v351_v37  ;;  %v267_v37 = vld [vmem:[%s5475_s18 + $0x2c0] sm:$0xff] }
  0x5e   : > { %v455_v45 = vadd.f32 %v454_v41, %v267_v37  ;;  %v223_v37 = vld [vmem:[%s5475_s18 + $0x160] sm:$0xff]  ;;  %v273_v41 = vld [vmem:[%s5475_s18 + $0x2f0] sm:$0xff] }
  0x60   : > { %448 = vadd.xlane.f32.xlu0 %v447_v7  ;;  %v459_v7 = vadd.f32 %v458_v35, %v269_v25  ;;  %v466_v25 = vsel %vm277_vm0, %v274_v61, 0.0  ;;  %v226_v35 = vld [vmem:[%s5475_s18 + $0x178] sm:$0xff] }
  0x61   : > { %356 = vadd.xlane.f32.xlu1 %v355_v51  ;;  %v221_v51 = vld [vmem:[%s5475_s18 + $0x150] sm:$0xff]  ;;  %v467_v59 = vadd.f32 %v466_v25, %v273_v41 }
  0x62   : > { %v363_v49 = vadd.f32 %v362_v9, %v221_v51  ;;  %v275_v51 = vld [vmem:[%s5475_s18 + $0x300] sm:$0xff]  ;;  %v228_v9 = vld [vmem:[%s5475_s18 + $0x188] sm:$0xff] }
  0x63   : > { %v374_v61 = vsel %vm277_vm0, %v228_v9, 0.0  ;;  %v1185_v9 = vld [vmem:[%s10210_s1 + $0xc0] sm:$0xff] }
  0x64   : > { %452 = vadd.xlane.f32.xlu0 %v451_v19  ;;  %v463_v19 = vadd.f32 %v462_v57, %v271_v53 }
  0x65   : > { %360 = vadd.xlane.f32.xlu1 %v359_v3  ;;  %v366_v3 = vsel %vm277_vm0, %v224_v13, 0.0  ;;  %v227_v13 = vld [vmem:[%s5475_s18 + $0x180] sm:$0xff] }
  0x66   : > { %v367_v29 = vadd.f32 %v366_v3, %v223_v37  ;;  %v375_v56 = vadd.f32 %v374_v61, %v227_v13  ;;  %v1167_v37 = vld [vmem:[%s10210_s1 + $0x30] sm:$0xff]  ;;  %v1180_v3 = vld [vmem:[%s10210_s1 + $0x98] sm:$0xff] }
  0x67   : > { %v1204_v13 = vld [vmem:[%s10210_s1 + $0x158] sm:$0xff] }
  0x68   : > { %456 = vadd.xlane.f32.xlu0 %v455_v45  ;;  %v370_v45 = vsel %vm277_vm0, %v226_v35, 0.0  ;;  %v1173_v35 = vld [vmem:[%s10210_s1 + $0x60] sm:$0xff] }
  0x69   : > { %460 = vadd.xlane.f32.xlu1 %v459_v7  ;;  %v470_v7 = vsel %vm277_vm0, %v276_v21, 0.0  ;;  %v371_v53 = vadd.f32 %v370_v45, %v225_v48  ;;  %v1161_v48 = vld [vmem:[%s10210_s1] sm:$0xff]  ;;  %v1179_v21 = vld [vmem:[%s10210_s1 + $0x90] sm:$0xff]  ;;  %v1192_v45 = vld [vmem:[%s10210_s1 + $0xf8] sm:$0xff] }
  0x6a   : > { %v471_v57 = vadd.f32 %v470_v7, %v275_v51  ;;  %v4543_v41 = vpack.c.bf16 %v1167_v37, %v1161_v48  ;;  %v4547_v51 = vpack.c.bf16 %v1179_v21, %v1173_v35  ;;  %v1203_v48 = vld [vmem:[%s10210_s1 + $0x150] sm:$0xff]  ;;  %v1216_v37 = vld [vmem:[%s10210_s1 + $0x1b8] sm:$0xff]  ;;  %v1222_v35 = vld [vmem:[%s10210_s1 + $0x1e8] sm:$0xff] }
  0x6b   : > { %v1228_v21 = vld [vmem:[%s10210_s1 + $0x218] sm:$0xff] }
  0x6c   : > { %364 = vadd.xlane.f32.xlu0 %v363_v49  ;;  %v1162_v49 = vld [vmem:[%s10210_s1 + $0x8] sm:$0xff] }
  0x6d   : > { %464 = vadd.xlane.f32.xlu1 %v463_v19  ;;  %v1168_v19 = vld [vmem:[%s10210_s1 + $0x38] sm:$0xff] }
  0x70   : > { %368 = vadd.xlane.f32.xlu0 %v367_v29  ;;  %v1186_v29 = vld [vmem:[%s10210_s1 + $0xc8] sm:$0xff] }
  0x71   : > { %468 = vadd.xlane.f32.xlu1 %v467_v59  ;;  %v4541_v59 = vpack.c.bf16 %v1168_v19, %v1162_v49  ;;  %v4549_v7 = vpack.c.bf16 %v1192_v45, %v1186_v29  ;;  %v1197_v19 = vld [vmem:[%s10210_s1 + $0x120] sm:$0xff]  ;;  %v4561_v45 = vpack.c.bf16 %v1228_v21, %v1222_v35 }
  0x73   : > { %4542 = vmatprep.subr.bf16.mxu0 %v4541_v59  ;;  %4685 = vmatprep.subr.bf16.mxu1 %v4541_v59  ;;  %v1210_v59 = vld [vmem:[%s10210_s1 + $0x188] sm:$0xff] }
  0x74   : > { %372 = vadd.xlane.f32.xlu0 %v371_v53  ;;  %4544 = vmatpush1.bf16.msra.mxu0 %v4543_v41  ;;  %v1191_v53 = vld [vmem:[%s10210_s1 + $0xf0] sm:$0xff] }
  0x75   : > { %472 = vadd.xlane.f32.xlu1 %v471_v57  ;;  %4697 = vmatpush1.bf16.msra.mxu1 %v4543_v41  ;;  %v1198_v57 = vld [vmem:[%s10210_s1 + $0x128] sm:$0xff]  ;;  %v4551_v61 = vpack.c.bf16 %v1191_v53, %v1185_v9  ;;  %v1209_v41 = vld [vmem:[%s10210_s1 + $0x180] sm:$0xff]  ;;  %v1240_v53 = vld [vmem:[%s10210_s1 + $0x278] sm:$0xff] }
  0x76   : > { %v4553_v49 = vpack.c.bf16 %v1204_v13, %v1198_v57  ;;  %v1234_v9 = vld [vmem:[%s10210_s1 + $0x248] sm:$0xff] }
  0x77   : > { %v4565_v13 = vpack.c.bf16 %v1240_v53, %v1234_v9 }
  0x78   : > { %376 = vadd.xlane.f32.xlu0 %v375_v56  ;;  %v1174_v56 = vld [vmem:[%s10210_s1 + $0x68] sm:$0xff] }
  0x79   : > { %v4545_v25 = vpack.c.bf16 %v1180_v3, %v1174_v56  ;;  %v4555_v56 = vpack.c.bf16 %v1203_v48, %v1197_v19  ;;  %v4557_v3 = vpack.c.bf16 %v1216_v37, %v1210_v59  ;;  %v1246_v48 = vld [vmem:[%s10210_s1 + $0x2a8] sm:$0xff]  ;;  %v1252_v59 = vld [vmem:[%s10210_s1 + $0x2d8] sm:$0xff] }
  0x7a   : > { %v4569_v21 = vpack.c.bf16 %v1252_v59, %v1246_v48 }
  0x7b   : > { %4546 = vmatprep.subr.bf16.mxu0 %v4545_v25  ;;  %4686 = vmatprep.subr.bf16.mxu1 %v4545_v25  ;;  %v1215_v25 = vld [vmem:[%s10210_s1 + $0x1b0] sm:$0xff] }
  0x7c   : > { %4548 = vmatpush1.bf16.msra.mxu0 %v4547_v51  ;;  %4698 = vmatpush1.bf16.msra.mxu1 %v4547_v51  ;;  %v4559_v29 = vpack.c.bf16 %v1215_v25, %v1209_v41  ;;  %v1221_v51 = vld [vmem:[%s10210_s1 + $0x1e0] sm:$0xff] }
  0x7d   : > { %4550 = vmatprep.subr.bf16.mxu0 %v4549_v7  ;;  %4687 = vmatprep.subr.bf16.mxu1 %v4549_v7  ;;  %v1227_v7 = vld [vmem:[%s10210_s1 + $0x210] sm:$0xff] }
  0x7e   : > { %v4563_v57 = vpack.c.bf16 %v1227_v7, %v1221_v51 }
  0x80   : > { %4552 = vmatpush1.bf16.msra.mxu0 %v4551_v61  ;;  %4699 = vmatpush1.bf16.msra.mxu1 %v4551_v61  ;;  %v1233_v61 = vld [vmem:[%s10210_s1 + $0x240] sm:$0xff] }
  0x81   : > { %4554 = vmatprep.subr.bf16.mxu0 %v4553_v49  ;;  %4688 = vmatprep.subr.bf16.mxu1 %v4553_v49  ;;  %v1239_v49 = vld [vmem:[%s10210_s1 + $0x270] sm:$0xff] }
  0x82   : > { %v4567_v41 = vpack.c.bf16 %v1239_v49, %v1233_v61 }
  0x84   : > { %4556 = vmatpush1.bf16.msra.mxu0 %v4555_v56  ;;  %4700 = vmatpush1.bf16.msra.mxu1 %v4555_v56 }
  0x85   : > { %4558 = vmatprep.subr.bf16.mxu0 %v4557_v3  ;;  %4689 = vmatprep.subr.bf16.mxu1 %v4557_v3 }
  0x88   : > { %4560 = vmatpush1.bf16.msra.mxu0 %v4559_v29  ;;  %4701 = vmatpush1.bf16.msra.mxu1 %v4559_v29  ;;  %v1245_v29 = vld [vmem:[%s10210_s1 + $0x2a0] sm:$0xff] }
  0x89   : > { %4562 = vmatprep.subr.bf16.mxu0 %v4561_v45  ;;  %4690 = vmatprep.subr.bf16.mxu1 %v4561_v45  ;;  %v1251_v45 = vld [vmem:[%s10210_s1 + $0x2d0] sm:$0xff] }
  0x8c   : > { %4564 = vmatpush1.bf16.msra.mxu0 %v4563_v57  ;;  %4702 = vmatpush1.bf16.msra.mxu1 %v4563_v57 }
  0x8d   : > { %4566 = vmatprep.subr.bf16.mxu0 %v4565_v13  ;;  %4691 = vmatprep.subr.bf16.mxu1 %v4565_v13 }
  0x90   : > { %4568 = vmatpush1.bf16.msra.mxu0 %v4567_v41  ;;  %4703 = vmatpush1.bf16.msra.mxu1 %v4567_v41 }
  0x91   : > { %4570 = vmatprep.subr.bf16.mxu0 %v4569_v21  ;;  %4692 = vmatprep.subr.bf16.mxu1 %v4569_v21 }
  0xa5   : > { %v281_v19 = vpop.xlane.xlu0 %280 }
  0xa6   : > { %v475_v37 = vmul.f32 0.0052083335, %v281_v19  ;;  %v381_v56 = vpop.xlane.xlu1 %380 }
  0xa7   : > { %v500_v3 = vmul.f32 0.0052083335, %v381_v56 }
  0xa8   : > { %v5925_v25 = vsub.f32 %v5478_v0, %v475_v37  ;;  %v5928_v35 = vsub.f32 %v5481_v1, %v475_v37 }
  0xa9   : > { %v5937_v51 = vsub.f32 %v5484_v2, %v500_v3  ;;  %v5940_v0 = vsub.f32 %v5489_v4, %v500_v3  ;;  %v285_v7 = vpop.xlane.xlu0 %284  ;;  %v4571_v4 = vpack.c.bf16 %v1251_v45, %v1245_v29 }
  0xaa   : > { %v476_v1 = vmul.f32 0.0052083335, %v285_v7  ;;  %v289_v9 = vpop.xlane.xlu1 %288  ;;  %v622_v53 = vmul.f32 %v5925_v25, %v5925_v25  ;;  %v623_v57 = vmul.f32 %v5928_v35, %v5928_v35 }
  0xab   : > { %v477_v13 = vmul.f32 0.0052083335, %v289_v9  ;;  %v672_v61 = vmul.f32 %v5937_v51, %v5937_v51  ;;  %v673_v2 = vmul.f32 %v5940_v0, %v5940_v0  ;;  %4572 = vmatpush1.bf16.msra.mxu0 %v4571_v4  ;;  %4704 = vmatpush1.bf16.msra.mxu1 %v4571_v4 }
  0xac   : > { %v5951_v49 = vsub.f32 %v5492_v5, %v476_v1  ;;  %v5954_v19 = vsub.f32 %v5495_v6, %v476_v1  ;;  %v720_v48 = vsel %vm277_vm0, %v623_v57, 0.0 }
  0xad   : > { %v5958_v59 = vsub.f32 %v5503_v10, %v477_v13  ;;  %v5961_v37 = vsub.f32 %v5506_v11, %v477_v13  ;;  %v385_v56 = vpop.xlane.xlu0 %384  ;;  %v721_v3 = vadd.f32 %v720_v48, %v622_v53  ;;  %v820_v41 = vsel %vm277_vm0, %v673_v2, 0.0 }
  0xae   : > { %v501_v29 = vmul.f32 0.0052083335, %v385_v56  ;;  %v293_v5 = vpop.xlane.xlu1 %292  ;;  %v624_v6 = vmul.f32 %v5951_v49, %v5951_v49  ;;  %v625_v45 = vmul.f32 %v5954_v19, %v5954_v19  ;;  %v821_v7 = vadd.f32 %v820_v41, %v672_v61 }
  0xaf   : > { %722 = vadd.xlane.f32.xlu1 %v721_v3  ;;  %v478_v21 = vmul.f32 0.0052083335, %v293_v5  ;;  %v626_v10 = vmul.f32 %v5958_v59, %v5958_v59  ;;  %v627_v11 = vmul.f32 %v5961_v37, %v5961_v37 }
  0xb0   : > { %v5973_v1 = vsub.f32 %v5520_v18, %v501_v29  ;;  %v5976_v9 = vsub.f32 %v5512_v14, %v501_v29  ;;  %v724_v53 = vsel %vm277_vm0, %v625_v45, 0.0 }
  0xb1   : > { %v5980_v57 = vsub.f32 %v5525_v20, %v478_v21  ;;  %v5983_v13 = vsub.f32 %v5515_v15, %v478_v21  ;;  %v389_v61 = vpop.xlane.xlu0 %388  ;;  %v725_v2 = vadd.f32 %v724_v53, %v624_v6  ;;  %v728_v48 = vsel %vm277_vm0, %v627_v11, 0.0 }
  0xb2   : > { %v502_v56 = vmul.f32 0.0052083335, %v389_v61  ;;  %v297_v3 = vpop.xlane.xlu1 %296  ;;  %v674_v18 = vmul.f32 %v5973_v1, %v5973_v1  ;;  %v675_v14 = vmul.f32 %v5976_v9, %v5976_v9  ;;  %v729_v20 = vadd.f32 %v728_v48, %v626_v10 }
  0xb3   : > { %822 = vadd.xlane.f32.xlu1 %v821_v7  ;;  %726 = vadd.xlane.f32.xlu0 %v725_v2  ;;  %v479_v4 = vmul.f32 0.0052083335, %v297_v3  ;;  %v628_v15 = vmul.f32 %v5980_v57, %v5980_v57  ;;  %v629_v41 = vmul.f32 %v5983_v13, %v5983_v13 }
  0xb4   : > { %v5995_v29 = vsub.f32 %v5538_v26, %v502_v56  ;;  %v5998_v5 = vsub.f32 %v5530_v22, %v502_v56  ;;  %v824_v6 = vsel %vm277_vm0, %v675_v14, 0.0 }
  0xb5   : > { %v6002_v45 = vsub.f32 %v5543_v28, %v479_v4  ;;  %v6005_v21 = vsub.f32 %v5533_v23, %v479_v4  ;;  %v393_v7 = vpop.xlane.xlu0 %392  ;;  %v825_v10 = vadd.f32 %v824_v6, %v674_v18  ;;  %v732_v11 = vsel %vm277_vm0, %v629_v41, 0.0 }
  0xb6   : > { %v503_v53 = vmul.f32 0.0052083335, %v393_v7  ;;  %v301_v61 = vpop.xlane.xlu1 %300  ;;  %v676_v26 = vmul.f32 %v5995_v29, %v5995_v29  ;;  %v677_v22 = vmul.f32 %v5998_v5, %v5998_v5  ;;  %v733_v28 = vadd.f32 %v732_v11, %v628_v15 }
  0xb7   : > { %730 = vadd.xlane.f32.xlu0 %v729_v20  ;;  %826 = vadd.xlane.f32.xlu1 %v825_v10  ;;  %v480_v2 = vmul.f32 0.0052083335, %v301_v61  ;;  %v630_v23 = vmul.f32 %v6002_v45, %v6002_v45  ;;  %v631_v48 = vmul.f32 %v6005_v21, %v6005_v21 }
  0xb8   : > { %v6017_v56 = vsub.f32 %v5556_v34, %v503_v53  ;;  %v6020_v3 = vsub.f32 %v5548_v30, %v503_v53  ;;  %v828_v18 = vsel %vm277_vm0, %v677_v22, 0.0  ;;  %v1258_v22 = vld [vmem:[%s10210_s1 + $0x308] sm:$0xff] }
  0xb9   : > { %v6024_v14 = vsub.f32 %v5561_v36, %v480_v2  ;;  %v6027_v4 = vsub.f32 %v5551_v31, %v480_v2  ;;  %v397_v20 = vpop.xlane.xlu0 %396  ;;  %v829_v15 = vadd.f32 %v828_v18, %v676_v26  ;;  %v736_v41 = vsel %vm277_vm0, %v631_v48, 0.0  ;;  %v1264_v2 = vld [vmem:[%s10210_s1 + $0x338] sm:$0xff]  ;;  %v1257_v18 = vld [vmem:[%s10210_s1 + $0x300] sm:$0xff] }
  0xba   : > { %v504_v6 = vmul.f32 0.0052083335, %v397_v20  ;;  %v305_v7 = vpop.xlane.xlu1 %304  ;;  %v678_v34 = vmul.f32 %v6017_v56, %v6017_v56  ;;  %v679_v30 = vmul.f32 %v6020_v3, %v6020_v3  ;;  %v737_v36 = vadd.f32 %v736_v41, %v630_v23  ;;  %v1263_v20 = vld [vmem:[%s10210_s1 + $0x330] sm:$0xff] }
  0xbb   : > { %734 = vadd.xlane.f32.xlu0 %v733_v28  ;;  %830 = vadd.xlane.f32.xlu1 %v829_v15  ;;  %v481_v10 = vmul.f32 0.0052083335, %v305_v7  ;;  %v632_v31 = vmul.f32 %v6024_v14, %v6024_v14  ;;  %v633_v11 = vmul.f32 %v6027_v4, %v6027_v4 }
  0xbc   : > { %v6039_v53 = vsub.f32 %v5574_v42, %v504_v6  ;;  %v6042_v61 = vsub.f32 %v5566_v38, %v504_v6  ;;  %v832_v26 = vsel %vm277_vm0, %v679_v30, 0.0 }
  0xbd   : > { %v6052_v28 = vsub.f32 %v5579_v44, %v481_v10  ;;  %v6055_v23 = vsub.f32 %v5569_v39, %v481_v10  ;;  %v401_v42 = vpop.xlane.xlu0 %400  ;;  %v833_v48 = vadd.f32 %v832_v26, %v678_v34  ;;  %v740_v38 = vsel %vm277_vm0, %v633_v11, 0.0 }
  0xbe   : > { %v505_v15 = vmul.f32 0.0052083335, %v401_v42  ;;  %v309_v41 = vpop.xlane.xlu1 %308  ;;  %v741_v6 = vadd.f32 %v740_v38, %v632_v31  ;;  %v680_v44 = vmul.f32 %v6039_v53, %v6039_v53  ;;  %v681_v39 = vmul.f32 %v6042_v61, %v6042_v61 }
  0xbf   : > { %10399 = vst [vmem:[#allocation28_spill] sm:$0xff] %v6052_v28  ;;  %738 = vadd.xlane.f32.xlu0 %v737_v36  ;;  %834 = vadd.xlane.f32.xlu1 %v833_v48  ;;  %v482_v7 = vmul.f32 0.0052083335, %v309_v41  ;;  %v634_v34 = vmul.f32 %v6052_v28, %v6052_v28  ;;  %v635_v30 = vmul.f32 %v6055_v23, %v6055_v23 }
  0xc0   : > { %v4573_v10 = vpack.c.bf16 %v1264_v2, %v1258_v22  ;;  %v6073_v11 = vsub.f32 %v5592_v50, %v505_v15  ;;  %v6076_v31 = vsub.f32 %v5584_v46, %v505_v15  ;;  %v836_v26 = vsel %vm277_vm0, %v681_v39, 0.0  ;;  %v1270_v46 = vld [vmem:[%s10210_s1 + $0x368] sm:$0xff]  ;;  %v1276_v50 = vld [vmem:[%s10210_s1 + $0x398] sm:$0xff]  ;;  %v1275_v15 = vld [vmem:[%s10210_s1 + $0x390] sm:$0xff] }
  0xc1   : > { %v4575_v42 = vpack.c.bf16 %v1263_v20, %v1257_v18  ;;  %v6080_v36 = vsub.f32 %v5597_v52, %v482_v7  ;;  %v6083_v48 = vsub.f32 %v5587_v47, %v482_v7  ;;  %v405_v38 = vpop.xlane.xlu0 %404  ;;  %v837_v41 = vadd.f32 %v836_v26, %v680_v44  ;;  %v1269_v20 = vld [vmem:[%s10210_s1 + $0x360] sm:$0xff] }
  0xc2   : > { %v744_v28 = vsel %vm277_vm0, %v635_v30, 0.0  ;;  %4574 = vmatprep.subr.bf16.mxu0 %v4573_v10  ;;  %4693 = vmatprep.subr.bf16.mxu1 %v4573_v10  ;;  %v506_v22 = vmul.f32 0.0052083335, %v405_v38  ;;  %v313_v52 = vpop.xlane.xlu1 %312  ;;  %v682_v47 = vmul.f32 %v6073_v11, %v6073_v11  ;;  %v683_v18 = vmul.f32 %v6076_v31, %v6076_v31 }
  0xc3   : > { %v745_v2 = vadd.f32 %v744_v28, %v634_v34  ;;  %4576 = vmatpush1.bf16.msra.mxu0 %v4575_v42  ;;  %4705 = vmatpush1.bf16.msra.mxu1 %v4575_v42  ;;  %v483_v44 = vmul.f32 0.0052083335, %v313_v52  ;;  %v636_v28 = vmul.f32 %v6080_v36, %v6080_v36  ;;  %v637_v39 = vmul.f32 %v6083_v48, %v6083_v48 }
  0xc4   : > { %742 = vadd.xlane.f32.xlu0 %v741_v6  ;;  %838 = vadd.xlane.f32.xlu1 %v837_v41  ;;  %v4577_v7 = vpack.c.bf16 %v1276_v50, %v1270_v46  ;;  %v6107_v34 = vsub.f32 %v5610_v58, %v506_v22  ;;  %v6110_v30 = vsub.f32 %v5602_v54, %v506_v22  ;;  %v840_v10 = vsel %vm277_vm0, %v683_v18, 0.0  ;;  %v1282_v54 = vld [vmem:[%s10210_s1 + $0x3c8] sm:$0xff]  ;;  %v1288_v58 = vld [vmem:[%s10210_s1 + $0x3f8] sm:$0xff]  ;;  %v1287_v18 = vld [vmem:[%s10210_s1 + $0x3f0] sm:$0xff] }
  0xc5   : > { %v4579_v26 = vpack.c.bf16 %v1275_v15, %v1269_v20  ;;  %v6114_v6 = vsub.f32 %v5615_v60, %v483_v44  ;;  %v6117_v42 = vsub.f32 %v5605_v55, %v483_v44  ;;  %v409_v38 = vpop.xlane.xlu0 %408  ;;  %v841_v41 = vadd.f32 %v840_v10, %v682_v47  ;;  %v1281_v47 = vld [vmem:[%s10210_s1 + $0x3c0] sm:$0xff] }
  0xc6   : > { %v748_v52 = vsel %vm277_vm0, %v637_v39, 0.0  ;;  %4578 = vmatprep.subr.bf16.mxu0 %v4577_v7  ;;  %4694 = vmatprep.subr.bf16.mxu1 %v4577_v7  ;;  %v507_v46 = vmul.f32 0.0052083335, %v409_v38  ;;  %v317_v60 = vpop.xlane.xlu1 %316  ;;  %v684_v55 = vmul.f32 %v6107_v34, %v6107_v34  ;;  %v685_v22 = vmul.f32 %v6110_v30, %v6110_v30 }
  0xc7   : > { %v749_v50 = vadd.f32 %v748_v52, %v636_v28  ;;  %4580 = vmatpush1.bf16.msra.mxu0 %v4579_v26  ;;  %4706 = vmatpush1.bf16.msra.mxu1 %v4579_v26  ;;  %v484_v20 = vmul.f32 0.0052083335, %v317_v60  ;;  %v638_v15 = vmul.f32 %v6114_v6, %v6114_v6  ;;  %v639_v44 = vmul.f32 %v6117_v42, %v6117_v42 }
  0xc8   : > { %746 = vadd.xlane.f32.xlu0 %v745_v2  ;;  %842 = vadd.xlane.f32.xlu1 %v841_v41  ;;  %v4581_v28 = vpack.c.bf16 %v1288_v58, %v1282_v54  ;;  %v6141_v39 = vsub.f32 %v5628_v8, %v507_v46  ;;  %v6144_v7 = vsub.f32 %v5620_v62, %v507_v46  ;;  %v844_v10 = vsel %vm277_vm0, %v685_v22, 0.0  ;;  %v1294_v62 = vld [vmem:[%s10210_s1 + $0x428] sm:$0xff]  ;;  %v1300_v8 = vld [vmem:[%s10210_s1 + $0x458] sm:$0xff]  ;;  %v1299_v22 = vld [vmem:[%s10210_s1 + $0x450] sm:$0xff] }
  0xc9   : > { %v4583_v26 = vpack.c.bf16 %v1287_v18, %v1281_v47  ;;  %v6148_v2 = vsub.f32 %v5633_v12, %v484_v20  ;;  %v6151_v38 = vsub.f32 %v5623_v63, %v484_v20  ;;  %v413_v41 = vpop.xlane.xlu0 %412  ;;  %v845_v52 = vadd.f32 %v844_v10, %v684_v55  ;;  %v1293_v55 = vld [vmem:[%s10210_s1 + $0x420] sm:$0xff] }
  0xca   : > { %v752_v60 = vsel %vm277_vm0, %v639_v44, 0.0  ;;  %4582 = vmatprep.subr.bf16.mxu0 %v4581_v28  ;;  %4695 = vmatprep.subr.bf16.mxu1 %v4581_v28  ;;  %v508_v54 = vmul.f32 0.0052083335, %v413_v41  ;;  %v321_v12 = vpop.xlane.xlu1 %320  ;;  %v686_v63 = vmul.f32 %v6141_v39, %v6141_v39  ;;  %v687_v46 = vmul.f32 %v6144_v7, %v6144_v7 }
  0xcb   : > { %v753_v58 = vadd.f32 %v752_v60, %v638_v15  ;;  %4584 = vmatpush1.bf16.msra.mxu0 %v4583_v26  ;;  %4707 = vmatpush1.bf16.msra.mxu1 %v4583_v26  ;;  %v485_v47 = vmul.f32 0.0052083335, %v321_v12  ;;  %v640_v18 = vmul.f32 %v6148_v2, %v6148_v2  ;;  %v641_v20 = vmul.f32 %v6151_v38, %v6151_v38 }
  0xcc   : > { %750 = vadd.xlane.f32.xlu0 %v749_v50  ;;  %846 = vadd.xlane.f32.xlu1 %v845_v52  ;;  %v4585_v15 = vpack.c.bf16 %v1300_v8, %v1294_v62  ;;  %v6175_v44 = vsub.f32 %v5646_v24, %v508_v54  ;;  %v6178_v28 = vsub.f32 %v5638_v16, %v508_v54  ;;  %v848_v10 = vsel %vm277_vm0, %v687_v46, 0.0 }
  0xcd   : > { %v4587_v26 = vpack.c.bf16 %v1299_v22, %v1293_v55  ;;  %v6182_v50 = vsub.f32 %v5651_v27, %v485_v47  ;;  %v6185_v41 = vsub.f32 %v5641_v17, %v485_v47  ;;  %v417_v52 = vpop.xlane.xlu0 %416  ;;  %v849_v60 = vadd.f32 %v848_v10, %v686_v63 }
  0xce   : > { %v756_v12 = vsel %vm277_vm0, %v641_v20, 0.0  ;;  %4586 = vmatprep.subr.bf16.mxu0 %v4585_v15  ;;  %4696 = vmatprep.subr.bf16.mxu1 %v4585_v15  ;;  %v509_v24 = vmul.f32 0.0052083335, %v417_v52  ;;  %v325_v62 = vpop.xlane.xlu1 %324  ;;  %v688_v16 = vmul.f32 %v6175_v44, %v6175_v44  ;;  %v689_v8 = vmul.f32 %v6178_v28, %v6178_v28 }
  0xcf   : > { %4588 = vmatpush1.bf16.msra.mxu0 %v4587_v26  ;;  %4708 = vmatpush1.bf16.msra.mxu1 %v4587_v26  ;;  %v486_v17 = vmul.f32 0.0052083335, %v325_v62  ;;  %v757_v27 = vadd.f32 %v756_v12, %v640_v18  ;;  %v642_v54 = vmul.f32 %v6182_v50, %v6182_v50  ;;  %v643_v63 = vmul.f32 %v6185_v41, %v6185_v41 }
  0xd0   : > { %754 = vadd.xlane.f32.xlu0 %v753_v58  ;;  %850 = vadd.xlane.f32.xlu1 %v849_v60  ;;  %v6197_v46 = vsub.f32 %v5664_v40, %v509_v24  ;;  %v6200_v55 = vsub.f32 %v5656_v32, %v509_v24  ;;  %v852_v22 = vsel %vm277_vm0, %v689_v8, 0.0 }
  0xd1   : > { %v6204_v47 = vsub.f32 %v5669_v43, %v486_v17  ;;  %v6207_v58 = vsub.f32 %v5659_v33, %v486_v17  ;;  %v421_v18 = vpop.xlane.xlu0 %420  ;;  %v853_v20 = vadd.f32 %v852_v22, %v688_v16  ;;  %v760_v15 = vsel %vm277_vm0, %v643_v63, 0.0  ;;  %v1166_v43 = vld [vmem:[%s10210_s1 + $0x28] sm:$0xff]  ;;  %v1172_v33 = vld [vmem:[%s10210_s1 + $0x58] sm:$0xff]  ;;  %v10402_v16 = vld [vmem:[#allocation4_spill] sm:$0xff] }
  0xd2   : > { %v510_v10 = vmul.f32 0.0052083335, %v421_v18  ;;  %v329_v26 = vpop.xlane.xlu1 %328  ;;  %v761_v52 = vadd.f32 %v760_v15, %v642_v54  ;;  %v690_v40 = vmul.f32 %v6197_v46, %v6197_v46  ;;  %v691_v32 = vmul.f32 %v6200_v55, %v6200_v55  ;;  %v10404_v17 = vld [vmem:[#allocation2_spill] sm:$0xff]  ;;  %v10406_v22 = vld [vmem:[#allocation5_spill] sm:$0xff] }
  0xd3   : > { %10400 = vst [vmem:[#allocation29_spill] sm:$0xff] %v6204_v47  ;;  %10401 = vst [vmem:[#allocation30_spill] sm:$0xff] %v6207_v58  ;;  %v487_v60 = vmul.f32 0.0052083335, %v329_v26  ;;  %v644_v12 = vmul.f32 %v6204_v47, %v6204_v47  ;;  %v645_v24 = vmul.f32 %v6207_v58, %v6207_v58  ;;  %v4637_v62 = vpack.c.bf16 %v1172_v33, %v1166_v43  ;;  %v10412_v58 = vld [vmem:[#allocation9_spill] sm:$0xff] }
  0xd4   : > { %758 = vadd.xlane.f32.xlu0 %v757_v27  ;;  %854 = vadd.xlane.f32.xlu1 %v853_v20  ;;  %v6225_v8 = vsub.f32 %v10402_v16, %v510_v10  ;;  %v6228_v54 = vsub.f32 %v10404_v17, %v510_v10  ;;  %v856_v63 = vsel %vm277_vm0, %v691_v32, 0.0  ;;  %v10408_v27 = vld [vmem:[#allocation3_spill] sm:$0xff]  ;;  %v1164_v17 = vld [vmem:[%s10210_s1 + $0x18] sm:$0xff] }
  0xd5   : > { %v6232_v18 = vsub.f32 %v10406_v22, %v487_v60  ;;  %v6235_v20 = vsub.f32 %v10408_v27, %v487_v60  ;;  %v425_v15 = vpop.xlane.xlu0 %424  ;;  %v857_v26 = vadd.f32 %v856_v63, %v690_v40  ;;  %v764_v47 = vsel %vm277_vm0, %v645_v24, 0.0  ;;  %4638 = vmatprep.subr.bf16.mxu0 %v4637_v62  ;;  %v1170_v40 = vld [vmem:[%s10210_s1 + $0x48] sm:$0xff]  ;;  %v10410_v62 = vld [vmem:[#allocation8_spill] sm:$0xff]  ;;  %v10411_v22 = vld [vmem:[#allocation6_spill] sm:$0xff] }
  0xd6   : > { %10403 = vst [vmem:[#allocation4_spill] sm:$0xff] %v6225_v8  ;;  %10405 = vst [vmem:[#allocation2_spill] sm:$0xff] %v6228_v54  ;;  %v511_v43 = vmul.f32 0.0052083335, %v425_v15  ;;  %v333_v33 = vpop.xlane.xlu1 %332  ;;  %v765_v16 = vadd.f32 %v764_v47, %v644_v12  ;;  %v692_v10 = vmul.f32 %v6225_v8, %v6225_v8  ;;  %v693_v32 = vmul.f32 %v6228_v54, %v6228_v54 }
  0xd7   : > { %10407 = vst [vmem:[#allocation5_spill] sm:$0xff] %v6232_v18  ;;  %10409 = vst [vmem:[#allocation3_spill] sm:$0xff] %v6235_v20  ;;  %v488_v60 = vmul.f32 0.0052083335, %v333_v33  ;;  %v646_v47 = vmul.f32 %v6232_v18, %v6232_v18  ;;  %v647_v12 = vmul.f32 %v6235_v20, %v6235_v20  ;;  %v4589_v24 = vpack.c.bf16 %v1170_v40, %v1164_v17 }
  0xd8   : > { %762 = vadd.xlane.f32.xlu0 %v761_v52  ;;  %858 = vadd.xlane.f32.xlu1 %v857_v26  ;;  %v6253_v63 = vsub.f32 %v10410_v62, %v511_v43  ;;  %v6256_v27 = vsub.f32 %v10411_v22, %v511_v43  ;;  %v860_v15 = vsel %vm277_vm0, %v693_v32, 0.0  ;;  %v10414_v52 = vld [vmem:[#allocation7_spill] sm:$0xff]  ;;  %v10418_v22 = vld [vmem:[#allocation10_spill] sm:$0xff] }
  0xd9   : > { %v6260_v8 = vsub.f32 %v10412_v58, %v488_v60  ;;  %v6263_v26 = vsub.f32 %v10414_v52, %v488_v60  ;;  %v429_v33 = vpop.xlane.xlu0 %428  ;;  %v861_v18 = vadd.f32 %v860_v15, %v692_v10  ;;  %v768_v54 = vsel %vm277_vm0, %v647_v12, 0.0  ;;  %4590 = vmatprep.subr.bf16.mxu1 %v4589_v24  ;;  %v10416_v12 = vld [vmem:[#allocation12_spill] sm:$0xff] }
  0xda   : > { %v512_v17 = vmul.f32 0.0052083335, %v429_v33  ;;  %v337_v40 = vpop.xlane.xlu1 %336  ;;  %v694_v62 = vmul.f32 %v6253_v63, %v6253_v63  ;;  %v695_v43 = vmul.f32 %v6256_v27, %v6256_v27  ;;  %v769_v32 = vadd.f32 %v768_v54, %v646_v47  ;;  %v10420_v33 = vld [vmem:[#allocation13_spill] sm:$0xff] }
  0xdb   : > { %10413 = vst [vmem:[#allocation8_spill] sm:$0xff] %v6260_v8  ;;  %10415 = vst [vmem:[#allocation6_spill] sm:$0xff] %v6263_v26  ;;  %v489_v58 = vmul.f32 0.0052083335, %v337_v40  ;;  %v648_v60 = vmul.f32 %v6260_v8, %v6260_v8  ;;  %v649_v10 = vmul.f32 %v6263_v26, %v6263_v26 }
  0xdc   : > { %766 = vadd.xlane.f32.xlu0 %v765_v16  ;;  %862 = vadd.xlane.f32.xlu1 %v861_v18  ;;  %v6275_v24 = vsub.f32 %v10416_v12, %v512_v17  ;;  %v6278_v15 = vsub.f32 %v10418_v22, %v512_v17  ;;  %v864_v52 = vsel %vm277_vm0, %v695_v43, 0.0  ;;  %v10422_v18 = vld [vmem:[#allocation11_spill] sm:$0xff] }
  0xdd   : > { %v6282_v20 = vsub.f32 %v10420_v33, %v489_v58  ;;  %v6285_v16 = vsub.f32 %v10422_v18, %v489_v58  ;;  %v433_v54 = vpop.xlane.xlu0 %432  ;;  %v865_v47 = vadd.f32 %v864_v52, %v694_v62  ;;  %v772_v40 = vsel %vm277_vm0, %v649_v10, 0.0  ;;  %v10424_v52 = vld [vmem:[#allocation16_spill] sm:$0xff]  ;;  %v10426_v33 = vld [vmem:[#allocation14_spill] sm:$0xff] }
  0xde   : > { %10417 = vst [vmem:[#allocation9_spill] sm:$0xff] %v6275_v24  ;;  %10419 = vst [vmem:[#allocation7_spill] sm:$0xff] %v6278_v15  ;;  %v513_v8 = vmul.f32 0.0052083335, %v433_v54  ;;  %v341_v26 = vpop.xlane.xlu1 %340  ;;  %v696_v12 = vmul.f32 %v6275_v24, %v6275_v24  ;;  %v697_v17 = vmul.f32 %v6278_v15, %v6278_v15  ;;  %v773_v22 = vadd.f32 %v772_v40, %v648_v60  ;;  %v10428_v24 = vld [vmem:[#allocation17_spill] sm:$0xff] }
  0xdf   : > { %10421 = vst [vmem:[#allocation12_spill] sm:$0xff] %v6282_v20  ;;  %10423 = vst [vmem:[#allocation10_spill] sm:$0xff] %v6285_v16  ;;  %v490_v43 = vmul.f32 0.0052083335, %v341_v26  ;;  %v650_v58 = vmul.f32 %v6282_v20, %v6282_v20  ;;  %v651_v62 = vmul.f32 %v6285_v16, %v6285_v16 }
  0xe0   : > { %770 = vadd.xlane.f32.xlu0 %v769_v32  ;;  %866 = vadd.xlane.f32.xlu1 %v865_v47  ;;  %v6297_v10 = vsub.f32 %v10424_v52, %v513_v8  ;;  %v6300_v18 = vsub.f32 %v10426_v33, %v513_v8  ;;  %v868_v54 = vsel %vm277_vm0, %v697_v17, 0.0  ;;  %v10430_v32 = vld [vmem:[#allocation15_spill] sm:$0xff]  ;;  %v10432_v33 = vld [vmem:[#allocation20_spill] sm:$0xff] }
  0xe1   : > { %v6304_v15 = vsub.f32 %v10428_v24, %v490_v43  ;;  %v6307_v26 = vsub.f32 %v10430_v32, %v490_v43  ;;  %v437_v60 = vpop.xlane.xlu0 %436  ;;  %v869_v47 = vadd.f32 %v868_v54, %v696_v12  ;;  %v776_v40 = vsel %vm277_vm0, %v651_v62, 0.0  ;;  %v10434_v54 = vld [vmem:[#allocation18_spill] sm:$0xff] }
  0xe2   : > { %10425 = vst [vmem:[#allocation13_spill] sm:$0xff] %v6297_v10  ;;  %10427 = vst [vmem:[#allocation11_spill] sm:$0xff] %v6300_v18  ;;  %v514_v20 = vmul.f32 0.0052083335, %v437_v60  ;;  %v345_v16 = vpop.xlane.xlu1 %344  ;;  %v698_v52 = vmul.f32 %v6297_v10, %v6297_v10  ;;  %v699_v8 = vmul.f32 %v6300_v18, %v6300_v18  ;;  %v777_v24 = vadd.f32 %v776_v40, %v650_v58  ;;  %v10436_v10 = vld [vmem:[#allocation21_spill] sm:$0xff] }
  0xe3   : > { %10429 = vst [vmem:[#allocation16_spill] sm:$0xff] %v6304_v15  ;;  %10431 = vst [vmem:[#allocation14_spill] sm:$0xff] %v6307_v26  ;;  %v491_v17 = vmul.f32 0.0052083335, %v345_v16  ;;  %v652_v43 = vmul.f32 %v6304_v15, %v6304_v15  ;;  %v653_v12 = vmul.f32 %v6307_v26, %v6307_v26 }
  0xe4   : > { %774 = vadd.xlane.f32.xlu0 %v773_v22  ;;  %870 = vadd.xlane.f32.xlu1 %v869_v47  ;;  %v6319_v62 = vsub.f32 %v10432_v33, %v514_v20  ;;  %v6322_v32 = vsub.f32 %v10434_v54, %v514_v20  ;;  %v872_v60 = vsel %vm277_vm0, %v699_v8, 0.0  ;;  %v10438_v22 = vld [vmem:[#allocation19_spill] sm:$0xff]  ;;  %v10440_v54 = vld [vmem:[#allocation24_spill] sm:$0xff] }
  0xe5   : > { %v6326_v18 = vsub.f32 %v10436_v10, %v491_v17  ;;  %v6329_v16 = vsub.f32 %v10438_v22, %v491_v17  ;;  %v441_v58 = vpop.xlane.xlu0 %440  ;;  %v873_v47 = vadd.f32 %v872_v60, %v698_v52  ;;  %v780_v40 = vsel %vm277_vm0, %v653_v12, 0.0  ;;  %v10442_v60 = vld [vmem:[#allocation22_spill] sm:$0xff] }
  0xe6   : > { %10433 = vst [vmem:[#allocation17_spill] sm:$0xff] %v6319_v62  ;;  %10435 = vst [vmem:[#allocation15_spill] sm:$0xff] %v6322_v32  ;;  %v515_v15 = vmul.f32 0.0052083335, %v441_v58  ;;  %v349_v26 = vpop.xlane.xlu1 %348  ;;  %v700_v33 = vmul.f32 %v6319_v62, %v6319_v62  ;;  %v701_v20 = vmul.f32 %v6322_v32, %v6322_v32  ;;  %v781_v10 = vadd.f32 %v780_v40, %v652_v43  ;;  %v10444_v62 = vld [vmem:[#allocation25_spill] sm:$0xff] }
  0xe7   : > { %10437 = vst [vmem:[#allocation20_spill] sm:$0xff] %v6326_v18  ;;  %10439 = vst [vmem:[#allocation18_spill] sm:$0xff] %v6329_v16  ;;  %v492_v8 = vmul.f32 0.0052083335, %v349_v26  ;;  %v654_v17 = vmul.f32 %v6326_v18, %v6326_v18  ;;  %v655_v52 = vmul.f32 %v6329_v16, %v6329_v16 }
  0xe8   : > { %778 = vadd.xlane.f32.xlu0 %v777_v24  ;;  %874 = vadd.xlane.f32.xlu1 %v873_v47  ;;  %v6341_v12 = vsub.f32 %v10440_v54, %v515_v15  ;;  %v6344_v22 = vsub.f32 %v10442_v60, %v515_v15  ;;  %v876_v58 = vsel %vm277_vm0, %v701_v20, 0.0  ;;  %v10446_v24 = vld [vmem:[#allocation23_spill] sm:$0xff] }
  0xe9   : > { %v6348_v32 = vsub.f32 %v10444_v62, %v492_v8  ;;  %v6351_v26 = vsub.f32 %v10446_v24, %v492_v8  ;;  %v445_v43 = vpop.xlane.xlu0 %444  ;;  %v877_v47 = vadd.f32 %v876_v58, %v700_v33  ;;  %v784_v40 = vsel %vm277_vm0, %v655_v52, 0.0  ;;  %v10448_v52 = vld [vmem:[#allocation26_spill] sm:$0xff]  ;;  %v5404_v24 = vld [vmem:[%s5475_s18 + $0x298] sm:$0xff] }
  0xea   : > { %10441 = vst [vmem:[#allocation21_spill] sm:$0xff] %v6341_v12  ;;  %10443 = vst [vmem:[#allocation19_spill] sm:$0xff] %v6344_v22  ;;  %v516_v18 = vmul.f32 0.0052083335, %v445_v43  ;;  %v353_v54 = vpop.xlane.xlu1 %352  ;;  %v702_v15 = vmul.f32 %v6341_v12, %v6341_v12  ;;  %v703_v20 = vmul.f32 %v6344_v22, %v6344_v22  ;;  %v785_v60 = vadd.f32 %v784_v40, %v654_v17  ;;  %v10451_v12 = vld [vmem:[#allocation27_spill] sm:$0xff] }
  0xeb   : > { %10445 = vst [vmem:[#allocation24_spill] sm:$0xff] %v6348_v32  ;;  %10447 = vst [vmem:[#allocation22_spill] sm:$0xff] %v6351_v26  ;;  %v493_v62 = vmul.f32 0.0052083335, %v353_v54  ;;  %v656_v8 = vmul.f32 %v6348_v32, %v6348_v32  ;;  %v657_v33 = vmul.f32 %v6351_v26, %v6351_v26 }
  0xec   : > { %782 = vadd.xlane.f32.xlu0 %v781_v10  ;;  %878 = vadd.xlane.f32.xlu1 %v877_v47  ;;  %v6363_v58 = vsub.f32 %v10448_v52, %v516_v18  ;;  %v6366_v43 = vsub.f32 %v5404_v24, %v516_v18  ;;  %v880_v16 = vsel %vm277_vm0, %v703_v20, 0.0  ;;  %v5405_v10 = vld [vmem:[%s5475_s18 + $0x128] sm:$0xff] }
  0xed   : > { %v6370_v22 = vsub.f32 %v10451_v12, %v493_v62  ;;  %v6373_v17 = vsub.f32 %v5405_v10, %v493_v62  ;;  %v449_v47 = vpop.xlane.xlu0 %448  ;;  %v881_v40 = vadd.f32 %v880_v16, %v702_v15  ;;  %v788_v54 = vsel %vm277_vm0, %v657_v33, 0.0  ;;  %v5406_v15 = vld [vmem:[%s5475_s18 + $0x2a0] sm:$0xff]  ;;  %v5407_v10 = vld [vmem:[%s5475_s18 + $0x2a8] sm:$0xff] }
  0xee   : > { %10449 = vst [vmem:[#allocation25_spill] sm:$0xff] %v6363_v58  ;;  %10450 = vst [vmem:[#allocation23_spill] sm:$0xff] %v6366_v43  ;;  %v517_v52 = vmul.f32 0.0052083335, %v449_v47  ;;  %v357_v32 = vpop.xlane.xlu1 %356  ;;  %v704_v18 = vmul.f32 %v6363_v58, %v6363_v58  ;;  %v705_v12 = vmul.f32 %v6366_v43, %v6366_v43  ;;  %v789_v62 = vadd.f32 %v788_v54, %v656_v8  ;;  %v5408_v58 = vld [vmem:[%s5475_s18 + $0x130] sm:$0xff] }
  0xef   : > { %10452 = vst [vmem:[#allocation26_spill] sm:$0xff] %v6370_v22  ;;  %10453 = vst [vmem:[#allocation27_spill] sm:$0xff] %v6373_v17  ;;  %v494_v20 = vmul.f32 0.0052083335, %v357_v32  ;;  %v658_v24 = vmul.f32 %v6370_v22, %v6370_v22  ;;  %v659_v16 = vmul.f32 %v6373_v17, %v6373_v17  ;;  %v5409_v32 = vld [vmem:[%s5475_s18 + $0x138] sm:$0xff] }
  0xf0   : > { %786 = vadd.xlane.f32.xlu0 %v785_v60  ;;  %882 = vadd.xlane.f32.xlu1 %v881_v40  ;;  %v6385_v33 = vsub.f32 %v5406_v15, %v517_v52  ;;  %v6388_v47 = vsub.f32 %v5407_v10, %v517_v52  ;;  %v884_v26 = vsel %vm277_vm0, %v705_v12, 0.0 }
  0xf1   : > { %v6392_v43 = vsub.f32 %v5408_v58, %v494_v20  ;;  %v6395_v60 = vsub.f32 %v5409_v32, %v494_v20  ;;  %v453_v8 = vpop.xlane.xlu0 %452  ;;  %v885_v40 = vadd.f32 %v884_v26, %v704_v18  ;;  %v792_v54 = vsel %vm277_vm0, %v659_v16, 0.0  ;;  %v5410_v18 = vld [vmem:[%s5475_s18 + $0x2b0] sm:$0xff]  ;;  %v5411_v32 = vld [vmem:[%s5475_s18 + $0x2b8] sm:$0xff] }
  0xf2   : > { %10454 = vst [vmem:[#allocation31_spill] sm:$0xff] %v6385_v33  ;;  %10455 = vst [vmem:[#allocation32_spill] sm:$0xff] %v6388_v47  ;;  %v518_v15 = vmul.f32 0.0052083335, %v453_v8  ;;  %v361_v22 = vpop.xlane.xlu1 %360  ;;  %v706_v52 = vmul.f32 %v6385_v33, %v6385_v33  ;;  %v707_v58 = vmul.f32 %v6388_v47, %v6388_v47  ;;  %v793_v20 = vadd.f32 %v792_v54, %v658_v24  ;;  %v5412_v33 = vld [vmem:[%s5475_s18 + $0x140] sm:$0xff] }
  0xf3   : > { %10456 = vst [vmem:[#allocation33_spill] sm:$0xff] %v6392_v43  ;;  %10457 = vst [vmem:[#allocation34_spill] sm:$0xff] %v6395_v60  ;;  %v495_v12 = vmul.f32 0.0052083335, %v361_v22  ;;  %v660_v10 = vmul.f32 %v6392_v43, %v6392_v43  ;;  %v661_v26 = vmul.f32 %v6395_v60, %v6395_v60  ;;  %v5413_v22 = vld [vmem:[%s5475_s18 + $0x148] sm:$0xff] }
  0xf4   : > { %790 = vadd.xlane.f32.xlu0 %v789_v62  ;;  %886 = vadd.xlane.f32.xlu1 %v885_v40  ;;  %v6407_v16 = vsub.f32 %v5410_v18, %v518_v15  ;;  %v6410_v8 = vsub.f32 %v5411_v32, %v518_v15  ;;  %v888_v17 = vsel %vm277_vm0, %v707_v58, 0.0 }
  0xf5   : > { %v6414_v47 = vsub.f32 %v5412_v33, %v495_v12  ;;  %v6417_v62 = vsub.f32 %v5413_v22, %v495_v12  ;;  %v457_v24 = vpop.xlane.xlu0 %456  ;;  %v889_v40 = vadd.f32 %v888_v17, %v706_v52  ;;  %v796_v54 = vsel %vm277_vm0, %v661_v26, 0.0  ;;  %v5414_v52 = vld [vmem:[%s5475_s18 + $0x2c0] sm:$0xff]  ;;  %v5415_v22 = vld [vmem:[%s5475_s18 + $0x2c8] sm:$0xff] }
  0xf6   : > { %10458 = vst [vmem:[#allocation35_spill] sm:$0xff] %v6407_v16  ;;  %10459 = vst [vmem:[#allocation36_spill] sm:$0xff] %v6410_v8  ;;  %v519_v18 = vmul.f32 0.0052083335, %v457_v24  ;;  %v461_v43 = vpop.xlane.xlu1 %460  ;;  %v708_v15 = vmul.f32 %v6407_v16, %v6407_v16  ;;  %v709_v33 = vmul.f32 %v6410_v8, %v6410_v8  ;;  %v797_v12 = vadd.f32 %v796_v54, %v660_v10  ;;  %v5416_v16 = vld [vmem:[%s5475_s18 + $0x2d0] sm:$0xff] }
  0xf7   : > { %10460 = vst [vmem:[#allocation37_spill] sm:$0xff] %v6414_v47  ;;  %10461 = vst [vmem:[#allocation38_spill] sm:$0xff] %v6417_v62  ;;  %v520_v58 = vmul.f32 0.0052083335, %v461_v43  ;;  %v662_v32 = vmul.f32 %v6414_v47, %v6414_v47  ;;  %v663_v17 = vmul.f32 %v6417_v62, %v6417_v62  ;;  %v5417_v43 = vld [vmem:[%s5475_s18 + $0x2d8] sm:$0xff] }
  0xf8   : > { %794 = vadd.xlane.f32.xlu0 %v793_v20  ;;  %890 = vadd.xlane.f32.xlu1 %v889_v40  ;;  %v6429_v26 = vsub.f32 %v5414_v52, %v519_v18  ;;  %v6432_v24 = vsub.f32 %v5415_v22, %v519_v18  ;;  %v892_v60 = vsel %vm277_vm0, %v709_v33, 0.0 }
  0xf9   : > { %v6436_v8 = vsub.f32 %v5416_v16, %v520_v58  ;;  %v6439_v20 = vsub.f32 %v5417_v43, %v520_v58  ;;  %v365_v10 = vpop.xlane.xlu0 %364  ;;  %v893_v40 = vadd.f32 %v892_v60, %v708_v15  ;;  %v800_v54 = vsel %vm277_vm0, %v663_v17, 0.0  ;;  %v5418_v15 = vld [vmem:[%s5475_s18 + $0x150] sm:$0xff]  ;;  %v5419_v43 = vld [vmem:[%s5475_s18 + $0x158] sm:$0xff] }
  0xfa   : > { %10462 = vst [vmem:[#allocation39_spill] sm:$0xff] %v6429_v26  ;;  %10463 = vst [vmem:[#allocation40_spill] sm:$0xff] %v6432_v24  ;;  %v496_v52 = vmul.f32 0.0052083335, %v365_v10  ;;  %v465_v47 = vpop.xlane.xlu1 %464  ;;  %v710_v18 = vmul.f32 %v6429_v26, %v6429_v26  ;;  %v711_v16 = vmul.f32 %v6432_v24, %v6432_v24  ;;  %v801_v58 = vadd.f32 %v800_v54, %v662_v32  ;;  %v5420_v26 = vld [vmem:[%s5475_s18 + $0x2e0] sm:$0xff] }
  0xfb   : > { %10464 = vst [vmem:[#allocation41_spill] sm:$0xff] %v6436_v8  ;;  %10465 = vst [vmem:[#allocation42_spill] sm:$0xff] %v6439_v20  ;;  %v521_v33 = vmul.f32 0.0052083335, %v465_v47  ;;  %v712_v22 = vmul.f32 %v6436_v8, %v6436_v8  ;;  %v713_v60 = vmul.f32 %v6439_v20, %v6439_v20  ;;  %v5421_v47 = vld [vmem:[%s5475_s18 + $0x2e8] sm:$0xff]  ;;  %v5424_v20 = vld [vmem:[%s5475_s18 + $0x2f0] sm:$0xff] }
  0xfc   : > { %798 = vadd.xlane.f32.xlu0 %v797_v12  ;;  %894 = vadd.xlane.f32.xlu1 %v893_v40  ;;  %v6451_v17 = vsub.f32 %v5418_v15, %v496_v52  ;;  %v6454_v10 = vsub.f32 %v5419_v43, %v496_v52  ;;  %v896_v62 = vsel %vm277_vm0, %v711_v16, 0.0 }
  0xfd   : > { %v6458_v24 = vsub.f32 %v5420_v26, %v521_v33  ;;  %v6461_v12 = vsub.f32 %v5421_v47, %v521_v33  ;;  %v369_v32 = vpop.xlane.xlu0 %368  ;;  %v897_v40 = vadd.f32 %v896_v62, %v710_v18  ;;  %v900_v54 = vsel %vm277_vm0, %v713_v60, 0.0  ;;  %v5422_v18 = vld [vmem:[%s5475_s18 + $0x160] sm:$0xff]  ;;  %v5423_v47 = vld [vmem:[%s5475_s18 + $0x168] sm:$0xff] }
  0xfe   : > { %10466 = vst [vmem:[#allocation43_spill] sm:$0xff] %v6451_v17  ;;  %10467 = vst [vmem:[#allocation44_spill] sm:$0xff] %v6454_v10  ;;  %v497_v15 = vmul.f32 0.0052083335, %v369_v32  ;;  %v469_v8 = vpop.xlane.xlu1 %468  ;;  %v664_v52 = vmul.f32 %v6451_v17, %v6451_v17  ;;  %v665_v26 = vmul.f32 %v6454_v10, %v6454_v10  ;;  %v901_v33 = vadd.f32 %v900_v54, %v712_v22 }
  0xff   : > { %10468 = vst [vmem:[#allocation45_spill] sm:$0xff] %v6458_v24  ;;  %v522_v16 = vmul.f32 0.0052083335, %v469_v8  ;;  %v714_v43 = vmul.f32 %v6458_v24, %v6458_v24  ;;  %v715_v62 = vmul.f32 %v6461_v12, %v6461_v12  ;;  %v5425_v8 = vld [vmem:[%s5475_s18 + $0x2f8] sm:$0xff] }
 0x100   : > { %802 = vadd.xlane.f32.xlu0 %v801_v58  ;;  %898 = vadd.xlane.f32.xlu1 %v897_v40  ;;  %v6473_v60 = vsub.f32 %v5422_v18, %v497_v15  ;;  %v6476_v32 = vsub.f32 %v5423_v47, %v497_v15  ;;  %v804_v17 = vsel %vm277_vm0, %v665_v26, 0.0 }
 0x101   : > { %v6480_v10 = vsub.f32 %v5424_v20, %v522_v16  ;;  %v6483_v58 = vsub.f32 %v5425_v8, %v522_v16  ;;  %v373_v22 = vpop.xlane.xlu0 %372  ;;  %v805_v40 = vadd.f32 %v804_v17, %v664_v52  ;;  %v904_v54 = vsel %vm277_vm0, %v715_v62, 0.0  ;;  %v5426_v52 = vld [vmem:[%s5475_s18 + $0x170] sm:$0xff]  ;;  %v5427_v8 = vld [vmem:[%s5475_s18 + $0x178] sm:$0xff] }
 0x102   : > { %10469 = vst [vmem:[#allocation46_spill] sm:$0xff] %v6473_v60  ;;  %10470 = vst [vmem:[#allocation47_spill] sm:$0xff] %v6476_v32  ;;  %v498_v18 = vmul.f32 0.0052083335, %v373_v22  ;;  %v473_v24 = vpop.xlane.xlu1 %472  ;;  %v666_v15 = vmul.f32 %v6473_v60, %v6473_v60  ;;  %v667_v20 = vmul.f32 %v6476_v32, %v6476_v32  ;;  %v905_v16 = vadd.f32 %v904_v54, %v714_v43  ;;  %v5428_v32 = vld [vmem:[%s5475_s18 + $0x300] sm:$0xff] }
 0x103   : > { %10471 = vst [vmem:[#allocation48_spill] sm:$0xff] %v6480_v10  ;;  %10472 = vst [vmem:[#allocation49_spill] sm:$0xff] %v6483_v58  ;;  %v523_v26 = vmul.f32 0.0052083335, %v473_v24  ;;  %v716_v47 = vmul.f32 %v6480_v10, %v6480_v10  ;;  %v717_v17 = vmul.f32 %v6483_v58, %v6483_v58  ;;  %v5429_v24 = vld [vmem:[%s5475_s18 + $0x308] sm:$0xff] }
 0x104   : > { %902 = vadd.xlane.f32.xlu1 %v901_v33  ;;  %806 = vadd.xlane.f32.xlu0 %v805_v40  ;;  %v6495_v62 = vsub.f32 %v5426_v52, %v498_v18  ;;  %v6498_v22 = vsub.f32 %v5427_v8, %v498_v18  ;;  %v808_v60 = vsel %vm277_vm0, %v667_v20, 0.0  ;;  %v5430_v8 = vld [vmem:[%s5475_s18 + $0x180] sm:$0xff] }
 0x105   : > { %v6502_v33 = vsub.f32 %v5428_v32, %v523_v26  ;;  %v6505_v43 = vsub.f32 %v5429_v24, %v523_v26  ;;  %v377_v40 = vpop.xlane.xlu0 %376  ;;  %v809_v54 = vadd.f32 %v808_v60, %v666_v15  ;;  %v908_v10 = vsel %vm277_vm0, %v717_v17, 0.0  ;;  %v5431_v15 = vld [vmem:[%s5475_s18 + $0x188] sm:$0xff] }
 0x106   : > { %10473 = vst [vmem:[#allocation50_spill] sm:$0xff] %v6495_v62  ;;  %10474 = vst [vmem:[#allocation51_spill] sm:$0xff] %v6498_v22  ;;  %v499_v58 = vmul.f32 0.0052083335, %v377_v40  ;;  %v668_v52 = vmul.f32 %v6495_v62, %v6495_v62  ;;  %v669_v18 = vmul.f32 %v6498_v22, %v6498_v22  ;;  %v909_v20 = vadd.f32 %v908_v10, %v716_v47 }
 0x107   : > { %10475 = vst [vmem:[#allocation52_spill] sm:$0xff] %v6502_v33  ;;  %10476 = vst [vmem:[#allocation53_spill] sm:$0xff] %v6505_v43  ;;  %v718_v32 = vmul.f32 %v6502_v33, %v6502_v33  ;;  %v719_v26 = vmul.f32 %v6505_v43, %v6505_v43 }
 0x108   : > { %906 = vadd.xlane.f32.xlu1 %v905_v16  ;;  %810 = vadd.xlane.f32.xlu0 %v809_v54  ;;  %v6517_v60 = vsub.f32 %v5430_v8, %v499_v58  ;;  %v6520_v17 = vsub.f32 %v5431_v15, %v499_v58  ;;  %v812_v24 = vsel %vm277_vm0, %v669_v18, 0.0 }
 0x109   : > { %v813_v40 = vadd.f32 %v812_v24, %v668_v52  ;;  %v912_v62 = vsel %vm277_vm0, %v719_v26, 0.0 }
 0x10a   : > { %10477 = vst [vmem:[#allocation54_spill] sm:$0xff] %v6517_v60  ;;  %10478 = vst [vmem:[#allocation55_spill] sm:$0xff] %v6520_v17  ;;  %v670_v10 = vmul.f32 %v6517_v60, %v6517_v60  ;;  %v671_v16 = vmul.f32 %v6520_v17, %v6520_v17  ;;  %v913_v47 = vadd.f32 %v912_v62, %v718_v32 }
 0x10c   : > { %910 = vadd.xlane.f32.xlu1 %v909_v20  ;;  %814 = vadd.xlane.f32.xlu0 %v813_v40  ;;  %v816_v54 = vsel %vm277_vm0, %v671_v16, 0.0 }
 0x10d   : > { %v817_v8 = vadd.f32 %v816_v54, %v670_v10 }
 0x110   : > { %914 = vadd.xlane.f32.xlu1 %v913_v47  ;;  %818 = vadd.xlane.f32.xlu0 %v817_v8  ;;  %v1165_v8 = vld [vmem:[%s10210_s1 + $0x20] sm:$0xff] }
 0x13c   : > { %v723_v58 = vpop.xlane.xlu1 %722 }
 0x13d   : > { %v916_v15 = vmul.f32 0.0052083335, %v723_v58 }
 0x13f   : > { %v965_v18 = vadd.f32 1e-05, %v916_v15  ;;  %v1163_v15 = vld [vmem:[%s10210_s1 + $0x10] sm:$0xff] }
 0x140   : > { %v823_v52 = vpop.xlane.xlu1 %822  ;;  %v727_v24 = vpop.xlane.xlu0 %726 }
 0x141   : > { %4718 = vrsqrt.f32 %v965_v18  ;;  %v941_v26 = vmul.f32 0.0052083335, %v823_v52  ;;  %v917_v33 = vmul.f32 0.0052083335, %v727_v24 }
 0x143   : > { %v990_v60 = vadd.f32 1e-05, %v941_v26  ;;  %v966_v43 = vadd.f32 1e-05, %v917_v33  ;;  %v1171_v33 = vld [vmem:[%s10210_s1 + $0x50] sm:$0xff] }
 0x144   : > { %v827_v22 = vpop.xlane.xlu1 %826  ;;  %v731_v17 = vpop.xlane.xlu0 %730 }
 0x145   : > { %4720 = vrsqrt.f32 %v990_v60  ;;  %v942_v20 = vmul.f32 0.0052083335, %v827_v22  ;;  %v918_v62 = vmul.f32 0.0052083335, %v731_v17  ;;  %v1178_v22 = vld [vmem:[%s10210_s1 + $0x88] sm:$0xff] }
 0x146   : > { %4722 = vrsqrt.f32 %v966_v43  ;;  %v1184_v43 = vld [vmem:[%s10210_s1 + $0xb8] sm:$0xff] }
 0x147   : > { %v991_v32 = vadd.f32 1e-05, %v942_v20  ;;  %v967_v40 = vadd.f32 1e-05, %v918_v62  ;;  %v4639_v20 = vpack.c.bf16 %v1171_v33, %v1165_v8  ;;  %v1169_v62 = vld [vmem:[%s10210_s1 + $0x40] sm:$0xff] }
 0x148   : > { %v831_v10 = vpop.xlane.xlu1 %830  ;;  %v735_v16 = vpop.xlane.xlu0 %734 }
 0x149   : > { %4724 = vrsqrt.f32 %v991_v32  ;;  %v943_v47 = vmul.f32 0.0052083335, %v831_v10  ;;  %v919_v54 = vmul.f32 0.0052083335, %v735_v16  ;;  %v6556_v32 = vld [vmem:[%s10210_s1 + $0x80] sm:$0xff]  ;;  %v1176_v16 = vld [vmem:[%s10210_s1 + $0x78] sm:$0xff] }
 0x14a   : > { %4726 = vrsqrt.f32 %v967_v40  ;;  %v6561_v40 = vld [vmem:[%s10210_s1 + $0xb0] sm:$0xff] }
 0x14b   : > { %v4719_v60 = vpop.eup %4718  ;;  %v992_v17 = vadd.f32 1e-05, %v943_v47  ;;  %v968_v58 = vadd.f32 1e-05, %v919_v54  ;;  %v1182_v47 = vld [vmem:[%s10210_s1 + $0xa8] sm:$0xff]  ;;  %v6574_v54 = vld [vmem:[%s10210_s1 + $0x70] sm:$0xff] }
 0x14c   : > { %v835_v18 = vpop.xlane.xlu1 %834  ;;  %v739_v52 = vpop.xlane.xlu0 %738  ;;  %v6545_v24 = vmul.f32 %v4719_v60, %v5928_v35  ;;  %v6548_v26 = vmul.f32 %v4719_v60, %v5925_v25  ;;  %v4641_v25 = vpack.c.bf16 %v1184_v43, %v1178_v22  ;;  %v4591_v43 = vpack.c.bf16 %v1169_v62, %v1163_v15  ;;  %v1190_v60 = vld [vmem:[%s10210_s1 + $0xe8] sm:$0xff] }
 0x14d   : > { %4728 = vrsqrt.f32 %v992_v17  ;;  %v944_v35 = vmul.f32 0.0052083335, %v835_v18  ;;  %v920_v10 = vmul.f32 0.0052083335, %v739_v52  ;;  %v1196_v17 = vld [vmem:[%s10210_s1 + $0x118] sm:$0xff]  ;;  %v4643_v15 = vpack.c.bf16 %v6561_v40, %v6556_v32 }
 0x14e   : > { %10479 = vst [vmem:[#allocation56_spill] sm:$0xff] %v6545_v24  ;;  %4730 = vrsqrt.f32 %v968_v58  ;;  %4391 = vmatprep.mubr.msk.f32.mxu0 %vm277_vm0, %v6545_v24  ;;  %v4593_v62 = vpack.c.bf16 %v1182_v47, %v1176_v16  ;;  %v6612_v40 = vld [vmem:[%s10210_s1 + $0xd8] sm:$0xff]  ;;  %v6617_v16 = vld [vmem:[%s10210_s1 + $0x108] sm:$0xff] }
 0x14f   : > { %v4721_v8 = vpop.eup %4720  ;;  %v993_v33 = vadd.f32 1e-05, %v944_v35  ;;  %v969_v22 = vadd.f32 1e-05, %v920_v10  ;;  %1549 = vmatmul.mubr.f32.vlgmr.msra.gmra.mrb[0].mxu0 %v6548_v26  ;;  %v6594_v10 = vld [vmem:[%s10210_s1 + $0xa0] sm:$0xff] }
 0x150   : > { %v4723_v58 = vpop.eup %4722  ;;  %4640 = vmatpush1.bf16.msra.mxu0 %v4639_v20  ;;  %v6584_v24 = vmul.f32 %v4721_v8, %v5940_v0  ;;  %v6587_v35 = vmul.f32 %v4721_v8, %v5937_v51  ;;  %v6599_v20 = vld [vmem:[%s10210_s1 + $0xe0] sm:$0xff]  ;;  %v6604_v0 = vld [vmem:[%s10210_s1 + $0x110] sm:$0xff] }
 0x151   : > { %v839_v18 = vpop.xlane.xlu1 %838  ;;  %v743_v52 = vpop.xlane.xlu0 %742  ;;  %4732 = vrsqrt.f32 %v993_v33  ;;  %v6607_v32 = vmul.f32 %v4723_v58, %v5954_v19  ;;  %4642 = vmatprep.subr.bf16.mxu0 %v4641_v25  ;;  %v6622_v47 = vmul.f32 %v4723_v58, %v5951_v49  ;;  %v4645_v19 = vpack.c.bf16 %v1196_v17, %v1190_v60  ;;  %v6627_v25 = vld [vmem:[%s10210_s1 + $0xd0] sm:$0xff]  ;;  %v1202_v60 = vld [vmem:[%s10210_s1 + $0x148] sm:$0xff]  ;;  %v1208_v17 = vld [vmem:[%s10210_s1 + $0x178] sm:$0xff] }
 0x152   : > { %10480 = vst [vmem:[#allocation57_spill] sm:$0xff] %v6587_v35  ;;  %v945_v51 = vmul.f32 0.0052083335, %v839_v18  ;;  %v921_v8 = vmul.f32 0.0052083335, %v743_v52  ;;  %4734 = vrsqrt.f32 %v969_v22  ;;  %4416 = vmatprep.mubr.msk.f32.mxu1 %vm277_vm0, %v6584_v24  ;;  %v4595_v22 = vpack.c.bf16 %v6594_v10, %v6574_v54 }
 0x153   : > { %v4725_v33 = vpop.eup %4724  ;;  %4392 = vmatprep.mubr.msk.f32.mxu0 %vm277_vm0, %v6607_v32  ;;  %1699 = vmatmul.mubr.f32.vlgmr.msra.gmra.mrb[0].mxu1 %v6587_v35  ;;  %v4647_v49 = vpack.c.bf16 %v6604_v0, %v6599_v20  ;;  %v4597_v10 = vpack.c.bf16 %v6617_v16, %v6612_v40  ;;  %v6654_v20 = vld [vmem:[%s10210_s1 + $0x100] sm:$0xff]  ;;  %v6672_v16 = vld [vmem:[%s10210_s1 + $0x138] sm:$0xff] }
 0x154   : > { %v994_v18 = vadd.f32 1e-05, %v945_v51  ;;  %v970_v52 = vadd.f32 1e-05, %v921_v8  ;;  %v4727_v58 = vpop.eup %4726  ;;  %1555 = vmatmul.mubr.f32.gmra.mrb[2].mxu0 %v6622_v47  ;;  %4592 = vmatpush1.bf16.msra.mxu1 %v4591_v43  ;;  %v6644_v35 = vmul.f32 %v4725_v33, %v5976_v9  ;;  %v6647_v54 = vmul.f32 %v4725_v33, %v5973_v1  ;;  %v6659_v43 = vld [vmem:[%s10210_s1 + $0x140] sm:$0xff]  ;;  %v6664_v9 = vld [vmem:[%s10210_s1 + $0x170] sm:$0xff] }
 0x155   : > { %v843_v51 = vpop.xlane.xlu1 %842  ;;  %v747_v8 = vpop.xlane.xlu0 %746  ;;  %v6667_v40 = vmul.f32 %v4727_v58, %v5961_v37  ;;  %4644 = vmatpush1.bf16.msra.mxu0 %v4643_v15  ;;  %4594 = vmatprep.subr.bf16.mxu1 %v4593_v62  ;;  %v6677_v33 = vld [vmem:[%s10210_s1 + $0x168] sm:$0xff]  ;;  %v4649_v37 = vpack.c.bf16 %v1208_v17, %v1202_v60  ;;  %v6687_v15 = vld [vmem:[%s10210_s1 + $0x130] sm:$0xff]  ;;  %v1220_v60 = vld [vmem:[%s10210_s1 + $0x1d8] sm:$0xff] }
 0x156   : > { %4736 = vrsqrt.f32 %v994_v18  ;;  %v946_v1 = vmul.f32 0.0052083335, %v843_v51  ;;  %v922_v0 = vmul.f32 0.0052083335, %v747_v8  ;;  %4417 = vmatprep.mubr.msk.f32.mxu1 %vm277_vm0, %v6644_v35  ;;  %v6682_v18 = vmul.f32 %v4727_v58, %v5958_v59  ;;  %4646 = vmatprep.subr.bf16.mxu0 %v4645_v19  ;;  %v1214_v19 = vld [vmem:[%s10210_s1 + $0x1a8] sm:$0xff] }
 0x157   : > { %4738 = vrsqrt.f32 %v970_v52  ;;  %v4729_v62 = vpop.eup %4728  ;;  %4393 = vmatprep.mubr.msk.f32.mxu0 %vm277_vm0, %v6667_v40  ;;  %1705 = vmatmul.mubr.f32.gmra.mrb[2].mxu1 %v6647_v54  ;;  %v4599_v52 = vpack.c.bf16 %v6654_v20, %v6627_v25  ;;  %v4651_v59 = vpack.c.bf16 %v6664_v9, %v6659_v43  ;;  %v4601_v20 = vpack.c.bf16 %v6677_v33, %v6672_v16  ;;  %v6714_v43 = vld [vmem:[%s10210_s1 + $0x160] sm:$0xff]  ;;  %v6732_v33 = vld [vmem:[%s10210_s1 + $0x198] sm:$0xff] }
 0x158   : > { %v995_v51 = vadd.f32 1e-05, %v946_v1  ;;  %v971_v8 = vadd.f32 1e-05, %v922_v0  ;;  %v4731_v17 = vpop.eup %4730  ;;  %1561 = vmatmul.mubr.f32.gmra.mrb[4].mxu0 %v6682_v18  ;;  %v6704_v0 = vmul.f32 %v4729_v62, %v5998_v5  ;;  %v6707_v25 = vmul.f32 %v4729_v62, %v5995_v29  ;;  %4596 = vmatpush1.bf16.msra.mxu1 %v4595_v22  ;;  %v6719_v9 = vld [vmem:[%s10210_s1 + $0x1a0] sm:$0xff]  ;;  %v6724_v5 = vld [vmem:[%s10210_s1 + $0x1d0] sm:$0xff] }
 0x159   : > { %v847_v58 = vpop.xlane.xlu1 %846  ;;  %v751_v1 = vpop.xlane.xlu0 %750  ;;  %v6727_v16 = vmul.f32 %v4731_v17, %v5983_v13  ;;  %4648 = vmatpush1.bf16.msra.mxu0 %v4647_v49  ;;  %4598 = vmatprep.subr.bf16.mxu1 %v4597_v10  ;;  %v6737_v62 = vld [vmem:[%s10210_s1 + $0x1c8] sm:$0xff]  ;;  %v4653_v13 = vpack.c.bf16 %v1220_v60, %v1214_v19  ;;  %v6747_v49 = vld [vmem:[%s10210_s1 + $0x190] sm:$0xff]  ;;  %v1232_v19 = vld [vmem:[%s10210_s1 + $0x238] sm:$0xff] }
 0x15a   : > { %4740 = vrsqrt.f32 %v995_v51  ;;  %v947_v29 = vmul.f32 0.0052083335, %v847_v58  ;;  %v923_v22 = vmul.f32 0.0052083335, %v751_v1  ;;  %4418 = vmatprep.mubr.msk.f32.mxu1 %vm277_vm0, %v6704_v0  ;;  %v6742_v51 = vmul.f32 %v4731_v17, %v5980_v57  ;;  %4650 = vmatprep.subr.bf16.mxu0 %v4649_v37  ;;  %v1226_v37 = vld [vmem:[%s10210_s1 + $0x208] sm:$0xff] }
 0x15b   : > { %4742 = vrsqrt.f32 %v971_v8  ;;  %v4733_v10 = vpop.eup %4732  ;;  %4394 = vmatprep.mubr.msk.f32.mxu0 %vm277_vm0, %v6727_v16  ;;  %1711 = vmatmul.mubr.f32.gmra.mrb[4].mxu1 %v6707_v25  ;;  %v4603_v8 = vpack.c.bf16 %v6714_v43, %v6687_v15  ;;  %v4655_v57 = vpack.c.bf16 %v6724_v5, %v6719_v9  ;;  %v4605_v43 = vpack.c.bf16 %v6737_v62, %v6732_v33  ;;  %v6774_v9 = vld [vmem:[%s10210_s1 + $0x1c0] sm:$0xff]  ;;  %v6792_v62 = vld [vmem:[%s10210_s1 + $0x1f8] sm:$0xff] }
 0x15c   : > { %v996_v58 = vadd.f32 1e-05, %v947_v29  ;;  %v972_v1 = vadd.f32 1e-05, %v923_v22  ;;  %v4735_v60 = vpop.eup %4734  ;;  %1567 = vmatmul.mubr.f32.gmra.mrb[6].mxu0 %v6742_v51  ;;  %v6764_v22 = vmul.f32 %v4733_v10, %v6020_v3  ;;  %v6767_v15 = vmul.f32 %v4733_v10, %v6017_v56  ;;  %4600 = vmatpush1.bf16.msra.mxu1 %v4599_v52  ;;  %v6779_v5 = vld [vmem:[%s10210_s1 + $0x200] sm:$0xff]  ;;  %v6784_v3 = vld [vmem:[%s10210_s1 + $0x230] sm:$0xff] }
 0x15d   : > { %v851_v17 = vpop.xlane.xlu1 %850  ;;  %v755_v29 = vpop.xlane.xlu0 %754  ;;  %v6787_v33 = vmul.f32 %v4735_v60, %v6005_v21  ;;  %4652 = vmatpush1.bf16.msra.mxu0 %v4651_v59  ;;  %4602 = vmatprep.subr.bf16.mxu1 %v4601_v20  ;;  %v6797_v10 = vld [vmem:[%s10210_s1 + $0x228] sm:$0xff]  ;;  %v4657_v21 = vpack.c.bf16 %v1232_v19, %v1226_v37  ;;  %v6807_v59 = vld [vmem:[%s10210_s1 + $0x1f0] sm:$0xff]  ;;  %v1244_v37 = vld [vmem:[%s10210_s1 + $0x298] sm:$0xff] }
 0x15e   : > { %10481 = vst [vmem:[#allocation58_spill] sm:$0xff] %v6767_v15  ;;  %4744 = vrsqrt.f32 %v996_v58  ;;  %v948_v56 = vmul.f32 0.0052083335, %v851_v17  ;;  %v924_v52 = vmul.f32 0.0052083335, %v755_v29  ;;  %4419 = vmatprep.mubr.msk.f32.mxu1 %vm277_vm0, %v6764_v22  ;;  %v6802_v58 = vmul.f32 %v4735_v60, %v6002_v45  ;;  %4654 = vmatprep.subr.bf16.mxu0 %v4653_v13  ;;  %v1238_v13 = vld [vmem:[%s10210_s1 + $0x268] sm:$0xff] }
 0x15f   : > { %4746 = vrsqrt.f32 %v972_v1  ;;  %4395 = vmatprep.mubr.msk.f32.mxu0 %vm277_vm0, %v6787_v33  ;;  %1717 = vmatmul.mubr.f32.gmra.mrb[6].mxu1 %v6767_v15  ;;  %v4607_v1 = vpack.c.bf16 %v6774_v9, %v6747_v49  ;;  %v4659_v45 = vpack.c.bf16 %v6784_v3, %v6779_v5  ;;  %v4609_v9 = vpack.c.bf16 %v6797_v10, %v6792_v62  ;;  %v6834_v5 = vld [vmem:[%s10210_s1 + $0x220] sm:$0xff]  ;;  %v6852_v10 = vld [vmem:[%s10210_s1 + $0x258] sm:$0xff] }
 0x160   : > { %v4737_v20 = vpop.eup %4736  ;;  %v997_v17 = vadd.f32 1e-05, %v948_v56  ;;  %v973_v29 = vadd.f32 1e-05, %v924_v52  ;;  %1573 = vmatmul.mubr.f32.gmra.mrb[8].mxu0 %v6802_v58  ;;  %4604 = vmatpush1.bf16.msra.mxu1 %v4603_v8  ;;  %v6839_v3 = vld [vmem:[%s10210_s1 + $0x260] sm:$0xff] }
 0x161   : > { %v4739_v19 = vpop.eup %4738  ;;  %v855_v60 = vpop.xlane.xlu1 %854  ;;  %v6824_v52 = vmul.f32 %v4737_v20, %v6042_v61  ;;  %v6827_v49 = vmul.f32 %v4737_v20, %v6039_v53  ;;  %v6844_v61 = vld [vmem:[%s10210_s1 + $0x290] sm:$0xff]  ;;  %4656 = vmatpush1.bf16.msra.mxu0 %v4655_v57  ;;  %4606 = vmatprep.subr.bf16.mxu1 %v4605_v43  ;;  %v6857_v20 = vld [vmem:[%s10210_s1 + $0x288] sm:$0xff] }
 0x162   : > { %v759_v56 = vpop.xlane.xlu0 %758  ;;  %4748 = vrsqrt.f32 %v997_v17  ;;  %v949_v53 = vmul.f32 0.0052083335, %v855_v60  ;;  %v6847_v62 = vmul.f32 %v4739_v19, %v6027_v4  ;;  %v6862_v17 = vmul.f32 %v4739_v19, %v6024_v14  ;;  %4658 = vmatprep.subr.bf16.mxu0 %v4657_v21  ;;  %v6867_v57 = vld [vmem:[%s10210_s1 + $0x250] sm:$0xff]  ;;  %v1250_v21 = vld [vmem:[%s10210_s1 + $0x2c8] sm:$0xff] }
 0x163   : > { %10482 = vst [vmem:[#allocation59_spill] sm:$0xff] %v6824_v52  ;;  %10483 = vst [vmem:[#allocation60_spill] sm:$0xff] %v6827_v49  ;;  %v925_v8 = vmul.f32 0.0052083335, %v759_v56  ;;  %4750 = vrsqrt.f32 %v973_v29  ;;  %4420 = vmatprep.mubr.msk.f32.mxu1 %vm277_vm0, %v6824_v52  ;;  %v4661_v4 = vpack.c.bf16 %v1244_v37, %v1238_v13  ;;  %v4611_v29 = vpack.c.bf16 %v6834_v5, %v6807_v59  ;;  %v1256_v13 = vld [vmem:[%s10210_s1 + $0x2f8] sm:$0xff] }
 0x164   : > { %v4741_v43 = vpop.eup %4740  ;;  %v998_v60 = vadd.f32 1e-05, %v949_v53  ;;  %4396 = vmatprep.mubr.msk.f32.mxu0 %vm277_vm0, %v6847_v62  ;;  %1723 = vmatmul.mubr.f32.gmra.mrb[8].mxu1 %v6827_v49  ;;  %v4663_v14 = vpack.c.bf16 %v6844_v61, %v6839_v3  ;;  %v4613_v5 = vpack.c.bf16 %v6857_v20, %v6852_v10  ;;  %v6894_v3 = vld [vmem:[%s10210_s1 + $0x280] sm:$0xff]  ;;  %v6899_v61 = vld [vmem:[%s10210_s1 + $0x2b8] sm:$0xff] }
 0x165   : > { %v974_v56 = vadd.f32 1e-05, %v925_v8  ;;  %v4743_v37 = vpop.eup %4742  ;;  %1579 = vmatmul.mubr.f32.gmra.mrb[10].mxu0 %v6862_v17  ;;  %v859_v19 = vpop.xlane.xlu1 %858  ;;  %v6884_v8 = vmul.f32 %v4741_v43, %v6076_v31  ;;  %v6887_v59 = vmul.f32 %v4741_v43, %v6073_v11  ;;  %4608 = vmatpush1.bf16.msra.mxu1 %v4607_v1  ;;  %v6904_v31 = vld [vmem:[%s10210_s1 + $0x2e8] sm:$0xff]  ;;  %v6912_v20 = vld [vmem:[%s10210_s1 + $0x2c0] sm:$0xff]  ;;  %v6917_v43 = vld [vmem:[%s10210_s1 + $0x2f0] sm:$0xff] }
 0x166   : > { %v763_v53 = vpop.xlane.xlu0 %762  ;;  %4752 = vrsqrt.f32 %v998_v60  ;;  %v950_v11 = vmul.f32 0.0052083335, %v859_v19  ;;  %v6907_v10 = vmul.f32 %v4743_v37, %v6055_v23  ;;  %4660 = vmatpush1.bf16.msra.mxu0 %v4659_v45  ;;  %4610 = vmatprep.subr.bf16.mxu1 %v4609_v9  ;;  %v10486_v60 = vld [vmem:[#allocation28_spill] sm:$0xff]  ;;  %v4665_v23 = vpack.c.bf16 %v1256_v13, %v1250_v21  ;;  %v1262_v21 = vld [vmem:[%s10210_s1 + $0x328] sm:$0xff]  ;;  %v1268_v13 = vld [vmem:[%s10210_s1 + $0x358] sm:$0xff] }
 0x167   : > { %10484 = vst [vmem:[#allocation61_spill] sm:$0xff] %v6884_v8  ;;  %10485 = vst [vmem:[#allocation62_spill] sm:$0xff] %v6887_v59  ;;  %v926_v1 = vmul.f32 0.0052083335, %v763_v53  ;;  %4754 = vrsqrt.f32 %v974_v56  ;;  %4421 = vmatprep.mubr.msk.f32.mxu1 %vm277_vm0, %v6884_v8  ;;  %v6922_v19 = vmul.f32 %v4743_v37, %v10486_v60  ;;  %4662 = vmatprep.subr.bf16.mxu0 %v4661_v4  ;;  %v6927_v45 = vld [vmem:[%s10210_s1 + $0x2b0] sm:$0xff] }
 0x168   : > { %v4745_v9 = vpop.eup %4744  ;;  %v999_v53 = vadd.f32 1e-05, %v950_v11  ;;  %4397 = vmatprep.mubr.msk.f32.mxu0 %vm277_vm0, %v6907_v10  ;;  %1729 = vmatmul.mubr.f32.gmra.mrb[10].mxu1 %v6887_v59  ;;  %v4615_v56 = vpack.c.bf16 %v6894_v3, %v6867_v57  ;;  %v4617_v4 = vpack.c.bf16 %v6904_v31, %v6899_v61  ;;  %v4667_v3 = vpack.c.bf16 %v6917_v43, %v6912_v20  ;;  %v6954_v61 = vld [vmem:[%s10210_s1 + $0x2e0] sm:$0xff]  ;;  %v6959_v31 = vld [vmem:[%s10210_s1 + $0x318] sm:$0xff] }
 0x169   : > { %v975_v49 = vadd.f32 1e-05, %v926_v1  ;;  %v4747_v37 = vpop.eup %4746  ;;  %1585 = vmatmul.mubr.f32.gmra.mrb[12].mxu0 %v6922_v19  ;;  %v863_v11 = vpop.xlane.xlu1 %862  ;;  %v6944_v60 = vmul.f32 %v4745_v9, %v6110_v30  ;;  %v6947_v57 = vmul.f32 %v4745_v9, %v6107_v34  ;;  %4612 = vmatpush1.bf16.msra.mxu1 %v4611_v29  ;;  %v6964_v30 = vld [vmem:[%s10210_s1 + $0x348] sm:$0xff]  ;;  %v6972_v43 = vld [vmem:[%s10210_s1 + $0x320] sm:$0xff]  ;;  %v6977_v9 = vld [vmem:[%s10210_s1 + $0x350] sm:$0xff] }
 0x16a   : > { %v767_v1 = vpop.xlane.xlu0 %766  ;;  %4756 = vrsqrt.f32 %v999_v53  ;;  %v951_v34 = vmul.f32 0.0052083335, %v863_v11  ;;  %v6967_v20 = vmul.f32 %v4747_v37, %v6083_v48  ;;  %4664 = vmatpush1.bf16.msra.mxu0 %v4663_v14  ;;  %4614 = vmatprep.subr.bf16.mxu1 %v4613_v5  ;;  %v6982_v53 = vmul.f32 %v4747_v37, %v6080_v36  ;;  %v6987_v14 = vld [vmem:[%s10210_s1 + $0x310] sm:$0xff] }
 0x16b   : > { %10487 = vst [vmem:[#allocation28_spill] sm:$0xff] %v6944_v60  ;;  %10488 = vst [vmem:[#allocation63_spill] sm:$0xff] %v6947_v57  ;;  %v927_v29 = vmul.f32 0.0052083335, %v767_v1  ;;  %4758 = vrsqrt.f32 %v975_v49  ;;  %4422 = vmatprep.mubr.msk.f32.mxu1 %vm277_vm0, %v6944_v60  ;;  %4666 = vmatprep.subr.bf16.mxu0 %v4665_v23  ;;  %v4669_v48 = vpack.c.bf16 %v1268_v13, %v1262_v21  ;;  %v1274_v23 = vld [vmem:[%s10210_s1 + $0x388] sm:$0xff]  ;;  %v1280_v21 = vld [vmem:[%s10210_s1 + $0x3b8] sm:$0xff] }
 0x16c   : > { %v4749_v5 = vpop.eup %4748  ;;  %v1000_v11 = vadd.f32 1e-05, %v951_v34  ;;  %4398 = vmatprep.mubr.msk.f32.mxu0 %vm277_vm0, %v6967_v20  ;;  %1735 = vmatmul.mubr.f32.gmra.mrb[12].mxu1 %v6947_v57  ;;  %v4619_v49 = vpack.c.bf16 %v6954_v61, %v6927_v45  ;;  %v4621_v36 = vpack.c.bf16 %v6964_v30, %v6959_v31  ;;  %v4671_v61 = vpack.c.bf16 %v6977_v9, %v6972_v43  ;;  %v7014_v31 = vld [vmem:[%s10210_s1 + $0x340] sm:$0xff]  ;;  %v7019_v30 = vld [vmem:[%s10210_s1 + $0x378] sm:$0xff] }
 0x16d   : > { %v976_v1 = vadd.f32 1e-05, %v927_v29  ;;  %v4751_v13 = vpop.eup %4750  ;;  %1591 = vmatmul.mubr.f32.gmra.mrb[14].mxu0 %v6982_v53  ;;  %v867_v37 = vpop.xlane.xlu1 %866  ;;  %v7004_v29 = vmul.f32 %v4749_v5, %v6144_v7  ;;  %v7007_v45 = vmul.f32 %v4749_v5, %v6141_v39  ;;  %4616 = vmatpush1.bf16.msra.mxu1 %v4615_v56  ;;  %v7024_v7 = vld [vmem:[%s10210_s1 + $0x3a8] sm:$0xff]  ;;  %v7032_v9 = vld [vmem:[%s10210_s1 + $0x380] sm:$0xff]  ;;  %v7037_v5 = vld [vmem:[%s10210_s1 + $0x3b0] sm:$0xff] }
 0x16e   : > { %v771_v34 = vpop.xlane.xlu0 %770  ;;  %4760 = vrsqrt.f32 %v1000_v11  ;;  %v952_v39 = vmul.f32 0.0052083335, %v867_v37  ;;  %v7027_v43 = vmul.f32 %v4751_v13, %v6117_v42  ;;  %4618 = vmatprep.subr.bf16.mxu1 %v4617_v4  ;;  %4668 = vmatpush1.bf16.msra.mxu0 %v4667_v3  ;;  %v7042_v11 = vmul.f32 %v4751_v13, %v6114_v6  ;;  %v7047_v4 = vld [vmem:[%s10210_s1 + $0x370] sm:$0xff] }
 0x16f   : > { %10489 = vst [vmem:[#allocation64_spill] sm:$0xff] %v7004_v29  ;;  %10490 = vst [vmem:[#allocation65_spill] sm:$0xff] %v7007_v45  ;;  %v928_v56 = vmul.f32 0.0052083335, %v771_v34  ;;  %4762 = vrsqrt.f32 %v976_v1  ;;  %4423 = vmatprep.mubr.msk.f32.mxu1 %vm277_vm0, %v7004_v29  ;;  %4670 = vmatprep.subr.bf16.mxu0 %v4669_v48  ;;  %v4673_v42 = vpack.c.bf16 %v1280_v21, %v1274_v23  ;;  %v1286_v48 = vld [vmem:[%s10210_s1 + $0x3e8] sm:$0xff]  ;;  %v1292_v23 = vld [vmem:[%s10210_s1 + $0x418] sm:$0xff] }
 0x170   : > { %v4753_v3 = vpop.eup %4752  ;;  %v1001_v37 = vadd.f32 1e-05, %v952_v39  ;;  %4399 = vmatprep.mubr.msk.f32.mxu0 %vm277_vm0, %v7027_v43  ;;  %1741 = vmatmul.mubr.f32.gmra.mrb[14].mxu1 %v7007_v45  ;;  %v4623_v1 = vpack.c.bf16 %v7014_v31, %v6987_v14  ;;  %v4625_v6 = vpack.c.bf16 %v7024_v7, %v7019_v30  ;;  %v4675_v31 = vpack.c.bf16 %v7037_v5, %v7032_v9  ;;  %v7074_v30 = vld [vmem:[%s10210_s1 + $0x3a0] sm:$0xff]  ;;  %v7079_v7 = vld [vmem:[%s10210_s1 + $0x3d8] sm:$0xff] }
 0x171   : > { %v977_v34 = vadd.f32 1e-05, %v928_v56  ;;  %v4755_v21 = vpop.eup %4754  ;;  %1597 = vmatmul.mubr.f32.gmra.mrb[16].mxu0 %v7042_v11  ;;  %v871_v13 = vpop.xlane.xlu1 %870  ;;  %v7064_v56 = vmul.f32 %v4753_v3, %v6178_v28  ;;  %v7067_v14 = vmul.f32 %v4753_v3, %v6175_v44  ;;  %4620 = vmatpush1.bf16.msra.mxu1 %v4619_v49  ;;  %v7084_v28 = vld [vmem:[%s10210_s1 + $0x408] sm:$0xff]  ;;  %v1285_v5 = vld [vmem:[%s10210_s1 + $0x3e0] sm:$0xff]  ;;  %v1291_v3 = vld [vmem:[%s10210_s1 + $0x410] sm:$0xff] }
 0x172   : > { %v775_v39 = vpop.xlane.xlu0 %774  ;;  %4764 = vrsqrt.f32 %v1001_v37  ;;  %v953_v44 = vmul.f32 0.0052083335, %v871_v13  ;;  %v7087_v9 = vmul.f32 %v4755_v21, %v6151_v38  ;;  %4622 = vmatprep.subr.bf16.mxu1 %v4621_v36  ;;  %4672 = vmatpush1.bf16.msra.mxu0 %v4671_v61  ;;  %v7098_v37 = vmul.f32 %v4755_v21, %v6148_v2  ;;  %v7103_v36 = vld [vmem:[%s10210_s1 + $0x3d0] sm:$0xff] }
 0x173   : > { %10491 = vst [vmem:[#allocation66_spill] sm:$0xff] %v7064_v56  ;;  %10492 = vst [vmem:[#allocation67_spill] sm:$0xff] %v7067_v14  ;;  %v929_v49 = vmul.f32 0.0052083335, %v775_v39  ;;  %4766 = vrsqrt.f32 %v977_v34  ;;  %4424 = vmatprep.mubr.msk.f32.mxu1 %vm277_vm0, %v7064_v56  ;;  %4674 = vmatprep.subr.bf16.mxu0 %v4673_v42  ;;  %v4677_v38 = vpack.c.bf16 %v1292_v23, %v1286_v48  ;;  %v1298_v42 = vld [vmem:[%s10210_s1 + $0x448] sm:$0xff]  ;;  %v1304_v48 = vld [vmem:[%s10210_s1 + $0x478] sm:$0xff] }
 0x174   : > { %v4757_v61 = vpop.eup %4756  ;;  %v1002_v13 = vadd.f32 1e-05, %v953_v44  ;;  %4400 = vmatprep.mubr.msk.f32.mxu0 %vm277_vm0, %v7087_v9  ;;  %1747 = vmatmul.mubr.f32.gmra.mrb[16].mxu1 %v7067_v14  ;;  %v4627_v34 = vpack.c.bf16 %v7074_v30, %v7047_v4  ;;  %v4629_v2 = vpack.c.bf16 %v7084_v28, %v7079_v7  ;;  %v1289_v30 = vld [vmem:[%s10210_s1 + $0x400] sm:$0xff]  ;;  %v4679_v7 = vpack.c.bf16 %v1291_v3, %v1285_v5  ;;  %v1296_v28 = vld [vmem:[%s10210_s1 + $0x438] sm:$0xff]  ;;  %v1302_v14 = vld [vmem:[%s10210_s1 + $0x468] sm:$0xff] }
 0x175   : > { %v978_v39 = vadd.f32 1e-05, %v929_v49  ;;  %v4759_v23 = vpop.eup %4758  ;;  %1603 = vmatmul.mubr.f32.gmra.mrb[18].mxu0 %v7098_v37  ;;  %v875_v21 = vpop.xlane.xlu1 %874  ;;  %v7120_v49 = vmul.f32 %v4757_v61, %v6200_v55  ;;  %v7123_v4 = vmul.f32 %v4757_v61, %v6197_v46  ;;  %4624 = vmatpush1.bf16.msra.mxu1 %v4623_v1  ;;  %v1297_v1 = vld [vmem:[%s10210_s1 + $0x440] sm:$0xff]  ;;  %v1303_v5 = vld [vmem:[%s10210_s1 + $0x470] sm:$0xff] }
 0x176   : > { %v779_v44 = vpop.xlane.xlu0 %778  ;;  %4768 = vrsqrt.f32 %v1002_v13  ;;  %v954_v55 = vmul.f32 0.0052083335, %v875_v21  ;;  %v7135_v46 = vmul.f32 %v4759_v23, %v6185_v41  ;;  %4626 = vmatprep.subr.bf16.mxu1 %v4625_v6  ;;  %4676 = vmatpush1.bf16.msra.mxu0 %v4675_v31  ;;  %v7146_v3 = vmul.f32 %v4759_v23, %v6182_v50  ;;  %v10495_v50 = vld [vmem:[#allocation2_spill] sm:$0xff] }
 0x177   : > { %10493 = vst [vmem:[#allocation68_spill] sm:$0xff] %v7120_v49  ;;  %10494 = vst [vmem:[#allocation69_spill] sm:$0xff] %v7123_v4  ;;  %v930_v56 = vmul.f32 0.0052083335, %v779_v44  ;;  %4770 = vrsqrt.f32 %v978_v39  ;;  %4425 = vmatprep.mubr.msk.f32.mxu1 %vm277_vm0, %v7120_v49  ;;  %4678 = vmatprep.subr.bf16.mxu0 %v4677_v38  ;;  %v4681_v41 = vpack.c.bf16 %v1304_v48, %v1298_v42  ;;  %v10497_v38 = vld [vmem:[#allocation4_spill] sm:$0xff] }
 0x178   : > { %v4761_v61 = vpop.eup %4760  ;;  %v1003_v6 = vadd.f32 1e-05, %v954_v55  ;;  %4401 = vmatprep.mubr.msk.f32.mxu0 %vm277_vm0, %v7135_v46  ;;  %1753 = vmatmul.mubr.f32.gmra.mrb[18].mxu1 %v7123_v4  ;;  %v4631_v13 = vpack.c.bf16 %v1289_v30, %v7103_v36  ;;  %v4633_v21 = vpack.c.bf16 %v1302_v14, %v1296_v28  ;;  %v10499_v4 = vld [vmem:[#allocation30_spill] sm:$0xff]  ;;  %v1295_v14 = vld [vmem:[%s10210_s1 + $0x430] sm:$0xff] }
 0x179   : > { %v979_v31 = vadd.f32 1e-05, %v930_v56  ;;  %v4763_v39 = vpop.eup %4762  ;;  %1609 = vmatmul.mubr.f32.gmra.mrb[20].mxu0 %v7146_v3  ;;  %v879_v44 = vpop.xlane.xlu1 %878  ;;  %v7154_v23 = vmul.f32 %v4761_v61, %v10495_v50  ;;  %v7157_v42 = vmul.f32 %v4761_v61, %v10497_v38  ;;  %4628 = vmatpush1.bf16.msra.mxu1 %v4627_v34  ;;  %v4683_v56 = vpack.c.bf16 %v1303_v5, %v1297_v1  ;;  %v1301_v36 = vld [vmem:[%s10210_s1 + $0x460] sm:$0xff]  ;;  %v10500_v34 = vld [vmem:[#allocation29_spill] sm:$0xff] }
 0x17a   : > { %v783_v49 = vpop.xlane.xlu0 %782  ;;  %4772 = vrsqrt.f32 %v1003_v6  ;;  %v955_v48 = vmul.f32 0.0052083335, %v879_v44  ;;  %v7160_v45 = vmul.f32 %v4763_v39, %v10499_v4  ;;  %4630 = vmatprep.subr.bf16.mxu1 %v4629_v2  ;;  %4680 = vmatpush1.bf16.msra.mxu0 %v4679_v7  ;;  %v7171_v30 = vmul.f32 %v4763_v39, %v10500_v34  ;;  %v10503_v39 = vld [vmem:[#allocation3_spill] sm:$0xff]  ;;  %v10504_v50 = vld [vmem:[#allocation5_spill] sm:$0xff] }
 0x17b   : > { %10496 = vst [vmem:[#allocation2_spill] sm:$0xff] %v7154_v23  ;;  %10498 = vst [vmem:[#allocation4_spill] sm:$0xff] %v7157_v42  ;;  %v931_v55 = vmul.f32 0.0052083335, %v783_v49  ;;  %4774 = vrsqrt.f32 %v979_v31  ;;  %4426 = vmatprep.mubr.msk.f32.mxu1 %vm277_vm0, %v7154_v23  ;;  %4682 = vmatprep.subr.bf16.mxu0 %v4681_v41  ;;  %v4635_v41 = vpack.c.bf16 %v1301_v36, %v1295_v14  ;;  %v10507_v36 = vld [vmem:[#allocation9_spill] sm:$0xff] }
 0x17c   : > { %v4765_v49 = vpop.eup %4764  ;;  %v1004_v4 = vadd.f32 1e-05, %v955_v48  ;;  %4402 = vmatprep.mubr.msk.f32.mxu0 %vm277_vm0, %v7160_v45  ;;  %1759 = vmatmul.mubr.f32.gmra.mrb[20].mxu1 %v7157_v42 }
 0x17d   : > { %v980_v2 = vadd.f32 1e-05, %v931_v55  ;;  %v4767_v7 = vpop.eup %4766  ;;  %1615 = vmatmul.mubr.f32.gmra.mrb[22].mxu0 %v7171_v30  ;;  %v883_v28 = vpop.xlane.xlu1 %882  ;;  %v7178_v5 = vmul.f32 %v4765_v49, %v6256_v27  ;;  %v7181_v61 = vmul.f32 %v4765_v49, %v6253_v63  ;;  %4632 = vmatpush1.bf16.msra.mxu1 %v4631_v13  ;;  %v10505_v55 = vld [vmem:[#allocation7_spill] sm:$0xff] }
 0x17e   : > { %v787_v1 = vpop.xlane.xlu0 %786  ;;  %4776 = vrsqrt.f32 %v1004_v4  ;;  %v956_v6 = vmul.f32 0.0052083335, %v883_v28  ;;  %v7184_v44 = vmul.f32 %v4767_v7, %v10503_v39  ;;  %4634 = vmatprep.subr.bf16.mxu1 %v4633_v21  ;;  %4684 = vmatpush1.bf16.msra.mxu0 %v4683_v56  ;;  %v7189_v27 = vmul.f32 %v4767_v7, %v10504_v50  ;;  %v10510_v28 = vld [vmem:[#allocation8_spill] sm:$0xff] }
 0x17f   : > { %10501 = vst [vmem:[#allocation30_spill] sm:$0xff] %v7178_v5  ;;  %10502 = vst [vmem:[#allocation29_spill] sm:$0xff] %v7181_v61  ;;  %v932_v31 = vmul.f32 0.0052083335, %v787_v1  ;;  %4778 = vrsqrt.f32 %v980_v2  ;;  %4427 = vmatprep.mubr.msk.f32.mxu1 %vm277_vm0, %v7178_v5  ;;  %v10509_v2 = vld [vmem:[#allocation6_spill] sm:$0xff] }
 0x180   : > { %v4769_v38 = vpop.eup %4768  ;;  %v1005_v63 = vadd.f32 1e-05, %v956_v6  ;;  %4403 = vmatprep.mubr.msk.f32.mxu0 %vm277_vm0, %v7184_v44  ;;  %1765 = vmatmul.mubr.f32.gmra.mrb[22].mxu1 %v7181_v61 }
 0x181   : > { %v981_v48 = vadd.f32 1e-05, %v932_v31  ;;  %v4771_v13 = vpop.eup %4770  ;;  %1621 = vmatmul.mubr.f32.gmra.mrb[24].mxu0 %v7189_v27  ;;  %v887_v21 = vpop.xlane.xlu1 %886  ;;  %v7196_v14 = vmul.f32 %v4769_v38, %v10505_v55  ;;  %v7199_v34 = vmul.f32 %v4769_v38, %v10507_v36  ;;  %4636 = vmatpush1.bf16.msra.mxu1 %v4635_v41  ;;  %v10515_v36 = vld [vmem:[#allocation10_spill] sm:$0xff] }
 0x182   : > { %v791_v56 = vpop.xlane.xlu0 %790  ;;  %4780 = vrsqrt.f32 %v1005_v63  ;;  %v957_v49 = vmul.f32 0.0052083335, %v887_v21  ;;  %v7202_v7 = vmul.f32 %v4771_v13, %v10509_v2  ;;  %v7207_v1 = vmul.f32 %v4771_v13, %v10510_v28  ;;  %v10511_v63 = vld [vmem:[#allocation11_spill] sm:$0xff]  ;;  %v10513_v21 = vld [vmem:[#allocation13_spill] sm:$0xff] }
 0x183   : > { %10506 = vst [vmem:[#allocation3_spill] sm:$0xff] %v7196_v14  ;;  %10508 = vst [vmem:[#allocation5_spill] sm:$0xff] %v7199_v34  ;;  %v933_v4 = vmul.f32 0.0052083335, %v791_v56  ;;  %4782 = vrsqrt.f32 %v981_v48  ;;  %4428 = vmatprep.mubr.msk.f32.mxu1 %vm277_vm0, %v7196_v14 }
 0x184   : > { %v4773_v6 = vpop.eup %4772  ;;  %v1006_v31 = vadd.f32 1e-05, %v957_v49  ;;  %4404 = vmatprep.mubr.msk.f32.mxu0 %vm277_vm0, %v7202_v7  ;;  %1771 = vmatmul.mubr.f32.gmra.mrb[24].mxu1 %v7199_v34 }
 0x185   : > { %v982_v39 = vadd.f32 1e-05, %v933_v4  ;;  %v4775_v41 = vpop.eup %4774  ;;  %1627 = vmatmul.mubr.f32.gmra.mrb[26].mxu0 %v7207_v1  ;;  %v891_v50 = vpop.xlane.xlu1 %890  ;;  %v7214_v48 = vmul.f32 %v4773_v6, %v10511_v63  ;;  %v7217_v56 = vmul.f32 %v4773_v6, %v10513_v21  ;;  %v10516_v4 = vld [vmem:[#allocation12_spill] sm:$0xff]  ;;  %v10519_v21 = vld [vmem:[#allocation17_spill] sm:$0xff] }
 0x186   : > { %v795_v38 = vpop.xlane.xlu0 %794  ;;  %4784 = vrsqrt.f32 %v1006_v31  ;;  %v958_v13 = vmul.f32 0.0052083335, %v891_v50  ;;  %v7220_v49 = vmul.f32 %v4775_v41, %v10515_v36  ;;  %v7225_v2 = vmul.f32 %v4775_v41, %v10516_v4 }
 0x187   : > { %10512 = vst [vmem:[#allocation7_spill] sm:$0xff] %v7214_v48  ;;  %10514 = vst [vmem:[#allocation9_spill] sm:$0xff] %v7217_v56  ;;  %v934_v55 = vmul.f32 0.0052083335, %v795_v38  ;;  %4786 = vrsqrt.f32 %v982_v39  ;;  %4429 = vmatprep.mubr.msk.f32.mxu1 %vm277_vm0, %v7214_v48  ;;  %v10517_v39 = vld [vmem:[#allocation15_spill] sm:$0xff] }
 0x188   : > { %v4777_v28 = vpop.eup %4776  ;;  %v1007_v34 = vadd.f32 1e-05, %v958_v13  ;;  %4405 = vmatprep.mubr.msk.f32.mxu0 %vm277_vm0, %v7220_v49  ;;  %1777 = vmatmul.mubr.f32.gmra.mrb[26].mxu1 %v7217_v56  ;;  %v10522_v56 = vld [vmem:[#allocation16_spill] sm:$0xff] }
 0x189   : > { %v983_v63 = vadd.f32 1e-05, %v934_v55  ;;  %v4779_v6 = vpop.eup %4778  ;;  %1633 = vmatmul.mubr.f32.gmra.mrb[28].mxu0 %v7225_v2  ;;  %v895_v31 = vpop.xlane.xlu1 %894  ;;  %v7232_v38 = vmul.f32 %v4777_v28, %v10517_v39  ;;  %v7235_v36 = vmul.f32 %v4777_v28, %v10519_v21  ;;  %v10521_v55 = vld [vmem:[#allocation14_spill] sm:$0xff]  ;;  %v10525_v21 = vld [vmem:[#allocation21_spill] sm:$0xff] }
 0x18a   : > { %v799_v50 = vpop.xlane.xlu0 %798  ;;  %4788 = vrsqrt.f32 %v1007_v34  ;;  %v959_v41 = vmul.f32 0.0052083335, %v895_v31  ;;  %v7238_v4 = vmul.f32 %v4779_v6, %v10521_v55  ;;  %v7243_v48 = vmul.f32 %v4779_v6, %v10522_v56 }
 0x18b   : > { %10518 = vst [vmem:[#allocation6_spill] sm:$0xff] %v7232_v38  ;;  %10520 = vst [vmem:[#allocation8_spill] sm:$0xff] %v7235_v36  ;;  %v935_v13 = vmul.f32 0.0052083335, %v799_v50  ;;  %4790 = vrsqrt.f32 %v983_v63  ;;  %4430 = vmatprep.mubr.msk.f32.mxu1 %vm277_vm0, %v7232_v38  ;;  %v10523_v63 = vld [vmem:[#allocation19_spill] sm:$0xff] }
 0x18c   : > { %v4781_v14 = vpop.eup %4780  ;;  %v1008_v61 = vadd.f32 1e-05, %v959_v41  ;;  %4406 = vmatprep.mubr.msk.f32.mxu0 %vm277_vm0, %v7238_v4  ;;  %1783 = vmatmul.mubr.f32.gmra.mrb[28].mxu1 %v7235_v36  ;;  %v10527_v41 = vld [vmem:[#allocation18_spill] sm:$0xff]  ;;  %v10528_v36 = vld [vmem:[#allocation20_spill] sm:$0xff] }
 0x18d   : > { %v984_v39 = vadd.f32 1e-05, %v935_v13  ;;  %v4783_v34 = vpop.eup %4782  ;;  %1639 = vmatmul.mubr.f32.gmra.mrb[30].mxu0 %v7243_v48  ;;  %v899_v28 = vpop.xlane.xlu1 %898  ;;  %v7250_v50 = vmul.f32 %v4781_v14, %v10523_v63  ;;  %v7253_v55 = vmul.f32 %v4781_v14, %v10525_v21  ;;  %v10531_v21 = vld [vmem:[#allocation25_spill] sm:$0xff] }
 0x18e   : > { %v803_v31 = vpop.xlane.xlu0 %802  ;;  %4792 = vrsqrt.f32 %v1008_v61  ;;  %v960_v56 = vmul.f32 0.0052083335, %v899_v28  ;;  %v7256_v13 = vmul.f32 %v4783_v34, %v10527_v41  ;;  %v7261_v38 = vmul.f32 %v4783_v34, %v10528_v36 }
 0x18f   : > { %10524 = vst [vmem:[#allocation11_spill] sm:$0xff] %v7250_v50  ;;  %10526 = vst [vmem:[#allocation13_spill] sm:$0xff] %v7253_v55  ;;  %v936_v6 = vmul.f32 0.0052083335, %v803_v31  ;;  %4794 = vrsqrt.f32 %v984_v39  ;;  %4431 = vmatprep.mubr.msk.f32.mxu1 %vm277_vm0, %v7250_v50  ;;  %v10529_v39 = vld [vmem:[#allocation23_spill] sm:$0xff] }
 0x190   : > { %v4785_v5 = vpop.eup %4784  ;;  %v1009_v42 = vadd.f32 1e-05, %v960_v56  ;;  %4407 = vmatprep.mubr.msk.f32.mxu0 %vm277_vm0, %v7256_v13  ;;  %1789 = vmatmul.mubr.f32.gmra.mrb[30].mxu1 %v7253_v55  ;;  %v10533_v56 = vld [vmem:[#allocation22_spill] sm:$0xff]  ;;  %v10534_v55 = vld [vmem:[#allocation24_spill] sm:$0xff] }
 0x191   : > { %v985_v63 = vadd.f32 1e-05, %v936_v6  ;;  %v4787_v61 = vpop.eup %4786  ;;  %1645 = vmatmul.mubr.f32.gmra.mrb[32].mxu0 %v7261_v38  ;;  %v903_v14 = vpop.xlane.xlu1 %902  ;;  %v7268_v31 = vmul.f32 %v4785_v5, %v10529_v39  ;;  %v7271_v41 = vmul.f32 %v4785_v5, %v10531_v21  ;;  %v10537_v21 = vld [vmem:[#allocation31_spill] sm:$0xff] }
 0x192   : > { %v807_v28 = vpop.xlane.xlu0 %806  ;;  %4796 = vrsqrt.f32 %v1009_v42  ;;  %v961_v36 = vmul.f32 0.0052083335, %v903_v14  ;;  %v7274_v6 = vmul.f32 %v4787_v61, %v10533_v56  ;;  %v7279_v50 = vmul.f32 %v4787_v61, %v10534_v55 }
 0x193   : > { %10530 = vst [vmem:[#allocation10_spill] sm:$0xff] %v7268_v31  ;;  %10532 = vst [vmem:[#allocation12_spill] sm:$0xff] %v7271_v41  ;;  %v937_v34 = vmul.f32 0.0052083335, %v807_v28  ;;  %4798 = vrsqrt.f32 %v985_v63  ;;  %4432 = vmatprep.mubr.msk.f32.mxu1 %vm277_vm0, %v7268_v31  ;;  %v10535_v63 = vld [vmem:[#allocation32_spill] sm:$0xff] }
 0x194   : > { %v4789_v23 = vpop.eup %4788  ;;  %v1010_v29 = vadd.f32 1e-05, %v961_v36  ;;  %4408 = vmatprep.mubr.msk.f32.mxu0 %vm277_vm0, %v7274_v6  ;;  %1795 = vmatmul.mubr.f32.gmra.mrb[32].mxu1 %v7271_v41  ;;  %v10539_v36 = vld [vmem:[#allocation27_spill] sm:$0xff]  ;;  %v10540_v41 = vld [vmem:[#allocation26_spill] sm:$0xff] }
 0x195   : > { %v986_v39 = vadd.f32 1e-05, %v937_v34  ;;  %v4791_v42 = vpop.eup %4790  ;;  %1651 = vmatmul.mubr.f32.gmra.mrb[34].mxu0 %v7279_v50  ;;  %v907_v5 = vpop.xlane.xlu1 %906  ;;  %v7286_v28 = vmul.f32 %v4789_v23, %v10535_v63  ;;  %v7289_v56 = vmul.f32 %v4789_v23, %v10537_v21  ;;  %v10543_v21 = vld [vmem:[#allocation35_spill] sm:$0xff] }
 0x196   : > { %v811_v14 = vpop.xlane.xlu0 %810  ;;  %4800 = vrsqrt.f32 %v1010_v29  ;;  %v962_v55 = vmul.f32 0.0052083335, %v907_v5  ;;  %v7292_v34 = vmul.f32 %v4791_v42, %v10539_v36  ;;  %v7297_v31 = vmul.f32 %v4791_v42, %v10540_v41 }
 0x197   : > { %10536 = vst [vmem:[#allocation15_spill] sm:$0xff] %v7286_v28  ;;  %10538 = vst [vmem:[#allocation17_spill] sm:$0xff] %v7289_v56  ;;  %v938_v61 = vmul.f32 0.0052083335, %v811_v14  ;;  %4802 = vrsqrt.f32 %v986_v39  ;;  %4433 = vmatprep.mubr.msk.f32.mxu1 %vm277_vm0, %v7286_v28  ;;  %v10541_v39 = vld [vmem:[#allocation36_spill] sm:$0xff] }
 0x198   : > { %v4793_v57 = vpop.eup %4792  ;;  %v1011_v60 = vadd.f32 1e-05, %v962_v55  ;;  %4409 = vmatprep.mubr.msk.f32.mxu0 %vm277_vm0, %v7292_v34  ;;  %1801 = vmatmul.mubr.f32.gmra.mrb[34].mxu1 %v7289_v56  ;;  %v10545_v55 = vld [vmem:[#allocation34_spill] sm:$0xff]  ;;  %v10546_v56 = vld [vmem:[#allocation33_spill] sm:$0xff] }
 0x199   : > { %v987_v63 = vadd.f32 1e-05, %v938_v61  ;;  %v4795_v29 = vpop.eup %4794  ;;  %1657 = vmatmul.mubr.f32.gmra.mrb[36].mxu0 %v7297_v31  ;;  %v911_v23 = vpop.xlane.xlu1 %910  ;;  %v7304_v14 = vmul.f32 %v4793_v57, %v10541_v39  ;;  %v7307_v36 = vmul.f32 %v4793_v57, %v10543_v21  ;;  %v10549_v21 = vld [vmem:[#allocation39_spill] sm:$0xff] }
 0x19a   : > { %v815_v5 = vpop.xlane.xlu0 %814  ;;  %4804 = vrsqrt.f32 %v1011_v60  ;;  %v963_v41 = vmul.f32 0.0052083335, %v911_v23  ;;  %v7310_v61 = vmul.f32 %v4795_v29, %v10545_v55  ;;  %v7315_v28 = vmul.f32 %v4795_v29, %v10546_v56 }
 0x19b   : > { %10542 = vst [vmem:[#allocation14_spill] sm:$0xff] %v7304_v14  ;;  %10544 = vst [vmem:[#allocation16_spill] sm:$0xff] %v7307_v36  ;;  %v939_v42 = vmul.f32 0.0052083335, %v815_v5  ;;  %4806 = vrsqrt.f32 %v987_v63  ;;  %4434 = vmatprep.mubr.msk.f32.mxu1 %vm277_vm0, %v7304_v14  ;;  %v10547_v63 = vld [vmem:[#allocation40_spill] sm:$0xff] }
 0x19c   : > { %v4797_v59 = vpop.eup %4796  ;;  %v1012_v8 = vadd.f32 1e-05, %v963_v41  ;;  %4410 = vmatprep.mubr.msk.f32.mxu0 %vm277_vm0, %v7310_v61  ;;  %1807 = vmatmul.mubr.f32.gmra.mrb[36].mxu1 %v7307_v36  ;;  %v10551_v41 = vld [vmem:[#allocation38_spill] sm:$0xff]  ;;  %v10552_v36 = vld [vmem:[#allocation37_spill] sm:$0xff] }
 0x19d   : > { %v988_v39 = vadd.f32 1e-05, %v939_v42  ;;  %v4799_v60 = vpop.eup %4798  ;;  %1663 = vmatmul.mubr.f32.gmra.mrb[38].mxu0 %v7315_v28  ;;  %v915_v57 = vpop.xlane.xlu1 %914  ;;  %v7322_v5 = vmul.f32 %v4797_v59, %v10547_v63  ;;  %v7325_v55 = vmul.f32 %v4797_v59, %v10549_v21  ;;  %v10553_v59 = vld [vmem:[#allocation42_spill] sm:$0xff]  ;;  %v10558_v21 = vld [vmem:[#allocation43_spill] sm:$0xff] }
 0x19e   : > { %v819_v23 = vpop.xlane.xlu0 %818  ;;  %4808 = vrsqrt.f32 %v1012_v8  ;;  %v964_v56 = vmul.f32 0.0052083335, %v915_v57  ;;  %v7328_v42 = vmul.f32 %v4799_v60, %v10551_v41  ;;  %v7333_v14 = vmul.f32 %v4799_v60, %v10552_v36  ;;  %v10557_v36 = vld [vmem:[#allocation44_spill] sm:$0xff] }
 0x19f   : > { %10548 = vst [vmem:[#allocation19_spill] sm:$0xff] %v7322_v5  ;;  %10550 = vst [vmem:[#allocation21_spill] sm:$0xff] %v7325_v55  ;;  %v940_v29 = vmul.f32 0.0052083335, %v819_v23  ;;  %4810 = vrsqrt.f32 %v988_v39  ;;  %4435 = vmatprep.mubr.msk.f32.mxu1 %vm277_vm0, %v7322_v5  ;;  %v10555_v39 = vld [vmem:[#allocation41_spill] sm:$0xff]  ;;  %v10572_v5 = vld [vmem:[#allocation54_spill] sm:$0xff] }
 0x1a0   : > { %v4801_v52 = vpop.eup %4800  ;;  %v1013_v15 = vadd.f32 1e-05, %v964_v56  ;;  %4411 = vmatprep.mubr.msk.f32.mxu0 %vm277_vm0, %v7328_v42  ;;  %1813 = vmatmul.mubr.f32.gmra.mrb[38].mxu1 %v7325_v55 }
 0x1a1   : > { %v989_v63 = vadd.f32 1e-05, %v940_v29  ;;  %v4803_v8 = vpop.eup %4802  ;;  %1669 = vmatmul.mubr.f32.gmra.mrb[40].mxu0 %v7333_v14  ;;  %v7340_v57 = vmul.f32 %v4801_v52, %v10553_v59  ;;  %v7343_v23 = vmul.f32 %v4801_v52, %v10555_v39  ;;  %v10560_v52 = vld [vmem:[#allocation45_spill] sm:$0xff]  ;;  %v10563_v39 = vld [vmem:[#allocation46_spill] sm:$0xff] }
 0x1a2   : > { %4812 = vrsqrt.f32 %v1013_v15  ;;  %v7346_v60 = vmul.f32 %v4803_v8, %v10557_v36  ;;  %v7349_v56 = vmul.f32 %v4803_v8, %v10558_v21  ;;  %v10562_v8 = vld [vmem:[#allocation47_spill] sm:$0xff] }
 0x1a3   : > { %10554 = vst [vmem:[#allocation18_spill] sm:$0xff] %v7340_v57  ;;  %10556 = vst [vmem:[#allocation20_spill] sm:$0xff] %v7343_v23  ;;  %4814 = vrsqrt.f32 %v989_v63  ;;  %4436 = vmatprep.mubr.msk.f32.mxu1 %vm277_vm0, %v7340_v57  ;;  %v10568_v57 = vld [vmem:[#allocation50_spill] sm:$0xff] }
 0x1a4   : > { %v4805_v29 = vpop.eup %4804  ;;  %4412 = vmatprep.mubr.msk.f32.mxu0 %vm277_vm0, %v7346_v60  ;;  %1819 = vmatmul.mubr.f32.gmra.mrb[40].mxu1 %v7343_v23 }
 0x1a5   : > { %v4807_v41 = vpop.eup %4806  ;;  %1675 = vmatmul.mubr.f32.gmra.mrb[42].mxu0 %v7349_v56  ;;  %v7358_v15 = vmul.f32 %v4805_v29, %v6461_v12  ;;  %v7361_v59 = vmul.f32 %v4805_v29, %v10560_v52  ;;  %v10564_v29 = vld [vmem:[#allocation49_spill] sm:$0xff] }
 0x1a6   : > { %v7364_v63 = vmul.f32 %v4807_v41, %v10562_v8  ;;  %v7367_v36 = vmul.f32 %v4807_v41, %v10563_v39  ;;  %v10566_v8 = vld [vmem:[#allocation48_spill] sm:$0xff]  ;;  %v10567_v41 = vld [vmem:[#allocation51_spill] sm:$0xff] }
 0x1a7   : > { %10559 = vst [vmem:[#allocation23_spill] sm:$0xff] %v7358_v15  ;;  %10561 = vst [vmem:[#allocation25_spill] sm:$0xff] %v7361_v59  ;;  %4437 = vmatprep.mubr.msk.f32.mxu1 %vm277_vm0, %v7358_v15 }
 0x1a8   : > { %v4809_v21 = vpop.eup %4808  ;;  %4413 = vmatprep.mubr.msk.f32.mxu0 %vm277_vm0, %v7364_v63  ;;  %1825 = vmatmul.mubr.f32.gmra.mrb[42].mxu1 %v7361_v59 }
 0x1a9   : > { %v4811_v12 = vpop.eup %4810  ;;  %1681 = vmatmul.mubr.f32.gmra.mrb[44].mxu0 %v7367_v36  ;;  %v7376_v52 = vmul.f32 %v4809_v21, %v10564_v29  ;;  %v7379_v23 = vmul.f32 %v4809_v21, %v10566_v8  ;;  %v10569_v21 = vld [vmem:[#allocation53_spill] sm:$0xff] }
 0x1aa   : > { %v7382_v39 = vmul.f32 %v4811_v12, %v10567_v41  ;;  %v7385_v15 = vmul.f32 %v4811_v12, %v10568_v57  ;;  %v10570_v41 = vld [vmem:[#allocation52_spill] sm:$0xff]  ;;  %v10571_v57 = vld [vmem:[#allocation55_spill] sm:$0xff] }
 0x1ab   : > { %10565 = vst [vmem:[#allocation22_spill] sm:$0xff] %v7376_v52  ;;  %4438 = vmatprep.mubr.msk.f32.mxu1 %vm277_vm0, %v7376_v52 }
 0x1ac   : > { %v4813_v55 = vpop.eup %4812  ;;  %4414 = vmatprep.mubr.msk.f32.mxu0 %vm277_vm0, %v7382_v39  ;;  %1831 = vmatmul.mubr.f32.gmra.mrb[44].mxu1 %v7379_v23 }
 0x1ad   : > { %v4815_v29 = vpop.eup %4814  ;;  %1687 = vmatmul.mubr.f32.gmra.mrb[46].mxu0 %v7385_v15  ;;  %v7394_v8 = vmul.f32 %v4813_v55, %v10569_v21  ;;  %v7397_v59 = vmul.f32 %v4813_v55, %v10570_v41  ;;  %v10573_v21 = vld [vmem:[#allocation56_spill] sm:$0xff] }
 0x1ae   : > { %v7400_v12 = vmul.f32 %v4815_v29, %v10571_v57  ;;  %v7403_v52 = vmul.f32 %v4815_v29, %v10572_v5  ;;  %v10581_v5 = vld [vmem:[#allocation63_spill] sm:$0xff] }
 0x1af   : > { %4439 = vmatprep.mubr.msk.f32.mxu1 %vm277_vm0, %v7394_v8 }
 0x1b0   : > { %4415 = vmatprep.mubr.msk.f32.mxu0 %vm277_vm0, %v7400_v12  ;;  %1837 = vmatmul.mubr.f32.gmra.mrb[46].mxu1 %v7397_v59 }
 0x1b1   : > { %1693 = vmatmul.mubr.f32.gmra.mrb[48].mxu0 %v7403_v52  ;;  %4440 = vmatprep.mubr.msk.f32.mxu1 %vm277_vm0, %v10573_v21 }
 0x1b2   : > { %4489 = vmatprep.mubr.msk.f32.mxu0 %vm277_vm0, %v10573_v21 }
 0x1b4   : > { %1908 = vmatmul.mubr.f32.vlgmr.msra.gmra.mrb[48].mxu1 %v6548_v26 }
 0x1b5   : > { %2267 = vmatmul.mubr.f32.vlgmr.msra.gmra.mrb[50].mxu0 %v6548_v26  ;;  %4441 = vmatprep.mubr.msk.f32.mxu1 %vm277_vm0, %v6607_v32  ;;  %v1307_v26 = vlaneseq }
 0x1b6   : > { %4490 = vmatprep.mubr.msk.f32.mxu0 %vm277_vm0, %v6607_v32  ;;  %v10574_v32 = vld [vmem:[#allocation57_spill] sm:$0xff] }
 0x1b8   : > { %1914 = vmatmul.mubr.f32.gmra.mrb[50].mxu1 %v6622_v47 }
 0x1b9   : > { %2273 = vmatmul.mubr.f32.gmra.mrb[52].mxu0 %v6622_v47  ;;  %4442 = vmatprep.mubr.msk.f32.mxu1 %vm277_vm0, %v6667_v40  ;;  %v7566_v47 = vshrl.u32 %v1307_v26, 7 }
 0x1ba   : > { %4491 = vmatprep.mubr.msk.f32.mxu0 %vm277_vm0, %v6667_v40 }
 0x1bb   : > { %v1309_v40 = vsub.s32 0, %v7566_v47 }
 0x1bc   : > { %1920 = vmatmul.mubr.f32.gmra.mrb[52].mxu1 %v6682_v18 }
 0x1bd   : > { %2279 = vmatmul.mubr.f32.gmra.mrb[54].mxu0 %v6682_v18  ;;  %4443 = vmatprep.mubr.msk.f32.mxu1 %vm277_vm0, %v6727_v16  ;;  %v1313_v18 = vsub.s32 1, %v7566_v47 }
 0x1be   : > { %4492 = vmatprep.mubr.msk.f32.mxu0 %vm277_vm0, %v6727_v16 }
 0x1c0   : > { %1926 = vmatmul.mubr.f32.gmra.mrb[54].mxu1 %v6742_v51 }
 0x1c1   : > { %2285 = vmatmul.mubr.f32.gmra.mrb[56].mxu0 %v6742_v51  ;;  %4444 = vmatprep.mubr.msk.f32.mxu1 %vm277_vm0, %v6787_v33 }
 0x1c2   : > { %4493 = vmatprep.mubr.msk.f32.mxu0 %vm277_vm0, %v6787_v33 }
 0x1c4   : > { %1932 = vmatmul.mubr.f32.gmra.mrb[56].mxu1 %v6802_v58 }
 0x1c5   : > { %2291 = vmatmul.mubr.f32.gmra.mrb[58].mxu0 %v6802_v58  ;;  %4445 = vmatprep.mubr.msk.f32.mxu1 %vm277_vm0, %v6847_v62  ;;  %v10575_v58 = vld [vmem:[#allocation58_spill] sm:$0xff] }
 0x1c6   : > { %4494 = vmatprep.mubr.msk.f32.mxu0 %vm277_vm0, %v6847_v62  ;;  %v10576_v62 = vld [vmem:[#allocation59_spill] sm:$0xff] }
 0x1c8   : > { %1938 = vmatmul.mubr.f32.gmra.mrb[58].mxu1 %v6862_v17 }
 0x1c9   : > { %2297 = vmatmul.mubr.f32.gmra.mrb[60].mxu0 %v6862_v17  ;;  %4446 = vmatprep.mubr.msk.f32.mxu1 %vm277_vm0, %v6907_v10 }
 0x1ca   : > { %4495 = vmatprep.mubr.msk.f32.mxu0 %vm277_vm0, %v6907_v10 }
 0x1cc   : > { %1944 = vmatmul.mubr.f32.gmra.mrb[60].mxu1 %v6922_v19 }
 0x1cd   : > { %2303 = vmatmul.mubr.f32.gmra.mrb[62].mxu0 %v6922_v19  ;;  %4447 = vmatprep.mubr.msk.f32.mxu1 %vm277_vm0, %v6967_v20 }
 0x1ce   : > { %4496 = vmatprep.mubr.msk.f32.mxu0 %vm277_vm0, %v6967_v20 }
 0x1d0   : > { %1950 = vmatmul.mubr.f32.gmra.mrb[62].mxu1 %v6982_v53 }
 0x1d1   : > { %2309 = vmatmul.mubr.f32.gmra.mrb[64].mxu0 %v6982_v53  ;;  %4448 = vmatprep.mubr.msk.f32.mxu1 %vm277_vm0, %v7027_v43  ;;  %v10577_v53 = vld [vmem:[#allocation60_spill] sm:$0xff] }
 0x1d2   : > { %4497 = vmatprep.mubr.msk.f32.mxu0 %vm277_vm0, %v7027_v43 }
 0x1d4   : > { %1956 = vmatmul.mubr.f32.gmra.mrb[64].mxu1 %v7042_v11 }
 0x1d5   : > { %2315 = vmatmul.mubr.f32.gmra.mrb[66].mxu0 %v7042_v11  ;;  %4449 = vmatprep.mubr.msk.f32.mxu1 %vm277_vm0, %v7087_v9 }
 0x1d6   : > { %4498 = vmatprep.mubr.msk.f32.mxu0 %vm277_vm0, %v7087_v9  ;;  %v10578_v9 = vld [vmem:[#allocation61_spill] sm:$0xff] }
 0x1d8   : > { %1962 = vmatmul.mubr.f32.gmra.mrb[66].mxu1 %v7098_v37 }
 0x1d9   : > { %2321 = vmatmul.mubr.f32.gmra.mrb[68].mxu0 %v7098_v37  ;;  %4450 = vmatprep.mubr.msk.f32.mxu1 %vm277_vm0, %v7135_v46 }
 0x1da   : > { %4499 = vmatprep.mubr.msk.f32.mxu0 %vm277_vm0, %v7135_v46 }
 0x1dc   : > { %1968 = vmatmul.mubr.f32.gmra.mrb[68].mxu1 %v7146_v3 }
 0x1dd   : > { %2327 = vmatmul.mubr.f32.gmra.mrb[70].mxu0 %v7146_v3  ;;  %4451 = vmatprep.mubr.msk.f32.mxu1 %vm277_vm0, %v7160_v45 }
 0x1de   : > { %4500 = vmatprep.mubr.msk.f32.mxu0 %vm277_vm0, %v7160_v45 }
 0x1e0   : > { %1974 = vmatmul.mubr.f32.gmra.mrb[70].mxu1 %v7171_v30 }
 0x1e1   : > { %2333 = vmatmul.mubr.f32.gmra.mrb[72].mxu0 %v7171_v30  ;;  %4452 = vmatprep.mubr.msk.f32.mxu1 %vm277_vm0, %v7184_v44 }
 0x1e2   : > { %4501 = vmatprep.mubr.msk.f32.mxu0 %vm277_vm0, %v7184_v44 }
 0x1e4   : > { %1980 = vmatmul.mubr.f32.gmra.mrb[72].mxu1 %v7189_v27 }
 0x1e5   : > { %2339 = vmatmul.mubr.f32.gmra.mrb[74].mxu0 %v7189_v27  ;;  %4453 = vmatprep.mubr.msk.f32.mxu1 %vm277_vm0, %v7202_v7 }
 0x1e6   : > { %4502 = vmatprep.mubr.msk.f32.mxu0 %vm277_vm0, %v7202_v7 }
 0x1e8   : > { %1986 = vmatmul.mubr.f32.gmra.mrb[74].mxu1 %v7207_v1 }
 0x1e9   : > { %2345 = vmatmul.mubr.f32.gmra.mrb[76].mxu0 %v7207_v1  ;;  %4454 = vmatprep.mubr.msk.f32.mxu1 %vm277_vm0, %v7220_v49  ;;  %v10579_v1 = vld [vmem:[#allocation62_spill] sm:$0xff] }
 0x1ea   : > { %4503 = vmatprep.mubr.msk.f32.mxu0 %vm277_vm0, %v7220_v49 }
 0x1ec   : > { %1992 = vmatmul.mubr.f32.gmra.mrb[76].mxu1 %v7225_v2 }
 0x1ed   : > { %2351 = vmatmul.mubr.f32.gmra.mrb[78].mxu0 %v7225_v2  ;;  %4455 = vmatprep.mubr.msk.f32.mxu1 %vm277_vm0, %v7238_v4 }
 0x1ee   : > { %4504 = vmatprep.mubr.msk.f32.mxu0 %vm277_vm0, %v7238_v4  ;;  %v10580_v4 = vld [vmem:[#allocation28_spill] sm:$0xff] }
 0x1f0   : > { %1998 = vmatmul.mubr.f32.gmra.mrb[78].mxu1 %v7243_v48 }
 0x1f1   : > { %2357 = vmatmul.mubr.f32.gmra.mrb[80].mxu0 %v7243_v48  ;;  %4456 = vmatprep.mubr.msk.f32.mxu1 %vm277_vm0, %v7256_v13 }
 0x1f2   : > { %4505 = vmatprep.mubr.msk.f32.mxu0 %vm277_vm0, %v7256_v13 }
 0x1f4   : > { %2004 = vmatmul.mubr.f32.gmra.mrb[80].mxu1 %v7261_v38 }
 0x1f5   : > { %2363 = vmatmul.mubr.f32.gmra.mrb[82].mxu0 %v7261_v38  ;;  %4457 = vmatprep.mubr.msk.f32.mxu1 %vm277_vm0, %v7274_v6 }
 0x1f6   : > { %4506 = vmatprep.mubr.msk.f32.mxu0 %vm277_vm0, %v7274_v6 }
 0x1f8   : > { %2010 = vmatmul.mubr.f32.gmra.mrb[82].mxu1 %v7279_v50 }
 0x1f9   : > { %2369 = vmatmul.mubr.f32.gmra.mrb[84].mxu0 %v7279_v50  ;;  %4458 = vmatprep.mubr.msk.f32.mxu1 %vm277_vm0, %v7292_v34 }
 0x1fa   : > { %4507 = vmatprep.mubr.msk.f32.mxu0 %vm277_vm0, %v7292_v34 }
 0x1fc   : > { %2016 = vmatmul.mubr.f32.gmra.mrb[84].mxu1 %v7297_v31 }
 0x1fd   : > { %2375 = vmatmul.mubr.f32.gmra.mrb[86].mxu0 %v7297_v31  ;;  %4459 = vmatprep.mubr.msk.f32.mxu1 %vm277_vm0, %v7310_v61 }
 0x1fe   : > { %4508 = vmatprep.mubr.msk.f32.mxu0 %vm277_vm0, %v7310_v61 }
 0x200   : > { %2022 = vmatmul.mubr.f32.gmra.mrb[86].mxu1 %v7315_v28 }
 0x201   : > { %2381 = vmatmul.mubr.f32.gmra.mrb[88].mxu0 %v7315_v28  ;;  %4460 = vmatprep.mubr.msk.f32.mxu1 %vm277_vm0, %v7328_v42 }
 0x202   : > { %4509 = vmatprep.mubr.msk.f32.mxu0 %vm277_vm0, %v7328_v42 }
 0x204   : > { %2028 = vmatmul.mubr.f32.gmra.mrb[88].mxu1 %v7333_v14 }
 0x205   : > { %2387 = vmatmul.mubr.f32.gmra.mrb[90].mxu0 %v7333_v14  ;;  %4461 = vmatprep.mubr.msk.f32.mxu1 %vm277_vm0, %v7346_v60 }
 0x206   : > { %4510 = vmatprep.mubr.msk.f32.mxu0 %vm277_vm0, %v7346_v60 }
 0x208   : > { %2034 = vmatmul.mubr.f32.gmra.mrb[90].mxu1 %v7349_v56 }
 0x209   : > { %2393 = vmatmul.mubr.f32.gmra.mrb[92].mxu0 %v7349_v56  ;;  %4462 = vmatprep.mubr.msk.f32.mxu1 %vm277_vm0, %v7364_v63 }
 0x20a   : > { %4511 = vmatprep.mubr.msk.f32.mxu0 %vm277_vm0, %v7364_v63  ;;  %v10582_v63 = vld [vmem:[#allocation64_spill] sm:$0xff] }
 0x20c   : > { %2040 = vmatmul.mubr.f32.gmra.mrb[92].mxu1 %v7367_v36 }
 0x20d   : > { %2399 = vmatmul.mubr.f32.gmra.mrb[94].mxu0 %v7367_v36  ;;  %4463 = vmatprep.mubr.msk.f32.mxu1 %vm277_vm0, %v7382_v39 }
 0x20e   : > { %4512 = vmatprep.mubr.msk.f32.mxu0 %vm277_vm0, %v7382_v39 }
 0x210   : > { %2046 = vmatmul.mubr.f32.gmra.mrb[94].mxu1 %v7385_v15 }
 0x211   : > { %2405 = vmatmul.mubr.f32.gmra.mrb[96].mxu0 %v7385_v15  ;;  %4464 = vmatprep.mubr.msk.f32.mxu1 %vm277_vm0, %v7400_v12 }
 0x212   : > { %4513 = vmatprep.mubr.msk.f32.mxu0 %vm277_vm0, %v7400_v12 }
 0x214   : > { %2052 = vmatmul.mubr.f32.gmra.mrb[96].mxu1 %v7403_v52 }
 0x215   : > { %2411 = vmatmul.mubr.f32.gmra.mrb[98].mxu0 %v7403_v52  ;;  %4465 = vmatprep.mubr.msk.f32.mxu1 %vm277_vm0, %v6584_v24 }
 0x216   : > { %4514 = vmatprep.mubr.msk.f32.mxu0 %vm277_vm0, %v6584_v24  ;;  %v1305_v24 = vld [vmem:[%s10211_s2] sm:$0x3f] }
 0x218   : > { %2058 = vmatmul.mubr.f32.gmra.mrb[98].mxu1 %v10574_v32 }
 0x219   : > { %2417 = vmatmul.mubr.f32.gmra.mrb[100].mxu0 %v10574_v32  ;;  %4466 = vmatprep.mubr.msk.f32.mxu1 %vm277_vm0, %v6644_v35 }
 0x21a   : > { %4515 = vmatprep.mubr.msk.f32.mxu0 %vm277_vm0, %v6644_v35  ;;  %v7585_v35 = vrot.slane %v1305_v24, %v1309_v40 }
 0x21c   : > { %2064 = vmatmul.mubr.f32.gmra.mrb[100].mxu1 %v6647_v54 }
 0x21d   : > { %2423 = vmatmul.mubr.f32.gmra.mrb[102].mxu0 %v6647_v54  ;;  %4467 = vmatprep.mubr.msk.f32.mxu1 %vm277_vm0, %v6704_v0  ;;  %v7590_v54 = vrot.slane %v1305_v24, %v1313_v18 }
 0x21e   : > { %4516 = vmatprep.mubr.msk.f32.mxu0 %vm277_vm0, %v6704_v0 }
 0x220   : > { %2070 = vmatmul.mubr.f32.gmra.mrb[102].mxu1 %v6707_v25 }
 0x221   : > { %2429 = vmatmul.mubr.f32.gmra.mrb[104].mxu0 %v6707_v25  ;;  %4468 = vmatprep.mubr.msk.f32.mxu1 %vm277_vm0, %v6764_v22 }
 0x222   : > { %4517 = vmatprep.mubr.msk.f32.mxu0 %vm277_vm0, %v6764_v22  ;;  %v1550_v16 = vpop.f32.mrb[0].mxu0 }
 0x223   : > { %v1551_v51 = vadd.f32 %v1550_v16, %v7585_v35  ;;  %v1552_v33 = vpop.f32.mrb[1].mxu0 }
 0x224   : > { %2076 = vmatmul.mubr.f32.gmra.mrb[104].mxu1 %v10575_v58  ;;  %v1553_v0 = vadd.f32 %v1552_v33, %v7590_v54  ;;  %v10583_v33 = vld [vmem:[#allocation65_spill] sm:$0xff] }
 0x225   : > { %2435 = vmatmul.mubr.f32.gmra.mrb[106].mxu0 %v10575_v58  ;;  %4469 = vmatprep.mubr.msk.f32.mxu1 %vm277_vm0, %v10576_v62  ;;  %v2855_v25 = vmul.f32 0.70710677, %v1551_v51  ;;  %v2561_v28 = vmul.f32 0.5, %v1551_v51 }
 0x226   : > { %4518 = vmatprep.mubr.msk.f32.mxu0 %vm277_vm0, %v10576_v62  ;;  %v2856_v17 = vmul.f32 0.70710677, %v1553_v0  ;;  %v1700_v10 = vpop.f32.mrb[0].mxu1  ;;  %v2562_v34 = vmul.f32 0.5, %v1553_v0 }
 0x227   : > { %4816 = verf.f32 %v2855_v25  ;;  %v1556_v22 = vpop.f32.mrb[2].mxu0  ;;  %v1701_v19 = vadd.f32 %v1700_v10, %v7585_v35  ;;  %v1702_v20 = vpop.f32.mrb[1].mxu1 }
 0x228   : > { %2082 = vmatmul.mubr.f32.gmra.mrb[106].mxu1 %v10577_v53  ;;  %4818 = verf.f32 %v2856_v17  ;;  %v1557_v45 = vadd.f32 %v1556_v22, %v7585_v35  ;;  %v1558_v43 = vpop.f32.mrb[3].mxu0  ;;  %v1703_v11 = vadd.f32 %v1702_v20, %v7590_v54  ;;  %v10584_v17 = vld [vmem:[#allocation66_spill] sm:$0xff] }
 0x229   : > { %2441 = vmatmul.mubr.f32.gmra.mrb[108].mxu0 %v10577_v53  ;;  %4470 = vmatprep.mubr.msk.f32.mxu1 %vm277_vm0, %v10578_v9  ;;  %v3005_v37 = vmul.f32 0.70710677, %v1701_v19  ;;  %v1559_v46 = vadd.f32 %v1558_v43, %v7590_v54  ;;  %v2711_v55 = vmul.f32 0.5, %v1701_v19 }
 0x22a   : > { %4519 = vmatprep.mubr.msk.f32.mxu0 %vm277_vm0, %v10578_v9  ;;  %v2861_v3 = vmul.f32 0.70710677, %v1557_v45  ;;  %v3006_v30 = vmul.f32 0.70710677, %v1703_v11  ;;  %v1706_v7 = vpop.f32.mrb[2].mxu1  ;;  %v2567_v52 = vmul.f32 0.5, %v1557_v45 }
 0x22b   : > { %4820 = verf.f32 %v3005_v37  ;;  %v2862_v44 = vmul.f32 0.70710677, %v1559_v46  ;;  %v1562_v27 = vpop.f32.mrb[4].mxu0  ;;  %v1707_v49 = vadd.f32 %v1706_v7, %v7585_v35  ;;  %v1708_v38 = vpop.f32.mrb[3].mxu1  ;;  %v7644_v21 = vmul.f32 0.5, %v1703_v11 }
 0x22c   : > { %2088 = vmatmul.mubr.f32.gmra.mrb[108].mxu1 %v10579_v1  ;;  %4822 = verf.f32 %v2861_v3  ;;  %v1563_v48 = vadd.f32 %v1562_v27, %v7585_v35  ;;  %v1564_v2 = vpop.f32.mrb[5].mxu0  ;;  %v7622_v13 = vadd.f32 %v1708_v38, %v7590_v54  ;;  %v2568_v24 = vmul.f32 0.5, %v1559_v46 }
 0x22d   : > { %2447 = vmatmul.mubr.f32.gmra.mrb[110].mxu0 %v10579_v1  ;;  %4471 = vmatprep.mubr.msk.f32.mxu1 %vm277_vm0, %v10580_v4  ;;  %4824 = verf.f32 %v2862_v44  ;;  %v7619_v50 = vadd.f32 %v1564_v2, %v7590_v54  ;;  %v3011_v14 = vmul.f32 0.70710677, %v1707_v49  ;;  %v2717_v43 = vmul.f32 0.5, %v1707_v49  ;;  %v10585_v1 = vld [vmem:[#allocation67_spill] sm:$0xff] }
 0x22e   : > { %4520 = vmatprep.mubr.msk.f32.mxu0 %vm277_vm0, %v10580_v4  ;;  %4826 = verf.f32 %v3006_v30  ;;  %v2867_v31 = vmul.f32 0.70710677, %v1563_v48  ;;  %v1712_v6 = vpop.f32.mrb[4].mxu1  ;;  %v3012_v42 = vmul.f32 0.70710677, %v7622_v13  ;;  %v7656_v0 = vmul.f32 0.5, %v1563_v48 }
 0x22f   : > { %v2868_v61 = vmul.f32 0.70710677, %v7619_v50  ;;  %v1568_v60 = vpop.f32.mrb[6].mxu0  ;;  %v7631_v56 = vadd.f32 %v1712_v6, %v7585_v35  ;;  %v1714_v15 = vpop.f32.mrb[5].mxu1  ;;  %v2574_v30 = vmul.f32 0.5, %v7619_v50  ;;  %v2718_v38 = vmul.f32 0.5, %v7622_v13 }
 0x230   : > { %2094 = vmatmul.mubr.f32.gmra.mrb[110].mxu1 %v10581_v5  ;;  %4828 = verf.f32 %v2867_v31  ;;  %v7637_v39 = vadd.f32 %v1568_v60, %v7585_v35  ;;  %v1570_v29 = vpop.f32.mrb[7].mxu0  ;;  %v7640_v41 = vadd.f32 %v1714_v15, %v7590_v54  ;;  %v10586_v50 = vld [vmem:[#allocation68_spill] sm:$0xff] }
 0x231   : > { %2453 = vmatmul.mubr.f32.gmra.mrb[112].mxu0 %v10581_v5  ;;  %4472 = vmatprep.mubr.msk.f32.mxu1 %vm277_vm0, %v10582_v63  ;;  %v4817_v36 = vpop.eup %4816  ;;  %4830 = verf.f32 %v3011_v14  ;;  %v3017_v26 = vmul.f32 0.70710677, %v7631_v56  ;;  %v7659_v62 = vadd.f32 %v1570_v29, %v7590_v54  ;;  %v10587_v29 = vld [vmem:[#allocation69_spill] sm:$0xff] }
 0x232   : > { %4521 = vmatprep.mubr.msk.f32.mxu0 %vm277_vm0, %v10582_v63  ;;  %v4819_v57 = vpop.eup %4818  ;;  %v3443_v12 = vadd.f32 1.0, %v4817_v36  ;;  %4832 = verf.f32 %v2868_v61  ;;  %v1718_v32 = vpop.f32.mrb[6].mxu1  ;;  %v2873_v18 = vmul.f32 0.70710677, %v7637_v39  ;;  %v3018_v19 = vmul.f32 0.70710677, %v7640_v41 }
 0x233   : > { %v3444_v40 = vadd.f32 1.0, %v4819_v57  ;;  %4834 = verf.f32 %v3012_v42  ;;  %v1574_v16 = vpop.f32.mrb[8].mxu0  ;;  %v1720_v51 = vpop.f32.mrb[7].mxu1  ;;  %v2874_v11 = vmul.f32 0.70710677, %v7659_v62  ;;  %v7673_v9 = vadd.f32 %v1718_v32, %v7585_v35 }
 0x234   : > { %2100 = vmatmul.mubr.f32.gmra.mrb[112].mxu1 %v10583_v33  ;;  %v3737_v58 = vmul.f32 %v3443_v12, %v2561_v28  ;;  %4836 = verf.f32 %v3017_v26  ;;  %v1576_v25 = vpop.f32.mrb[9].mxu0  ;;  %v7666_v20 = vadd.f32 %v1574_v16, %v7585_v35  ;;  %v7695_v61 = vadd.f32 %v1720_v51, %v7590_v54 }
 0x235   : > { %2459 = vmatmul.mubr.f32.gmra.mrb[114].mxu0 %v10583_v33  ;;  %4473 = vmatprep.mubr.msk.f32.mxu1 %vm277_vm0, %v10584_v17  ;;  %v4821_v10 = vpop.eup %4820  ;;  %v3738_v22 = vmul.f32 %v3444_v40, %v2562_v34  ;;  %4838 = verf.f32 %v2873_v18  ;;  %v3023_v28 = vmul.f32 0.70710677, %v7673_v9  ;;  %v7692_v14 = vadd.f32 %v1576_v25, %v7590_v54 }
 0x236   : > { %4522 = vmatprep.mubr.msk.f32.mxu0 %vm277_vm0, %v10584_v17  ;;  %v4823_v53 = vpop.eup %4822  ;;  %4031 = vst [vmem:[%s7652_s15] sm:$0xff] %v3737_v58  ;;  %v3593_v45 = vadd.f32 1.0, %v4821_v10  ;;  %4840 = verf.f32 %v3018_v19  ;;  %v2879_v44 = vmul.f32 0.70710677, %v7666_v20  ;;  %v2723_v63 = vmul.f32 0.5, %v7631_v56  ;;  %v10588_v56 = vld [vmem:[#allocation2_spill] sm:$0xff] }
 0x237   : > { %v1724_v37 = vpop.f32.mrb[8].mxu1  ;;  %v4825_v46 = vpop.eup %4824  ;;  %4032 = vst [vmem:[%s7652_s15 + $0x8] sm:$0xff] %v3738_v22  ;;  %v3449_v3 = vadd.f32 1.0, %v4823_v53  ;;  %4842 = verf.f32 %v2874_v11  ;;  %v2579_v26 = vmul.f32 0.5, %v7637_v39  ;;  %v2880_v32 = vmul.f32 0.70710677, %v7692_v14 }
 0x238   : > { %v1580_v27 = vpop.f32.mrb[10].mxu0  ;;  %v7678_v7 = vpop.f32.mrb[9].mxu1  ;;  %2106 = vmatmul.mubr.f32.gmra.mrb[114].mxu1 %v10585_v1  ;;  %v3887_v49 = vmul.f32 %v3593_v45, %v2711_v55  ;;  %v3450_v2 = vadd.f32 1.0, %v4825_v46  ;;  %4844 = verf.f32 %v2879_v44  ;;  %v7710_v40 = vadd.f32 %v1724_v37, %v7585_v35  ;;  %v10589_v11 = vld [vmem:[#allocation4_spill] sm:$0xff] }
 0x239   : > { %v4827_v48 = vpop.eup %4826  ;;  %v7682_v4 = vpop.f32.mrb[11].mxu0  ;;  %2465 = vmatmul.mubr.f32.gmra.mrb[116].mxu0 %v10585_v1  ;;  %4474 = vmatprep.mubr.msk.f32.mxu1 %vm277_vm0, %v10586_v50  ;;  %v3743_v31 = vmul.f32 %v3449_v3, %v2567_v52  ;;  %v7698_v5 = vadd.f32 %v1580_v27, %v7585_v35  ;;  %4846 = verf.f32 %v3023_v28  ;;  %v2724_v39 = vmul.f32 0.5, %v7640_v41 }
 0x23a   : > { %v3594_v6 = vadd.f32 1.0, %v4827_v48  ;;  %4523 = vmatprep.mubr.msk.f32.mxu0 %vm277_vm0, %v10586_v50  ;;  %v4829_v34 = vpop.eup %4828  ;;  %4181 = vst [vmem:[%s7652_s15 + $0x4b0] sm:$0xff] %v3887_v49  ;;  %v3744_v13 = vmul.f32 %v3450_v2, %v2568_v24  ;;  %v3024_v51 = vmul.f32 0.70710677, %v7695_v61  ;;  %4848 = verf.f32 %v2880_v32 }
 0x23b   : > { %v1730_v55 = vpop.f32.mrb[10].mxu1  ;;  %v4831_v42 = vpop.eup %4830  ;;  %4037 = vst [vmem:[%s7652_s15 + $0x30] sm:$0xff] %v3743_v31  ;;  %v3455_v15 = vadd.f32 1.0, %v4829_v34  ;;  %v2885_v17 = vmul.f32 0.70710677, %v7698_v5  ;;  %v2580_v41 = vmul.f32 0.5, %v7659_v62  ;;  %v7741_v27 = vadd.f32 %v7682_v4, %v7590_v54 }
 0x23c   : > { %v3888_v60 = vmul.f32 %v3594_v6, %v7644_v21  ;;  %v1586_v36 = vpop.f32.mrb[12].mxu0  ;;  %v7703_v52 = vpop.f32.mrb[11].mxu1  ;;  %2112 = vmatmul.mubr.f32.gmra.mrb[116].mxu1 %v10587_v29  ;;  %4038 = vst [vmem:[%s7652_s15 + $0x38] sm:$0xff] %v3744_v13  ;;  %v3599_v12 = vadd.f32 1.0, %v4831_v42  ;;  %4850 = verf.f32 %v3024_v51  ;;  %v3029_v46 = vmul.f32 0.70710677, %v7710_v40 }
 0x23d   : > { %v4833_v57 = vpop.eup %4832  ;;  %v7712_v21 = vpop.f32.mrb[13].mxu0  ;;  %2471 = vmatmul.mubr.f32.gmra.mrb[118].mxu0 %v10587_v29  ;;  %4475 = vmatprep.mubr.msk.f32.mxu1 %vm277_vm0, %v10588_v56  ;;  %v3749_v18 = vmul.f32 %v3455_v15, %v7656_v0  ;;  %4852 = verf.f32 %v2885_v17  ;;  %v7745_v1 = vadd.f32 %v7678_v7, %v7590_v54  ;;  %v7748_v48 = vadd.f32 %v1586_v36, %v7585_v35  ;;  %v10591_v42 = vld [vmem:[#allocation29_spill] sm:$0xff] }
 0x23e   : > { %v4835_v24 = vpop.eup %4834  ;;  %4182 = vst [vmem:[%s7652_s15 + $0x4b8] sm:$0xff] %v3888_v60  ;;  %v3456_v16 = vadd.f32 1.0, %v4833_v57  ;;  %4524 = vmatprep.mubr.msk.f32.mxu0 %vm277_vm0, %v10588_v56  ;;  %v3893_v58 = vmul.f32 %v3599_v12, %v2717_v43  ;;  %4854 = verf.f32 %v3029_v46  ;;  %v7754_v50 = vadd.f32 %v1730_v55, %v7585_v35 }
 0x23f   : > { %v4837_v33 = vpop.eup %4836  ;;  %v3600_v25 = vadd.f32 1.0, %v4835_v24  ;;  %v7724_v10 = vpop.f32.mrb[12].mxu1  ;;  %4043 = vst [vmem:[%s7652_s15 + $0x60] sm:$0xff] %v3749_v18  ;;  %v2585_v6 = vmul.f32 0.5, %v7666_v20  ;;  %v2729_v28 = vmul.f32 0.5, %v7673_v9  ;;  %v2586_v15 = vmul.f32 0.5, %v7692_v14 }
 0x240   : > { %v4839_v22 = vpop.eup %4838  ;;  %v3750_v0 = vmul.f32 %v3456_v16, %v2574_v30  ;;  %v3605_v19 = vadd.f32 1.0, %v4837_v33  ;;  %v1592_v53 = vpop.f32.mrb[14].mxu0  ;;  %2118 = vmatmul.mubr.f32.gmra.mrb[118].mxu1 %v10589_v11  ;;  %4187 = vst [vmem:[%s7652_s15 + $0x4e0] sm:$0xff] %v3893_v58  ;;  %v10590_v30 = vld [vmem:[#allocation30_spill] sm:$0xff]  ;;  %v2886_v34 = vmul.f32 0.70710677, %v7741_v27  ;;  %v7790_v18 = vadd.f32 %v7703_v52, %v7590_v54 }
 0x241   : > { %v7728_v45 = vpop.f32.mrb[13].mxu1  ;;  %v3894_v43 = vmul.f32 %v3600_v25, %v2718_v38  ;;  %v3461_v37 = vadd.f32 1.0, %v4839_v22  ;;  %v7733_v3 = vpop.f32.mrb[15].mxu0  ;;  %2477 = vmatmul.mubr.f32.gmra.mrb[120].mxu0 %v10589_v11  ;;  %4476 = vmatprep.mubr.msk.f32.mxu1 %vm277_vm0, %v10590_v30  ;;  %v10592_v9 = vld [vmem:[#allocation3_spill] sm:$0xff]  ;;  %v2730_v12 = vmul.f32 0.5, %v7695_v61  ;;  %v7786_v61 = vadd.f32 %v7712_v21, %v7590_v54  ;;  %v10593_v33 = vld [vmem:[#allocation5_spill] sm:$0xff] }
 0x242   : > { %v4841_v62 = vpop.eup %4840  ;;  %4044 = vst [vmem:[%s7652_s15 + $0x68] sm:$0xff] %v3750_v0  ;;  %v3899_v44 = vmul.f32 %v3605_v19, %v2723_v63  ;;  %4525 = vmatprep.mubr.msk.f32.mxu0 %vm277_vm0, %v10590_v30  ;;  %v3030_v63 = vmul.f32 0.70710677, %v7745_v1  ;;  %4856 = verf.f32 %v2886_v34  ;;  %v3035_v56 = vmul.f32 0.70710677, %v7754_v50  ;;  %v10594_v22 = vld [vmem:[#allocation7_spill] sm:$0xff] }
 0x243   : > { %v4843_v49 = vpop.eup %4842  ;;  %4188 = vst [vmem:[%s7652_s15 + $0x4e8] sm:$0xff] %v3894_v43  ;;  %v3755_v2 = vmul.f32 %v3461_v37, %v2579_v26  ;;  %v3606_v38 = vadd.f32 1.0, %v4841_v62  ;;  %v7756_v4 = vpop.f32.mrb[14].mxu1  ;;  %v2891_v26 = vmul.f32 0.70710677, %v7748_v48  ;;  %v7793_v16 = vadd.f32 %v1592_v53, %v7585_v35 }
 0x244   : > { %v4845_v31 = vpop.eup %4844  ;;  %4193 = vst [vmem:[%s7652_s15 + $0x510] sm:$0xff] %v3899_v44  ;;  %v3462_v7 = vadd.f32 1.0, %v4843_v49  ;;  %v7762_v13 = vpop.f32.mrb[16].mxu0  ;;  %2124 = vmatmul.mubr.f32.gmra.mrb[120].mxu1 %v10591_v42  ;;  %4858 = verf.f32 %v3030_v63  ;;  %v2591_v21 = vmul.f32 0.5, %v7698_v5  ;;  %v7804_v52 = vadd.f32 %v7724_v10, %v7585_v35  ;;  %v10595_v49 = vld [vmem:[#allocation9_spill] sm:$0xff] }
 0x245   : > { %4049 = vst [vmem:[%s7652_s15 + $0x90] sm:$0xff] %v3755_v2  ;;  %v3900_v60 = vmul.f32 %v3606_v38, %v2724_v39  ;;  %v3467_v55 = vadd.f32 1.0, %v4845_v31  ;;  %v7768_v36 = vpop.f32.mrb[17].mxu0  ;;  %v7770_v20 = vpop.f32.mrb[15].mxu1  ;;  %2483 = vmatmul.mubr.f32.gmra.mrb[122].mxu0 %v10591_v42  ;;  %4477 = vmatprep.mubr.msk.f32.mxu1 %vm277_vm0, %v10592_v9  ;;  %4860 = verf.f32 %v2891_v26  ;;  %v2892_v53 = vmul.f32 0.70710677, %v7786_v61 }
 0x246   : > { %v4847_v29 = vpop.eup %4846  ;;  %v3756_v57 = vmul.f32 %v3462_v7, %v2580_v41  ;;  %4526 = vmatprep.mubr.msk.f32.mxu0 %vm277_vm0, %v10592_v9  ;;  %4862 = verf.f32 %v3035_v56  ;;  %v2735_v41 = vmul.f32 0.5, %v7710_v40  ;;  %v7815_v5 = vadd.f32 %v7733_v3, %v7590_v54 }
 0x247   : > { %4194 = vst [vmem:[%s7652_s15 + $0x518] sm:$0xff] %v3900_v60  ;;  %v3761_v14 = vmul.f32 %v3467_v55, %v2585_v6  ;;  %v3611_v32 = vadd.f32 1.0, %v4847_v29  ;;  %v7781_v24 = vpop.f32.mrb[16].mxu1  ;;  %v4849_v58 = vpop.eup %4848  ;;  %v2592_v43 = vmul.f32 0.5, %v7741_v27  ;;  %v3036_v37 = vmul.f32 0.70710677, %v7790_v18 }
 0x248   : > { %4050 = vst [vmem:[%s7652_s15 + $0x98] sm:$0xff] %v3756_v57  ;;  %v7795_v39 = vpop.f32.mrb[18].mxu0  ;;  %v7797_v51 = vpop.f32.mrb[17].mxu1  ;;  %2130 = vmatmul.mubr.f32.gmra.mrb[122].mxu1 %v10593_v33  ;;  %v3468_v19 = vadd.f32 1.0, %v4849_v58  ;;  %v2897_v46 = vmul.f32 0.70710677, %v7793_v16  ;;  %4864 = verf.f32 %v2892_v53  ;;  %v7849_v60 = vadd.f32 %v7762_v13, %v7585_v35 }
 0x249   : > { %4055 = vst [vmem:[%s7652_s15 + $0xc0] sm:$0xff] %v3761_v14  ;;  %v3905_v25 = vmul.f32 %v3611_v32, %v2729_v28  ;;  %v7806_v17 = vpop.f32.mrb[19].mxu0  ;;  %2489 = vmatmul.mubr.f32.gmra.mrb[124].mxu0 %v10593_v33  ;;  %4478 = vmatprep.mubr.msk.f32.mxu1 %vm277_vm0, %v10594_v22  ;;  %v4851_v0 = vpop.eup %4850  ;;  %v2736_v62 = vmul.f32 0.5, %v7745_v1  ;;  %v2597_v27 = vmul.f32 0.5, %v7748_v48  ;;  %4866 = verf.f32 %v3036_v37  ;;  %v10596_v1 = vld [vmem:[#allocation6_spill] sm:$0xff] }
 0x24a   : > { %4527 = vmatprep.mubr.msk.f32.mxu0 %vm277_vm0, %v10594_v22  ;;  %v4853_v10 = vpop.eup %4852  ;;  %v3612_v11 = vadd.f32 1.0, %v4851_v0  ;;  %v3762_v30 = vmul.f32 %v3468_v19, %v2586_v15  ;;  %v3041_v31 = vmul.f32 0.70710677, %v7804_v52  ;;  %4868 = verf.f32 %v2897_v46  ;;  %v10599_v46 = vld [vmem:[#allocation13_spill] sm:$0xff] }
 0x24b   : > { %4199 = vst [vmem:[%s7652_s15 + $0x540] sm:$0xff] %v3905_v25  ;;  %v3473_v40 = vadd.f32 1.0, %v4853_v10  ;;  %v7826_v44 = vpop.f32.mrb[18].mxu1  ;;  %v4855_v2 = vpop.eup %4854  ;;  %v2898_v42 = vmul.f32 0.70710677, %v7815_v5  ;;  %v7845_v48 = vadd.f32 %v7728_v45, %v7590_v54  ;;  %v7853_v55 = vadd.f32 %v7756_v4, %v7585_v35 }
 0x24c   : > { %v7824_v3 = vpop.f32.mrb[20].mxu0  ;;  %2136 = vmatmul.mubr.f32.gmra.mrb[124].mxu1 %v10595_v49  ;;  %v3906_v38 = vmul.f32 %v3612_v11, %v2730_v12  ;;  %v7833_v6 = vpop.f32.mrb[19].mxu1  ;;  %4056 = vst [vmem:[%s7652_s15 + $0xc8] sm:$0xff] %v3762_v30  ;;  %v3617_v34 = vadd.f32 1.0, %v4855_v2  ;;  %4870 = verf.f32 %v3041_v31  ;;  %v2741_v29 = vmul.f32 0.5, %v7754_v50  ;;  %v10597_v12 = vld [vmem:[#allocation8_spill] sm:$0xff] }
 0x24d   : > { %v7831_v7 = vpop.f32.mrb[21].mxu0  ;;  %2495 = vmatmul.mubr.f32.gmra.mrb[126].mxu0 %v10595_v49  ;;  %4479 = vmatprep.mubr.msk.f32.mxu1 %vm277_vm0, %v10596_v1  ;;  %v3767_v28 = vmul.f32 %v3473_v40, %v2591_v21  ;;  %v4857_v63 = vpop.eup %4856  ;;  %4872 = verf.f32 %v2898_v42  ;;  %v7861_v45 = vadd.f32 %v7768_v36, %v7590_v54  ;;  %v2598_v14 = vmul.f32 0.5, %v7786_v61  ;;  %v10598_v36 = vld [vmem:[#allocation11_spill] sm:$0xff] }
 0x24e   : > { %4528 = vmatprep.mubr.msk.f32.mxu0 %vm277_vm0, %v10596_v1  ;;  %4200 = vst [vmem:[%s7652_s15 + $0x548] sm:$0xff] %v3906_v38  ;;  %v3911_v9 = vmul.f32 %v3617_v34, %v2735_v41  ;;  %v4859_v4 = vpop.eup %4858  ;;  %v3474_v26 = vadd.f32 1.0, %v4857_v63  ;;  %v3042_v32 = vmul.f32 0.70710677, %v7845_v48  ;;  %v7872_v50 = vadd.f32 %v7770_v20, %v7590_v54 }
 0x24f   : > { %v7855_v15 = vpop.f32.mrb[20].mxu1  ;;  %4061 = vst [vmem:[%s7652_s15 + $0xf0] sm:$0xff] %v3767_v28  ;;  %v4861_v33 = vpop.eup %4860  ;;  %v3618_v58 = vadd.f32 1.0, %v4859_v4  ;;  %v2742_v25 = vmul.f32 0.5, %v7790_v18  ;;  %v2903_v61 = vmul.f32 0.70710677, %v7849_v60  ;;  %v7905_v38 = vadd.f32 %v7795_v39, %v7585_v35 }
 0x250   : > { %v7863_v57 = vpop.f32.mrb[22].mxu0  ;;  %v7865_v13 = vpop.f32.mrb[21].mxu1  ;;  %2142 = vmatmul.mubr.f32.gmra.mrb[126].mxu1 %v10597_v12  ;;  %4205 = vst [vmem:[%s7652_s15 + $0x570] sm:$0xff] %v3911_v9  ;;  %v3047_v21 = vmul.f32 0.70710677, %v7853_v55  ;;  %v3768_v22 = vmul.f32 %v3474_v26, %v2592_v43  ;;  %v3479_v0 = vadd.f32 1.0, %v4861_v33  ;;  %4874 = verf.f32 %v3042_v32 }
 0x251   : > { %v7874_v56 = vpop.f32.mrb[23].mxu0  ;;  %2501 = vmatmul.mubr.f32.gmra.mrb[128].mxu0 %v10597_v12  ;;  %4480 = vmatprep.mubr.msk.f32.mxu1 %vm277_vm0, %v10598_v36  ;;  %v4863_v20 = vpop.eup %4862  ;;  %v2603_v19 = vmul.f32 0.5, %v7793_v16  ;;  %v3912_v53 = vmul.f32 %v3618_v58, %v2736_v62  ;;  %4876 = verf.f32 %v2903_v61  ;;  %v2904_v18 = vmul.f32 0.70710677, %v7861_v45  ;;  %v10600_v62 = vld [vmem:[#allocation10_spill] sm:$0xff] }
 0x252   : > { %4529 = vmatprep.mubr.msk.f32.mxu0 %vm277_vm0, %v10598_v36  ;;  %v3623_v10 = vadd.f32 1.0, %v4863_v20  ;;  %4062 = vst [vmem:[%s7652_s15 + $0xf8] sm:$0xff] %v3768_v22  ;;  %v3773_v43 = vmul.f32 %v3479_v0, %v2597_v27  ;;  %v2747_v16 = vmul.f32 0.5, %v7804_v52  ;;  %4878 = verf.f32 %v3047_v21  ;;  %v4865_v49 = vpop.eup %4864 }
 0x253   : > { %v7886_v41 = vpop.f32.mrb[22].mxu1  ;;  %v3048_v30 = vmul.f32 0.70710677, %v7872_v50  ;;  %4206 = vst [vmem:[%s7652_s15 + $0x578] sm:$0xff] %v3912_v53  ;;  %4880 = verf.f32 %v2904_v18  ;;  %v7909_v52 = vadd.f32 %v7781_v24, %v7585_v35  ;;  %v4867_v27 = vpop.eup %4866  ;;  %v3480_v31 = vadd.f32 1.0, %v4865_v49 }
 0x254   : > { %v7889_v11 = vpop.f32.mrb[24].mxu0  ;;  %v7891_v37 = vpop.f32.mrb[23].mxu1  ;;  %2148 = vmatmul.mubr.f32.gmra.mrb[128].mxu1 %v10599_v46  ;;  %v3917_v2 = vmul.f32 %v3623_v10, %v2741_v29  ;;  %4067 = vst [vmem:[%s7652_s15 + $0x120] sm:$0xff] %v3773_v43  ;;  %v2604_v1 = vmul.f32 0.5, %v7815_v5  ;;  %v7917_v28 = vadd.f32 %v7806_v17, %v7590_v54  ;;  %v3624_v42 = vadd.f32 1.0, %v4867_v27  ;;  %v10601_v5 = vld [vmem:[#allocation12_spill] sm:$0xff] }
 0x255   : > { %v7897_v40 = vpop.f32.mrb[25].mxu0  ;;  %2507 = vmatmul.mubr.f32.gmra.mrb[130].mxu0 %v10599_v46  ;;  %4481 = vmatprep.mubr.msk.f32.mxu1 %vm277_vm0, %v10600_v62  ;;  %4882 = verf.f32 %v3048_v30  ;;  %v4869_v39 = vpop.eup %4868  ;;  %v2748_v24 = vmul.f32 0.5, %v7845_v48  ;;  %v2909_v63 = vmul.f32 0.70710677, %v7905_v38  ;;  %v7926_v9 = vadd.f32 %v7797_v51, %v7590_v54  ;;  %v10602_v51 = vld [vmem:[#allocation15_spill] sm:$0xff] }
 0x256   : > { %4530 = vmatprep.mubr.msk.f32.mxu0 %vm277_vm0, %v10600_v62  ;;  %4211 = vst [vmem:[%s7652_s15 + $0x5a0] sm:$0xff] %v3917_v2  ;;  %v4871_v17 = vpop.eup %4870  ;;  %v3774_v12 = vmul.f32 %v3480_v31, %v2598_v14  ;;  %v3485_v4 = vadd.f32 1.0, %v4869_v39  ;;  %v2609_v26 = vmul.f32 0.5, %v7849_v60  ;;  %v3053_v32 = vmul.f32 0.70710677, %v7909_v52 }
 0x257   : > { %v7919_v34 = vpop.f32.mrb[24].mxu1  ;;  %v4873_v33 = vpop.eup %4872  ;;  %v3918_v58 = vmul.f32 %v3624_v42, %v2742_v25  ;;  %v3629_v61 = vadd.f32 1.0, %v4871_v17  ;;  %4884 = verf.f32 %v2909_v63  ;;  %v2910_v14 = vmul.f32 0.70710677, %v7917_v28 }
 0x258   : > { %v7928_v29 = vpop.f32.mrb[26].mxu0  ;;  %2154 = vmatmul.mubr.f32.gmra.mrb[130].mxu1 %v10601_v5  ;;  %v7935_v48 = vpop.f32.mrb[25].mxu1  ;;  %4068 = vst [vmem:[%s7652_s15 + $0x128] sm:$0xff] %v3774_v12  ;;  %v3779_v60 = vmul.f32 %v3485_v4, %v2603_v19  ;;  %v3486_v21 = vadd.f32 1.0, %v4873_v33  ;;  %v2753_v20 = vmul.f32 0.5, %v7853_v55  ;;  %4886 = verf.f32 %v3053_v32  ;;  %v10603_v19 = vld [vmem:[#allocation17_spill] sm:$0xff] }
 0x259   : > { %v7933_v36 = vpop.f32.mrb[27].mxu0  ;;  %2513 = vmatmul.mubr.f32.gmra.mrb[132].mxu0 %v10601_v5  ;;  %4482 = vmatprep.mubr.msk.f32.mxu1 %vm277_vm0, %v10602_v51  ;;  %4212 = vst [vmem:[%s7652_s15 + $0x5a8] sm:$0xff] %v3918_v58  ;;  %v3923_v0 = vmul.f32 %v3629_v61, %v2747_v16  ;;  %4888 = verf.f32 %v2910_v14  ;;  %v3054_v25 = vmul.f32 0.70710677, %v7926_v9  ;;  %v7951_v53 = vadd.f32 %v7824_v3, %v7585_v35  ;;  %v10605_v32 = vld [vmem:[#allocation16_spill] sm:$0xff] }
 0x25a   : > { %4531 = vmatprep.mubr.msk.f32.mxu0 %vm277_vm0, %v10602_v51  ;;  %v4875_v55 = vpop.eup %4874  ;;  %4073 = vst [vmem:[%s7652_s15 + $0x150] sm:$0xff] %v3779_v60  ;;  %v3780_v46 = vmul.f32 %v3486_v21, %v2604_v1  ;;  %v2610_v43 = vmul.f32 0.5, %v7861_v45  ;;  %v7962_v16 = vadd.f32 %v7826_v44, %v7585_v35  ;;  %v7966_v3 = vadd.f32 %v7831_v7, %v7590_v54  ;;  %v10604_v44 = vld [vmem:[#allocation14_spill] sm:$0xff] }
 0x25b   : > { %v7945_v22 = vpop.f32.mrb[26].mxu1  ;;  %v4877_v62 = vpop.eup %4876  ;;  %4217 = vst [vmem:[%s7652_s15 + $0x5d0] sm:$0xff] %v3923_v0  ;;  %v3630_v49 = vadd.f32 1.0, %v4875_v55  ;;  %4890 = verf.f32 %v3054_v25  ;;  %v2915_v2 = vmul.f32 0.70710677, %v7951_v53  ;;  %v7975_v45 = vadd.f32 %v7833_v6, %v7590_v54 }
 0x25c   : > { %v7953_v10 = vpop.f32.mrb[28].mxu0  ;;  %v7955_v18 = vpop.f32.mrb[27].mxu1  ;;  %2160 = vmatmul.mubr.f32.gmra.mrb[132].mxu1 %v10603_v19  ;;  %4074 = vst [vmem:[%s7652_s15 + $0x158] sm:$0xff] %v3780_v46  ;;  %v3491_v27 = vadd.f32 1.0, %v4877_v62  ;;  %v2754_v31 = vmul.f32 0.5, %v7872_v50  ;;  %v2615_v1 = vmul.f32 0.5, %v7905_v38  ;;  %v8010_v21 = vadd.f32 %v7855_v15, %v7585_v35 }
 0x25d   : > { %v7968_v30 = vpop.f32.mrb[29].mxu0  ;;  %2519 = vmatmul.mubr.f32.gmra.mrb[134].mxu0 %v10603_v19  ;;  %4483 = vmatprep.mubr.msk.f32.mxu1 %vm277_vm0, %v10604_v44  ;;  %v4879_v7 = vpop.eup %4878  ;;  %v3059_v39 = vmul.f32 0.70710677, %v7962_v16  ;;  %v3924_v6 = vmul.f32 %v3630_v49, %v2748_v24  ;;  %4892 = verf.f32 %v2915_v2  ;;  %v2916_v17 = vmul.f32 0.70710677, %v7966_v3  ;;  %v10606_v24 = vld [vmem:[#allocation19_spill] sm:$0xff] }
 0x25e   : > { %4532 = vmatprep.mubr.msk.f32.mxu0 %vm277_vm0, %v10604_v44  ;;  %v4881_v63 = vpop.eup %4880  ;;  %v3635_v5 = vadd.f32 1.0, %v4879_v7  ;;  %v3785_v38 = vmul.f32 %v3491_v27, %v2609_v26  ;;  %v2759_v33 = vmul.f32 0.5, %v7909_v52  ;;  %v3060_v60 = vmul.f32 0.70710677, %v7975_v45 }
 0x25f   : > { %v7985_v42 = vpop.f32.mrb[28].mxu1  ;;  %v4883_v50 = vpop.eup %4882  ;;  %v3492_v51 = vadd.f32 1.0, %v4881_v63  ;;  %4894 = verf.f32 %v3059_v39  ;;  %4218 = vst [vmem:[%s7652_s15 + $0x5d8] sm:$0xff] %v3924_v6  ;;  %v8006_v26 = vadd.f32 %v7863_v57, %v7585_v35  ;;  %v2616_v55 = vmul.f32 0.5, %v7917_v28 }
 0x260   : > { %v7988_v12 = vpop.f32.mrb[30].mxu0  ;;  %v7990_v4 = vpop.f32.mrb[29].mxu1  ;;  %2166 = vmatmul.mubr.f32.gmra.mrb[134].mxu1 %v10605_v32  ;;  %v3929_v61 = vmul.f32 %v3635_v5, %v2753_v20  ;;  %v3636_v14 = vadd.f32 1.0, %v4883_v50  ;;  %4896 = verf.f32 %v2916_v17  ;;  %4079 = vst [vmem:[%s7652_s15 + $0x180] sm:$0xff] %v3785_v38  ;;  %v8014_v20 = vadd.f32 %v7874_v56, %v7590_v54 }
 0x261   : > { %v7994_v58 = vpop.f32.mrb[31].mxu0  ;;  %2525 = vmatmul.mubr.f32.gmra.mrb[136].mxu0 %v10605_v32  ;;  %4484 = vmatprep.mubr.msk.f32.mxu1 %vm277_vm0, %v10606_v24  ;;  %v3786_v52 = vmul.f32 %v3492_v51, %v2610_v43  ;;  %v4885_v25 = vpop.eup %4884  ;;  %4898 = verf.f32 %v3060_v60  ;;  %v8022_v57 = vadd.f32 %v7865_v13, %v7590_v54  ;;  %v10607_v43 = vld [vmem:[#allocation21_spill] sm:$0xff]  ;;  %v2760_v49 = vmul.f32 0.5, %v7926_v9  ;;  %v10608_v13 = vld [vmem:[#allocation18_spill] sm:$0xff] }
 0x262   : > { %4533 = vmatprep.mubr.msk.f32.mxu0 %vm277_vm0, %v10606_v24  ;;  %4223 = vst [vmem:[%s7652_s15 + $0x600] sm:$0xff] %v3929_v61  ;;  %v3930_v19 = vmul.f32 %v3636_v14, %v2754_v31  ;;  %v4887_v56 = vpop.eup %4886  ;;  %v3497_v62 = vadd.f32 1.0, %v4885_v25  ;;  %v2921_v2 = vmul.f32 0.70710677, %v8006_v26  ;;  %v8034_v28 = vadd.f32 %v7889_v11, %v7585_v35  ;;  %v10609_v24 = vld [vmem:[#allocation20_spill] sm:$0xff] }
 0x263   : > { %v8016_v0 = vpop.f32.mrb[30].mxu1  ;;  %4080 = vst [vmem:[%s7652_s15 + $0x188] sm:$0xff] %v3786_v52  ;;  %v4889_v7 = vpop.eup %4888  ;;  %v3641_v27 = vadd.f32 1.0, %v4887_v56  ;;  %v2621_v31 = vmul.f32 0.5, %v7951_v53  ;;  %v3065_v9 = vmul.f32 0.70710677, %v8010_v21  ;;  %v1767_v60 = vadd.f32 %v7886_v41, %v7585_v35 }
 0x264   : > { %v8024_v46 = vpop.f32.mrb[32].mxu0  ;;  %v8026_v15 = vpop.f32.mrb[31].mxu1  ;;  %2172 = vmatmul.mubr.f32.gmra.mrb[136].mxu1 %v10607_v43  ;;  %4224 = vst [vmem:[%s7652_s15 + $0x608] sm:$0xff] %v3930_v19  ;;  %v2922_v39 = vmul.f32 0.70710677, %v8014_v20  ;;  %v3791_v11 = vmul.f32 %v3497_v62, %v2615_v1  ;;  %v3498_v63 = vadd.f32 1.0, %v4889_v7  ;;  %4900 = verf.f32 %v2921_v2 }
 0x265   : > { %v8036_v44 = vpop.f32.mrb[33].mxu0  ;;  %2531 = vmatmul.mubr.f32.gmra.mrb[138].mxu0 %v10607_v43  ;;  %4485 = vmatprep.mubr.msk.f32.mxu1 %vm277_vm0, %v10608_v13  ;;  %v2765_v6 = vmul.f32 0.5, %v7962_v16  ;;  %v4891_v17 = vpop.eup %4890  ;;  %v3935_v32 = vmul.f32 %v3641_v27, %v2759_v33  ;;  %v2622_v53 = vmul.f32 0.5, %v7966_v3  ;;  %4902 = verf.f32 %v3065_v9  ;;  %v10610_v3 = vld [vmem:[#allocation23_spill] sm:$0xff]  ;;  %v10611_v27 = vld [vmem:[#allocation25_spill] sm:$0xff] }
 0x266   : > { %4534 = vmatprep.mubr.msk.f32.mxu0 %vm277_vm0, %v10608_v13  ;;  %v3066_v50 = vmul.f32 0.70710677, %v8022_v57  ;;  %4085 = vst [vmem:[%s7652_s15 + $0x1b0] sm:$0xff] %v3791_v11  ;;  %v3792_v16 = vmul.f32 %v3498_v63, %v2616_v55  ;;  %v3642_v1 = vadd.f32 1.0, %v4891_v17  ;;  %4904 = verf.f32 %v2922_v39 }
 0x267   : > { %v8048_v5 = vpop.f32.mrb[32].mxu1  ;;  %v2927_v61 = vmul.f32 0.70710677, %v8034_v28  ;;  %v4893_v14 = vpop.eup %4892  ;;  %4229 = vst [vmem:[%s7652_s15 + $0x630] sm:$0xff] %v3935_v32  ;;  %v8069_v52 = vadd.f32 %v7897_v40, %v7590_v54  ;;  %v8073_v25 = vadd.f32 %v7891_v37, %v7590_v54  ;;  %v8080_v41 = vadd.f32 %v7928_v29, %v7585_v35 }
 0x268   : > { %v8052_v38 = vpop.f32.mrb[34].mxu0  ;;  %v8054_v51 = vpop.f32.mrb[33].mxu1  ;;  %2178 = vmatmul.mubr.f32.gmra.mrb[138].mxu1 %v10609_v24  ;;  %4906 = verf.f32 %v3066_v50  ;;  %4086 = vst [vmem:[%s7652_s15 + $0x1b8] sm:$0xff] %v3792_v16  ;;  %v3936_v55 = vmul.f32 %v3642_v1, %v2760_v49  ;;  %v3503_v43 = vadd.f32 1.0, %v4893_v14  ;;  %v2766_v37 = vmul.f32 0.5, %v7975_v45  ;;  %v10612_v45 = vld [vmem:[#allocation22_spill] sm:$0xff] }
 0x269   : > { %v8059_v33 = vpop.f32.mrb[35].mxu0  ;;  %2537 = vmatmul.mubr.f32.gmra.mrb[140].mxu0 %v10609_v24  ;;  %4486 = vmatprep.mubr.msk.f32.mxu1 %vm277_vm0, %v10610_v3  ;;  %v4895_v19 = vpop.eup %4894  ;;  %4908 = verf.f32 %v2927_v61  ;;  %v2627_v2 = vmul.f32 0.5, %v8006_v26  ;;  %v3071_v13 = vmul.f32 0.70710677, %v1767_v60  ;;  %v2771_v29 = vmul.f32 0.5, %v8010_v21 }
 0x26a   : > { %4535 = vmatprep.mubr.msk.f32.mxu0 %vm277_vm0, %v10610_v3  ;;  %v4897_v40 = vpop.eup %4896  ;;  %v3647_v62 = vadd.f32 1.0, %v4895_v19  ;;  %4230 = vst [vmem:[%s7652_s15 + $0x638] sm:$0xff] %v3936_v55  ;;  %v3797_v49 = vmul.f32 %v3503_v43, %v2621_v31  ;;  %v2928_v39 = vmul.f32 0.70710677, %v8069_v52  ;;  %v2628_v32 = vmul.f32 0.5, %v8014_v20 }
 0x26b   : > { %v8082_v56 = vpop.f32.mrb[34].mxu1  ;;  %v3504_v9 = vadd.f32 1.0, %v4897_v40  ;;  %v4899_v26 = vpop.eup %4898  ;;  %4910 = verf.f32 %v3071_v13  ;;  %v3072_v31 = vmul.f32 0.70710677, %v8073_v25  ;;  %v2933_v24 = vmul.f32 0.70710677, %v8080_v41 }
 0x26c   : > { %v8086_v7 = vpop.f32.mrb[36].mxu0  ;;  %2184 = vmatmul.mubr.f32.gmra.mrb[140].mxu1 %v10611_v27  ;;  %v8094_v63 = vpop.f32.mrb[35].mxu1  ;;  %v3941_v17 = vmul.f32 %v3647_v62, %v2765_v6  ;;  %4091 = vst [vmem:[%s7652_s15 + $0x1e0] sm:$0xff] %v3797_v49  ;;  %v3648_v50 = vadd.f32 1.0, %v4899_v26  ;;  %4912 = verf.f32 %v2928_v39  ;;  %v8110_v20 = vadd.f32 %v7919_v34, %v7585_v35 }
 0x26d   : > { %v8092_v11 = vpop.f32.mrb[37].mxu0  ;;  %2543 = vmatmul.mubr.f32.gmra.mrb[142].mxu0 %v10611_v27  ;;  %4487 = vmatprep.mubr.msk.f32.mxu1 %vm277_vm0, %v10612_v45  ;;  %v3798_v21 = vmul.f32 %v3504_v9, %v2622_v53  ;;  %4914 = verf.f32 %v3072_v31  ;;  %v8114_v6 = vadd.f32 %v7933_v36, %v7590_v54  ;;  %v8118_v1 = vadd.f32 %v7935_v48, %v7590_v54 }
 0x26e   : > { %4536 = vmatprep.mubr.msk.f32.mxu0 %vm277_vm0, %v10612_v45  ;;  %4235 = vst [vmem:[%s7652_s15 + $0x660] sm:$0xff] %v3941_v17  ;;  %v4901_v3 = vpop.eup %4900  ;;  %v3942_v14 = vmul.f32 %v3648_v50, %v2766_v37  ;;  %v2772_v34 = vmul.f32 0.5, %v8022_v57  ;;  %4916 = verf.f32 %v2933_v24  ;;  %v8129_v36 = vadd.f32 %v7953_v10, %v7585_v35 }
 0x26f   : > { %v8105_v16 = vpop.f32.mrb[36].mxu1  ;;  %4092 = vst [vmem:[%s7652_s15 + $0x1e8] sm:$0xff] %v3798_v21  ;;  %v4903_v48 = vpop.eup %4902  ;;  %v3509_v55 = vadd.f32 1.0, %v4901_v3  ;;  %v2633_v43 = vmul.f32 0.5, %v8034_v28  ;;  %v2777_v40 = vmul.f32 0.5, %v1767_v60  ;;  %v8145_v13 = vadd.f32 %v7945_v22, %v7585_v35 }
 0x270   : > { %v8120_v53 = vpop.f32.mrb[38].mxu0  ;;  %v8122_v61 = vpop.f32.mrb[37].mxu1  ;;  %2190 = vmatmul.mubr.f32.gmra.mrb[142].mxu1 %v7379_v23  ;;  %v3077_v62 = vmul.f32 0.70710677, %v8110_v20  ;;  %4236 = vst [vmem:[%s7652_s15 + $0x668] sm:$0xff] %v3942_v14  ;;  %v3653_v10 = vadd.f32 1.0, %v4903_v48  ;;  %v1637_v24 = vadd.f32 %v7968_v30, %v7590_v54 }
 0x271   : > { %v8131_v19 = vpop.f32.mrb[39].mxu0  ;;  %2549 = vmatmul.mubr.f32.gmra.mrb[144].mxu0 %v7379_v23  ;;  %4488 = vmatprep.mubr.msk.f32.mxu1 %vm277_vm0, %v7394_v8  ;;  %v4905_v57 = vpop.eup %4904  ;;  %v2934_v37 = vmul.f32 0.70710677, %v8114_v6  ;;  %v3078_v23 = vmul.f32 0.70710677, %v8118_v1  ;;  %v3803_v28 = vmul.f32 %v3509_v55, %v2627_v2  ;;  %v2634_v49 = vmul.f32 0.5, %v8069_v52 }
 0x272   : > { %4537 = vmatprep.mubr.msk.f32.mxu0 %vm277_vm0, %v7394_v8  ;;  %v4907_v27 = vpop.eup %4906  ;;  %v3510_v60 = vadd.f32 1.0, %v4905_v57  ;;  %4918 = verf.f32 %v3077_v62  ;;  %v3947_v45 = vmul.f32 %v3653_v10, %v2771_v29  ;;  %v2939_v22 = vmul.f32 0.70710677, %v8129_v36 }
 0x273   : > { %v8150_v8 = vpop.f32.mrb[38].mxu1  ;;  %v4909_v39 = vpop.eup %4908  ;;  %v3654_v26 = vadd.f32 1.0, %v4907_v27  ;;  %4920 = verf.f32 %v2934_v37  ;;  %4097 = vst [vmem:[%s7652_s15 + $0x210] sm:$0xff] %v3803_v28  ;;  %v2778_v21 = vmul.f32 0.5, %v8073_v25  ;;  %v3083_v50 = vmul.f32 0.70710677, %v8145_v13 }
 0x274   : > { %v8148_v9 = vpop.f32.mrb[40].mxu0  ;;  %2196 = vmatmul.mubr.f32.gmra.mrb[144].mxu1 %v7397_v59  ;;  %v8156_v2 = vpop.f32.mrb[39].mxu1  ;;  %v3804_v52 = vmul.f32 %v3510_v60, %v2628_v32  ;;  %v3515_v31 = vadd.f32 1.0, %v4909_v39  ;;  %4922 = verf.f32 %v3078_v23  ;;  %4241 = vst [vmem:[%s7652_s15 + $0x690] sm:$0xff] %v3947_v45  ;;  %v2639_v32 = vmul.f32 0.5, %v8080_v41 }
 0x275   : > { %v8154_v17 = vpop.f32.mrb[41].mxu0  ;;  %2555 = vmatmul.mubr.f32.gmra.mrb[146].mxu0 %v7397_v59  ;;  %v3948_v29 = vmul.f32 %v3654_v26, %v2772_v34  ;;  %4924 = verf.f32 %v2939_v22  ;;  %v4911_v14 = vpop.eup %4910  ;;  %v8171_v25 = vadd.f32 %v7955_v18, %v7590_v54  ;;  %v8175_v34 = vadd.f32 %v7988_v12, %v7585_v35 }
 0x276   : > { %4098 = vst [vmem:[%s7652_s15 + $0x218] sm:$0xff] %v3804_v52  ;;  %v3809_v59 = vmul.f32 %v3515_v31, %v2633_v43  ;;  %v4913_v30 = vpop.eup %4912  ;;  %v3659_v62 = vadd.f32 1.0, %v4911_v14  ;;  %4926 = verf.f32 %v3083_v50  ;;  %v2940_v57 = vmul.f32 0.70710677, %v1637_v24 }
 0x277   : > { %v8165_v3 = vpop.f32.mrb[40].mxu1  ;;  %4242 = vst [vmem:[%s7652_s15 + $0x698] sm:$0xff] %v3948_v29  ;;  %v8184_v41 = vadd.f32 %v7985_v42, %v7585_v35  ;;  %v4915_v18 = vpop.eup %4914  ;;  %v3516_v10 = vadd.f32 1.0, %v4913_v30  ;;  %v2783_v12 = vmul.f32 0.5, %v8110_v20  ;;  %v2640_v37 = vmul.f32 0.5, %v8114_v6 }
 0x278   : > { %v8177_v48 = vpop.f32.mrb[42].mxu0  ;;  %v8179_v55 = vpop.f32.mrb[41].mxu1  ;;  %4103 = vst [vmem:[%s7652_s15 + $0x240] sm:$0xff] %v3809_v59  ;;  %v3084_v23 = vmul.f32 0.70710677, %v8171_v25  ;;  %v3953_v28 = vmul.f32 %v3659_v62, %v2777_v40  ;;  %v3660_v60 = vadd.f32 1.0, %v4915_v18  ;;  %4928 = verf.f32 %v2940_v57 }
 0x279   : > { %v8186_v43 = vpop.f32.mrb[43].mxu0  ;;  %v4917_v27 = vpop.eup %4916  ;;  %v2945_v42 = vmul.f32 0.70710677, %v8175_v34  ;;  %v3810_v45 = vmul.f32 %v3516_v10, %v2634_v49  ;;  %v2784_v22 = vmul.f32 0.5, %v8118_v1  ;;  %v3089_v40 = vmul.f32 0.70710677, %v8184_v41 }
 0x27a   : > { %v3521_v26 = vadd.f32 1.0, %v4917_v27  ;;  %4930 = verf.f32 %v3084_v23  ;;  %4247 = vst [vmem:[%s7652_s15 + $0x6c0] sm:$0xff] %v3953_v28  ;;  %v3954_v52 = vmul.f32 %v3660_v60, %v2778_v21  ;;  %v1643_v31 = vadd.f32 %v7994_v58, %v7590_v54 }
 0x27b   : > { %v8193_v39 = vpop.f32.mrb[42].mxu1  ;;  %4932 = verf.f32 %v2945_v42  ;;  %4104 = vst [vmem:[%s7652_s15 + $0x248] sm:$0xff] %v3810_v45  ;;  %v2645_v50 = vmul.f32 0.5, %v8129_v36  ;;  %v1787_v14 = vadd.f32 %v7990_v4, %v7590_v54  ;;  %v8212_v21 = vadd.f32 %v8024_v46, %v7585_v35 }
 0x27c   : > { %v8196_v20 = vpop.f32.mrb[44].mxu0  ;;  %v8198_v6 = vpop.f32.mrb[43].mxu1  ;;  %v3815_v1 = vmul.f32 %v3521_v26, %v2639_v32  ;;  %4248 = vst [vmem:[%s7652_s15 + $0x6c8] sm:$0xff] %v3954_v52  ;;  %4934 = verf.f32 %v3089_v40  ;;  %v2946_v58 = vmul.f32 0.70710677, %v1643_v31  ;;  %v8217_v62 = vadd.f32 %v8016_v0, %v7585_v35 }
 0x27d   : > { %v8204_v29 = vpop.f32.mrb[45].mxu0  ;;  %v4919_v49 = vpop.eup %4918  ;;  %v2789_v4 = vmul.f32 0.5, %v8145_v13  ;;  %v2646_v18 = vmul.f32 0.5, %v1637_v24  ;;  %v3090_v46 = vmul.f32 0.70710677, %v1787_v14  ;;  %v2790_v13 = vmul.f32 0.5, %v8171_v25 }
 0x27e   : > { %v4921_v59 = vpop.eup %4920  ;;  %v3665_v30 = vadd.f32 1.0, %v4919_v49  ;;  %4109 = vst [vmem:[%s7652_s15 + $0x270] sm:$0xff] %v3815_v1  ;;  %4936 = verf.f32 %v2946_v58  ;;  %v2951_v0 = vmul.f32 0.70710677, %v8212_v21  ;;  %v1649_v40 = vadd.f32 %v8036_v44, %v7590_v54 }
 0x27f   : > { %v8219_v57 = vpop.f32.mrb[44].mxu1  ;;  %v4923_v32 = vpop.eup %4922  ;;  %v3522_v36 = vadd.f32 1.0, %v4921_v59  ;;  %4938 = verf.f32 %v3090_v46  ;;  %v8240_v25 = vadd.f32 %v8026_v15, %v7590_v54  ;;  %v8244_v59 = vadd.f32 %v8052_v38, %v7585_v35 }
 0x280   : > { %v8223_v10 = vpop.f32.mrb[46].mxu0  ;;  %v4925_v23 = vpop.eup %4924  ;;  %v3959_v27 = vmul.f32 %v3665_v30, %v2783_v12  ;;  %v3666_v28 = vadd.f32 1.0, %v4923_v32  ;;  %4940 = verf.f32 %v2951_v0  ;;  %v3095_v12 = vmul.f32 0.70710677, %v8217_v62 }
 0x281   : > { %v8226_v60 = vpop.f32.mrb[47].mxu0  ;;  %v8228_v42 = vpop.f32.mrb[45].mxu1  ;;  %v3816_v45 = vmul.f32 %v3522_v36, %v2640_v37  ;;  %v3527_v26 = vadd.f32 1.0, %v4925_v23  ;;  %v2651_v44 = vmul.f32 0.5, %v8175_v34  ;;  %v8254_v32 = vadd.f32 %v8048_v5, %v7585_v35 }
 0x282   : > { %v4927_v24 = vpop.eup %4926  ;;  %4253 = vst [vmem:[%s7652_s15 + $0x6f0] sm:$0xff] %v3959_v27  ;;  %v3960_v52 = vmul.f32 %v3666_v28, %v2784_v22  ;;  %4942 = verf.f32 %v3095_v12  ;;  %v2795_v23 = vmul.f32 0.5, %v8184_v41  ;;  %v3096_v27 = vmul.f32 0.70710677, %v8240_v25 }
 0x283   : > { %v8235_v49 = vpop.f32.mrb[46].mxu1  ;;  %4110 = vst [vmem:[%s7652_s15 + $0x278] sm:$0xff] %v3816_v45  ;;  %v3821_v1 = vmul.f32 %v3527_v26, %v2645_v50  ;;  %v3671_v37 = vadd.f32 1.0, %v4927_v24  ;;  %v4929_v58 = vpop.eup %4928  ;;  %v2952_v50 = vmul.f32 0.70710677, %v1649_v40  ;;  %v2652_v34 = vmul.f32 0.5, %v1643_v31 }
 0x284   : > { %v8246_v22 = vpop.f32.mrb[48].mxu0  ;;  %v8248_v30 = vpop.f32.mrb[47].mxu1  ;;  %4254 = vst [vmem:[%s7652_s15 + $0x6f8] sm:$0xff] %v3960_v52  ;;  %v3528_v46 = vadd.f32 1.0, %v4929_v58  ;;  %v2957_v45 = vmul.f32 0.70710677, %v8244_v59 }
 0x285   : > { %v8256_v15 = vpop.f32.mrb[49].mxu0  ;;  %v4931_v36 = vpop.eup %4930  ;;  %4115 = vst [vmem:[%s7652_s15 + $0x2a0] sm:$0xff] %v3821_v1  ;;  %v3965_v38 = vmul.f32 %v3671_v37, %v2789_v4  ;;  %4944 = verf.f32 %v2952_v50  ;;  %v2796_v52 = vmul.f32 0.5, %v1787_v14  ;;  %v3101_v31 = vmul.f32 0.70710677, %v8254_v32 }
 0x286   : > { %v4933_v28 = vpop.eup %4932  ;;  %v3672_v0 = vadd.f32 1.0, %v4931_v36  ;;  %v3822_v5 = vmul.f32 %v3528_v46, %v2646_v18  ;;  %4946 = verf.f32 %v3096_v27  ;;  %v1655_v37 = vadd.f32 %v8059_v33, %v7590_v54 }
 0x287   : > { %v8262_v26 = vpop.f32.mrb[48].mxu1  ;;  %4259 = vst [vmem:[%s7652_s15 + $0x720] sm:$0xff] %v3965_v38  ;;  %v3533_v24 = vadd.f32 1.0, %v4933_v28  ;;  %v4935_v12 = vpop.eup %4934  ;;  %4948 = verf.f32 %v2957_v45  ;;  %v1799_v50 = vadd.f32 %v8054_v51, %v7590_v54  ;;  %v8279_v36 = vadd.f32 %v8086_v7, %v7585_v35 }
 0x288   : > { %v8265_v4 = vpop.f32.mrb[50].mxu0  ;;  %v8267_v41 = vpop.f32.mrb[49].mxu1  ;;  %v3966_v1 = vmul.f32 %v3672_v0, %v2790_v13  ;;  %4116 = vst [vmem:[%s7652_s15 + $0x2a8] sm:$0xff] %v3822_v5  ;;  %v3677_v14 = vadd.f32 1.0, %v4935_v12  ;;  %v2657_v38 = vmul.f32 0.5, %v8212_v21  ;;  %4950 = verf.f32 %v3101_v31 }
 0x289   : > { %v8272_v58 = vpop.f32.mrb[51].mxu0  ;;  %v3827_v18 = vmul.f32 %v3533_v24, %v2651_v44  ;;  %v4937_v13 = vpop.eup %4936  ;;  %v2958_v46 = vmul.f32 0.70710677, %v1655_v37  ;;  %v8285_v33 = vadd.f32 %v8082_v56, %v7585_v35  ;;  %v2801_v7 = vmul.f32 0.5, %v8217_v62 }
 0x28a   : > { %4260 = vst [vmem:[%s7652_s15 + $0x728] sm:$0xff] %v3966_v1  ;;  %v4939_v27 = vpop.eup %4938  ;;  %v3971_v51 = vmul.f32 %v3677_v14, %v2795_v23  ;;  %v3534_v28 = vadd.f32 1.0, %v4937_v13  ;;  %v3102_v0 = vmul.f32 0.70710677, %v1799_v50  ;;  %v2658_v12 = vmul.f32 0.5, %v1649_v40 }
 0x28b   : > { %v8287_v44 = vpop.f32.mrb[50].mxu1  ;;  %4121 = vst [vmem:[%s7652_s15 + $0x2d0] sm:$0xff] %v3827_v18  ;;  %v4941_v21 = vpop.eup %4940  ;;  %v3678_v24 = vadd.f32 1.0, %v4939_v27  ;;  %4952 = verf.f32 %v2958_v46  ;;  %v2963_v56 = vmul.f32 0.70710677, %v8279_v36  ;;  %v2802_v18 = vmul.f32 0.5, %v8240_v25 }
 0x28c   : > { %v8291_v45 = vpop.f32.mrb[52].mxu0  ;;  %v8293_v5 = vpop.f32.mrb[51].mxu1  ;;  %4265 = vst [vmem:[%s7652_s15 + $0x750] sm:$0xff] %v3971_v51  ;;  %v3828_v31 = vmul.f32 %v3534_v28, %v2652_v34  ;;  %v3539_v23 = vadd.f32 1.0, %v4941_v21  ;;  %4954 = verf.f32 %v3102_v0  ;;  %v3107_v13 = vmul.f32 0.70710677, %v8285_v33 }
 0x28d   : > { %v8296_v1 = vpop.f32.mrb[53].mxu0  ;;  %v4943_v62 = vpop.eup %4942  ;;  %v3972_v14 = vmul.f32 %v3678_v24, %v2796_v52  ;;  %4956 = verf.f32 %v2963_v56  ;;  %v1661_v40 = vadd.f32 %v8092_v11, %v7590_v54  ;;  %v8308_v34 = vadd.f32 %v8094_v63, %v7590_v54 }
 0x28e   : > { %4122 = vst [vmem:[%s7652_s15 + $0x2d8] sm:$0xff] %v3828_v31  ;;  %v3833_v27 = vmul.f32 %v3539_v23, %v2657_v38  ;;  %v3683_v51 = vadd.f32 1.0, %v4943_v62  ;;  %v8312_v25 = vadd.f32 %v8120_v53, %v7585_v35  ;;  %v2663_v11 = vmul.f32 0.5, %v8244_v59 }
 0x28f   : > { %v8303_v46 = vpop.f32.mrb[52].mxu1  ;;  %v4945_v0 = vpop.eup %4944  ;;  %4266 = vst [vmem:[%s7652_s15 + $0x758] sm:$0xff] %v3972_v14  ;;  %4958 = verf.f32 %v3107_v13  ;;  %v2964_v38 = vmul.f32 0.70710677, %v1661_v40  ;;  %v8322_v21 = vadd.f32 %v8105_v16, %v7585_v35  ;;  %v2807_v31 = vmul.f32 0.5, %v8254_v32 }
 0x290   : > { %v8314_v52 = vpop.f32.mrb[54].mxu0  ;;  %v8316_v28 = vpop.f32.mrb[53].mxu1  ;;  %4127 = vst [vmem:[%s7652_s15 + $0x300] sm:$0xff] %v3833_v27  ;;  %v3977_v53 = vmul.f32 %v3683_v51, %v2801_v7  ;;  %v3540_v56 = vadd.f32 1.0, %v4945_v0  ;;  %v3108_v23 = vmul.f32 0.70710677, %v8308_v34  ;;  %v1667_v0 = vadd.f32 %v8131_v19, %v7590_v54 }
 0x291   : > { %10613 = vst [vmem:[#allocation24_spill] sm:$0xff] %v8314_v52  ;;  %10614 = vst [vmem:[#allocation32_spill] sm:$0xff] %v8316_v28  ;;  %v8324_v63 = vpop.f32.mrb[55].mxu0  ;;  %v4947_v24 = vpop.eup %4946  ;;  %v2664_v59 = vmul.f32 0.5, %v1655_v37  ;;  %4960 = verf.f32 %v2964_v38  ;;  %v2969_v13 = vmul.f32 0.70710677, %v8312_v25  ;;  %v8353_v19 = vadd.f32 %v8150_v8, %v7585_v35 }
 0x292   : > { %10615 = vst [vmem:[#allocation31_spill] sm:$0xff] %v8324_v63  ;;  %v4949_v62 = vpop.eup %4948  ;;  %v3684_v14 = vadd.f32 1.0, %v4947_v24  ;;  %4271 = vst [vmem:[%s7652_s15 + $0x780] sm:$0xff] %v3977_v53  ;;  %v3834_v16 = vmul.f32 %v3540_v56, %v2658_v12  ;;  %v2808_v52 = vmul.f32 0.5, %v1799_v50  ;;  %4962 = verf.f32 %v3108_v23 }
 0x293   : > { %v8330_v28 = vpop.f32.mrb[54].mxu1  ;;  %v3545_v63 = vadd.f32 1.0, %v4949_v62  ;;  %v4951_v27 = vpop.eup %4950  ;;  %4964 = verf.f32 %v2969_v13  ;;  %v3113_v37 = vmul.f32 0.70710677, %v8322_v21  ;;  %v1811_v24 = vadd.f32 %v8122_v61, %v7590_v54 }
 0x294   : > { %v8333_v7 = vpop.f32.mrb[56].mxu0  ;;  %v8335_v32 = vpop.f32.mrb[55].mxu1  ;;  %v3978_v51 = vmul.f32 %v3684_v14, %v2802_v18  ;;  %4128 = vst [vmem:[%s7652_s15 + $0x308] sm:$0xff] %v3834_v16  ;;  %v3689_v50 = vadd.f32 1.0, %v4951_v27  ;;  %v8347_v53 = vadd.f32 %v8148_v9, %v7585_v35  ;;  %v2669_v56 = vmul.f32 0.5, %v8279_v36 }
 0x295   : > { %v8340_v38 = vpop.f32.mrb[57].mxu0  ;;  %v3839_v12 = vmul.f32 %v3545_v63, %v2663_v11  ;;  %v4953_v18 = vpop.eup %4952  ;;  %4966 = verf.f32 %v3113_v37  ;;  %v2970_v23 = vmul.f32 0.70710677, %v1667_v0  ;;  %v2813_v9 = vmul.f32 0.5, %v8285_v33 }
 0x296   : > { %4272 = vst [vmem:[%s7652_s15 + $0x788] sm:$0xff] %v3978_v51  ;;  %v4955_v63 = vpop.eup %4954  ;;  %v3983_v61 = vmul.f32 %v3689_v50, %v2807_v31  ;;  %v3546_v62 = vadd.f32 1.0, %v4953_v18  ;;  %v3114_v14 = vmul.f32 0.70710677, %v1811_v24  ;;  %v2670_v51 = vmul.f32 0.5, %v1661_v40 }
 0x297   : > { %v8355_v11 = vpop.f32.mrb[56].mxu1  ;;  %4133 = vst [vmem:[%s7652_s15 + $0x330] sm:$0xff] %v3839_v12  ;;  %v4957_v36 = vpop.eup %4956  ;;  %v3690_v27 = vadd.f32 1.0, %v4955_v63  ;;  %4968 = verf.f32 %v2970_v23  ;;  %v2975_v8 = vmul.f32 0.70710677, %v8347_v53  ;;  %v2814_v50 = vmul.f32 0.5, %v8308_v34 }
 0x298   : > { %v8359_v13 = vpop.f32.mrb[58].mxu0  ;;  %v8361_v16 = vpop.f32.mrb[57].mxu1  ;;  %4277 = vst [vmem:[%s7652_s15 + $0x7b0] sm:$0xff] %v3983_v61  ;;  %v3840_v12 = vmul.f32 %v3546_v62, %v2664_v59  ;;  %v3551_v31 = vadd.f32 1.0, %v4957_v36  ;;  %4970 = verf.f32 %v3114_v14  ;;  %v1673_v40 = vadd.f32 %v8154_v17, %v7590_v54 }
 0x299   : > { %10616 = vst [vmem:[#allocation27_spill] sm:$0xff] %v8361_v16  ;;  %v8364_v37 = vpop.f32.mrb[59].mxu0  ;;  %v4959_v33 = vpop.eup %4958  ;;  %v3984_v18 = vmul.f32 %v3690_v27, %v2808_v52  ;;  %4972 = verf.f32 %v2975_v8  ;;  %v3119_v16 = vmul.f32 0.70710677, %v8353_v19  ;;  %v8376_v59 = vadd.f32 %v8156_v2, %v7590_v54 }
 0x29a   : > { %4134 = vst [vmem:[%s7652_s15 + $0x338] sm:$0xff] %v3840_v12  ;;  %v3845_v63 = vmul.f32 %v3551_v31, %v2669_v56  ;;  %v3695_v61 = vadd.f32 1.0, %v4959_v33  ;;  %v8380_v34 = vadd.f32 %v8177_v48, %v7585_v35  ;;  %v2675_v17 = vmul.f32 0.5, %v8312_v25 }
 0x29b   : > { %v8371_v23 = vpop.f32.mrb[58].mxu1  ;;  %v4961_v14 = vpop.eup %4960  ;;  %4278 = vst [vmem:[%s7652_s15 + $0x7b8] sm:$0xff] %v3984_v18  ;;  %4974 = verf.f32 %v3119_v16  ;;  %v2976_v56 = vmul.f32 0.70710677, %v1673_v40  ;;  %v8390_v36 = vadd.f32 %v8165_v3, %v7585_v35  ;;  %v2819_v12 = vmul.f32 0.5, %v8322_v21 }
 0x29c   : > { %v8382_v52 = vpop.f32.mrb[60].mxu0  ;;  %v8384_v62 = vpop.f32.mrb[59].mxu1  ;;  %4139 = vst [vmem:[%s7652_s15 + $0x360] sm:$0xff] %v3845_v63  ;;  %v3989_v48 = vmul.f32 %v3695_v61, %v2813_v9  ;;  %v3552_v8 = vadd.f32 1.0, %v4961_v14  ;;  %v3120_v31 = vmul.f32 0.70710677, %v8376_v59  ;;  %v1679_v14 = vadd.f32 %v8186_v43, %v7590_v54 }
 0x29d   : > { %10617 = vst [vmem:[#allocation26_spill] sm:$0xff] %v8382_v52  ;;  %10618 = vst [vmem:[#allocation36_spill] sm:$0xff] %v8384_v62  ;;  %v8392_v2 = vpop.f32.mrb[61].mxu0  ;;  %v4963_v27 = vpop.eup %4962  ;;  %v2676_v25 = vmul.f32 0.5, %v1667_v0  ;;  %4976 = verf.f32 %v2976_v56  ;;  %v2981_v16 = vmul.f32 0.70710677, %v8380_v34  ;;  %v8421_v43 = vadd.f32 %v8193_v39, %v7585_v35 }
 0x29e   : > { %10619 = vst [vmem:[#allocation35_spill] sm:$0xff] %v8392_v2  ;;  %v4965_v33 = vpop.eup %4964  ;;  %v3696_v18 = vadd.f32 1.0, %v4963_v27  ;;  %4283 = vst [vmem:[%s7652_s15 + $0x7e0] sm:$0xff] %v3989_v48  ;;  %v3846_v3 = vmul.f32 %v3552_v8, %v2670_v51  ;;  %v2820_v52 = vmul.f32 0.5, %v1811_v24  ;;  %4978 = verf.f32 %v3120_v31 }
 0x29f   : > { %v8398_v62 = vpop.f32.mrb[60].mxu1  ;;  %v3557_v2 = vadd.f32 1.0, %v4965_v33  ;;  %v4967_v63 = vpop.eup %4966  ;;  %4980 = verf.f32 %v2981_v16  ;;  %v3125_v0 = vmul.f32 0.70710677, %v8390_v36  ;;  %v1823_v27 = vadd.f32 %v8179_v55, %v7590_v54 }
 0x2a0   : > { %v8401_v9 = vpop.f32.mrb[62].mxu0  ;;  %v8403_v21 = vpop.f32.mrb[61].mxu1  ;;  %v3990_v61 = vmul.f32 %v3696_v18, %v2814_v50  ;;  %4140 = vst [vmem:[%s7652_s15 + $0x368] sm:$0xff] %v3846_v3  ;;  %v3701_v24 = vadd.f32 1.0, %v4967_v63  ;;  %v8415_v48 = vadd.f32 %v8196_v20, %v7585_v35  ;;  %v2681_v8 = vmul.f32 0.5, %v8347_v53 }
 0x2a1   : > { %v8408_v56 = vpop.f32.mrb[63].mxu0  ;;  %v3851_v51 = vmul.f32 %v3557_v2, %v2675_v17  ;;  %v4969_v50 = vpop.eup %4968  ;;  %4982 = verf.f32 %v3125_v0  ;;  %v2982_v31 = vmul.f32 0.70710677, %v1679_v14  ;;  %v2825_v20 = vmul.f32 0.5, %v8353_v19 }
 0x2a2   : > { %4284 = vst [vmem:[%s7652_s15 + $0x7e8] sm:$0xff] %v3990_v61  ;;  %v4971_v2 = vpop.eup %4970  ;;  %v3995_v55 = vmul.f32 %v3701_v24, %v2819_v12  ;;  %v3558_v33 = vadd.f32 1.0, %v4969_v50  ;;  %v3126_v18 = vmul.f32 0.70710677, %v1823_v27  ;;  %v2682_v61 = vmul.f32 0.5, %v1673_v40 }
 0x2a3   : > { %v8423_v17 = vpop.f32.mrb[62].mxu1  ;;  %4145 = vst [vmem:[%s7652_s15 + $0x390] sm:$0xff] %v3851_v51  ;;  %v4973_v53 = vpop.eup %4972  ;;  %v3702_v63 = vadd.f32 1.0, %v4971_v2  ;;  %4984 = verf.f32 %v2982_v31  ;;  %v2987_v39 = vmul.f32 0.70710677, %v8415_v48  ;;  %v2826_v24 = vmul.f32 0.5, %v8376_v59 }
 0x2a4   : > { %v8427_v16 = vpop.f32.mrb[64].mxu0  ;;  %v8429_v3 = vpop.f32.mrb[63].mxu1  ;;  %4289 = vst [vmem:[%s7652_s15 + $0x810] sm:$0xff] %v3995_v55  ;;  %v3852_v51 = vmul.f32 %v3558_v33, %v2676_v25  ;;  %v3563_v12 = vadd.f32 1.0, %v4973_v53  ;;  %4986 = verf.f32 %v3126_v18  ;;  %v1685_v40 = vadd.f32 %v8204_v29, %v7590_v54 }
 0x2a5   : > { %10620 = vst [vmem:[#allocation34_spill] sm:$0xff] %v8429_v3  ;;  %v8432_v0 = vpop.f32.mrb[65].mxu0  ;;  %v4975_v19 = vpop.eup %4974  ;;  %v3996_v50 = vmul.f32 %v3702_v63, %v2820_v52  ;;  %4988 = verf.f32 %v2987_v39  ;;  %v3131_v3 = vmul.f32 0.70710677, %v8421_v43  ;;  %v8444_v25 = vadd.f32 %v8198_v6, %v7590_v54 }
 0x2a6   : > { %4146 = vst [vmem:[%s7652_s15 + $0x398] sm:$0xff] %v3852_v51  ;;  %v3857_v2 = vmul.f32 %v3563_v12, %v2681_v8  ;;  %v3707_v55 = vadd.f32 1.0, %v4975_v19  ;;  %v8448_v59 = vadd.f32 %v8223_v10, %v7585_v35  ;;  %v2687_v29 = vmul.f32 0.5, %v8380_v34 }
 0x2a7   : > { %v8439_v31 = vpop.f32.mrb[64].mxu1  ;;  %v4977_v18 = vpop.eup %4976  ;;  %4290 = vst [vmem:[%s7652_s15 + $0x818] sm:$0xff] %v3996_v50  ;;  %4990 = verf.f32 %v3131_v3  ;;  %v2988_v8 = vmul.f32 0.70710677, %v1685_v40  ;;  %v8458_v53 = vadd.f32 %v8219_v57, %v7585_v35  ;;  %v2831_v51 = vmul.f32 0.5, %v8390_v36 }
 0x2a8   : > { %v8450_v52 = vpop.f32.mrb[66].mxu0  ;;  %v8452_v33 = vpop.f32.mrb[65].mxu1  ;;  %4151 = vst [vmem:[%s7652_s15 + $0x3c0] sm:$0xff] %v3857_v2  ;;  %v4001_v10 = vmul.f32 %v3707_v55, %v2825_v20  ;;  %v3564_v39 = vadd.f32 1.0, %v4977_v18  ;;  %v3132_v12 = vmul.f32 0.70710677, %v8444_v25  ;;  %v8476_v18 = vadd.f32 %v8226_v60, %v7590_v54 }
 0x2a9   : > { %10621 = vst [vmem:[#allocation33_spill] sm:$0xff] %v8450_v52  ;;  %10622 = vst [vmem:[#allocation40_spill] sm:$0xff] %v8452_v33  ;;  %v8460_v6 = vpop.f32.mrb[67].mxu0  ;;  %v4979_v63 = vpop.eup %4978  ;;  %v2688_v34 = vmul.f32 0.5, %v1679_v14  ;;  %4992 = verf.f32 %v2988_v8  ;;  %v2993_v3 = vmul.f32 0.70710677, %v8448_v59 }
 0x2aa   : > { %10623 = vst [vmem:[#allocation39_spill] sm:$0xff] %v8460_v6  ;;  %v4981_v19 = vpop.eup %4980  ;;  %v3708_v50 = vadd.f32 1.0, %v4979_v63  ;;  %4295 = vst [vmem:[%s7652_s15 + $0x840] sm:$0xff] %v4001_v10  ;;  %v3858_v57 = vmul.f32 %v3564_v39, %v2682_v61  ;;  %v2832_v52 = vmul.f32 0.5, %v1823_v27  ;;  %4994 = verf.f32 %v3132_v12 }
 0x2ab   : > { %v8466_v33 = vpop.f32.mrb[66].mxu1  ;;  %v3569_v6 = vadd.f32 1.0, %v4981_v19  ;;  %v4983_v2 = vpop.eup %4982  ;;  %4996 = verf.f32 %v2993_v3  ;;  %v3137_v14 = vmul.f32 0.70710677, %v8458_v53  ;;  %v8483_v63 = vadd.f32 %v8228_v42, %v7590_v54 }
 0x2ac   : > { %v8469_v20 = vpop.f32.mrb[68].mxu0  ;;  %v8471_v36 = vpop.f32.mrb[67].mxu1  ;;  %v4002_v55 = vmul.f32 %v3708_v50, %v2826_v24  ;;  %4152 = vst [vmem:[%s7652_s15 + $0x3c8] sm:$0xff] %v3858_v57  ;;  %v3713_v61 = vadd.f32 1.0, %v4983_v2  ;;  %v8487_v24 = vadd.f32 %v8246_v22, %v7585_v35  ;;  %v2693_v39 = vmul.f32 0.5, %v8415_v48 }
 0x2ad   : > { %v8478_v8 = vpop.f32.mrb[69].mxu0  ;;  %v3863_v27 = vmul.f32 %v3569_v6, %v2687_v29  ;;  %v4985_v10 = vpop.eup %4984  ;;  %4998 = verf.f32 %v3137_v14  ;;  %v2994_v60 = vmul.f32 0.70710677, %v8476_v18  ;;  %v8494_v12 = vadd.f32 %v8235_v49, %v7585_v35 }
 0x2ae   : > { %4296 = vst [vmem:[%s7652_s15 + $0x848] sm:$0xff] %v4002_v55  ;;  %v4987_v42 = vpop.eup %4986  ;;  %v4007_v6 = vmul.f32 %v3713_v61, %v2831_v51  ;;  %v3570_v19 = vadd.f32 1.0, %v4985_v10  ;;  %v2837_v22 = vmul.f32 0.5, %v8421_v43  ;;  %v3138_v50 = vmul.f32 0.70710677, %v8483_v63 }
 0x2af   : > { %v8496_v29 = vpop.f32.mrb[68].mxu1  ;;  %4157 = vst [vmem:[%s7652_s15 + $0x3f0] sm:$0xff] %v3863_v27  ;;  %v4989_v57 = vpop.eup %4988  ;;  %v3714_v2 = vadd.f32 1.0, %v4987_v42  ;;  %v2694_v35 = vmul.f32 0.5, %v1685_v40  ;;  %5000 = verf.f32 %v2994_v60  ;;  %v2999_v49 = vmul.f32 0.70710677, %v8487_v24 }
 0x2b0   : > { %v8501_v3 = vpop.f32.mrb[70].mxu0  ;;  %v8503_v48 = vpop.f32.mrb[69].mxu1  ;;  %4301 = vst [vmem:[%s7652_s15 + $0x870] sm:$0xff] %v4007_v6  ;;  %v3864_v51 = vmul.f32 %v3570_v19, %v2688_v34  ;;  %v3575_v14 = vadd.f32 1.0, %v4989_v57  ;;  %v2838_v43 = vmul.f32 0.5, %v8444_v25  ;;  %5002 = verf.f32 %v3138_v50 }
 0x2b1   : > { %v8506_v55 = vpop.f32.mrb[71].mxu0  ;;  %v4991_v27 = vpop.eup %4990  ;;  %v4008_v61 = vmul.f32 %v3714_v2, %v2832_v52  ;;  %5004 = verf.f32 %v2999_v49  ;;  %v3143_v10 = vmul.f32 0.70710677, %v8494_v12  ;;  %v8513_v40 = vadd.f32 %v8256_v15, %v7590_v54 }
 0x2b2   : > { %4158 = vst [vmem:[%s7652_s15 + $0x3f8] sm:$0xff] %v3864_v51  ;;  %v3869_v42 = vmul.f32 %v3575_v14, %v2693_v39  ;;  %v3719_v34 = vadd.f32 1.0, %v4991_v27  ;;  %v8520_v25 = vadd.f32 %v8248_v30, %v7590_v54  ;;  %v1317_v6 = vsub.s32 2, %v7566_v47 }
 0x2b3   : > { %v8515_v60 = vpop.f32.mrb[70].mxu1  ;;  %v4993_v50 = vpop.eup %4992  ;;  %4302 = vst [vmem:[%s7652_s15 + $0x878] sm:$0xff] %v4008_v61  ;;  %v2699_v15 = vmul.f32 0.5, %v8448_v59  ;;  %5006 = verf.f32 %v3143_v10  ;;  %v3000_v57 = vmul.f32 0.70710677, %v8513_v40  ;;  %v1325_v39 = vsub.s32 4, %v7566_v47 }
 0x2b4   : > { %v8523_v52 = vpop.f32.mrb[72].mxu0  ;;  %v8525_v19 = vpop.f32.mrb[71].mxu1  ;;  %4163 = vst [vmem:[%s7652_s15 + $0x420] sm:$0xff] %v3869_v42  ;;  %v4013_v30 = vmul.f32 %v3719_v34, %v2837_v22  ;;  %v3576_v49 = vadd.f32 1.0, %v4993_v50  ;;  %v2843_v51 = vmul.f32 0.5, %v8458_v53  ;;  %v1321_v53 = vsub.s32 3, %v7566_v47 }
 0x2b5   : > { %10624 = vst [vmem:[#allocation38_spill] sm:$0xff] %v8525_v19  ;;  %v8531_v2 = vpop.f32.mrb[73].mxu0  ;;  %v4995_v54 = vpop.eup %4994  ;;  %v3144_v14 = vmul.f32 0.70710677, %v8520_v25  ;;  %5008 = verf.f32 %v3000_v57  ;;  %v5432_v59 = vld [vmem:[%s10211_s2] sm:$0x3f] }
 0x2b6   : > { %10625 = vst [vmem:[#allocation37_spill] sm:$0xff] %v8531_v2  ;;  %v4997_v27 = vpop.eup %4996  ;;  %v3720_v61 = vadd.f32 1.0, %v4995_v54  ;;  %v8539_v10 = vrot.slane %v5432_v59, %v1317_v6  ;;  %v8541_v19 = vrot.slane %v5432_v59, %v1325_v39  ;;  %4307 = vst [vmem:[%s7652_s15 + $0x8a0] sm:$0xff] %v4013_v30  ;;  %v3870_v22 = vmul.f32 %v3576_v49, %v2694_v35 }
 0x2b7   : > { %v8543_v2 = vpop.f32.mrb[72].mxu1  ;;  %v3581_v42 = vadd.f32 1.0, %v4997_v27  ;;  %5010 = verf.f32 %v3144_v14  ;;  %v4999_v57 = vpop.eup %4998  ;;  %v1329_v35 = vsub.s32 5, %v7566_v47  ;;  %v8563_v27 = vrot.slane %v5432_v59, %v1321_v53 }
 0x2b8   : > { %v8547_v34 = vpop.f32.mrb[74].mxu0  ;;  %v8549_v50 = vpop.f32.mrb[73].mxu1  ;;  %v4014_v54 = vmul.f32 %v3720_v61, %v2838_v43  ;;  %v8553_v6 = vadd.f32 %v8262_v26, %v8539_v10  ;;  %v8557_v39 = vadd.f32 %v8265_v4, %v8541_v19  ;;  %4164 = vst [vmem:[%s7652_s15 + $0x428] sm:$0xff] %v3870_v22  ;;  %v3725_v14 = vadd.f32 1.0, %v4999_v57 }
 0x2b9   : > { %10626 = vst [vmem:[#allocation42_spill] sm:$0xff] %v8549_v50  ;;  %v8560_v30 = vpop.f32.mrb[75].mxu0  ;;  %v3875_v49 = vmul.f32 %v3581_v42, %v2699_v15  ;;  %v8567_v43 = vadd.f32 %v8287_v44, %v8539_v10  ;;  %v5001_v26 = vpop.eup %5000  ;;  %v2700_v61 = vmul.f32 0.5, %v8476_v18  ;;  %v2844_v4 = vmul.f32 0.5, %v8483_v63 }
 0x2ba   : > { %10627 = vst [vmem:[#allocation41_spill] sm:$0xff] %v8560_v30  ;;  %4308 = vst [vmem:[%s7652_s15 + $0x8a8] sm:$0xff] %v4014_v54  ;;  %v2857_v50 = vmul.f32 0.70710677, %v8553_v6  ;;  %v2859_v47 = vmul.f32 0.70710677, %v8557_v39  ;;  %v5003_v22 = vpop.eup %5002  ;;  %v4019_v15 = vmul.f32 %v3725_v14, %v2843_v51  ;;  %v8577_v53 = vadd.f32 %v8267_v41, %v8563_v27 }
 0x2bb   : > { %4169 = vst [vmem:[%s7652_s15 + $0x450] sm:$0xff] %v3875_v49  ;;  %v3582_v42 = vadd.f32 1.0, %v5001_v26  ;;  %v8579_v44 = vrot.slane %v5432_v59, %v1329_v35  ;;  %v8581_v57 = vpop.f32.mrb[74].mxu1  ;;  %v5005_v63 = vpop.eup %5004  ;;  %v3726_v54 = vadd.f32 1.0, %v5003_v22  ;;  %v2705_v30 = vmul.f32 0.5, %v8487_v24 }
 0x2bc   : > { %v8583_v18 = vpop.f32.mrb[76].mxu0  ;;  %5012 = verf.f32 %v2857_v50  ;;  %v2863_v49 = vmul.f32 0.70710677, %v8567_v43  ;;  %v8587_v51 = vpop.f32.mrb[75].mxu1  ;;  %4313 = vst [vmem:[%s7652_s15 + $0x8d0] sm:$0xff] %v4019_v15  ;;  %v3587_v59 = vadd.f32 1.0, %v5005_v63 }
 0x2bd   : > { %10628 = vst [vmem:[#allocation44_spill] sm:$0xff] %v8583_v18  ;;  %v8589_v14 = vpop.f32.mrb[77].mxu0  ;;  %v3876_v41 = vmul.f32 %v3582_v42, %v2700_v61  ;;  %v2849_v35 = vmul.f32 0.5, %v8494_v12  ;;  %5014 = verf.f32 %v2859_v47  ;;  %v5007_v26 = vpop.eup %5006  ;;  %v4020_v18 = vmul.f32 %v3726_v54, %v2844_v4 }
 0x2be   : > { %10629 = vst [vmem:[#allocation43_spill] sm:$0xff] %v8589_v14  ;;  %v2858_v22 = vmul.f32 0.70710677, %v8577_v53  ;;  %v2271_v24 = vadd.f32 %v8272_v58, %v8579_v44  ;;  %5016 = verf.f32 %v2863_v49  ;;  %v3881_v14 = vmul.f32 %v3587_v59, %v2705_v30 }
 0x2bf   : > { %v8596_v50 = vpop.f32.mrb[76].mxu1  ;;  %4170 = vst [vmem:[%s7652_s15 + $0x458] sm:$0xff] %v3876_v41  ;;  %v3731_v15 = vadd.f32 1.0, %v5007_v26  ;;  %v2275_v61 = vadd.f32 %v8291_v45, %v8541_v19  ;;  %v8603_v12 = vadd.f32 %v8293_v5, %v8563_v27  ;;  %v5009_v42 = vpop.eup %5008  ;;  %4314 = vst [vmem:[%s7652_s15 + $0x8d8] sm:$0xff] %v4020_v18  ;;  %v8612_v30 = vadd.f32 %v8296_v1, %v8579_v44 }
 0x2c0   : > { %v8605_v4 = vpop.f32.mrb[78].mxu0  ;;  %v8607_v47 = vpop.f32.mrb[77].mxu1  ;;  %5018 = verf.f32 %v2858_v22  ;;  %v2860_v58 = vmul.f32 0.70710677, %v2271_v24  ;;  %4175 = vst [vmem:[%s7652_s15 + $0x480] sm:$0xff] %v3881_v14  ;;  %v2706_v5 = vmul.f32 0.5, %v8513_v40 }
 0x2c1   : > { %10630 = vst [vmem:[#allocation45_spill] sm:$0xff] %v8605_v4  ;;  %10631 = vst [vmem:[#allocation47_spill] sm:$0xff] %v8607_v47  ;;  %v8614_v63 = vpop.f32.mrb[79].mxu0  ;;  %v5011_v45 = vpop.eup %5010  ;;  %v4025_v54 = vmul.f32 %v3731_v15, %v2849_v35  ;;  %v3588_v49 = vadd.f32 1.0, %v5009_v42  ;;  %v2865_v41 = vmul.f32 0.70710677, %v2275_v61  ;;  %v1922_v15 = vadd.f32 %v8303_v46, %v8539_v10 }
 0x2c2   : > { %10632 = vst [vmem:[#allocation46_spill] sm:$0xff] %v8614_v63  ;;  %v2850_v59 = vmul.f32 0.5, %v8520_v25  ;;  %v3732_v26 = vadd.f32 1.0, %v5011_v45  ;;  %5020 = verf.f32 %v2860_v58  ;;  %v2864_v18 = vmul.f32 0.70710677, %v8603_v12  ;;  %v10636_v42 = vld [vmem:[#allocation24_spill] sm:$0xff] }
 0x2c3   : > { %v8620_v22 = vpop.f32.mrb[78].mxu1  ;;  %4319 = vst [vmem:[%s7652_s15 + $0x900] sm:$0xff] %v4025_v54  ;;  %v3882_v1 = vmul.f32 %v3588_v49, %v2706_v5  ;;  %v2563_v63 = vmul.f32 0.5, %v8553_v6  ;;  %5022 = verf.f32 %v2865_v41  ;;  %v2866_v14 = vmul.f32 0.70710677, %v8612_v30  ;;  %v10638_v6 = vld [vmem:[#allocation32_spill] sm:$0xff] }
 0x2c4   : > { %10633 = vst [vmem:[#allocation49_spill] sm:$0xff] %v8620_v22  ;;  %v8625_v40 = vpop.f32.mrb[80].mxu0  ;;  %v8627_v35 = vpop.f32.mrb[79].mxu1  ;;  %v4026_v25 = vmul.f32 %v3732_v26, %v2850_v59  ;;  %5024 = verf.f32 %v2864_v18  ;;  %v8633_v58 = vadd.f32 %v10636_v42, %v8541_v19  ;;  %v8640_v54 = vadd.f32 %v10638_v6, %v8563_v27  ;;  %v10639_v5 = vld [vmem:[#allocation31_spill] sm:$0xff] }
 0x2c5   : > { %10634 = vst [vmem:[#allocation48_spill] sm:$0xff] %v8625_v40  ;;  %10635 = vst [vmem:[#allocation51_spill] sm:$0xff] %v8627_v35  ;;  %v8635_v45 = vpop.f32.mrb[81].mxu0  ;;  %5026 = verf.f32 %v2866_v14  ;;  %v8644_v49 = vadd.f32 %v10639_v5, %v8579_v44  ;;  %v8648_v41 = vadd.f32 %v8330_v28, %v8539_v10  ;;  %v2565_v59 = vmul.f32 0.5, %v8557_v39 }
 0x2c6   : > { %10637 = vst [vmem:[#allocation50_spill] sm:$0xff] %v8635_v45  ;;  %4176 = vst [vmem:[%s7652_s15 + $0x488] sm:$0xff] %v3882_v1  ;;  %v5013_v46 = vpop.eup %5012  ;;  %v2569_v26 = vmul.f32 0.5, %v8567_v43  ;;  %v2869_v18 = vmul.f32 0.70710677, %v1922_v15  ;;  %v2564_v6 = vmul.f32 0.5, %v8577_v53 }
 0x2c7   : > { %4320 = vst [vmem:[%s7652_s15 + $0x908] sm:$0xff] %v4026_v25  ;;  %v2871_v1 = vmul.f32 0.70710677, %v8633_v58  ;;  %v5015_v14 = vpop.eup %5014  ;;  %v3445_v42 = vadd.f32 1.0, %v5013_v46  ;;  %v2566_v45 = vmul.f32 0.5, %v2271_v24  ;;  %v8656_v35 = vpop.f32.mrb[80].mxu1 }
 0x2c8   : > { %v2870_v5 = vmul.f32 0.70710677, %v8640_v54  ;;  %10640 = vst [vmem:[#allocation53_spill] sm:$0xff] %v8656_v35  ;;  %v5017_v28 = vpop.eup %5016  ;;  %v3447_v40 = vadd.f32 1.0, %v5015_v14  ;;  %v2571_v22 = vmul.f32 0.5, %v2275_v61  ;;  %5028 = verf.f32 %v2869_v18  ;;  %v8659_v43 = vpop.f32.mrb[82].mxu0 }
 0x2c9   : > { %v2872_v39 = vmul.f32 0.70710677, %v8644_v49  ;;  %v8661_v25 = vpop.f32.mrb[81].mxu1  ;;  %v3739_v47 = vmul.f32 %v3445_v42, %v2563_v63  ;;  %v3451_v46 = vadd.f32 1.0, %v5017_v28  ;;  %5030 = verf.f32 %v2871_v1  ;;  %v8664_v24 = vpop.f32.mrb[83].mxu0 }
 0x2ca   : > { %v2875_v53 = vmul.f32 0.70710677, %v8648_v41  ;;  %v5019_v35 = vpop.eup %5018  ;;  %v3741_v4 = vmul.f32 %v3447_v40, %v2565_v59  ;;  %5032 = verf.f32 %v2870_v5  ;;  %v8668_v61 = vadd.f32 %v8333_v7, %v8541_v19 }
 0x2cb   : > { %v8672_v18 = vadd.f32 %v8335_v32, %v8563_v27  ;;  %v8674_v14 = vpop.f32.mrb[82].mxu1  ;;  %4033 = vst [vmem:[%s7652_s15 + $0x10] sm:$0xff] %v3739_v47  ;;  %v3446_v63 = vadd.f32 1.0, %v5019_v35  ;;  %v3745_v1 = vmul.f32 %v3451_v46, %v2569_v26  ;;  %5034 = verf.f32 %v2872_v39 }
 0x2cc   : > { %v8679_v42 = vadd.f32 %v8340_v38, %v8579_v44  ;;  %v8681_v40 = vpop.f32.mrb[84].mxu0  ;;  %v8683_v59 = vpop.f32.mrb[83].mxu1  ;;  %4035 = vst [vmem:[%s7652_s15 + $0x20] sm:$0xff] %v3741_v4  ;;  %v2570_v32 = vmul.f32 0.5, %v8603_v12  ;;  %v2572_v5 = vmul.f32 0.5, %v8612_v30  ;;  %5036 = verf.f32 %v2875_v53 }
 0x2cd   : > { %10641 = vst [vmem:[#allocation52_spill] sm:$0xff] %v8681_v40  ;;  %10642 = vst [vmem:[#allocation55_spill] sm:$0xff] %v8683_v59  ;;  %v5021_v7 = vpop.eup %5020  ;;  %v2877_v47 = vmul.f32 0.70710677, %v8668_v61  ;;  %v8689_v35 = vpop.f32.mrb[85].mxu0  ;;  %v3740_v28 = vmul.f32 %v3446_v63, %v2564_v6  ;;  %v2575_v39 = vmul.f32 0.5, %v1922_v15  ;;  %v8696_v4 = vadd.f32 %v8355_v11, %v8539_v10 }
 0x2ce   : > { %v5023_v26 = vpop.eup %5022  ;;  %v3448_v38 = vadd.f32 1.0, %v5021_v7  ;;  %4039 = vst [vmem:[%s7652_s15 + $0x40] sm:$0xff] %v3745_v1  ;;  %v2876_v46 = vmul.f32 0.70710677, %v8672_v18  ;;  %v2878_v12 = vmul.f32 0.70710677, %v8679_v42  ;;  %v8703_v15 = vadd.f32 %v8359_v13, %v8541_v19 }
 0x2cf   : > { %v5025_v59 = vpop.eup %5024  ;;  %v3453_v40 = vadd.f32 1.0, %v5023_v26  ;;  %5038 = verf.f32 %v2877_v47  ;;  %v8698_v30 = vpop.f32.mrb[84].mxu1  ;;  %4034 = vst [vmem:[%s7652_s15 + $0x18] sm:$0xff] %v3740_v28  ;;  %v2577_v11 = vmul.f32 0.5, %v8633_v58  ;;  %v2881_v28 = vmul.f32 0.70710677, %v8696_v4 }
 0x2d0   : > { %10643 = vst [vmem:[#allocation54_spill] sm:$0xff] %v8698_v30  ;;  %v5027_v53 = vpop.eup %5026  ;;  %v3742_v6 = vmul.f32 %v3448_v38, %v2566_v45  ;;  %v3452_v63 = vadd.f32 1.0, %v5025_v59  ;;  %5040 = verf.f32 %v2876_v46  ;;  %v8705_v1 = vpop.f32.mrb[86].mxu0  ;;  %v2576_v59 = vmul.f32 0.5, %v8640_v54  ;;  %v10646_v58 = vld [vmem:[#allocation27_spill] sm:$0xff] }
 0x2d1   : > { %v8707_v7 = vpop.f32.mrb[85].mxu1  ;;  %v3747_v47 = vmul.f32 %v3453_v40, %v2571_v22  ;;  %v3454_v26 = vadd.f32 1.0, %v5027_v53  ;;  %5042 = verf.f32 %v2878_v12  ;;  %v8710_v30 = vpop.f32.mrb[87].mxu0  ;;  %v2883_v13 = vmul.f32 0.70710677, %v8703_v15 }
 0x2d2   : > { %10644 = vst [vmem:[#allocation56_spill] sm:$0xff] %v8707_v7  ;;  %10645 = vst [vmem:[#allocation57_spill] sm:$0xff] %v8710_v30  ;;  %v3746_v45 = vmul.f32 %v3452_v63, %v2570_v32  ;;  %v5029_v38 = vpop.eup %5028  ;;  %v2578_v22 = vmul.f32 0.5, %v8644_v49  ;;  %v8720_v40 = vadd.f32 %v10646_v58, %v8563_v27  ;;  %v8724_v12 = vadd.f32 %v8364_v37, %v8579_v44 }
 0x2d3   : > { %4036 = vst [vmem:[%s7652_s15 + $0x28] sm:$0xff] %v3742_v6  ;;  %4041 = vst [vmem:[%s7652_s15 + $0x50] sm:$0xff] %v3747_v47  ;;  %v3748_v46 = vmul.f32 %v3454_v26, %v2572_v5  ;;  %v8726_v32 = vpop.f32.mrb[86].mxu1  ;;  %v5031_v54 = vpop.eup %5030  ;;  %v3457_v53 = vadd.f32 1.0, %v5029_v38  ;;  %v2581_v6 = vmul.f32 0.5, %v8648_v41  ;;  %5044 = verf.f32 %v2881_v28 }
 0x2d4   : > { %10647 = vst [vmem:[#allocation58_spill] sm:$0xff] %v8726_v32  ;;  %4040 = vst [vmem:[%s7652_s15 + $0x48] sm:$0xff] %v3746_v45  ;;  %v8732_v5 = vadd.f32 %v8371_v23, %v8539_v10  ;;  %v8734_v49 = vpop.f32.mrb[88].mxu0  ;;  %v8736_v63 = vpop.f32.mrb[87].mxu1  ;;  %v3459_v37 = vadd.f32 1.0, %v5031_v54  ;;  %5046 = verf.f32 %v2883_v13  ;;  %v10650_v45 = vld [vmem:[#allocation26_spill] sm:$0xff] }
 0x2d5   : > { %10648 = vst [vmem:[#allocation59_spill] sm:$0xff] %v8734_v49  ;;  %10649 = vst [vmem:[#allocation60_spill] sm:$0xff] %v8736_v63  ;;  %v5033_v47 = vpop.eup %5032  ;;  %v2882_v26 = vmul.f32 0.70710677, %v8720_v40  ;;  %v8742_v38 = vadd.f32 %v10650_v45, %v8541_v19  ;;  %v8744_v41 = vpop.f32.mrb[89].mxu0  ;;  %v3751_v23 = vmul.f32 %v3457_v53, %v2575_v39  ;;  %v10652_v63 = vld [vmem:[#allocation36_spill] sm:$0xff] }
 0x2d6   : > { %4042 = vst [vmem:[%s7652_s15 + $0x58] sm:$0xff] %v3748_v46  ;;  %10651 = vst [vmem:[#allocation61_spill] sm:$0xff] %v8744_v41  ;;  %v5035_v28 = vpop.eup %5034  ;;  %v3458_v58 = vadd.f32 1.0, %v5033_v47  ;;  %v2884_v49 = vmul.f32 0.70710677, %v8724_v12  ;;  %v8749_v46 = vadd.f32 %v10652_v63, %v8563_v27  ;;  %v3753_v13 = vmul.f32 %v3459_v37, %v2577_v11 }
 0x2d7   : > { %v5037_v54 = vpop.eup %5036  ;;  %v3460_v32 = vadd.f32 1.0, %v5035_v28  ;;  %v2583_v30 = vmul.f32 0.5, %v8668_v61  ;;  %5048 = verf.f32 %v2882_v26  ;;  %v8752_v45 = vpop.f32.mrb[88].mxu1  ;;  %4045 = vst [vmem:[%s7652_s15 + $0x70] sm:$0xff] %v3751_v23  ;;  %v2887_v53 = vmul.f32 0.70710677, %v8732_v5 }
 0x2d8   : > { %v3752_v41 = vmul.f32 %v3458_v58, %v2576_v59  ;;  %v3463_v39 = vadd.f32 1.0, %v5037_v54  ;;  %5050 = verf.f32 %v2884_v49  ;;  %v8756_v47 = vpop.f32.mrb[90].mxu0  ;;  %v8758_v63 = vpop.f32.mrb[89].mxu1  ;;  %4047 = vst [vmem:[%s7652_s15 + $0x80] sm:$0xff] %v3753_v13  ;;  %v2582_v61 = vmul.f32 0.5, %v8672_v18  ;;  %v10653_v18 = vld [vmem:[#allocation35_spill] sm:$0xff] }
 0x2d9   : > { %v5039_v7 = vpop.eup %5038  ;;  %v3754_v11 = vmul.f32 %v3460_v32, %v2578_v22  ;;  %v2584_v37 = vmul.f32 0.5, %v8679_v42  ;;  %v2889_v26 = vmul.f32 0.70710677, %v8742_v38  ;;  %v8764_v59 = vpop.f32.mrb[91].mxu0  ;;  %5052 = verf.f32 %v2887_v53 }
 0x2da   : > { %v5041_v49 = vpop.eup %5040  ;;  %4046 = vst [vmem:[%s7652_s15 + $0x78] sm:$0xff] %v3752_v41  ;;  %v3757_v28 = vmul.f32 %v3463_v39, %v2581_v6  ;;  %v3465_v23 = vadd.f32 1.0, %v5039_v7  ;;  %v2888_v58 = vmul.f32 0.70710677, %v8749_v46  ;;  %v8771_v22 = vadd.f32 %v10653_v18, %v8579_v44 }
 0x2db   : > { %v5043_v54 = vpop.eup %5042  ;;  %4048 = vst [vmem:[%s7652_s15 + $0x88] sm:$0xff] %v3754_v11  ;;  %v3464_v13 = vadd.f32 1.0, %v5041_v49  ;;  %5054 = verf.f32 %v2889_v26  ;;  %v8775_v42 = vadd.f32 %v8398_v62, %v8539_v10  ;;  %v8777_v32 = vpop.f32.mrb[90].mxu1  ;;  %v8782_v41 = vadd.f32 %v8401_v9, %v8541_v19 }
 0x2dc   : > { %4051 = vst [vmem:[%s7652_s15 + $0xa0] sm:$0xff] %v3757_v28  ;;  %v3759_v7 = vmul.f32 %v3465_v23, %v2583_v30  ;;  %v3466_v6 = vadd.f32 1.0, %v5043_v54  ;;  %5056 = verf.f32 %v2888_v58  ;;  %v8784_v39 = vpop.f32.mrb[92].mxu0  ;;  %v8786_v53 = vpop.f32.mrb[91].mxu1  ;;  %v2587_v26 = vmul.f32 0.5, %v8696_v4 }
 0x2dd   : > { %v3758_v11 = vmul.f32 %v3464_v13, %v2582_v61  ;;  %v2589_v62 = vmul.f32 0.5, %v8703_v15  ;;  %v2890_v49 = vmul.f32 0.70710677, %v8771_v22  ;;  %v8791_v30 = vpop.f32.mrb[93].mxu0  ;;  %v5045_v28 = vpop.eup %5044  ;;  %v2588_v9 = vmul.f32 0.5, %v8720_v40 }
 0x2de   : > { %4053 = vst [vmem:[%s7652_s15 + $0xb0] sm:$0xff] %v3759_v7  ;;  %v3760_v23 = vmul.f32 %v3466_v6, %v2584_v37  ;;  %v2893_v58 = vmul.f32 0.70710677, %v8775_v42  ;;  %v2895_v54 = vmul.f32 0.70710677, %v8782_v41  ;;  %v5047_v18 = vpop.eup %5046  ;;  %v3469_v61 = vadd.f32 1.0, %v5045_v28 }
 0x2df   : > { %4052 = vst [vmem:[%s7652_s15 + $0xa8] sm:$0xff] %v3758_v11  ;;  %5058 = verf.f32 %v2890_v49  ;;  %v8800_v4 = vadd.f32 %v8403_v21, %v8563_v27  ;;  %v8804_v15 = vadd.f32 %v8408_v56, %v8579_v44  ;;  %v8806_v13 = vpop.f32.mrb[92].mxu1  ;;  %v3471_v40 = vadd.f32 1.0, %v5047_v18 }
 0x2e0   : > { %10654 = vst [vmem:[#allocation62_spill] sm:$0xff] %v8806_v13  ;;  %4054 = vst [vmem:[%s7652_s15 + $0xb8] sm:$0xff] %v3760_v23  ;;  %5060 = verf.f32 %v2893_v58  ;;  %v8811_v37 = vadd.f32 %v8423_v17, %v8539_v10  ;;  %v8815_v7 = vadd.f32 %v8427_v16, %v8541_v19  ;;  %v8817_v21 = vpop.f32.mrb[94].mxu0  ;;  %v8819_v6 = vpop.f32.mrb[93].mxu1  ;;  %v3763_v11 = vmul.f32 %v3469_v61, %v2587_v26 }
 0x2e1   : > { %10655 = vst [vmem:[#allocation28_spill] sm:$0xff] %v8817_v21  ;;  %10656 = vst [vmem:[#allocation63_spill] sm:$0xff] %v8819_v6  ;;  %v5049_v56 = vpop.eup %5048  ;;  %v2590_v49 = vmul.f32 0.5, %v8724_v12  ;;  %5062 = verf.f32 %v2895_v54  ;;  %v2894_v28 = vmul.f32 0.70710677, %v8800_v4  ;;  %v8823_v23 = vpop.f32.mrb[95].mxu0  ;;  %v3765_v58 = vmul.f32 %v3471_v40, %v2589_v62 }
 0x2e2   : > { %v5051_v17 = vpop.eup %5050  ;;  %v3470_v18 = vadd.f32 1.0, %v5049_v56  ;;  %v2593_v16 = vmul.f32 0.5, %v8732_v5  ;;  %v2896_v13 = vmul.f32 0.70710677, %v8804_v15  ;;  %4057 = vst [vmem:[%s7652_s15 + $0xd0] sm:$0xff] %v3763_v11  ;;  %v2595_v6 = vmul.f32 0.5, %v8742_v38 }
 0x2e3   : > { %v3472_v21 = vadd.f32 1.0, %v5051_v17  ;;  %5064 = verf.f32 %v2894_v28  ;;  %v2899_v12 = vmul.f32 0.70710677, %v8811_v37  ;;  %v8830_v26 = vpop.f32.mrb[94].mxu1  ;;  %v5053_v54 = vpop.eup %5052  ;;  %4059 = vst [vmem:[%s7652_s15 + $0xe0] sm:$0xff] %v3765_v58  ;;  %v2594_v62 = vmul.f32 0.5, %v8749_v46 }
 0x2e4   : > { %10657 = vst [vmem:[#allocation64_spill] sm:$0xff] %v8830_v26  ;;  %v3764_v61 = vmul.f32 %v3470_v18, %v2588_v9  ;;  %5066 = verf.f32 %v2896_v13  ;;  %v2901_v5 = vmul.f32 0.70710677, %v8815_v7  ;;  %v8835_v40 = vpop.f32.mrb[96].mxu0  ;;  %v8837_v56 = vpop.f32.mrb[95].mxu1  ;;  %v3475_v28 = vadd.f32 1.0, %v5053_v54 }
 0x2e5   : > { %v5055_v38 = vpop.eup %5054  ;;  %v3766_v11 = vmul.f32 %v3472_v21, %v2590_v49  ;;  %5068 = verf.f32 %v2899_v12  ;;  %v10658_v17 = vld [vmem:[#allocation34_spill] sm:$0xff]  ;;  %v8843_v58 = vpop.f32.mrb[97].mxu0  ;;  %v8848_v13 = vadd.f32 %v8432_v0, %v8579_v44  ;;  %v8852_v21 = vadd.f32 %v8439_v31, %v8539_v10 }
 0x2e6   : > { %v8841_v26 = vadd.f32 %v10658_v17, %v8563_v27  ;;  %10659 = vst [vmem:[#allocation65_spill] sm:$0xff] %v8843_v58  ;;  %v5057_v9 = vpop.eup %5056  ;;  %4058 = vst [vmem:[%s7652_s15 + $0xd8] sm:$0xff] %v3764_v61  ;;  %v3477_v46 = vadd.f32 1.0, %v5055_v38  ;;  %5070 = verf.f32 %v2901_v5  ;;  %v3769_v49 = vmul.f32 %v3475_v28, %v2593_v16  ;;  %v10663_v28 = vld [vmem:[#allocation33_spill] sm:$0xff] }
 0x2e7   : > { %4060 = vst [vmem:[%s7652_s15 + $0xe8] sm:$0xff] %v3766_v11  ;;  %v3476_v18 = vadd.f32 1.0, %v5057_v9  ;;  %v2596_v12 = vmul.f32 0.5, %v8771_v22  ;;  %v8857_v61 = vpop.f32.mrb[96].mxu1  ;;  %v2599_v38 = vmul.f32 0.5, %v8775_v42  ;;  %v2601_v0 = vmul.f32 0.5, %v8782_v41 }
 0x2e8   : > { %v2900_v54 = vmul.f32 0.70710677, %v8841_v26  ;;  %10660 = vst [vmem:[#allocation66_spill] sm:$0xff] %v8857_v61  ;;  %v3771_v5 = vmul.f32 %v3477_v46, %v2595_v6  ;;  %v2902_v17 = vmul.f32 0.70710677, %v8848_v13  ;;  %v8862_v58 = vpop.f32.mrb[98].mxu0  ;;  %v8870_v6 = vadd.f32 %v10663_v28, %v8541_v19 }
 0x2e9   : > { %10661 = vst [vmem:[#allocation67_spill] sm:$0xff] %v8862_v58  ;;  %v8864_v31 = vpop.f32.mrb[97].mxu1  ;;  %v5059_v16 = vpop.eup %5058  ;;  %4063 = vst [vmem:[%s7652_s15 + $0x100] sm:$0xff] %v3769_v49  ;;  %v3770_v22 = vmul.f32 %v3476_v18, %v2594_v62  ;;  %v2905_v11 = vmul.f32 0.70710677, %v8852_v21  ;;  %v10665_v46 = vld [vmem:[#allocation40_spill] sm:$0xff] }
 0x2ea   : > { %10662 = vst [vmem:[#allocation68_spill] sm:$0xff] %v8864_v31  ;;  %5072 = verf.f32 %v2900_v54  ;;  %v8872_v42 = vpop.f32.mrb[99].mxu0  ;;  %v5061_v41 = vpop.eup %5060  ;;  %4065 = vst [vmem:[%s7652_s15 + $0x110] sm:$0xff] %v3771_v5  ;;  %v3478_v9 = vadd.f32 1.0, %v5059_v16  ;;  %v8877_v58 = vadd.f32 %v10665_v46, %v8563_v27  ;;  %v10666_v49 = vld [vmem:[#allocation39_spill] sm:$0xff]  ;;  %v2600_v28 = vmul.f32 0.5, %v8800_v4 }
 0x2eb   : > { %10664 = vst [vmem:[#allocation69_spill] sm:$0xff] %v8872_v42  ;;  %5074 = verf.f32 %v2902_v17  ;;  %v8881_v62 = vadd.f32 %v10666_v49, %v8579_v44  ;;  %v5063_v18 = vpop.eup %5062  ;;  %4064 = vst [vmem:[%s7652_s15 + $0x108] sm:$0xff] %v3770_v22  ;;  %v3481_v54 = vadd.f32 1.0, %v5061_v41  ;;  %v2907_v42 = vmul.f32 0.70710677, %v8870_v6  ;;  %v8886_v5 = vpop.f32.mrb[98].mxu1 }
 0x2ec   : > { %5076 = verf.f32 %v2905_v11  ;;  %10667 = vst [vmem:[#allocation2_spill] sm:$0xff] %v8886_v5  ;;  %v3772_v17 = vmul.f32 %v3478_v9, %v2596_v12  ;;  %v3483_v16 = vadd.f32 1.0, %v5063_v18  ;;  %v2602_v46 = vmul.f32 0.5, %v8804_v15  ;;  %v8890_v49 = vpop.f32.mrb[100].mxu0  ;;  %v8892_v61 = vpop.f32.mrb[99].mxu1 }
 0x2ed   : > { %v2906_v31 = vmul.f32 0.70710677, %v8877_v58  ;;  %10668 = vst [vmem:[#allocation4_spill] sm:$0xff] %v8892_v61  ;;  %v5065_v22 = vpop.eup %5064  ;;  %v3775_v41 = vmul.f32 %v3481_v54, %v2599_v38  ;;  %v2605_v4 = vmul.f32 0.5, %v8811_v37  ;;  %5078 = verf.f32 %v2907_v42  ;;  %v8896_v5 = vpop.f32.mrb[101].mxu0 }
 0x2ee   : > { %v2908_v11 = vmul.f32 0.70710677, %v8881_v62  ;;  %v5067_v12 = vpop.eup %5066  ;;  %4066 = vst [vmem:[%s7652_s15 + $0x118] sm:$0xff] %v3772_v17  ;;  %v3777_v15 = vmul.f32 %v3483_v16, %v2601_v0  ;;  %v3482_v9 = vadd.f32 1.0, %v5065_v22  ;;  %v8901_v18 = vadd.f32 %v8466_v33, %v8539_v10 }
 0x2ef   : > { %5080 = verf.f32 %v2906_v31  ;;  %v5069_v61 = vpop.eup %5068  ;;  %4069 = vst [vmem:[%s7652_s15 + $0x130] sm:$0xff] %v3775_v41  ;;  %v3484_v38 = vadd.f32 1.0, %v5067_v12  ;;  %v8906_v37 = vadd.f32 %v8469_v20, %v8541_v19  ;;  %v8910_v42 = vadd.f32 %v8471_v36, %v8563_v27  ;;  %v8912_v0 = vpop.f32.mrb[100].mxu1 }
 0x2f0   : > { %5082 = verf.f32 %v2908_v11  ;;  %10669 = vst [vmem:[#allocation30_spill] sm:$0xff] %v8912_v0  ;;  %v5071_v31 = vpop.eup %5070  ;;  %4071 = vst [vmem:[%s7652_s15 + $0x140] sm:$0xff] %v3777_v15  ;;  %v3776_v54 = vmul.f32 %v3482_v9, %v2600_v28  ;;  %v3487_v33 = vadd.f32 1.0, %v5069_v61  ;;  %v2607_v17 = vmul.f32 0.5, %v8815_v7  ;;  %v8917_v22 = vpop.f32.mrb[102].mxu0 }
 0x2f1   : > { %v2911_v16 = vmul.f32 0.70710677, %v8901_v18  ;;  %v8919_v20 = vpop.f32.mrb[101].mxu1  ;;  %v3778_v41 = vmul.f32 %v3484_v38, %v2602_v46  ;;  %v3489_v11 = vadd.f32 1.0, %v5071_v31  ;;  %v2606_v36 = vmul.f32 0.5, %v8841_v26  ;;  %v8923_v0 = vpop.f32.mrb[103].mxu0 }
 0x2f2   : > { %v2913_v12 = vmul.f32 0.70710677, %v8906_v37  ;;  %4070 = vst [vmem:[%s7652_s15 + $0x138] sm:$0xff] %v3776_v54  ;;  %v3781_v61 = vmul.f32 %v3487_v33, %v2605_v4  ;;  %v2608_v28 = vmul.f32 0.5, %v8848_v13  ;;  %v2912_v7 = vmul.f32 0.70710677, %v8910_v42 }
 0x2f3   : > { %5084 = verf.f32 %v2911_v16  ;;  %4072 = vst [vmem:[%s7652_s15 + $0x148] sm:$0xff] %v3778_v41  ;;  %v3783_v9 = vmul.f32 %v3489_v11, %v2607_v17  ;;  %v8931_v26 = vadd.f32 %v8478_v8, %v8579_v44  ;;  %v8935_v46 = vadd.f32 %v8496_v29, %v8539_v10  ;;  %v8937_v38 = vpop.f32.mrb[102].mxu1 }
 0x2f4   : > { %v5073_v15 = vpop.eup %5072  ;;  %5086 = verf.f32 %v2913_v12  ;;  %4075 = vst [vmem:[%s7652_s15 + $0x160] sm:$0xff] %v3781_v61  ;;  %v8942_v31 = vadd.f32 %v8501_v3, %v8541_v19  ;;  %v8946_v54 = vadd.f32 %v8503_v48, %v8563_v27  ;;  %v8948_v8 = vpop.f32.mrb[104].mxu0  ;;  %v2611_v16 = vmul.f32 0.5, %v8852_v21 }
 0x2f5   : > { %v5075_v4 = vpop.eup %5074  ;;  %v3488_v13 = vadd.f32 1.0, %v5073_v15  ;;  %5088 = verf.f32 %v2912_v7  ;;  %v8950_v33 = vpop.f32.mrb[103].mxu1  ;;  %4077 = vst [vmem:[%s7652_s15 + $0x170] sm:$0xff] %v3783_v9  ;;  %v2613_v41 = vmul.f32 0.5, %v8870_v6  ;;  %v2914_v11 = vmul.f32 0.70710677, %v8931_v26 }
 0x2f6   : > { %10670 = vst [vmem:[#allocation29_spill] sm:$0xff] %v8950_v33  ;;  %v5077_v29 = vpop.eup %5076  ;;  %v3490_v17 = vadd.f32 1.0, %v5075_v4  ;;  %v8956_v3 = vpop.f32.mrb[105].mxu0  ;;  %v2612_v48 = vmul.f32 0.5, %v8877_v58  ;;  %v2917_v7 = vmul.f32 0.70710677, %v8935_v46 }
 0x2f7   : > { %10671 = vst [vmem:[#allocation3_spill] sm:$0xff] %v8956_v3  ;;  %v3782_v12 = vmul.f32 %v3488_v13, %v2606_v36  ;;  %v3493_v61 = vadd.f32 1.0, %v5077_v29  ;;  %v5079_v15 = vpop.eup %5078  ;;  %v2614_v9 = vmul.f32 0.5, %v8881_v62  ;;  %5090 = verf.f32 %v2914_v11  ;;  %v8962_v4 = vpop.f32.mrb[104].mxu1 }
 0x2f8   : > { %v3784_v33 = vmul.f32 %v3490_v17, %v2608_v28  ;;  %v2919_v21 = vmul.f32 0.70710677, %v8942_v31  ;;  %v3495_v36 = vadd.f32 1.0, %v5079_v15  ;;  %5092 = verf.f32 %v2917_v7  ;;  %v8966_v13 = vpop.f32.mrb[106].mxu0  ;;  %v8968_v29 = vpop.f32.mrb[105].mxu1 }
 0x2f9   : > { %v5081_v6 = vpop.eup %5080  ;;  %4076 = vst [vmem:[%s7652_s15 + $0x168] sm:$0xff] %v3782_v12  ;;  %v3787_v3 = vmul.f32 %v3493_v61, %v2611_v16  ;;  %v2918_v58 = vmul.f32 0.70710677, %v8946_v54  ;;  %v8973_v17 = vadd.f32 %v8506_v55, %v8579_v44  ;;  %v8977_v16 = vadd.f32 %v8515_v60, %v8539_v10  ;;  %v8979_v11 = vpop.f32.mrb[107].mxu0 }
 0x2fa   : > { %v5083_v28 = vpop.eup %5082  ;;  %4078 = vst [vmem:[%s7652_s15 + $0x178] sm:$0xff] %v3784_v33  ;;  %v3494_v62 = vadd.f32 1.0, %v5081_v6  ;;  %5094 = verf.f32 %v2919_v21  ;;  %v3789_v12 = vmul.f32 %v3495_v36, %v2613_v41  ;;  %v8984_v33 = vadd.f32 %v8523_v52, %v8541_v19 }
 0x2fb   : > { %4081 = vst [vmem:[%s7652_s15 + $0x190] sm:$0xff] %v3787_v3  ;;  %v3496_v61 = vadd.f32 1.0, %v5083_v28  ;;  %5096 = verf.f32 %v2918_v58  ;;  %v2617_v15 = vmul.f32 0.5, %v8901_v18  ;;  %v2619_v55 = vmul.f32 0.5, %v8906_v37  ;;  %v8989_v60 = vpop.f32.mrb[106].mxu1  ;;  %v10674_v37 = vld [vmem:[#allocation38_spill] sm:$0xff] }
 0x2fc   : > { %v3788_v7 = vmul.f32 %v3494_v62, %v2612_v48  ;;  %v2920_v21 = vmul.f32 0.70710677, %v8973_v17  ;;  %10672 = vst [vmem:[#allocation5_spill] sm:$0xff] %v8989_v60  ;;  %4083 = vst [vmem:[%s7652_s15 + $0x1a0] sm:$0xff] %v3789_v12  ;;  %v2618_v3 = vmul.f32 0.5, %v8910_v42  ;;  %v8995_v58 = vpop.f32.mrb[108].mxu0  ;;  %v9000_v28 = vadd.f32 %v10674_v37, %v8563_v27 }
 0x2fd   : > { %v5085_v6 = vpop.eup %5084  ;;  %v3790_v41 = vmul.f32 %v3496_v61, %v2614_v9  ;;  %v2923_v36 = vmul.f32 0.70710677, %v8977_v16  ;;  %v2925_v52 = vmul.f32 0.70710677, %v8984_v33  ;;  %10673 = vst [vmem:[#allocation7_spill] sm:$0xff] %v8995_v58  ;;  %v10675_v62 = vld [vmem:[#allocation37_spill] sm:$0xff] }
 0x2fe   : > { %v5087_v48 = vpop.eup %5086  ;;  %4082 = vst [vmem:[%s7652_s15 + $0x198] sm:$0xff] %v3788_v7  ;;  %v3499_v18 = vadd.f32 1.0, %v5085_v6  ;;  %5098 = verf.f32 %v2920_v21  ;;  %v9004_v12 = vadd.f32 %v10675_v62, %v8579_v44  ;;  %v9006_v9 = vpop.f32.mrb[107].mxu1  ;;  %v9013_v7 = vadd.f32 %v8543_v2, %v8539_v10 }
 0x2ff   : > { %10676 = vst [vmem:[#allocation9_spill] sm:$0xff] %v9006_v9  ;;  %v9008_v42 = vpop.f32.mrb[109].mxu0  ;;  %v5089_v61 = vpop.eup %5088  ;;  %4084 = vst [vmem:[%s7652_s15 + $0x1a8] sm:$0xff] %v3790_v41  ;;  %v3501_v58 = vadd.f32 1.0, %v5087_v48  ;;  %5100 = verf.f32 %v2923_v36  ;;  %v9017_v21 = vadd.f32 %v8547_v34, %v8541_v19  ;;  %v2620_v62 = vmul.f32 0.5, %v8931_v26 }
 0x300   : > { %10677 = vst [vmem:[#allocation6_spill] sm:$0xff] %v9008_v42  ;;  %v3793_v6 = vmul.f32 %v3499_v18, %v2617_v15  ;;  %v3500_v37 = vadd.f32 1.0, %v5089_v61  ;;  %5102 = verf.f32 %v2925_v52  ;;  %v9020_v42 = vpop.f32.mrb[108].mxu1  ;;  %v2623_v48 = vmul.f32 0.5, %v8935_v46  ;;  %v9025_v9 = vpop.f32.mrb[110].mxu0 }
 0x301   : > { %10678 = vst [vmem:[#allocation8_spill] sm:$0xff] %v9020_v42  ;;  %v3795_v41 = vmul.f32 %v3501_v58, %v2619_v55  ;;  %v2924_v36 = vmul.f32 0.70710677, %v9000_v28  ;;  %v2926_v2 = vmul.f32 0.70710677, %v9004_v12  ;;  %10679 = vst [vmem:[#allocation11_spill] sm:$0xff] %v9025_v9  ;;  %v5091_v34 = vpop.eup %5090 }
 0x302   : > { %4087 = vst [vmem:[%s7652_s15 + $0x1c0] sm:$0xff] %v3793_v6  ;;  %v3794_v15 = vmul.f32 %v3500_v37, %v2618_v3  ;;  %v2625_v18 = vmul.f32 0.5, %v8942_v31  ;;  %v2624_v26 = vmul.f32 0.5, %v8946_v54  ;;  %v2929_v52 = vmul.f32 0.70710677, %v9013_v7  ;;  %v9031_v61 = vpop.f32.mrb[109].mxu1  ;;  %v5093_v46 = vpop.eup %5092 }
 0x303   : > { %10680 = vst [vmem:[#allocation13_spill] sm:$0xff] %v9031_v61  ;;  %v9033_v55 = vpop.f32.mrb[111].mxu0  ;;  %4089 = vst [vmem:[%s7652_s15 + $0x1d0] sm:$0xff] %v3795_v41  ;;  %v3502_v58 = vadd.f32 1.0, %v5091_v34  ;;  %5104 = verf.f32 %v2924_v36  ;;  %v2931_v9 = vmul.f32 0.70710677, %v9017_v21  ;;  %v9048_v41 = vadd.f32 %v8581_v57, %v8539_v10 }
 0x304   : > { %10681 = vst [vmem:[#allocation10_spill] sm:$0xff] %v9033_v55  ;;  %v10682_v42 = vld [vmem:[#allocation42_spill] sm:$0xff]  ;;  %v5095_v3 = vpop.eup %5094  ;;  %4088 = vst [vmem:[%s7652_s15 + $0x1c8] sm:$0xff] %v3794_v15  ;;  %v3505_v31 = vadd.f32 1.0, %v5093_v46  ;;  %5106 = verf.f32 %v2926_v2  ;;  %v10683_v54 = vld [vmem:[#allocation41_spill] sm:$0xff]  ;;  %v9050_v36 = vpop.f32.mrb[110].mxu1 }
 0x305   : > { %v9039_v6 = vadd.f32 %v10682_v42, %v8563_v27  ;;  %v9044_v37 = vadd.f32 %v10683_v54, %v8579_v44  ;;  %10684 = vst [vmem:[#allocation12_spill] sm:$0xff] %v9050_v36  ;;  %v5097_v34 = vpop.eup %5096  ;;  %v3796_v55 = vmul.f32 %v3502_v58, %v2620_v62  ;;  %v3507_v61 = vadd.f32 1.0, %v5095_v3  ;;  %v9053_v15 = vpop.f32.mrb[112].mxu0 }
 0x306   : > { %v2626_v42 = vmul.f32 0.5, %v8973_v17  ;;  %5108 = verf.f32 %v2929_v52  ;;  %v9055_v2 = vpop.f32.mrb[111].mxu1  ;;  %v3799_v46 = vmul.f32 %v3505_v31, %v2623_v48  ;;  %v3506_v54 = vadd.f32 1.0, %v5097_v34  ;;  %v9058_v60 = vpop.f32.mrb[113].mxu0  ;;  %v10686_v48 = vld [vmem:[#allocation44_spill] sm:$0xff] }
 0x307   : > { %5110 = verf.f32 %v2931_v9  ;;  %v2930_v57 = vmul.f32 0.70710677, %v9039_v6  ;;  %10685 = vst [vmem:[#allocation15_spill] sm:$0xff] %v9058_v60  ;;  %4090 = vst [vmem:[%s7652_s15 + $0x1d8] sm:$0xff] %v3796_v55  ;;  %v3801_v36 = vmul.f32 %v3507_v61, %v2625_v18  ;;  %v2629_v62 = vmul.f32 0.5, %v8977_v16  ;;  %v9070_v34 = vpop.f32.mrb[112].mxu1 }
 0x308   : > { %v2631_v58 = vmul.f32 0.5, %v8984_v33  ;;  %v2932_v17 = vmul.f32 0.70710677, %v9044_v37  ;;  %v5099_v52 = vpop.eup %5098  ;;  %4093 = vst [vmem:[%s7652_s15 + $0x1f0] sm:$0xff] %v3799_v46  ;;  %v3800_v3 = vmul.f32 %v3506_v54, %v2624_v26  ;;  %v2935_v9 = vmul.f32 0.70710677, %v9048_v41 }
 0x309   : > { %5112 = verf.f32 %v2930_v57  ;;  %v9068_v31 = vadd.f32 %v10686_v48, %v8541_v19  ;;  %10687 = vst [vmem:[#allocation17_spill] sm:$0xff] %v9070_v34  ;;  %v5101_v18 = vpop.eup %5100  ;;  %4095 = vst [vmem:[%s7652_s15 + $0x200] sm:$0xff] %v3801_v36  ;;  %v3508_v16 = vadd.f32 1.0, %v5099_v52  ;;  %v9075_v33 = vadd.f32 %v8587_v51, %v8563_v27  ;;  %v10688_v61 = vld [vmem:[#allocation43_spill] sm:$0xff]  ;;  %v9081_v55 = vpop.f32.mrb[114].mxu0 }
 0x30a   : > { %5114 = verf.f32 %v2932_v17  ;;  %v9079_v26 = vadd.f32 %v10688_v61, %v8579_v44  ;;  %10689 = vst [vmem:[#allocation14_spill] sm:$0xff] %v9081_v55  ;;  %v9083_v46 = vpop.f32.mrb[113].mxu1  ;;  %v5103_v54 = vpop.eup %5102  ;;  %4094 = vst [vmem:[%s7652_s15 + $0x1f8] sm:$0xff] %v3800_v3  ;;  %v3511_v57 = vadd.f32 1.0, %v5101_v18  ;;  %v2630_v36 = vmul.f32 0.5, %v9000_v28 }
 0x30b   : > { %10690 = vst [vmem:[#allocation16_spill] sm:$0xff] %v9083_v46  ;;  %5116 = verf.f32 %v2935_v9  ;;  %v2937_v17 = vmul.f32 0.70710677, %v9068_v31  ;;  %v9088_v52 = vpop.f32.mrb[115].mxu0  ;;  %v3802_v51 = vmul.f32 %v3508_v16, %v2626_v42  ;;  %v3513_v48 = vadd.f32 1.0, %v5103_v54  ;;  %v9094_v18 = vpop.f32.mrb[114].mxu1 }
 0x30c   : > { %10691 = vst [vmem:[#allocation19_spill] sm:$0xff] %v9088_v52  ;;  %v2632_v61 = vmul.f32 0.5, %v9004_v12  ;;  %v2936_v55 = vmul.f32 0.70710677, %v9075_v33  ;;  %v3805_v34 = vmul.f32 %v3511_v57, %v2629_v62  ;;  %v2635_v46 = vmul.f32 0.5, %v9013_v7  ;;  %10692 = vst [vmem:[#allocation21_spill] sm:$0xff] %v9094_v18 }
 0x30d   : > { %5118 = verf.f32 %v2937_v17  ;;  %v2938_v3 = vmul.f32 0.70710677, %v9079_v26  ;;  %v5105_v28 = vpop.eup %5104  ;;  %4096 = vst [vmem:[%s7652_s15 + $0x208] sm:$0xff] %v3802_v51  ;;  %v3807_v9 = vmul.f32 %v3513_v48, %v2631_v58  ;;  %v9099_v42 = vadd.f32 %v8596_v50, %v8539_v10  ;;  %v10693_v12 = vld [vmem:[#allocation45_spill] sm:$0xff]  ;;  %v9105_v62 = vpop.f32.mrb[116].mxu0  ;;  %v10696_v17 = vld [vmem:[#allocation47_spill] sm:$0xff] }
 0x30e   : > { %5120 = verf.f32 %v2936_v55  ;;  %v9103_v16 = vadd.f32 %v10693_v12, %v8541_v19  ;;  %10694 = vst [vmem:[#allocation18_spill] sm:$0xff] %v9105_v62  ;;  %v9107_v7 = vpop.f32.mrb[115].mxu1  ;;  %v5107_v54 = vpop.eup %5106  ;;  %4099 = vst [vmem:[%s7652_s15 + $0x220] sm:$0xff] %v3805_v34  ;;  %v3512_v57 = vadd.f32 1.0, %v5105_v28  ;;  %v9112_v58 = vadd.f32 %v10696_v17, %v8563_v27  ;;  %v10697_v55 = vld [vmem:[#allocation46_spill] sm:$0xff] }
 0x30f   : > { %10695 = vst [vmem:[#allocation20_spill] sm:$0xff] %v9107_v7  ;;  %5122 = verf.f32 %v2938_v3  ;;  %v9116_v50 = vadd.f32 %v10697_v55, %v8579_v44  ;;  %v9118_v51 = vpop.f32.mrb[117].mxu0  ;;  %4101 = vst [vmem:[%s7652_s15 + $0x230] sm:$0xff] %v3807_v9  ;;  %v3514_v12 = vadd.f32 1.0, %v5107_v54  ;;  %v2637_v62 = vmul.f32 0.5, %v9017_v21  ;;  %v9126_v52 = vpop.f32.mrb[116].mxu1 }
 0x310   : > { %10698 = vst [vmem:[#allocation23_spill] sm:$0xff] %v9118_v51  ;;  %v5109_v48 = vpop.eup %5108  ;;  %v2636_v34 = vmul.f32 0.5, %v9039_v6  ;;  %v2941_v3 = vmul.f32 0.70710677, %v9099_v42  ;;  %v3806_v7 = vmul.f32 %v3512_v57, %v2630_v36  ;;  %v2638_v18 = vmul.f32 0.5, %v9044_v37  ;;  %v9129_v54 = vpop.f32.mrb[118].mxu0 }
 0x311   : > { %v5111_v28 = vpop.eup %5110  ;;  %v3517_v17 = vadd.f32 1.0, %v5109_v48  ;;  %v2943_v55 = vmul.f32 0.70710677, %v9103_v16  ;;  %v3808_v51 = vmul.f32 %v3514_v12, %v2632_v61  ;;  %v2942_v21 = vmul.f32 0.70710677, %v9112_v58  ;;  %10699 = vst [vmem:[#allocation25_spill] sm:$0xff] %v9129_v54 }
 0x312   : > { %v3519_v9 = vadd.f32 1.0, %v5111_v28  ;;  %5124 = verf.f32 %v2941_v3  ;;  %v9131_v6 = vpop.f32.mrb[117].mxu1  ;;  %4100 = vst [vmem:[%s7652_s15 + $0x228] sm:$0xff] %v3806_v7  ;;  %v2641_v37 = vmul.f32 0.5, %v9048_v41  ;;  %v2944_v57 = vmul.f32 0.70710677, %v9116_v50 }
 0x313   : > { %10700 = vst [vmem:[#allocation22_spill] sm:$0xff] %v9131_v6  ;;  %v5113_v60 = vpop.eup %5112  ;;  %v3811_v36 = vmul.f32 %v3517_v17, %v2635_v46  ;;  %5126 = verf.f32 %v2943_v55  ;;  %v9136_v48 = vpop.f32.mrb[119].mxu0  ;;  %4102 = vst [vmem:[%s7652_s15 + $0x238] sm:$0xff] %v3808_v51  ;;  %v10701_v28 = vld [vmem:[#allocation49_spill] sm:$0xff]  ;;  %v10702_v41 = vld [vmem:[#allocation48_spill] sm:$0xff] }
 0x314   : > { %v5115_v61 = vpop.eup %5114  ;;  %v3813_v12 = vmul.f32 %v3519_v9, %v2637_v62  ;;  %v3518_v3 = vadd.f32 1.0, %v5113_v60  ;;  %5128 = verf.f32 %v2942_v21  ;;  %v9141_v54 = vadd.f32 %v10701_v28, %v8539_v10  ;;  %v10703_v17 = vld [vmem:[#allocation51_spill] sm:$0xff]  ;;  %v9152_v62 = vpop.f32.mrb[118].mxu1 }
 0x315   : > { %v5117_v6 = vpop.eup %5116  ;;  %4105 = vst [vmem:[%s7652_s15 + $0x250] sm:$0xff] %v3811_v36  ;;  %v3520_v46 = vadd.f32 1.0, %v5115_v61  ;;  %5130 = verf.f32 %v2944_v57  ;;  %v9146_v7 = vadd.f32 %v10702_v41, %v8541_v19  ;;  %v9150_v55 = vadd.f32 %v10703_v17, %v8563_v27  ;;  %10704 = vst [vmem:[#allocation24_spill] sm:$0xff] %v9152_v62  ;;  %v9157_v36 = vpop.f32.mrb[120].mxu0 }
 0x316   : > { %4107 = vst [vmem:[%s7652_s15 + $0x260] sm:$0xff] %v3813_v12  ;;  %v3812_v60 = vmul.f32 %v3518_v3, %v2636_v34  ;;  %v3523_v51 = vadd.f32 1.0, %v5117_v6  ;;  %v2643_v9 = vmul.f32 0.5, %v9068_v31  ;;  %v2947_v21 = vmul.f32 0.70710677, %v9141_v54  ;;  %10705 = vst [vmem:[#allocation32_spill] sm:$0xff] %v9157_v36 }
 0x317   : > { %v9159_v57 = vpop.f32.mrb[119].mxu1  ;;  %v5119_v61 = vpop.eup %5118  ;;  %v3814_v28 = vmul.f32 %v3520_v46, %v2638_v18  ;;  %v2642_v41 = vmul.f32 0.5, %v9075_v33  ;;  %v2644_v17 = vmul.f32 0.5, %v9079_v26  ;;  %v2949_v12 = vmul.f32 0.70710677, %v9146_v7  ;;  %v10708_v33 = vld [vmem:[#allocation50_spill] sm:$0xff] }
 0x318   : > { %10706 = vst [vmem:[#allocation31_spill] sm:$0xff] %v9159_v57  ;;  %v9164_v34 = vpop.f32.mrb[121].mxu0  ;;  %v5121_v6 = vpop.eup %5120  ;;  %4106 = vst [vmem:[%s7652_s15 + $0x258] sm:$0xff] %v3812_v60  ;;  %v3817_v31 = vmul.f32 %v3523_v51, %v2641_v37  ;;  %v3525_v3 = vadd.f32 1.0, %v5119_v61  ;;  %5132 = verf.f32 %v2947_v21  ;;  %v2948_v36 = vmul.f32 0.70710677, %v9150_v55 }
 0x319   : > { %10707 = vst [vmem:[#allocation27_spill] sm:$0xff] %v9164_v34  ;;  %v5123_v62 = vpop.eup %5122  ;;  %4108 = vst [vmem:[%s7652_s15 + $0x268] sm:$0xff] %v3814_v28  ;;  %v3524_v57 = vadd.f32 1.0, %v5121_v6  ;;  %5134 = verf.f32 %v2949_v12  ;;  %v9171_v26 = vadd.f32 %v10708_v33, %v8579_v44  ;;  %v10709_v18 = vld [vmem:[#allocation53_spill] sm:$0xff]  ;;  %v9177_v34 = vpop.f32.mrb[120].mxu1  ;;  %v9182_v51 = vadd.f32 %v8659_v43, %v8541_v19 }
 0x31a   : > { %v9175_v46 = vadd.f32 %v10709_v18, %v8539_v10  ;;  %4111 = vst [vmem:[%s7652_s15 + $0x280] sm:$0xff] %v3817_v31  ;;  %v3819_v37 = vmul.f32 %v3525_v3, %v2643_v9  ;;  %v3526_v60 = vadd.f32 1.0, %v5123_v62  ;;  %5136 = verf.f32 %v2948_v36  ;;  %v9184_v21 = vpop.f32.mrb[122].mxu0  ;;  %v9186_v61 = vpop.f32.mrb[121].mxu1 }
 0x31b   : > { %v3818_v28 = vmul.f32 %v3524_v57, %v2642_v41  ;;  %v2647_v12 = vmul.f32 0.5, %v9099_v42  ;;  %v2950_v6 = vmul.f32 0.70710677, %v9171_v26  ;;  %v9190_v33 = vpop.f32.mrb[123].mxu0  ;;  %v2649_v36 = vmul.f32 0.5, %v9103_v16  ;;  %v9205_v41 = vpop.f32.mrb[122].mxu1 }
 0x31c   : > { %10710 = vst [vmem:[#allocation26_spill] sm:$0xff] %v9190_v33  ;;  %v5125_v9 = vpop.eup %5124  ;;  %4113 = vst [vmem:[%s7652_s15 + $0x290] sm:$0xff] %v3819_v37  ;;  %v3820_v62 = vmul.f32 %v3526_v60, %v2644_v17  ;;  %v2953_v43 = vmul.f32 0.70710677, %v9175_v46  ;;  %v2955_v31 = vmul.f32 0.70710677, %v9182_v51  ;;  %v9199_v42 = vadd.f32 %v8661_v25, %v8563_v27 }
 0x31d   : > { %v5127_v3 = vpop.eup %5126  ;;  %4112 = vst [vmem:[%s7652_s15 + $0x288] sm:$0xff] %v3818_v28  ;;  %v3529_v18 = vadd.f32 1.0, %v5125_v9  ;;  %5138 = verf.f32 %v2950_v6  ;;  %v9203_v57 = vadd.f32 %v8664_v24, %v8579_v44  ;;  %10711 = vst [vmem:[#allocation36_spill] sm:$0xff] %v9205_v41  ;;  %v9210_v37 = vadd.f32 %v8674_v14, %v8539_v10  ;;  %v10712_v60 = vld [vmem:[#allocation52_spill] sm:$0xff]  ;;  %v9216_v25 = vpop.f32.mrb[124].mxu0 }
 0x31e   : > { %v5129_v17 = vpop.eup %5128  ;;  %4114 = vst [vmem:[%s7652_s15 + $0x298] sm:$0xff] %v3820_v62  ;;  %v3531_v16 = vadd.f32 1.0, %v5127_v3  ;;  %5140 = verf.f32 %v2953_v43  ;;  %v9214_v28 = vadd.f32 %v10712_v60, %v8541_v19  ;;  %10713 = vst [vmem:[#allocation35_spill] sm:$0xff] %v9216_v25  ;;  %v9218_v6 = vpop.f32.mrb[123].mxu1  ;;  %v2648_v62 = vmul.f32 0.5, %v9112_v58 }
 0x31f   : > { %10714 = vst [vmem:[#allocation34_spill] sm:$0xff] %v9218_v6  ;;  %v5131_v24 = vpop.eup %5130  ;;  %v3823_v9 = vmul.f32 %v3529_v18, %v2647_v12  ;;  %v3530_v3 = vadd.f32 1.0, %v5129_v17  ;;  %5142 = verf.f32 %v2955_v31  ;;  %v9221_v43 = vpop.f32.mrb[125].mxu0  ;;  %v2650_v14 = vmul.f32 0.5, %v9116_v50 }
 0x320   : > { %v3825_v41 = vmul.f32 %v3531_v16, %v2649_v36  ;;  %v3532_v33 = vadd.f32 1.0, %v5131_v24  ;;  %v2954_v60 = vmul.f32 0.70710677, %v9199_v42  ;;  %v2653_v6 = vmul.f32 0.5, %v9141_v54  ;;  %v9229_v58 = vpop.f32.mrb[124].mxu1  ;;  %v9234_v16 = vpop.f32.mrb[126].mxu0 }
 0x321   : > { %4117 = vst [vmem:[%s7652_s15 + $0x2b0] sm:$0xff] %v3823_v9  ;;  %v3824_v25 = vmul.f32 %v3530_v3, %v2648_v62  ;;  %v2956_v12 = vmul.f32 0.70710677, %v9203_v57  ;;  %v2959_v18 = vmul.f32 0.70710677, %v9210_v37  ;;  %v2655_v50 = vmul.f32 0.5, %v9146_v7 }
 0x322   : > { %v5133_v31 = vpop.eup %5132  ;;  %4119 = vst [vmem:[%s7652_s15 + $0x2c0] sm:$0xff] %v3825_v41  ;;  %v3826_v36 = vmul.f32 %v3532_v33, %v2650_v14  ;;  %5144 = verf.f32 %v2954_v60  ;;  %v2961_v17 = vmul.f32 0.70710677, %v9214_v28  ;;  %10715 = vst [vmem:[#allocation33_spill] sm:$0xff] %v9234_v16  ;;  %v9236_v24 = vpop.f32.mrb[125].mxu1  ;;  %v10717_v62 = vld [vmem:[#allocation55_spill] sm:$0xff]  ;;  %v9245_v33 = vadd.f32 %v8689_v35, %v8579_v44 }
 0x323   : > { %10716 = vst [vmem:[#allocation40_spill] sm:$0xff] %v9236_v24  ;;  %v5135_v54 = vpop.eup %5134  ;;  %4118 = vst [vmem:[%s7652_s15 + $0x2b8] sm:$0xff] %v3824_v25  ;;  %v3535_v9 = vadd.f32 1.0, %v5133_v31  ;;  %5146 = verf.f32 %v2956_v12  ;;  %v9241_v3 = vadd.f32 %v10717_v62, %v8563_v27  ;;  %v9247_v7 = vpop.f32.mrb[127].mxu0  ;;  %v10719_v60 = vld [vmem:[#allocation54_spill] sm:$0xff]  ;;  %v9256_v12 = vadd.f32 %v8705_v1, %v8541_v19 }
 0x324   : > { %10718 = vst [vmem:[#allocation39_spill] sm:$0xff] %v9247_v7  ;;  %v5137_v41 = vpop.eup %5136  ;;  %4120 = vst [vmem:[%s7652_s15 + $0x2c8] sm:$0xff] %v3826_v36  ;;  %v3537_v14 = vadd.f32 1.0, %v5135_v54  ;;  %5148 = verf.f32 %v2959_v18  ;;  %v9252_v25 = vadd.f32 %v10719_v60, %v8539_v10  ;;  %v2654_v62 = vmul.f32 0.5, %v9150_v55  ;;  %v9259_v7 = vpop.f32.mrb[126].mxu1 }
 0x325   : > { %v3829_v31 = vmul.f32 %v3535_v9, %v2653_v6  ;;  %v3536_v35 = vadd.f32 1.0, %v5137_v41  ;;  %5150 = verf.f32 %v2961_v17  ;;  %10720 = vst [vmem:[#allocation38_spill] sm:$0xff] %v9259_v7  ;;  %v2656_v54 = vmul.f32 0.5, %v9171_v26  ;;  %v9264_v24 = vpop.f32.mrb[128].mxu0  ;;  %v9270_v41 = vpop.f32.mrb[127].mxu1  ;;  %v10724_v7 = vld [vmem:[#allocation56_spill] sm:$0xff] }
 0x326   : > { %v3831_v36 = vmul.f32 %v3537_v14, %v2655_v50  ;;  %v2960_v18 = vmul.f32 0.70710677, %v9241_v3  ;;  %v2962_v60 = vmul.f32 0.70710677, %v9245_v33  ;;  %10721 = vst [vmem:[#allocation37_spill] sm:$0xff] %v9264_v24  ;;  %v2659_v55 = vmul.f32 0.5, %v9175_v46 }
 0x327   : > { %v5139_v1 = vpop.eup %5138  ;;  %4123 = vst [vmem:[%s7652_s15 + $0x2e0] sm:$0xff] %v3829_v31  ;;  %v3830_v6 = vmul.f32 %v3536_v35, %v2654_v62  ;;  %v2661_v17 = vmul.f32 0.5, %v9182_v51  ;;  %v2965_v9 = vmul.f32 0.70710677, %v9252_v25  ;;  %10722 = vst [vmem:[#allocation42_spill] sm:$0xff] %v9270_v41  ;;  %v9272_v50 = vpop.f32.mrb[129].mxu0  ;;  %v9278_v31 = vadd.f32 %v10724_v7, %v8563_v27 }
 0x328   : > { %10723 = vst [vmem:[#allocation41_spill] sm:$0xff] %v9272_v50  ;;  %v5141_v26 = vpop.eup %5140  ;;  %4125 = vst [vmem:[%s7652_s15 + $0x2f0] sm:$0xff] %v3831_v36  ;;  %v3538_v14 = vadd.f32 1.0, %v5139_v1  ;;  %5152 = verf.f32 %v2960_v18  ;;  %v2967_v24 = vmul.f32 0.70710677, %v9256_v12  ;;  %v10725_v51 = vld [vmem:[#allocation57_spill] sm:$0xff] }
 0x329   : > { %v5143_v62 = vpop.eup %5142  ;;  %4124 = vst [vmem:[%s7652_s15 + $0x2e8] sm:$0xff] %v3830_v6  ;;  %v3541_v46 = vadd.f32 1.0, %v5141_v26  ;;  %5154 = verf.f32 %v2962_v60  ;;  %v9283_v35 = vadd.f32 %v10725_v51, %v8579_v44  ;;  %v10726_v50 = vld [vmem:[#allocation58_spill] sm:$0xff]  ;;  %v2660_v41 = vmul.f32 0.5, %v9199_v42  ;;  %v9290_v7 = vpop.f32.mrb[128].mxu1 }
 0x32a   : > { %v9287_v36 = vadd.f32 %v10726_v50, %v8539_v10  ;;  %v3832_v18 = vmul.f32 %v3538_v14, %v2656_v54  ;;  %v3543_v1 = vadd.f32 1.0, %v5143_v62  ;;  %5156 = verf.f32 %v2965_v9  ;;  %10727 = vst [vmem:[#allocation44_spill] sm:$0xff] %v9290_v7  ;;  %v9292_v6 = vpop.f32.mrb[130].mxu0  ;;  %v9300_v14 = vpop.f32.mrb[129].mxu1 }
 0x32b   : > { %10728 = vst [vmem:[#allocation43_spill] sm:$0xff] %v9292_v6  ;;  %v3835_v26 = vmul.f32 %v3541_v46, %v2659_v55  ;;  %v2662_v60 = vmul.f32 0.5, %v9203_v57  ;;  %5158 = verf.f32 %v2967_v24  ;;  %v2966_v51 = vmul.f32 0.70710677, %v9278_v31  ;;  %10729 = vst [vmem:[#allocation45_spill] sm:$0xff] %v9300_v14  ;;  %v10730_v57 = vld [vmem:[#allocation59_spill] sm:$0xff] }
 0x32c   : > { %v5145_v16 = vpop.eup %5144  ;;  %4126 = vst [vmem:[%s7652_s15 + $0x2f8] sm:$0xff] %v3832_v18  ;;  %v3837_v50 = vmul.f32 %v3543_v1, %v2661_v17  ;;  %v2665_v54 = vmul.f32 0.5, %v9210_v37  ;;  %v2968_v42 = vmul.f32 0.70710677, %v9283_v35  ;;  %v2971_v9 = vmul.f32 0.70710677, %v9287_v36 }
 0x32d   : > { %v5147_v62 = vpop.eup %5146  ;;  %4129 = vst [vmem:[%s7652_s15 + $0x310] sm:$0xff] %v3835_v26  ;;  %v3542_v55 = vadd.f32 1.0, %v5145_v16  ;;  %5160 = verf.f32 %v2966_v51  ;;  %v9305_v24 = vadd.f32 %v10730_v57, %v8541_v19  ;;  %v10731_v46 = vld [vmem:[#allocation60_spill] sm:$0xff]  ;;  %v9311_v17 = vpop.f32.mrb[131].mxu0  ;;  %v10733_v14 = vld [vmem:[#allocation61_spill] sm:$0xff]  ;;  %v9320_v16 = vadd.f32 %v8752_v45, %v8539_v10 }
 0x32e   : > { %v9309_v18 = vadd.f32 %v10731_v46, %v8563_v27  ;;  %10732 = vst [vmem:[#allocation47_spill] sm:$0xff] %v9311_v17  ;;  %v5149_v37 = vpop.eup %5148  ;;  %4131 = vst [vmem:[%s7652_s15 + $0x320] sm:$0xff] %v3837_v50  ;;  %v3544_v1 = vadd.f32 1.0, %v5147_v62  ;;  %5162 = verf.f32 %v2968_v42  ;;  %v9316_v26 = vadd.f32 %v10733_v14, %v8579_v44  ;;  %v9325_v7 = vpop.f32.mrb[130].mxu1 }
 0x32f   : > { %v5151_v51 = vpop.eup %5150  ;;  %v3836_v57 = vmul.f32 %v3542_v55, %v2660_v41  ;;  %v3547_v46 = vadd.f32 1.0, %v5149_v37  ;;  %v2667_v6 = vmul.f32 0.5, %v9214_v28  ;;  %5164 = verf.f32 %v2971_v9  ;;  %v9327_v14 = vpop.f32.mrb[132].mxu0 }
 0x330   : > { %v3838_v17 = vmul.f32 %v3544_v1, %v2662_v60  ;;  %v3549_v50 = vadd.f32 1.0, %v5151_v51  ;;  %v2666_v62 = vmul.f32 0.5, %v9241_v3  ;;  %v2973_v42 = vmul.f32 0.70710677, %v9305_v24  ;;  %v9336_v1 = vpop.f32.mrb[131].mxu1  ;;  %v9338_v51 = vpop.f32.mrb[133].mxu0 }
 0x331   : > { %4130 = vst [vmem:[%s7652_s15 + $0x318] sm:$0xff] %v3836_v57  ;;  %v3841_v45 = vmul.f32 %v3547_v46, %v2665_v54  ;;  %v2668_v41 = vmul.f32 0.5, %v9245_v33  ;;  %v2972_v55 = vmul.f32 0.70710677, %v9309_v18  ;;  %v2974_v28 = vmul.f32 0.70710677, %v9316_v26 }
 0x332   : > { %v5153_v60 = vpop.eup %5152  ;;  %4132 = vst [vmem:[%s7652_s15 + $0x328] sm:$0xff] %v3838_v17  ;;  %v3843_v9 = vmul.f32 %v3549_v50, %v2667_v6  ;;  %v2671_v3 = vmul.f32 0.5, %v9252_v25  ;;  %5166 = verf.f32 %v2973_v42  ;;  %v2977_v37 = vmul.f32 0.70710677, %v9320_v16 }
 0x333   : > { %v5155_v54 = vpop.eup %5154  ;;  %4135 = vst [vmem:[%s7652_s15 + $0x340] sm:$0xff] %v3841_v45  ;;  %v3548_v33 = vadd.f32 1.0, %v5153_v60  ;;  %5168 = verf.f32 %v2972_v55  ;;  %v9343_v57 = vadd.f32 %v8756_v47, %v8541_v19  ;;  %v9347_v6 = vadd.f32 %v8758_v63, %v8563_v27 }
 0x334   : > { %v5157_v25 = vpop.eup %5156  ;;  %4137 = vst [vmem:[%s7652_s15 + $0x350] sm:$0xff] %v3843_v9  ;;  %v3550_v17 = vadd.f32 1.0, %v5155_v54  ;;  %v2673_v46 = vmul.f32 0.5, %v9256_v12  ;;  %5170 = verf.f32 %v2974_v28  ;;  %v9353_v50 = vadd.f32 %v8764_v59, %v8579_v44  ;;  %v9361_v28 = vpop.f32.mrb[132].mxu1 }
 0x335   : > { %v5159_v42 = vpop.eup %5158  ;;  %v3842_v45 = vmul.f32 %v3548_v33, %v2666_v62  ;;  %v3553_v55 = vadd.f32 1.0, %v5157_v25  ;;  %5172 = verf.f32 %v2977_v37  ;;  %v9357_v47 = vadd.f32 %v8777_v32, %v8539_v10  ;;  %v9363_v54 = vpop.f32.mrb[134].mxu0 }
 0x336   : > { %v3844_v63 = vmul.f32 %v3550_v17, %v2668_v41  ;;  %v3555_v60 = vadd.f32 1.0, %v5159_v42  ;;  %v2672_v9 = vmul.f32 0.5, %v9278_v31  ;;  %v2979_v12 = vmul.f32 0.70710677, %v9343_v57  ;;  %10734 = vst [vmem:[#allocation46_spill] sm:$0xff] %v9363_v54  ;;  %v9369_v41 = vpop.f32.mrb[133].mxu1 }
 0x337   : > { %v5161_v59 = vpop.eup %5160  ;;  %4136 = vst [vmem:[%s7652_s15 + $0x348] sm:$0xff] %v3842_v45  ;;  %v3847_v62 = vmul.f32 %v3553_v55, %v2671_v3  ;;  %v2674_v37 = vmul.f32 0.5, %v9283_v35  ;;  %v2978_v33 = vmul.f32 0.70710677, %v9347_v6  ;;  %v2980_v32 = vmul.f32 0.70710677, %v9353_v50 }
 0x338   : > { %v5163_v31 = vpop.eup %5162  ;;  %4138 = vst [vmem:[%s7652_s15 + $0x358] sm:$0xff] %v3844_v63  ;;  %v3849_v25 = vmul.f32 %v3555_v60, %v2673_v46  ;;  %v3554_v17 = vadd.f32 1.0, %v5161_v59  ;;  %v2677_v42 = vmul.f32 0.5, %v9287_v36  ;;  %5174 = verf.f32 %v2979_v12  ;;  %v9373_v54 = vpop.f32.mrb[135].mxu0 }
 0x339   : > { %v5165_v45 = vpop.eup %5164  ;;  %4141 = vst [vmem:[%s7652_s15 + $0x370] sm:$0xff] %v3847_v62  ;;  %v3556_v35 = vadd.f32 1.0, %v5163_v31  ;;  %5176 = verf.f32 %v2978_v33  ;;  %v2983_v3 = vmul.f32 0.70710677, %v9357_v47  ;;  %v9379_v55 = vadd.f32 %v8784_v39, %v8541_v19 }
 0x33a   : > { %4143 = vst [vmem:[%s7652_s15 + $0x380] sm:$0xff] %v3849_v25  ;;  %v3848_v63 = vmul.f32 %v3554_v17, %v2672_v9  ;;  %v3559_v46 = vadd.f32 1.0, %v5165_v45  ;;  %5178 = verf.f32 %v2980_v32  ;;  %v9384_v36 = vadd.f32 %v8786_v53, %v8563_v27  ;;  %v9395_v53 = vpop.f32.mrb[134].mxu1  ;;  %v10736_v25 = vld [vmem:[#allocation62_spill] sm:$0xff] }
 0x33b   : > { %v3850_v60 = vmul.f32 %v3556_v35, %v2674_v37  ;;  %v2679_v12 = vmul.f32 0.5, %v9305_v24  ;;  %5180 = verf.f32 %v2983_v3  ;;  %v2985_v59 = vmul.f32 0.70710677, %v9379_v55  ;;  %v9397_v37 = vpop.f32.mrb[136].mxu0  ;;  %v9408_v45 = vpop.f32.mrb[135].mxu1 }
 0x33c   : > { %v5167_v62 = vpop.eup %5166  ;;  %4142 = vst [vmem:[%s7652_s15 + $0x378] sm:$0xff] %v3848_v63  ;;  %v3853_v39 = vmul.f32 %v3559_v46, %v2677_v42  ;;  %v2678_v33 = vmul.f32 0.5, %v9309_v18  ;;  %v2984_v9 = vmul.f32 0.70710677, %v9384_v36  ;;  %v9393_v32 = vadd.f32 %v8791_v30, %v8579_v44  ;;  %10735 = vst [vmem:[#allocation49_spill] sm:$0xff] %v9397_v37  ;;  %v10737_v18 = vld [vmem:[#allocation28_spill] sm:$0xff] }
 0x33d   : > { %v5169_v24 = vpop.eup %5168  ;;  %4144 = vst [vmem:[%s7652_s15 + $0x388] sm:$0xff] %v3850_v60  ;;  %v3561_v31 = vadd.f32 1.0, %v5167_v62  ;;  %5182 = verf.f32 %v2985_v59  ;;  %v9402_v17 = vadd.f32 %v10736_v25, %v8539_v10  ;;  %v9406_v42 = vadd.f32 %v10737_v18, %v8541_v19  ;;  %10738 = vst [vmem:[#allocation48_spill] sm:$0xff] %v9408_v45  ;;  %v9413_v46 = vpop.f32.mrb[137].mxu0 }
 0x33e   : > { %v5171_v30 = vpop.eup %5170  ;;  %4147 = vst [vmem:[%s7652_s15 + $0x3a0] sm:$0xff] %v3853_v39  ;;  %v3560_v35 = vadd.f32 1.0, %v5169_v24  ;;  %v2680_v3 = vmul.f32 0.5, %v9316_v26  ;;  %5184 = verf.f32 %v2984_v9  ;;  %v2986_v63 = vmul.f32 0.70710677, %v9393_v32  ;;  %10739 = vst [vmem:[#allocation51_spill] sm:$0xff] %v9413_v46 }
 0x33f   : > { %v5173_v60 = vpop.eup %5172  ;;  %v3855_v59 = vmul.f32 %v3561_v31, %v2679_v12  ;;  %v3562_v62 = vadd.f32 1.0, %v5171_v30  ;;  %v2683_v25 = vmul.f32 0.5, %v9320_v16  ;;  %v2989_v18 = vmul.f32 0.70710677, %v9402_v17  ;;  %v10740_v24 = vld [vmem:[#allocation63_spill] sm:$0xff]  ;;  %v10741_v31 = vld [vmem:[#allocation64_spill] sm:$0xff] }
 0x340   : > { %v3854_v45 = vmul.f32 %v3560_v35, %v2678_v33  ;;  %v3565_v37 = vadd.f32 1.0, %v5173_v60  ;;  %v2685_v39 = vmul.f32 0.5, %v9343_v57  ;;  %5186 = verf.f32 %v2986_v63  ;;  %v9434_v35 = vpop.f32.mrb[136].mxu1 }
 0x341   : > { %4149 = vst [vmem:[%s7652_s15 + $0x3b0] sm:$0xff] %v3855_v59  ;;  %v3856_v26 = vmul.f32 %v3562_v62, %v2680_v3  ;;  %5188 = verf.f32 %v2989_v18  ;;  %v2991_v9 = vmul.f32 0.70710677, %v9406_v42  ;;  %v9422_v46 = vadd.f32 %v10740_v24, %v8563_v27  ;;  %v9436_v3 = vpop.f32.mrb[138].mxu0 }
 0x342   : > { %v5175_v12 = vpop.eup %5174  ;;  %4148 = vst [vmem:[%s7652_s15 + $0x3a8] sm:$0xff] %v3854_v45  ;;  %v3859_v16 = vmul.f32 %v3565_v37, %v2683_v25  ;;  %v2684_v33 = vmul.f32 0.5, %v9347_v6  ;;  %v9428_v57 = vadd.f32 %v8823_v23, %v8579_v44  ;;  %v9432_v30 = vadd.f32 %v10741_v31, %v8539_v10  ;;  %v9444_v23 = vpop.f32.mrb[137].mxu1 }
 0x343   : > { %v5177_v63 = vpop.eup %5176  ;;  %4150 = vst [vmem:[%s7652_s15 + $0x3b8] sm:$0xff] %v3856_v26  ;;  %v3567_v60 = vadd.f32 1.0, %v5175_v12  ;;  %5190 = verf.f32 %v2991_v9  ;;  %v2990_v37 = vmul.f32 0.70710677, %v9422_v46  ;;  %v9442_v6 = vadd.f32 %v8835_v40, %v8541_v19  ;;  %10742 = vst [vmem:[#allocation50_spill] sm:$0xff] %v9444_v23  ;;  %v9450_v26 = vpop.f32.mrb[139].mxu0 }
 0x344   : > { %v5179_v45 = vpop.eup %5178  ;;  %4153 = vst [vmem:[%s7652_s15 + $0x3d0] sm:$0xff] %v3859_v16  ;;  %v3566_v59 = vadd.f32 1.0, %v5177_v63  ;;  %v2686_v62 = vmul.f32 0.5, %v9353_v50  ;;  %v2689_v25 = vmul.f32 0.5, %v9357_v47  ;;  %v2992_v18 = vmul.f32 0.70710677, %v9428_v57 }
 0x345   : > { %v5181_v9 = vpop.eup %5180  ;;  %v3861_v24 = vmul.f32 %v3567_v60, %v2685_v39  ;;  %v3568_v12 = vadd.f32 1.0, %v5179_v45  ;;  %5192 = verf.f32 %v2990_v37  ;;  %v2995_v40 = vmul.f32 0.70710677, %v9432_v30  ;;  %v10743_v45 = vld [vmem:[#allocation65_spill] sm:$0xff] }
 0x346   : > { %v3860_v31 = vmul.f32 %v3566_v59, %v2684_v33  ;;  %v3571_v23 = vadd.f32 1.0, %v5181_v9  ;;  %v2691_v16 = vmul.f32 0.5, %v9379_v55  ;;  %5194 = verf.f32 %v2992_v18  ;;  %v10744_v59 = vld [vmem:[#allocation66_spill] sm:$0xff]  ;;  %v9471_v9 = vpop.f32.mrb[140].mxu0 }
 0x347   : > { %v5183_v50 = vpop.eup %5182  ;;  %4155 = vst [vmem:[%s7652_s15 + $0x3e0] sm:$0xff] %v3861_v24  ;;  %v3862_v47 = vmul.f32 %v3568_v12, %v2686_v62  ;;  %5196 = verf.f32 %v2995_v40  ;;  %v2997_v63 = vmul.f32 0.70710677, %v9442_v6  ;;  %v9458_v39 = vadd.f32 %v8837_v56, %v8563_v27  ;;  %v9469_v62 = vpop.f32.mrb[138].mxu1  ;;  %10745 = vst [vmem:[#allocation53_spill] sm:$0xff] %v9471_v9 }
 0x348   : > { %v5185_v60 = vpop.eup %5184  ;;  %4154 = vst [vmem:[%s7652_s15 + $0x3d8] sm:$0xff] %v3860_v31  ;;  %v3865_v37 = vmul.f32 %v3571_v23, %v2689_v25  ;;  %v3573_v33 = vadd.f32 1.0, %v5183_v50  ;;  %v9463_v55 = vadd.f32 %v10743_v45, %v8579_v44  ;;  %v9467_v18 = vadd.f32 %v10744_v59, %v8539_v10  ;;  %v9480_v45 = vpop.f32.mrb[139].mxu1 }
 0x349   : > { %4156 = vst [vmem:[%s7652_s15 + $0x3e8] sm:$0xff] %v3862_v47  ;;  %v2690_v56 = vmul.f32 0.5, %v9384_v36  ;;  %v3572_v24 = vadd.f32 1.0, %v5185_v60  ;;  %5198 = verf.f32 %v2997_v63  ;;  %v2996_v23 = vmul.f32 0.70710677, %v9458_v39  ;;  %10746 = vst [vmem:[#allocation52_spill] sm:$0xff] %v9480_v45 }
 0x34a   : > { %v5187_v25 = vpop.eup %5186  ;;  %4159 = vst [vmem:[%s7652_s15 + $0x400] sm:$0xff] %v3865_v37  ;;  %v3867_v12 = vmul.f32 %v3573_v33, %v2691_v16  ;;  %v2692_v40 = vmul.f32 0.5, %v9393_v32  ;;  %v2695_v31 = vmul.f32 0.5, %v9402_v17  ;;  %v2998_v50 = vmul.f32 0.70710677, %v9463_v55  ;;  %v9482_v47 = vpop.f32.mrb[141].mxu0 }
 0x34b   : > { %10747 = vst [vmem:[#allocation55_spill] sm:$0xff] %v9482_v47  ;;  %v5189_v36 = vpop.eup %5188  ;;  %v3866_v60 = vmul.f32 %v3572_v24, %v2690_v56  ;;  %v3574_v59 = vadd.f32 1.0, %v5187_v25  ;;  %5200 = verf.f32 %v2996_v23  ;;  %v3001_v63 = vmul.f32 0.70710677, %v9467_v18  ;;  %v10748_v32 = vld [vmem:[#allocation67_spill] sm:$0xff]  ;;  %v10749_v17 = vld [vmem:[#allocation68_spill] sm:$0xff] }
 0x34c   : > { %4161 = vst [vmem:[%s7652_s15 + $0x410] sm:$0xff] %v3867_v12  ;;  %v3577_v37 = vadd.f32 1.0, %v5189_v36  ;;  %5202 = verf.f32 %v2998_v50  ;;  %v9488_v16 = vadd.f32 %v10748_v32, %v8541_v19  ;;  %v9492_v33 = vadd.f32 %v10749_v17, %v8563_v27  ;;  %v10750_v56 = vld [vmem:[#allocation69_spill] sm:$0xff]  ;;  %v10751_v23 = vld [vmem:[#allocation2_spill] sm:$0xff]  ;;  %v9505_v17 = vpop.f32.mrb[140].mxu1 }
 0x34d   : > { %v5191_v45 = vpop.eup %5190  ;;  %4160 = vst [vmem:[%s7652_s15 + $0x408] sm:$0xff] %v3866_v60  ;;  %v3868_v47 = vmul.f32 %v3574_v59, %v2692_v40  ;;  %5204 = verf.f32 %v3001_v63  ;;  %v9497_v24 = vadd.f32 %v10750_v56, %v8579_v44  ;;  %v9501_v25 = vadd.f32 %v10751_v23, %v8539_v10  ;;  %10752 = vst [vmem:[#allocation54_spill] sm:$0xff] %v9505_v17  ;;  %v9507_v60 = vpop.f32.mrb[142].mxu0 }
 0x34e   : > { %v3871_v12 = vmul.f32 %v3577_v37, %v2695_v31  ;;  %v2697_v50 = vmul.f32 0.5, %v9406_v42  ;;  %v3579_v36 = vadd.f32 1.0, %v5191_v45  ;;  %v3003_v32 = vmul.f32 0.70710677, %v9488_v16  ;;  %10753 = vst [vmem:[#allocation56_spill] sm:$0xff] %v9507_v60  ;;  %v9516_v17 = vpop.f32.mrb[141].mxu1 }
 0x34f   : > { %v5193_v40 = vpop.eup %5192  ;;  %4162 = vst [vmem:[%s7652_s15 + $0x418] sm:$0xff] %v3868_v47  ;;  %v2696_v59 = vmul.f32 0.5, %v9422_v46  ;;  %v2698_v63 = vmul.f32 0.5, %v9428_v57  ;;  %v3002_v56 = vmul.f32 0.70710677, %v9492_v33  ;;  %v2701_v23 = vmul.f32 0.5, %v9432_v30 }
 0x350   : > { %v3004_v31 = vmul.f32 0.70710677, %v9497_v24  ;;  %v5195_v37 = vpop.eup %5194  ;;  %4165 = vst [vmem:[%s7652_s15 + $0x430] sm:$0xff] %v3871_v12  ;;  %v3873_v42 = vmul.f32 %v3579_v36, %v2697_v50  ;;  %v3578_v45 = vadd.f32 1.0, %v5193_v40  ;;  %5206 = verf.f32 %v3003_v32  ;;  %v9518_v60 = vpop.f32.mrb[143].mxu0  ;;  %v10755_v30 = vld [vmem:[#allocation4_spill] sm:$0xff] }
 0x351   : > { %10754 = vst [vmem:[#allocation57_spill] sm:$0xff] %v9518_v60  ;;  %v5197_v46 = vpop.eup %5196  ;;  %v3580_v47 = vadd.f32 1.0, %v5195_v37  ;;  %5208 = verf.f32 %v3002_v56  ;;  %v3007_v57 = vmul.f32 0.70710677, %v9501_v25  ;;  %v9523_v9 = vadd.f32 %v8890_v49, %v8541_v19 }
 0x352   : > { %4167 = vst [vmem:[%s7652_s15 + $0x440] sm:$0xff] %v3873_v42  ;;  %v3872_v12 = vmul.f32 %v3578_v45, %v2696_v59  ;;  %v3583_v50 = vadd.f32 1.0, %v5197_v46  ;;  %5210 = verf.f32 %v3004_v31  ;;  %v9528_v36 = vadd.f32 %v10755_v30, %v8563_v27 }
 0x353   : > { %v5199_v32 = vpop.eup %5198  ;;  %v3874_v40 = vmul.f32 %v3580_v47, %v2698_v63  ;;  %v2703_v37 = vmul.f32 0.5, %v9442_v6  ;;  %5212 = verf.f32 %v3007_v57  ;;  %v3009_v56 = vmul.f32 0.70710677, %v9523_v9  ;;  %v10756_v6 = vld [vmem:[#allocation30_spill] sm:$0xff] }
 0x354   : > { %4166 = vst [vmem:[%s7652_s15 + $0x438] sm:$0xff] %v3872_v12  ;;  %v3877_v49 = vmul.f32 %v3583_v50, %v2701_v23  ;;  %v3585_v60 = vadd.f32 1.0, %v5199_v32  ;;  %v2702_v42 = vmul.f32 0.5, %v9458_v39  ;;  %v3008_v59 = vmul.f32 0.70710677, %v9528_v36  ;;  %v9548_v23 = vpop.f32.mrb[142].mxu1 }
 0x355   : > { %v5201_v31 = vpop.eup %5200  ;;  %4168 = vst [vmem:[%s7652_s15 + $0x448] sm:$0xff] %v3874_v40  ;;  %5214 = verf.f32 %v3009_v56  ;;  %v9538_v45 = vadd.f32 %v8896_v5, %v8579_v44  ;;  %v9542_v63 = vadd.f32 %v10756_v6, %v8539_v10  ;;  %v9546_v46 = vadd.f32 %v8917_v22, %v8541_v19  ;;  %v9550_v39 = vpop.f32.mrb[144].mxu0 }
 0x356   : > { %v5203_v47 = vpop.eup %5202  ;;  %4171 = vst [vmem:[%s7652_s15 + $0x460] sm:$0xff] %v3877_v49  ;;  %v3879_v57 = vmul.f32 %v3585_v60, %v2703_v37  ;;  %v3584_v12 = vadd.f32 1.0, %v5201_v31  ;;  %5216 = verf.f32 %v3008_v59  ;;  %v9555_v5 = vadd.f32 %v8919_v20, %v8563_v27  ;;  %v9557_v50 = vpop.f32.mrb[143].mxu1 }
 0x357   : > { %v9559_v30 = vpop.f32.mrb[145].mxu0  ;;  %v5205_v22 = vpop.eup %5204  ;;  %v2704_v32 = vmul.f32 0.5, %v9463_v55  ;;  %v3586_v40 = vadd.f32 1.0, %v5203_v47  ;;  %v2707_v56 = vmul.f32 0.5, %v9467_v18  ;;  %v3010_v49 = vmul.f32 0.70710677, %v9538_v45 }
 0x358   : > { %10757 = vst [vmem:[#allocation58_spill] sm:$0xff] %v9559_v30  ;;  %4173 = vst [vmem:[%s7652_s15 + $0x470] sm:$0xff] %v3879_v57  ;;  %v3878_v60 = vmul.f32 %v3584_v12, %v2702_v42  ;;  %v3589_v37 = vadd.f32 1.0, %v5205_v22  ;;  %v2709_v20 = vmul.f32 0.5, %v9488_v16  ;;  %v3013_v59 = vmul.f32 0.70710677, %v9542_v63 }
 0x359   : > { %v3880_v31 = vmul.f32 %v3586_v40, %v2704_v32  ;;  %v2708_v6 = vmul.f32 0.5, %v9492_v33  ;;  %5218 = verf.f32 %v3010_v49  ;;  %v3015_v30 = vmul.f32 0.70710677, %v9546_v46  ;;  %v9575_v16 = vpop.f32.mrb[144].mxu1  ;;  %v9577_v57 = vpop.f32.mrb[146].mxu0 }
 0x35a   : > { %v5207_v55 = vpop.eup %5206  ;;  %4172 = vst [vmem:[%s7652_s15 + $0x468] sm:$0xff] %v3878_v60  ;;  %v3883_v18 = vmul.f32 %v3589_v37, %v2707_v56  ;;  %5220 = verf.f32 %v3013_v59  ;;  %v3014_v47 = vmul.f32 0.70710677, %v9555_v5  ;;  %v9573_v42 = vadd.f32 %v8923_v0, %v8579_v44  ;;  %v9588_v40 = vpop.f32.mrb[145].mxu1 }
 0x35b   : > { %v5209_v12 = vpop.eup %5208  ;;  %4174 = vst [vmem:[%s7652_s15 + $0x478] sm:$0xff] %v3880_v31  ;;  %v3591_v33 = vadd.f32 1.0, %v5207_v55  ;;  %5222 = verf.f32 %v3015_v30  ;;  %v9582_v22 = vadd.f32 %v8937_v38, %v8539_v10  ;;  %v9586_v32 = vadd.f32 %v8948_v8, %v8541_v19  ;;  %v9593_v30 = vpop.f32.mrb[147].mxu0 }
 0x35c   : > { %v5211_v0 = vpop.eup %5210  ;;  %4177 = vst [vmem:[%s7652_s15 + $0x490] sm:$0xff] %v3883_v18  ;;  %v3590_v56 = vadd.f32 1.0, %v5209_v12  ;;  %v2710_v49 = vmul.f32 0.5, %v9497_v24  ;;  %5224 = verf.f32 %v3014_v47  ;;  %v3016_v60 = vmul.f32 0.70710677, %v9573_v42  ;;  %10758 = vst [vmem:[#allocation59_spill] sm:$0xff] %v9593_v30 }
 0x35d   : > { %v5213_v37 = vpop.eup %5212  ;;  %v3885_v38 = vmul.f32 %v3591_v33, %v2709_v20  ;;  %v3592_v59 = vadd.f32 1.0, %v5211_v0  ;;  %v2713_v8 = vmul.f32 0.5, %v9501_v25  ;;  %v3019_v31 = vmul.f32 0.70710677, %v9582_v22  ;;  %v10759_v20 = vld [vmem:[#allocation29_spill] sm:$0xff] }
 0x35e   : > { %v3884_v55 = vmul.f32 %v3590_v56, %v2708_v6  ;;  %v3595_v18 = vadd.f32 1.0, %v5213_v37  ;;  %v2715_v12 = vmul.f32 0.5, %v9523_v9  ;;  %5226 = verf.f32 %v3016_v60  ;;  %v10760_v56 = vld [vmem:[#allocation3_spill] sm:$0xff] }
 0x35f   : > { %v5215_v24 = vpop.eup %5214  ;;  %4179 = vst [vmem:[%s7652_s15 + $0x4a0] sm:$0xff] %v3885_v38  ;;  %v3886_v47 = vmul.f32 %v3592_v59, %v2710_v49  ;;  %5228 = verf.f32 %v3019_v31  ;;  %v3021_v30 = vmul.f32 0.70710677, %v9586_v32  ;;  %v9602_v33 = vadd.f32 %v10759_v20, %v8563_v27 }
 0x360   : > { %v5217_v25 = vpop.eup %5216  ;;  %4178 = vst [vmem:[%s7652_s15 + $0x498] sm:$0xff] %v3884_v55  ;;  %v3889_v0 = vmul.f32 %v3595_v18, %v2713_v8  ;;  %v3597_v6 = vadd.f32 1.0, %v5215_v24  ;;  %v9607_v37 = vadd.f32 %v10760_v56, %v8579_v44  ;;  %v9611_v9 = vadd.f32 %v8962_v4, %v8539_v10 }
 0x361   : > { %4180 = vst [vmem:[%s7652_s15 + $0x4a8] sm:$0xff] %v3886_v47  ;;  %v2714_v49 = vmul.f32 0.5, %v9528_v36  ;;  %v3596_v60 = vadd.f32 1.0, %v5217_v25  ;;  %5230 = verf.f32 %v3021_v30  ;;  %v3020_v38 = vmul.f32 0.70710677, %v9602_v33 }
 0x362   : > { %4183 = vst [vmem:[%s7652_s15 + $0x4c0] sm:$0xff] %v3889_v0  ;;  %v3891_v59 = vmul.f32 %v3597_v6, %v2715_v12  ;;  %v2716_v8 = vmul.f32 0.5, %v9538_v45  ;;  %v2719_v31 = vmul.f32 0.5, %v9542_v63  ;;  %v3022_v55 = vmul.f32 0.70710677, %v9607_v37 }
 0x363   : > { %v5219_v18 = vpop.eup %5218  ;;  %v3890_v4 = vmul.f32 %v3596_v60, %v2714_v49  ;;  %5232 = verf.f32 %v3020_v38  ;;  %v3025_v24 = vmul.f32 0.70710677, %v9611_v9  ;;  %v9623_v36 = vadd.f32 %v8966_v13, %v8541_v19 }
 0x364   : > { %v5221_v30 = vpop.eup %5220  ;;  %4185 = vst [vmem:[%s7652_s15 + $0x4d0] sm:$0xff] %v3891_v59  ;;  %v3598_v47 = vadd.f32 1.0, %v5219_v18  ;;  %5234 = verf.f32 %v3022_v55  ;;  %v9628_v45 = vadd.f32 %v8968_v29, %v8563_v27  ;;  %v9632_v63 = vadd.f32 %v8979_v11, %v8579_v44 }
 0x365   : > { %v5223_v12 = vpop.eup %5222  ;;  %4184 = vst [vmem:[%s7652_s15 + $0x4c8] sm:$0xff] %v3890_v4  ;;  %v3601_v20 = vadd.f32 1.0, %v5221_v30  ;;  %v2721_v25 = vmul.f32 0.5, %v9546_v46  ;;  %5236 = verf.f32 %v3025_v24  ;;  %v3027_v13 = vmul.f32 0.70710677, %v9623_v36  ;;  %v10762_v24 = vld [vmem:[#allocation7_spill] sm:$0xff] }
 0x366   : > { %v5225_v0 = vpop.eup %5224  ;;  %v3892_v6 = vmul.f32 %v3598_v47, %v2716_v8  ;;  %v3603_v56 = vadd.f32 1.0, %v5223_v12  ;;  %v2720_v29 = vmul.f32 0.5, %v9555_v5  ;;  %v3026_v49 = vmul.f32 0.70710677, %v9628_v45  ;;  %v10761_v8 = vld [vmem:[#allocation5_spill] sm:$0xff] }
 0x367   : > { %v3895_v60 = vmul.f32 %v3601_v20, %v2719_v31  ;;  %v3602_v11 = vadd.f32 1.0, %v5225_v0  ;;  %v2722_v38 = vmul.f32 0.5, %v9573_v42  ;;  %5238 = verf.f32 %v3027_v13  ;;  %v10763_v42 = vld [vmem:[#allocation9_spill] sm:$0xff] }
 0x368   : > { %v5227_v59 = vpop.eup %5226  ;;  %4186 = vst [vmem:[%s7652_s15 + $0x4d8] sm:$0xff] %v3892_v6  ;;  %v3897_v46 = vmul.f32 %v3603_v56, %v2721_v25  ;;  %5240 = verf.f32 %v3026_v49  ;;  %v3028_v55 = vmul.f32 0.70710677, %v9632_v63  ;;  %v9644_v18 = vadd.f32 %v10761_v8, %v8539_v10 }
 0x369   : > { %v5229_v5 = vpop.eup %5228  ;;  %4189 = vst [vmem:[%s7652_s15 + $0x4f0] sm:$0xff] %v3895_v60  ;;  %v3896_v4 = vmul.f32 %v3602_v11, %v2720_v29  ;;  %v3604_v31 = vadd.f32 1.0, %v5227_v59  ;;  %v9649_v30 = vadd.f32 %v10762_v24, %v8541_v19  ;;  %v9653_v47 = vadd.f32 %v10763_v42, %v8563_v27  ;;  %v10764_v59 = vld [vmem:[#allocation6_spill] sm:$0xff] }
 0x36a   : > { %4191 = vst [vmem:[%s7652_s15 + $0x500] sm:$0xff] %v3897_v46  ;;  %v2725_v12 = vmul.f32 0.5, %v9582_v22  ;;  %v3607_v20 = vadd.f32 1.0, %v5229_v5  ;;  %5242 = verf.f32 %v3028_v55  ;;  %v3031_v25 = vmul.f32 0.70710677, %v9644_v18 }
 0x36b   : > { %v5231_v13 = vpop.eup %5230  ;;  %4190 = vst [vmem:[%s7652_s15 + $0x4f8] sm:$0xff] %v3896_v4  ;;  %v3898_v0 = vmul.f32 %v3604_v31, %v2722_v38  ;;  %v2727_v6 = vmul.f32 0.5, %v9586_v32  ;;  %v2726_v56 = vmul.f32 0.5, %v9602_v33  ;;  %v3033_v29 = vmul.f32 0.70710677, %v9649_v30  ;;  %v10765_v38 = vld [vmem:[#allocation8_spill] sm:$0xff] }
 0x36c   : > { %v3901_v49 = vmul.f32 %v3607_v20, %v2725_v12  ;;  %v3609_v60 = vadd.f32 1.0, %v5231_v13  ;;  %5244 = verf.f32 %v3031_v25  ;;  %v3032_v11 = vmul.f32 0.70710677, %v9653_v47  ;;  %v10766_v33 = vld [vmem:[#allocation11_spill] sm:$0xff]  ;;  %v10767_v31 = vld [vmem:[#allocation13_spill] sm:$0xff] }
 0x36d   : > { %v5233_v22 = vpop.eup %5232  ;;  %4192 = vst [vmem:[%s7652_s15 + $0x508] sm:$0xff] %v3898_v0  ;;  %5246 = verf.f32 %v3033_v29  ;;  %v9666_v46 = vadd.f32 %v10764_v59, %v8579_v44  ;;  %v9670_v32 = vadd.f32 %v10765_v38, %v8539_v10  ;;  %v9674_v55 = vadd.f32 %v10766_v33, %v8541_v19  ;;  %v10768_v33 = vld [vmem:[#allocation10_spill] sm:$0xff] }
 0x36e   : > { %v5235_v8 = vpop.eup %5234  ;;  %4195 = vst [vmem:[%s7652_s15 + $0x520] sm:$0xff] %v3901_v49  ;;  %v3903_v5 = vmul.f32 %v3609_v60, %v2727_v6  ;;  %v3608_v4 = vadd.f32 1.0, %v5233_v22  ;;  %5248 = verf.f32 %v3032_v11  ;;  %v9679_v24 = vadd.f32 %v10767_v31, %v8563_v27 }
 0x36f   : > { %v5237_v42 = vpop.eup %5236  ;;  %v2728_v12 = vmul.f32 0.5, %v9607_v37  ;;  %v3610_v20 = vadd.f32 1.0, %v5235_v8  ;;  %v2731_v25 = vmul.f32 0.5, %v9611_v9  ;;  %v3034_v13 = vmul.f32 0.70710677, %v9666_v46 }
 0x370   : > { %4197 = vst [vmem:[%s7652_s15 + $0x530] sm:$0xff] %v3903_v5  ;;  %v3902_v0 = vmul.f32 %v3608_v4, %v2726_v56  ;;  %v3613_v29 = vadd.f32 1.0, %v5237_v42  ;;  %v2733_v6 = vmul.f32 0.5, %v9623_v36  ;;  %v3037_v49 = vmul.f32 0.70710677, %v9670_v32  ;;  %v10769_v5 = vld [vmem:[#allocation12_spill] sm:$0xff] }
 0x371   : > { %v5239_v60 = vpop.eup %5238  ;;  %v3904_v11 = vmul.f32 %v3610_v20, %v2728_v12  ;;  %v2732_v22 = vmul.f32 0.5, %v9628_v45  ;;  %5250 = verf.f32 %v3034_v13  ;;  %v3039_v37 = vmul.f32 0.70710677, %v9674_v55 }
 0x372   : > { %v5241_v59 = vpop.eup %5240  ;;  %4196 = vst [vmem:[%s7652_s15 + $0x528] sm:$0xff] %v3902_v0  ;;  %v3907_v9 = vmul.f32 %v3613_v29, %v2731_v25  ;;  %v3615_v38 = vadd.f32 1.0, %v5239_v60  ;;  %5252 = verf.f32 %v3037_v49  ;;  %v3038_v56 = vmul.f32 0.70710677, %v9679_v24 }
 0x373   : > { %4198 = vst [vmem:[%s7652_s15 + $0x538] sm:$0xff] %v3904_v11  ;;  %v3614_v36 = vadd.f32 1.0, %v5241_v59  ;;  %5254 = verf.f32 %v3039_v37  ;;  %v2451_v8 = vadd.f32 %v10768_v33, %v8579_v44  ;;  %v9696_v45 = vadd.f32 %v10769_v5, %v8539_v10 }
 0x374   : > { %v5243_v4 = vpop.eup %5242  ;;  %4201 = vst [vmem:[%s7652_s15 + $0x550] sm:$0xff] %v3907_v9  ;;  %v3909_v31 = vmul.f32 %v3615_v38, %v2733_v6  ;;  %5256 = verf.f32 %v3038_v56  ;;  %v9701_v42 = vadd.f32 %v9053_v15, %v8541_v19  ;;  %v9705_v12 = vadd.f32 %v9055_v2, %v8563_v27 }
 0x375   : > { %v3908_v20 = vmul.f32 %v3614_v36, %v2732_v22  ;;  %v2734_v25 = vmul.f32 0.5, %v9632_v63  ;;  %v3616_v13 = vadd.f32 1.0, %v5243_v4  ;;  %v3040_v0 = vmul.f32 0.70710677, %v2451_v8  ;;  %v10771_v36 = vld [vmem:[#allocation17_spill] sm:$0xff] }
 0x376   : > { %v5245_v29 = vpop.eup %5244  ;;  %4203 = vst [vmem:[%s7652_s15 + $0x560] sm:$0xff] %v3909_v31  ;;  %v2737_v49 = vmul.f32 0.5, %v9644_v18  ;;  %v2739_v6 = vmul.f32 0.5, %v9649_v30  ;;  %v3043_v60 = vmul.f32 0.70710677, %v9696_v45  ;;  %v2738_v22 = vmul.f32 0.5, %v9653_v47 }
 0x377   : > { %v3045_v15 = vmul.f32 0.70710677, %v9701_v42  ;;  %v5247_v11 = vpop.eup %5246  ;;  %4202 = vst [vmem:[%s7652_s15 + $0x558] sm:$0xff] %v3908_v20  ;;  %v3910_v2 = vmul.f32 %v3616_v13, %v2734_v25  ;;  %v3619_v37 = vadd.f32 1.0, %v5245_v29  ;;  %5258 = verf.f32 %v3040_v0  ;;  %v10770_v18 = vld [vmem:[#allocation15_spill] sm:$0xff]  ;;  %v10772_v0 = vld [vmem:[#allocation14_spill] sm:$0xff] }
 0x378   : > { %v5249_v63 = vpop.eup %5248  ;;  %v3621_v59 = vadd.f32 1.0, %v5247_v11  ;;  %5260 = verf.f32 %v3043_v60  ;;  %v3044_v9 = vmul.f32 0.70710677, %v9705_v12  ;;  %v9718_v30 = vadd.f32 %v10770_v18, %v8579_v44 }
 0x379   : > { %4204 = vst [vmem:[%s7652_s15 + $0x568] sm:$0xff] %v3910_v2  ;;  %v3913_v38 = vmul.f32 %v3619_v37, %v2737_v49  ;;  %v3620_v56 = vadd.f32 1.0, %v5249_v63  ;;  %5262 = verf.f32 %v3045_v15  ;;  %v9723_v33 = vadd.f32 %v10771_v36, %v8539_v10  ;;  %v10774_v15 = vld [vmem:[#allocation19_spill] sm:$0xff] }
 0x37a   : > { %v3915_v47 = vmul.f32 %v3621_v59, %v2739_v6  ;;  %v2740_v5 = vmul.f32 0.5, %v9666_v46  ;;  %5264 = verf.f32 %v3044_v9  ;;  %v3046_v4 = vmul.f32 0.70710677, %v9718_v30  ;;  %v10773_v46 = vld [vmem:[#allocation16_spill] sm:$0xff] }
 0x37b   : > { %v5251_v31 = vpop.eup %5250  ;;  %4207 = vst [vmem:[%s7652_s15 + $0x580] sm:$0xff] %v3913_v38  ;;  %v3914_v20 = vmul.f32 %v3620_v56, %v2738_v22  ;;  %v2743_v25 = vmul.f32 0.5, %v9670_v32  ;;  %v3049_v13 = vmul.f32 0.70710677, %v9723_v33  ;;  %v9732_v29 = vadd.f32 %v10772_v0, %v8541_v19 }
 0x37c   : > { %v5253_v49 = vpop.eup %5252  ;;  %4209 = vst [vmem:[%s7652_s15 + $0x590] sm:$0xff] %v3915_v47  ;;  %v3622_v6 = vadd.f32 1.0, %v5251_v31  ;;  %5266 = verf.f32 %v3046_v4  ;;  %v9737_v60 = vadd.f32 %v10773_v46, %v8563_v27  ;;  %v9741_v11 = vadd.f32 %v10774_v15, %v8579_v44  ;;  %v10775_v31 = vld [vmem:[#allocation21_spill] sm:$0xff] }
 0x37d   : > { %v5255_v32 = vpop.eup %5254  ;;  %4208 = vst [vmem:[%s7652_s15 + $0x588] sm:$0xff] %v3914_v20  ;;  %v3625_v2 = vadd.f32 1.0, %v5253_v49  ;;  %v2745_v37 = vmul.f32 0.5, %v9674_v55  ;;  %5268 = verf.f32 %v3049_v13  ;;  %v3051_v22 = vmul.f32 0.70710677, %v9732_v29 }
 0x37e   : > { %v5257_v63 = vpop.eup %5256  ;;  %v3916_v59 = vmul.f32 %v3622_v6, %v2740_v5  ;;  %v3627_v9 = vadd.f32 1.0, %v5255_v32  ;;  %v2744_v18 = vmul.f32 0.5, %v9679_v24  ;;  %v3050_v38 = vmul.f32 0.70710677, %v9737_v60  ;;  %v10778_v32 = vld [vmem:[#allocation23_spill] sm:$0xff] }
 0x37f   : > { %v3919_v56 = vmul.f32 %v3625_v2, %v2743_v25  ;;  %v3626_v36 = vadd.f32 1.0, %v5257_v63  ;;  %v2746_v47 = vmul.f32 0.5, %v2451_v8  ;;  %5270 = verf.f32 %v3051_v22  ;;  %v10776_v25 = vld [vmem:[#allocation18_spill] sm:$0xff]  ;;  %v10777_v8 = vld [vmem:[#allocation20_spill] sm:$0xff] }
 0x380   : > { %4210 = vst [vmem:[%s7652_s15 + $0x598] sm:$0xff] %v3916_v59  ;;  %v3921_v4 = vmul.f32 %v3627_v9, %v2745_v37  ;;  %5272 = verf.f32 %v3050_v38  ;;  %v3052_v55 = vmul.f32 0.70710677, %v9741_v11  ;;  %v9752_v20 = vadd.f32 %v10775_v31, %v8539_v10 }
 0x381   : > { %v5259_v5 = vpop.eup %5258  ;;  %4213 = vst [vmem:[%s7652_s15 + $0x5b0] sm:$0xff] %v3919_v56  ;;  %v3920_v24 = vmul.f32 %v3626_v36, %v2744_v18  ;;  %v2749_v13 = vmul.f32 0.5, %v9696_v45  ;;  %v9758_v0 = vadd.f32 %v10776_v25, %v8541_v19  ;;  %v9762_v49 = vadd.f32 %v10777_v8, %v8563_v27  ;;  %v10779_v25 = vld [vmem:[#allocation25_spill] sm:$0xff] }
 0x382   : > { %v5261_v6 = vpop.eup %5260  ;;  %4215 = vst [vmem:[%s7652_s15 + $0x5c0] sm:$0xff] %v3921_v4  ;;  %v3628_v46 = vadd.f32 1.0, %v5259_v5  ;;  %5274 = verf.f32 %v3052_v55  ;;  %v3055_v15 = vmul.f32 0.70710677, %v9752_v20  ;;  %v9768_v2 = vadd.f32 %v10778_v32, %v8579_v44 }
 0x383   : > { %v5263_v37 = vpop.eup %5262  ;;  %4214 = vst [vmem:[%s7652_s15 + $0x5b8] sm:$0xff] %v3920_v24  ;;  %v3631_v45 = vadd.f32 1.0, %v5261_v6  ;;  %v2751_v22 = vmul.f32 0.5, %v9701_v42  ;;  %v2750_v63 = vmul.f32 0.5, %v9705_v12  ;;  %v3057_v59 = vmul.f32 0.70710677, %v9758_v0 }
 0x384   : > { %v5265_v9 = vpop.eup %5264  ;;  %v3922_v18 = vmul.f32 %v3628_v46, %v2746_v47  ;;  %v3633_v38 = vadd.f32 1.0, %v5263_v37  ;;  %5276 = verf.f32 %v3055_v15  ;;  %v3056_v56 = vmul.f32 0.70710677, %v9762_v49 }
 0x385   : > { %v3925_v36 = vmul.f32 %v3631_v45, %v2749_v13  ;;  %v3632_v4 = vadd.f32 1.0, %v5265_v9  ;;  %v2752_v55 = vmul.f32 0.5, %v9718_v30  ;;  %5278 = verf.f32 %v3057_v59  ;;  %v10780_v30 = vld [vmem:[#allocation22_spill] sm:$0xff] }
 0x386   : > { %v5267_v31 = vpop.eup %5266  ;;  %4216 = vst [vmem:[%s7652_s15 + $0x5c8] sm:$0xff] %v3922_v18  ;;  %v3927_v42 = vmul.f32 %v3633_v38, %v2751_v22  ;;  %5280 = verf.f32 %v3056_v56  ;;  %v3058_v12 = vmul.f32 0.70710677, %v9768_v2  ;;  %v9780_v47 = vadd.f32 %v9126_v52, %v8539_v10 }
 0x387   : > { %v5269_v5 = vpop.eup %5268  ;;  %4219 = vst [vmem:[%s7652_s15 + $0x5e0] sm:$0xff] %v3925_v36  ;;  %v3926_v24 = vmul.f32 %v3632_v4, %v2750_v63  ;;  %v3634_v13 = vadd.f32 1.0, %v5267_v31  ;;  %v9785_v8 = vadd.f32 %v10779_v25, %v8541_v19  ;;  %v9789_v6 = vadd.f32 %v10780_v30, %v8563_v27 }
 0x388   : > { %4221 = vst [vmem:[%s7652_s15 + $0x5f0] sm:$0xff] %v3927_v42  ;;  %v2755_v46 = vmul.f32 0.5, %v9723_v33  ;;  %v3637_v15 = vadd.f32 1.0, %v5269_v5  ;;  %5282 = verf.f32 %v3058_v12  ;;  %v3061_v52 = vmul.f32 0.70710677, %v9780_v47  ;;  %v10783_v42 = vld [vmem:[#allocation31_spill] sm:$0xff] }
 0x389   : > { %v5271_v32 = vpop.eup %5270  ;;  %4220 = vst [vmem:[%s7652_s15 + $0x5e8] sm:$0xff] %v3926_v24  ;;  %v3928_v37 = vmul.f32 %v3634_v13, %v2752_v55  ;;  %v2757_v45 = vmul.f32 0.5, %v9732_v29  ;;  %v2756_v22 = vmul.f32 0.5, %v9737_v60  ;;  %v3063_v63 = vmul.f32 0.70710677, %v9785_v8  ;;  %v10781_v29 = vld [vmem:[#allocation24_spill] sm:$0xff] }
 0x38a   : > { %v5273_v59 = vpop.eup %5272  ;;  %v3931_v9 = vmul.f32 %v3637_v15, %v2755_v46  ;;  %v3639_v18 = vadd.f32 1.0, %v5271_v32  ;;  %5284 = verf.f32 %v3061_v52  ;;  %v3062_v33 = vmul.f32 0.70710677, %v9789_v6  ;;  %v10782_v55 = vld [vmem:[#allocation32_spill] sm:$0xff] }
 0x38b   : > { %4222 = vst [vmem:[%s7652_s15 + $0x5f8] sm:$0xff] %v3928_v37  ;;  %v3638_v38 = vadd.f32 1.0, %v5273_v59  ;;  %5286 = verf.f32 %v3063_v63  ;;  %v9802_v56 = vadd.f32 %v9136_v48, %v8579_v44  ;;  %v9806_v36 = vadd.f32 %v10781_v29, %v8539_v10 }
 0x38c   : > { %v5275_v60 = vpop.eup %5274  ;;  %4225 = vst [vmem:[%s7652_s15 + $0x610] sm:$0xff] %v3931_v9  ;;  %v3933_v4 = vmul.f32 %v3639_v18, %v2757_v45  ;;  %5288 = verf.f32 %v3062_v33  ;;  %v9811_v31 = vadd.f32 %v10782_v55, %v8541_v19  ;;  %v9815_v12 = vadd.f32 %v10783_v42, %v8563_v27 }
 0x38d   : > { %v3932_v5 = vmul.f32 %v3638_v38, %v2756_v22  ;;  %v2758_v48 = vmul.f32 0.5, %v9741_v11  ;;  %v3640_v24 = vadd.f32 1.0, %v5275_v60  ;;  %v3064_v13 = vmul.f32 0.70710677, %v9802_v56 }
 0x38e   : > { %v5277_v25 = vpop.eup %5276  ;;  %4227 = vst [vmem:[%s7652_s15 + $0x620] sm:$0xff] %v3933_v4  ;;  %v2761_v30 = vmul.f32 0.5, %v9752_v20  ;;  %v2763_v46 = vmul.f32 0.5, %v9758_v0  ;;  %v3067_v15 = vmul.f32 0.70710677, %v9806_v36  ;;  %v2762_v11 = vmul.f32 0.5, %v9762_v49 }
 0x38f   : > { %v3069_v52 = vmul.f32 0.70710677, %v9811_v31  ;;  %v5279_v32 = vpop.eup %5278  ;;  %4226 = vst [vmem:[%s7652_s15 + $0x618] sm:$0xff] %v3932_v5  ;;  %v3934_v37 = vmul.f32 %v3640_v24, %v2758_v48  ;;  %v3643_v45 = vadd.f32 1.0, %v5277_v25  ;;  %5290 = verf.f32 %v3064_v13  ;;  %v10784_v20 = vld [vmem:[#allocation27_spill] sm:$0xff]  ;;  %v10785_v24 = vld [vmem:[#allocation26_spill] sm:$0xff] }
 0x390   : > { %v5281_v22 = vpop.eup %5280  ;;  %v3645_v63 = vadd.f32 1.0, %v5279_v32  ;;  %5292 = verf.f32 %v3067_v15  ;;  %v3068_v59 = vmul.f32 0.70710677, %v9815_v12  ;;  %v9829_v0 = vadd.f32 %v10784_v20, %v8579_v44 }
 0x391   : > { %4228 = vst [vmem:[%s7652_s15 + $0x628] sm:$0xff] %v3934_v37  ;;  %v3937_v9 = vmul.f32 %v3643_v45, %v2761_v30  ;;  %v3644_v18 = vadd.f32 1.0, %v5281_v22  ;;  %5294 = verf.f32 %v3069_v52  ;;  %v9834_v33 = vadd.f32 %v9177_v34, %v8539_v10 }
 0x392   : > { %v5283_v49 = vpop.eup %5282  ;;  %v3939_v38 = vmul.f32 %v3645_v63, %v2763_v46  ;;  %v2764_v29 = vmul.f32 0.5, %v9768_v2  ;;  %5296 = verf.f32 %v3068_v59  ;;  %v3070_v60 = vmul.f32 0.70710677, %v9829_v0  ;;  %v10786_v46 = vld [vmem:[#allocation36_spill] sm:$0xff] }
 0x393   : > { %4231 = vst [vmem:[%s7652_s15 + $0x640] sm:$0xff] %v3937_v9  ;;  %v3938_v4 = vmul.f32 %v3644_v18, %v2762_v11  ;;  %v3646_v55 = vadd.f32 1.0, %v5283_v49  ;;  %v2767_v42 = vmul.f32 0.5, %v9780_v47  ;;  %v3073_v5 = vmul.f32 0.70710677, %v9834_v33  ;;  %v10787_v49 = vld [vmem:[#allocation35_spill] sm:$0xff] }
 0x394   : > { %v5285_v48 = vpop.eup %5284  ;;  %4233 = vst [vmem:[%s7652_s15 + $0x650] sm:$0xff] %v3939_v38  ;;  %5298 = verf.f32 %v3070_v60  ;;  %v9844_v34 = vadd.f32 %v9184_v21, %v8541_v19  ;;  %v9848_v2 = vadd.f32 %v9186_v61, %v8563_v27  ;;  %v9852_v13 = vadd.f32 %v10785_v24, %v8579_v44 }
 0x395   : > { %v5287_v25 = vpop.eup %5286  ;;  %4232 = vst [vmem:[%s7652_s15 + $0x648] sm:$0xff] %v3938_v4  ;;  %v3940_v47 = vmul.f32 %v3646_v55, %v2764_v29  ;;  %v3649_v30 = vadd.f32 1.0, %v5285_v48  ;;  %5300 = verf.f32 %v3073_v5  ;;  %v9857_v15 = vadd.f32 %v10786_v46, %v8539_v10 }
 0x396   : > { %v5289_v21 = vpop.eup %5288  ;;  %v2769_v52 = vmul.f32 0.5, %v9785_v8  ;;  %v3651_v32 = vadd.f32 1.0, %v5287_v25  ;;  %v2768_v61 = vmul.f32 0.5, %v9789_v6  ;;  %v3075_v37 = vmul.f32 0.70710677, %v9844_v34 }
 0x397   : > { %4234 = vst [vmem:[%s7652_s15 + $0x658] sm:$0xff] %v3940_v47  ;;  %v3943_v45 = vmul.f32 %v3649_v30, %v2767_v42  ;;  %v3650_v11 = vadd.f32 1.0, %v5289_v21  ;;  %v2770_v22 = vmul.f32 0.5, %v9802_v56  ;;  %v3074_v63 = vmul.f32 0.70710677, %v9848_v2 }
 0x398   : > { %v3945_v59 = vmul.f32 %v3651_v32, %v2769_v52  ;;  %v2773_v20 = vmul.f32 0.5, %v9806_v36  ;;  %5302 = verf.f32 %v3075_v37  ;;  %v3076_v8 = vmul.f32 0.70710677, %v9852_v13  ;;  %v10788_v36 = vld [vmem:[#allocation34_spill] sm:$0xff] }
 0x399   : > { %v5291_v9 = vpop.eup %5290  ;;  %4237 = vst [vmem:[%s7652_s15 + $0x670] sm:$0xff] %v3943_v45  ;;  %v3944_v6 = vmul.f32 %v3650_v11, %v2768_v61  ;;  %5304 = verf.f32 %v3074_v63  ;;  %v3079_v18 = vmul.f32 0.70710677, %v9857_v15  ;;  %v9871_v38 = vadd.f32 %v10787_v49, %v8541_v19 }
 0x39a   : > { %v5293_v56 = vpop.eup %5292  ;;  %4239 = vst [vmem:[%s7652_s15 + $0x680] sm:$0xff] %v3945_v59  ;;  %v3652_v29 = vadd.f32 1.0, %v5291_v9  ;;  %5306 = verf.f32 %v3076_v8  ;;  %v9876_v60 = vadd.f32 %v10788_v36, %v8563_v27  ;;  %v9880_v4 = vadd.f32 %v9221_v43, %v8579_v44 }
 0x39b   : > { %v5295_v55 = vpop.eup %5294  ;;  %4238 = vst [vmem:[%s7652_s15 + $0x678] sm:$0xff] %v3944_v6  ;;  %v3655_v42 = vadd.f32 1.0, %v5293_v56  ;;  %v2775_v5 = vmul.f32 0.5, %v9811_v31  ;;  %5308 = verf.f32 %v3079_v18  ;;  %v3081_v48 = vmul.f32 0.70710677, %v9871_v38 }
 0x39c   : > { %v5297_v24 = vpop.eup %5296  ;;  %v3946_v25 = vmul.f32 %v3652_v29, %v2770_v22  ;;  %v3657_v47 = vadd.f32 1.0, %v5295_v55  ;;  %v2774_v30 = vmul.f32 0.5, %v9815_v12  ;;  %v3080_v46 = vmul.f32 0.70710677, %v9876_v60  ;;  %v10789_v22 = vld [vmem:[#allocation33_spill] sm:$0xff] }
 0x39d   : > { %v3949_v21 = vmul.f32 %v3655_v42, %v2773_v20  ;;  %v3656_v43 = vadd.f32 1.0, %v5297_v24  ;;  %v2776_v52 = vmul.f32 0.5, %v9829_v0  ;;  %5310 = verf.f32 %v3081_v48  ;;  %v10790_v0 = vld [vmem:[#allocation40_spill] sm:$0xff]  ;;  %v10792_v48 = vld [vmem:[#allocation38_spill] sm:$0xff] }
 0x39e   : > { %v5299_v32 = vpop.eup %5298  ;;  %4240 = vst [vmem:[%s7652_s15 + $0x688] sm:$0xff] %v3946_v25  ;;  %v3951_v31 = vmul.f32 %v3657_v47, %v2775_v5  ;;  %5312 = verf.f32 %v3080_v46  ;;  %v3082_v61 = vmul.f32 0.70710677, %v9880_v4  ;;  %v9892_v37 = vadd.f32 %v9229_v58, %v8539_v10 }
 0x39f   : > { %v5301_v12 = vpop.eup %5300  ;;  %4243 = vst [vmem:[%s7652_s15 + $0x6a0] sm:$0xff] %v3949_v21  ;;  %v3950_v45 = vmul.f32 %v3656_v43, %v2774_v30  ;;  %v3658_v11 = vadd.f32 1.0, %v5299_v32  ;;  %v9897_v63 = vadd.f32 %v10789_v22, %v8541_v19  ;;  %v9901_v59 = vadd.f32 %v10790_v0, %v8563_v27  ;;  %v10794_v0 = vld [vmem:[#allocation42_spill] sm:$0xff] }
 0x3a0   : > { %4245 = vst [vmem:[%s7652_s15 + $0x6b0] sm:$0xff] %v3951_v31  ;;  %v2779_v20 = vmul.f32 0.5, %v9834_v33  ;;  %v3661_v8 = vadd.f32 1.0, %v5301_v12  ;;  %5314 = verf.f32 %v3082_v61  ;;  %v3085_v58 = vmul.f32 0.70710677, %v9892_v37  ;;  %v10791_v33 = vld [vmem:[#allocation39_spill] sm:$0xff] }
 0x3a1   : > { %4244 = vst [vmem:[%s7652_s15 + $0x6a8] sm:$0xff] %v3950_v45  ;;  %v3952_v9 = vmul.f32 %v3658_v11, %v2776_v52  ;;  %v2781_v6 = vmul.f32 0.5, %v9844_v34  ;;  %v2780_v18 = vmul.f32 0.5, %v9848_v2  ;;  %v3087_v49 = vmul.f32 0.70710677, %v9897_v63  ;;  %v10793_v2 = vld [vmem:[#allocation37_spill] sm:$0xff] }
 0x3a2   : > { %v5303_v56 = vpop.eup %5302  ;;  %v3955_v29 = vmul.f32 %v3661_v8, %v2779_v20  ;;  %5316 = verf.f32 %v3085_v58  ;;  %v3086_v36 = vmul.f32 0.70710677, %v9901_v59  ;;  %v9913_v55 = vadd.f32 %v10791_v33, %v8579_v44 }
 0x3a3   : > { %v5305_v42 = vpop.eup %5304  ;;  %4246 = vst [vmem:[%s7652_s15 + $0x6b8] sm:$0xff] %v3952_v9  ;;  %v3663_v5 = vadd.f32 1.0, %v5303_v56  ;;  %5318 = verf.f32 %v3087_v49  ;;  %v9918_v34 = vadd.f32 %v10792_v48, %v8539_v10  ;;  %v9922_v24 = vadd.f32 %v10793_v2, %v8541_v19  ;;  %v10795_v9 = vld [vmem:[#allocation41_spill] sm:$0xff] }
 0x3a4   : > { %v5307_v25 = vpop.eup %5306  ;;  %4249 = vst [vmem:[%s7652_s15 + $0x6d0] sm:$0xff] %v3955_v29  ;;  %v3662_v47 = vadd.f32 1.0, %v5305_v42  ;;  %v2782_v30 = vmul.f32 0.5, %v9852_v13  ;;  %5320 = verf.f32 %v3086_v36  ;;  %v3088_v46 = vmul.f32 0.70710677, %v9913_v55 }
 0x3a5   : > { %v5309_v21 = vpop.eup %5308  ;;  %v3957_v43 = vmul.f32 %v3663_v5, %v2781_v6  ;;  %v3664_v52 = vadd.f32 1.0, %v5307_v25  ;;  %v2785_v32 = vmul.f32 0.5, %v9857_v15  ;;  %v3091_v31 = vmul.f32 0.70710677, %v9918_v34 }
 0x3a6   : > { %v3956_v61 = vmul.f32 %v3662_v47, %v2780_v18  ;;  %v3667_v12 = vadd.f32 1.0, %v5309_v21  ;;  %v2787_v45 = vmul.f32 0.5, %v9871_v38  ;;  %5322 = verf.f32 %v3088_v46  ;;  %v10796_v38 = vld [vmem:[#allocation44_spill] sm:$0xff]  ;;  %v10798_v21 = vld [vmem:[#allocation45_spill] sm:$0xff] }
 0x3a7   : > { %v5311_v11 = vpop.eup %5310  ;;  %4251 = vst [vmem:[%s7652_s15 + $0x6e0] sm:$0xff] %v3957_v43  ;;  %v3958_v13 = vmul.f32 %v3664_v52, %v2782_v30  ;;  %5324 = verf.f32 %v3091_v31  ;;  %v3093_v22 = vmul.f32 0.70710677, %v9922_v24  ;;  %v9934_v20 = vadd.f32 %v10794_v0, %v8563_v27  ;;  %v10797_v30 = vld [vmem:[#allocation43_spill] sm:$0xff] }
 0x3a8   : > { %v5313_v15 = vpop.eup %5312  ;;  %4250 = vst [vmem:[%s7652_s15 + $0x6d8] sm:$0xff] %v3956_v61  ;;  %v3961_v8 = vmul.f32 %v3667_v12, %v2785_v32  ;;  %v3669_v58 = vadd.f32 1.0, %v5311_v11  ;;  %v9939_v6 = vadd.f32 %v10795_v9, %v8579_v44  ;;  %v9943_v18 = vadd.f32 %v10796_v38, %v8539_v10 }
 0x3a9   : > { %4252 = vst [vmem:[%s7652_s15 + $0x6e8] sm:$0xff] %v3958_v13  ;;  %v2786_v49 = vmul.f32 0.5, %v9876_v60  ;;  %v3668_v56 = vadd.f32 1.0, %v5313_v15  ;;  %5326 = verf.f32 %v3093_v22  ;;  %v3092_v29 = vmul.f32 0.70710677, %v9934_v20 }
 0x3aa   : > { %v5315_v36 = vpop.eup %5314  ;;  %4255 = vst [vmem:[%s7652_s15 + $0x700] sm:$0xff] %v3961_v8  ;;  %v3963_v33 = vmul.f32 %v3669_v58, %v2787_v45  ;;  %v2788_v42 = vmul.f32 0.5, %v9880_v4  ;;  %v2791_v5 = vmul.f32 0.5, %v9892_v37  ;;  %v3094_v48 = vmul.f32 0.70710677, %v9939_v6  ;;  %v10799_v37 = vld [vmem:[#allocation47_spill] sm:$0xff] }
 0x3ab   : > { %v3962_v2 = vmul.f32 %v3668_v56, %v2786_v49  ;;  %v3670_v25 = vadd.f32 1.0, %v5315_v36  ;;  %5328 = verf.f32 %v3092_v29  ;;  %v3097_v47 = vmul.f32 0.70710677, %v9943_v18 }
 0x3ac   : > { %v5317_v60 = vpop.eup %5316  ;;  %4257 = vst [vmem:[%s7652_s15 + $0x710] sm:$0xff] %v3963_v33  ;;  %5330 = verf.f32 %v3094_v48  ;;  %v9956_v46 = vadd.f32 %v10797_v30, %v8541_v19  ;;  %v9960_v4 = vadd.f32 %v10798_v21, %v8563_v27  ;;  %v9964_v43 = vadd.f32 %v10799_v37, %v8579_v44 }
 0x3ad   : > { %v5319_v52 = vpop.eup %5318  ;;  %4256 = vst [vmem:[%s7652_s15 + $0x708] sm:$0xff] %v3962_v2  ;;  %v3964_v32 = vmul.f32 %v3670_v25, %v2788_v42  ;;  %v3673_v31 = vadd.f32 1.0, %v5317_v60  ;;  %5332 = verf.f32 %v3097_v47  ;;  %v9969_v61 = vadd.f32 %v9325_v7, %v8539_v10 }
 0x3ae   : > { %v5321_v12 = vpop.eup %5320  ;;  %v2793_v45 = vmul.f32 0.5, %v9897_v63  ;;  %v3675_v11 = vadd.f32 1.0, %v5319_v52  ;;  %v2792_v13 = vmul.f32 0.5, %v9901_v59  ;;  %v3099_v22 = vmul.f32 0.70710677, %v9956_v46 }
 0x3af   : > { %4258 = vst [vmem:[%s7652_s15 + $0x718] sm:$0xff] %v3964_v32  ;;  %v3967_v0 = vmul.f32 %v3673_v31, %v2791_v5  ;;  %v3674_v15 = vadd.f32 1.0, %v5321_v12  ;;  %v2794_v8 = vmul.f32 0.5, %v9913_v55  ;;  %v3098_v58 = vmul.f32 0.70710677, %v9960_v4 }
 0x3b0   : > { %v5323_v9 = vpop.eup %5322  ;;  %v3969_v7 = vmul.f32 %v3675_v11, %v2793_v45  ;;  %v2797_v38 = vmul.f32 0.5, %v9918_v34  ;;  %5334 = verf.f32 %v3099_v22  ;;  %v3100_v63 = vmul.f32 0.70710677, %v9964_v43 }
 0x3b1   : > { %v5325_v49 = vpop.eup %5324  ;;  %4261 = vst [vmem:[%s7652_s15 + $0x730] sm:$0xff] %v3967_v0  ;;  %v3968_v59 = vmul.f32 %v3674_v15, %v2792_v13  ;;  %v3676_v56 = vadd.f32 1.0, %v5323_v9  ;;  %5336 = verf.f32 %v3098_v58  ;;  %v3103_v29 = vmul.f32 0.70710677, %v9969_v61 }
 0x3b2   : > { %4263 = vst [vmem:[%s7652_s15 + $0x740] sm:$0xff] %v3969_v7  ;;  %v3679_v55 = vadd.f32 1.0, %v5325_v49  ;;  %5338 = verf.f32 %v3100_v63  ;;  %v2515_v36 = vadd.f32 %v9327_v14, %v8541_v19  ;;  %v9986_v34 = vadd.f32 %v9336_v1, %v8563_v27  ;;  %v10801_v63 = vld [vmem:[#allocation49_spill] sm:$0xff] }
 0x3b3   : > { %v5327_v33 = vpop.eup %5326  ;;  %4262 = vst [vmem:[%s7652_s15 + $0x738] sm:$0xff] %v3968_v59  ;;  %v3970_v42 = vmul.f32 %v3676_v56, %v2794_v8  ;;  %5340 = verf.f32 %v3103_v29  ;;  %v9991_v5 = vadd.f32 %v9338_v51, %v8579_v44  ;;  %v9995_v48 = vadd.f32 %v9361_v28, %v8539_v10 }
 0x3b4   : > { %v3973_v2 = vmul.f32 %v3679_v55, %v2797_v38  ;;  %v2799_v14 = vmul.f32 0.5, %v9922_v24  ;;  %v3681_v25 = vadd.f32 1.0, %v5327_v33  ;;  %v3105_v47 = vmul.f32 0.70710677, %v2515_v36 }
 0x3b5   : > { %v5329_v1 = vpop.eup %5328  ;;  %4264 = vst [vmem:[%s7652_s15 + $0x748] sm:$0xff] %v3970_v42  ;;  %v2798_v60 = vmul.f32 0.5, %v9934_v20  ;;  %v2800_v30 = vmul.f32 0.5, %v9939_v6  ;;  %v3104_v21 = vmul.f32 0.70710677, %v9986_v34  ;;  %v2803_v32 = vmul.f32 0.5, %v9943_v18 }
 0x3b6   : > { %v3106_v51 = vmul.f32 0.70710677, %v9991_v5  ;;  %v5331_v37 = vpop.eup %5330  ;;  %4267 = vst [vmem:[%s7652_s15 + $0x760] sm:$0xff] %v3973_v2  ;;  %v3975_v28 = vmul.f32 %v3681_v25, %v2799_v14  ;;  %v3680_v52 = vadd.f32 1.0, %v5329_v1  ;;  %5342 = verf.f32 %v3105_v47  ;;  %v10800_v20 = vld [vmem:[#allocation46_spill] sm:$0xff]  ;;  %v10802_v1 = vld [vmem:[#allocation48_spill] sm:$0xff] }
 0x3b7   : > { %v5333_v24 = vpop.eup %5332  ;;  %v3682_v31 = vadd.f32 1.0, %v5331_v37  ;;  %5344 = verf.f32 %v3104_v21  ;;  %v3109_v12 = vmul.f32 0.70710677, %v9995_v48  ;;  %v10008_v6 = vadd.f32 %v10800_v20, %v8541_v19 }
 0x3b8   : > { %4269 = vst [vmem:[%s7652_s15 + $0x770] sm:$0xff] %v3975_v28  ;;  %v3974_v45 = vmul.f32 %v3680_v52, %v2798_v60  ;;  %v3685_v11 = vadd.f32 1.0, %v5333_v24  ;;  %5346 = verf.f32 %v3106_v51  ;;  %v10013_v13 = vadd.f32 %v9369_v41, %v8563_v27  ;;  %v10803_v51 = vld [vmem:[#allocation51_spill] sm:$0xff] }
 0x3b9   : > { %v3976_v18 = vmul.f32 %v3682_v31, %v2800_v30  ;;  %v2805_v22 = vmul.f32 0.5, %v9956_v46  ;;  %5348 = verf.f32 %v3109_v12  ;;  %v3111_v0 = vmul.f32 0.70710677, %v10008_v6 }
 0x3ba   : > { %v5335_v15 = vpop.eup %5334  ;;  %4268 = vst [vmem:[%s7652_s15 + $0x768] sm:$0xff] %v3974_v45  ;;  %v3979_v8 = vmul.f32 %v3685_v11, %v2803_v32  ;;  %v2804_v58 = vmul.f32 0.5, %v9960_v4  ;;  %v3110_v9 = vmul.f32 0.70710677, %v10013_v13  ;;  %v10022_v7 = vadd.f32 %v9373_v54, %v8579_v44 }
 0x3bb   : > { %v5337_v41 = vpop.eup %5336  ;;  %4270 = vst [vmem:[%s7652_s15 + $0x778] sm:$0xff] %v3976_v18  ;;  %v3687_v38 = vadd.f32 1.0, %v5335_v15  ;;  %5350 = verf.f32 %v3111_v0  ;;  %v10027_v46 = vadd.f32 %v9395_v53, %v8539_v10  ;;  %v10031_v49 = vadd.f32 %v10801_v63, %v8541_v19 }
 0x3bc   : > { %v5339_v4 = vpop.eup %5338  ;;  %4273 = vst [vmem:[%s7652_s15 + $0x790] sm:$0xff] %v3979_v8  ;;  %v3686_v59 = vadd.f32 1.0, %v5337_v41  ;;  %v2806_v56 = vmul.f32 0.5, %v9964_v43  ;;  %5352 = verf.f32 %v3110_v9  ;;  %v3112_v54 = vmul.f32 0.70710677, %v10022_v7 }
 0x3bd   : > { %v5341_v29 = vpop.eup %5340  ;;  %v3981_v55 = vmul.f32 %v3687_v38, %v2805_v22  ;;  %v3688_v33 = vadd.f32 1.0, %v5339_v4  ;;  %v2809_v53 = vmul.f32 0.5, %v9969_v61  ;;  %v3115_v42 = vmul.f32 0.70710677, %v10027_v46 }
 0x3be   : > { %v3980_v2 = vmul.f32 %v3686_v59, %v2804_v58  ;;  %v3691_v14 = vadd.f32 1.0, %v5341_v29  ;;  %v2811_v25 = vmul.f32 0.5, %v2515_v36  ;;  %5354 = verf.f32 %v3112_v54  ;;  %v10804_v58 = vld [vmem:[#allocation50_spill] sm:$0xff] }
 0x3bf   : > { %4275 = vst [vmem:[%s7652_s15 + $0x7a0] sm:$0xff] %v3981_v55  ;;  %v3982_v47 = vmul.f32 %v3688_v33, %v2806_v56  ;;  %5356 = verf.f32 %v3115_v42  ;;  %v3117_v43 = vmul.f32 0.70710677, %v10031_v49  ;;  %v10042_v60 = vadd.f32 %v10802_v1, %v8563_v27 }
 0x3c0   : > { %v5343_v30 = vpop.eup %5342  ;;  %4274 = vst [vmem:[%s7652_s15 + $0x798] sm:$0xff] %v3980_v2  ;;  %v3985_v61 = vmul.f32 %v3691_v14, %v2809_v53  ;;  %v2810_v21 = vmul.f32 0.5, %v9986_v34  ;;  %v10048_v37 = vadd.f32 %v10803_v51, %v8579_v44  ;;  %v10052_v36 = vadd.f32 %v9434_v35, %v8539_v10 }
 0x3c1   : > { %v5345_v28 = vpop.eup %5344  ;;  %4276 = vst [vmem:[%s7652_s15 + $0x7a8] sm:$0xff] %v3982_v47  ;;  %v3693_v52 = vadd.f32 1.0, %v5343_v30  ;;  %5358 = verf.f32 %v3117_v43  ;;  %v3116_v32 = vmul.f32 0.70710677, %v10042_v60  ;;  %v10058_v24 = vadd.f32 %v9436_v3, %v8541_v19  ;;  %v10807_v30 = vld [vmem:[#allocation55_spill] sm:$0xff] }
 0x3c2   : > { %v5347_v31 = vpop.eup %5346  ;;  %4279 = vst [vmem:[%s7652_s15 + $0x7c0] sm:$0xff] %v3985_v61  ;;  %v3692_v34 = vadd.f32 1.0, %v5345_v28  ;;  %v2812_v12 = vmul.f32 0.5, %v9991_v5  ;;  %v2815_v20 = vmul.f32 0.5, %v9995_v48  ;;  %v3118_v35 = vmul.f32 0.70710677, %v10048_v37 }
 0x3c3   : > { %v5349_v45 = vpop.eup %5348  ;;  %v3987_v11 = vmul.f32 %v3693_v52, %v2811_v25  ;;  %v3694_v18 = vadd.f32 1.0, %v5347_v31  ;;  %5360 = verf.f32 %v3116_v32  ;;  %v3121_v22 = vmul.f32 0.70710677, %v10052_v36  ;;  %v10805_v25 = vld [vmem:[#allocation53_spill] sm:$0xff] }
 0x3c4   : > { %v3986_v0 = vmul.f32 %v3692_v34, %v2810_v21  ;;  %v3697_v3 = vadd.f32 1.0, %v5349_v45  ;;  %v2817_v15 = vmul.f32 0.5, %v10008_v6  ;;  %5362 = verf.f32 %v3118_v35  ;;  %v10808_v21 = vld [vmem:[#allocation54_spill] sm:$0xff] }
 0x3c5   : > { %v5351_v8 = vpop.eup %5350  ;;  %4281 = vst [vmem:[%s7652_s15 + $0x7d0] sm:$0xff] %v3987_v11  ;;  %v3988_v5 = vmul.f32 %v3694_v18, %v2812_v12  ;;  %5364 = verf.f32 %v3121_v22  ;;  %v3123_v48 = vmul.f32 0.70710677, %v10058_v24  ;;  %v10070_v9 = vadd.f32 %v10804_v58, %v8563_v27 }
 0x3c6   : > { %v5353_v41 = vpop.eup %5352  ;;  %4280 = vst [vmem:[%s7652_s15 + $0x7c8] sm:$0xff] %v3986_v0  ;;  %v3991_v38 = vmul.f32 %v3697_v3, %v2815_v20  ;;  %v3699_v63 = vadd.f32 1.0, %v5351_v8  ;;  %v10075_v4 = vadd.f32 %v9450_v26, %v8579_v44  ;;  %v10079_v6 = vadd.f32 %v9469_v62, %v8539_v10 }
 0x3c7   : > { %4282 = vst [vmem:[%s7652_s15 + $0x7d8] sm:$0xff] %v3988_v5  ;;  %v2816_v59 = vmul.f32 0.5, %v10013_v13  ;;  %v3698_v56 = vadd.f32 1.0, %v5353_v41  ;;  %5366 = verf.f32 %v3123_v48  ;;  %v3122_v54 = vmul.f32 0.70710677, %v10070_v9 }
 0x3c8   : > { %v5355_v29 = vpop.eup %5354  ;;  %4285 = vst [vmem:[%s7652_s15 + $0x7f0] sm:$0xff] %v3991_v38  ;;  %v3993_v55 = vmul.f32 %v3699_v63, %v2817_v15  ;;  %v2818_v33 = vmul.f32 0.5, %v10022_v7  ;;  %v2821_v26 = vmul.f32 0.5, %v10027_v46  ;;  %v3124_v53 = vmul.f32 0.70710677, %v10075_v4  ;;  %v10806_v7 = vld [vmem:[#allocation52_spill] sm:$0xff] }
 0x3c9   : > { %v5357_v62 = vpop.eup %5356  ;;  %v3992_v42 = vmul.f32 %v3698_v56, %v2816_v59  ;;  %v3700_v2 = vadd.f32 1.0, %v5355_v29  ;;  %5368 = verf.f32 %v3122_v54  ;;  %v3127_v13 = vmul.f32 0.70710677, %v10079_v6 }
 0x3ca   : > { %4287 = vst [vmem:[%s7652_s15 + $0x800] sm:$0xff] %v3993_v55  ;;  %v3703_v14 = vadd.f32 1.0, %v5357_v62  ;;  %5370 = verf.f32 %v3124_v53  ;;  %v10092_v47 = vadd.f32 %v10805_v25, %v8541_v19  ;;  %v10096_v43 = vadd.f32 %v10806_v7, %v8563_v27 }
 0x3cb   : > { %v5359_v46 = vpop.eup %5358  ;;  %4286 = vst [vmem:[%s7652_s15 + $0x7f8] sm:$0xff] %v3992_v42  ;;  %v3994_v1 = vmul.f32 %v3700_v2, %v2818_v33  ;;  %5372 = verf.f32 %v3127_v13  ;;  %v10101_v61 = vadd.f32 %v10807_v30, %v8579_v44  ;;  %v10105_v51 = vadd.f32 %v10808_v21, %v8539_v10 }
 0x3cc   : > { %v3997_v28 = vmul.f32 %v3703_v14, %v2821_v26  ;;  %v2823_v52 = vmul.f32 0.5, %v10031_v49  ;;  %v3705_v32 = vadd.f32 1.0, %v5359_v46  ;;  %v3129_v31 = vmul.f32 0.70710677, %v10092_v47 }
 0x3cd   : > { %v5361_v34 = vpop.eup %5360  ;;  %4288 = vst [vmem:[%s7652_s15 + $0x808] sm:$0xff] %v3994_v1  ;;  %v2822_v12 = vmul.f32 0.5, %v10042_v60  ;;  %v2824_v20 = vmul.f32 0.5, %v10048_v37  ;;  %v3128_v35 = vmul.f32 0.70710677, %v10096_v43  ;;  %v2827_v49 = vmul.f32 0.5, %v10052_v36 }
 0x3ce   : > { %v3130_v45 = vmul.f32 0.70710677, %v10101_v61  ;;  %v5363_v11 = vpop.eup %5362  ;;  %4291 = vst [vmem:[%s7652_s15 + $0x820] sm:$0xff] %v3997_v28  ;;  %v3999_v18 = vmul.f32 %v3705_v32, %v2823_v52  ;;  %v3704_v22 = vadd.f32 1.0, %v5361_v34  ;;  %5374 = verf.f32 %v3129_v31  ;;  %v10809_v60 = vld [vmem:[#allocation56_spill] sm:$0xff]  ;;  %v10811_v28 = vld [vmem:[#allocation58_spill] sm:$0xff] }
 0x3cf   : > { %v5365_v0 = vpop.eup %5364  ;;  %v3706_v3 = vadd.f32 1.0, %v5363_v11  ;;  %5376 = verf.f32 %v3128_v35  ;;  %v3133_v15 = vmul.f32 0.70710677, %v10105_v51  ;;  %v10119_v37 = vadd.f32 %v10809_v60, %v8541_v19 }
 0x3d0   : > { %4293 = vst [vmem:[%s7652_s15 + $0x830] sm:$0xff] %v3999_v18  ;;  %v3998_v8 = vmul.f32 %v3704_v22, %v2822_v12  ;;  %v3709_v5 = vadd.f32 1.0, %v5365_v0  ;;  %5378 = verf.f32 %v3130_v45  ;;  %v10124_v48 = vadd.f32 %v9516_v17, %v8563_v27  ;;  %v10810_v17 = vld [vmem:[#allocation57_spill] sm:$0xff] }
 0x3d1   : > { %v5367_v36 = vpop.eup %5366  ;;  %v4000_v58 = vmul.f32 %v3706_v3, %v2824_v20  ;;  %v2829_v41 = vmul.f32 0.5, %v10058_v24  ;;  %5380 = verf.f32 %v3133_v15  ;;  %v3135_v38 = vmul.f32 0.70710677, %v10119_v37 }
 0x3d2   : > { %4292 = vst [vmem:[%s7652_s15 + $0x828] sm:$0xff] %v3998_v8  ;;  %v4003_v63 = vmul.f32 %v3709_v5, %v2827_v49  ;;  %v3711_v59 = vadd.f32 1.0, %v5367_v36  ;;  %v2828_v56 = vmul.f32 0.5, %v10070_v9  ;;  %v3134_v54 = vmul.f32 0.70710677, %v10124_v48 }
 0x3d3   : > { %v5369_v29 = vpop.eup %5368  ;;  %4294 = vst [vmem:[%s7652_s15 + $0x838] sm:$0xff] %v4000_v58  ;;  %5382 = verf.f32 %v3135_v38  ;;  %v10134_v55 = vadd.f32 %v10810_v17, %v8579_v44  ;;  %v10138_v24 = vadd.f32 %v9548_v23, %v8539_v10  ;;  %v10142_v33 = vadd.f32 %v9550_v39, %v8541_v19 }
 0x3d4   : > { %v5371_v26 = vpop.eup %5370  ;;  %4297 = vst [vmem:[%s7652_s15 + $0x850] sm:$0xff] %v4003_v63  ;;  %v4005_v9 = vmul.f32 %v3711_v59, %v2829_v41  ;;  %v3710_v53 = vadd.f32 1.0, %v5369_v29  ;;  %5384 = verf.f32 %v3134_v54  ;;  %v10147_v62 = vadd.f32 %v9557_v50, %v8563_v27 }
 0x3d5   : > { %v5373_v42 = vpop.eup %5372  ;;  %v2830_v2 = vmul.f32 0.5, %v10075_v4  ;;  %v3712_v13 = vadd.f32 1.0, %v5371_v26  ;;  %v3136_v23 = vmul.f32 0.70710677, %v10134_v55  ;;  %v2833_v14 = vmul.f32 0.5, %v10079_v6 }
 0x3d6   : > { %4299 = vst [vmem:[%s7652_s15 + $0x860] sm:$0xff] %v4005_v9  ;;  %v4004_v39 = vmul.f32 %v3710_v53, %v2828_v56  ;;  %v3715_v25 = vadd.f32 1.0, %v5373_v42  ;;  %v3139_v7 = vmul.f32 0.70710677, %v10138_v24  ;;  %v2835_v1 = vmul.f32 0.5, %v10092_v47 }
 0x3d7   : > { %v4006_v46 = vmul.f32 %v3712_v13, %v2830_v2  ;;  %5386 = verf.f32 %v3136_v23  ;;  %v3141_v50 = vmul.f32 0.70710677, %v10142_v33  ;;  %v3140_v21 = vmul.f32 0.70710677, %v10147_v62 }
 0x3d8   : > { %v5375_v30 = vpop.eup %5374  ;;  %4298 = vst [vmem:[%s7652_s15 + $0x858] sm:$0xff] %v4004_v39  ;;  %v4009_v4 = vmul.f32 %v3715_v25, %v2833_v14  ;;  %5388 = verf.f32 %v3139_v7  ;;  %v10160_v52 = vadd.f32 %v10811_v28, %v8579_v44  ;;  %v10165_v47 = vadd.f32 %v9575_v16, %v8539_v10 }
 0x3d9   : > { %v5377_v6 = vpop.eup %5376  ;;  %4300 = vst [vmem:[%s7652_s15 + $0x868] sm:$0xff] %v4006_v46  ;;  %v3717_v32 = vadd.f32 1.0, %v5375_v30  ;;  %5390 = verf.f32 %v3141_v50  ;;  %v10169_v31 = vadd.f32 %v9577_v57, %v8541_v19  ;;  %v2834_v12 = vmul.f32 0.5, %v10096_v43 }
 0x3da   : > { %v5379_v34 = vpop.eup %5378  ;;  %4303 = vst [vmem:[%s7652_s15 + $0x880] sm:$0xff] %v4009_v4  ;;  %v3716_v20 = vadd.f32 1.0, %v5377_v6  ;;  %5392 = verf.f32 %v3140_v21  ;;  %v3142_v35 = vmul.f32 0.70710677, %v10160_v52  ;;  %v2836_v18 = vmul.f32 0.5, %v10101_v61 }
 0x3db   : > { %v5381_v45 = vpop.eup %5380  ;;  %v4011_v11 = vmul.f32 %v3717_v32, %v2835_v1  ;;  %v3718_v10 = vadd.f32 1.0, %v5379_v34  ;;  %v3145_v16 = vmul.f32 0.70710677, %v10165_v47  ;;  %v2839_v19 = vmul.f32 0.5, %v10105_v51  ;;  %v10812_v51 = vld [vmem:[#allocation59_spill] sm:$0xff] }
 0x3dc   : > { %v4010_v22 = vmul.f32 %v3716_v20, %v2834_v12  ;;  %v3721_v57 = vadd.f32 1.0, %v5381_v45  ;;  %5394 = verf.f32 %v3142_v35  ;;  %v3147_v0 = vmul.f32 0.70710677, %v10169_v31 }
 0x3dd   : > { %v5383_v49 = vpop.eup %5382  ;;  %4305 = vst [vmem:[%s7652_s15 + $0x890] sm:$0xff] %v4011_v11  ;;  %v4012_v43 = vmul.f32 %v3718_v10, %v2836_v18  ;;  %5396 = verf.f32 %v3145_v16  ;;  %v2200_v3 = vadd.f32 %v9588_v40, %v8563_v27  ;;  %v2841_v60 = vmul.f32 0.5, %v10119_v37 }
 0x3de   : > { %v5385_v61 = vpop.eup %5384  ;;  %4304 = vst [vmem:[%s7652_s15 + $0x888] sm:$0xff] %v4010_v22  ;;  %v4015_v15 = vmul.f32 %v3721_v57, %v2839_v19  ;;  %v3723_v8 = vadd.f32 1.0, %v5383_v49  ;;  %v2559_v5 = vadd.f32 %v10812_v51, %v8579_v44  ;;  %v2840_v36 = vmul.f32 0.5, %v10124_v48 }
 0x3df   : > { %4306 = vst [vmem:[%s7652_s15 + $0x898] sm:$0xff] %v4012_v43  ;;  %v3722_v58 = vadd.f32 1.0, %v5385_v61  ;;  %5398 = verf.f32 %v3147_v0  ;;  %v3146_v41 = vmul.f32 0.70710677, %v2200_v3  ;;  %v2842_v37 = vmul.f32 0.5, %v10134_v55 }
 0x3e0   : > { %4309 = vst [vmem:[%s7652_s15 + $0x8b0] sm:$0xff] %v4015_v15  ;;  %v4017_v38 = vmul.f32 %v3723_v8, %v2841_v60  ;;  %v3148_v27 = vmul.f32 0.70710677, %v2559_v5  ;;  %v2845_v48 = vmul.f32 0.5, %v10138_v24  ;;  %v2847_v26 = vmul.f32 0.5, %v10142_v33 }
 0x3e1   : > { %v5387_v40 = vpop.eup %5386  ;;  %v4016_v63 = vmul.f32 %v3722_v58, %v2840_v36  ;;  %5400 = verf.f32 %v3146_v41  ;;  %v2846_v42 = vmul.f32 0.5, %v10147_v62  ;;  %v2848_v39 = vmul.f32 0.5, %v10160_v52 }
 0x3e2   : > { %v5389_v59 = vpop.eup %5388  ;;  %4311 = vst [vmem:[%s7652_s15 + $0x8c0] sm:$0xff] %v4017_v38  ;;  %v3724_v56 = vadd.f32 1.0, %v5387_v40  ;;  %5402 = verf.f32 %v3148_v27  ;;  %v2851_v33 = vmul.f32 0.5, %v10165_v47  ;;  %v2853_v1 = vmul.f32 0.5, %v10169_v31 }
 0x3e3   : > { %v5391_v44 = vpop.eup %5390  ;;  %4310 = vst [vmem:[%s7652_s15 + $0x8b8] sm:$0xff] %v4016_v63  ;;  %v3727_v54 = vadd.f32 1.0, %v5389_v59  ;;  %v2852_v28 = vmul.f32 0.5, %v2200_v3  ;;  %v2854_v6 = vmul.f32 0.5, %v2559_v5 }
 0x3e4   : > { %v5393_v29 = vpop.eup %5392  ;;  %v4018_v17 = vmul.f32 %v3724_v56, %v2842_v37  ;;  %v3729_v9 = vadd.f32 1.0, %v5391_v44 }
 0x3e5   : > { %v4021_v53 = vmul.f32 %v3727_v54, %v2845_v48  ;;  %v3728_v2 = vadd.f32 1.0, %v5393_v29 }
 0x3e6   : > { %v5395_v55 = vpop.eup %5394  ;;  %4312 = vst [vmem:[%s7652_s15 + $0x8c8] sm:$0xff] %v4018_v17  ;;  %v4023_v13 = vmul.f32 %v3729_v9, %v2847_v26 }
 0x3e7   : > { %v5397_v23 = vpop.eup %5396  ;;  %4315 = vst [vmem:[%s7652_s15 + $0x8e0] sm:$0xff] %v4021_v53  ;;  %v4022_v24 = vmul.f32 %v3728_v2, %v2846_v42  ;;  %v3730_v14 = vadd.f32 1.0, %v5395_v55 }
 0x3e8   : > { %4317 = vst [vmem:[%s7652_s15 + $0x8f0] sm:$0xff] %v4023_v13  ;;  %v3733_v25 = vadd.f32 1.0, %v5397_v23 }
 0x3e9   : > { %v5399_v7 = vpop.eup %5398  ;;  %4316 = vst [vmem:[%s7652_s15 + $0x8e8] sm:$0xff] %v4022_v24  ;;  %v4024_v62 = vmul.f32 %v3730_v14, %v2848_v39 }
 0x3ea   : > { %v4027_v46 = vmul.f32 %v3733_v25, %v2851_v33  ;;  %v3735_v50 = vadd.f32 1.0, %v5399_v7 }
 0x3eb   : > { %v5401_v30 = vpop.eup %5400  ;;  %4318 = vst [vmem:[%s7652_s15 + $0x8f8] sm:$0xff] %v4024_v62 }
 0x3ec   : > { %v5403_v4 = vpop.eup %5402  ;;  %4321 = vst [vmem:[%s7652_s15 + $0x910] sm:$0xff] %v4027_v46  ;;  %v4029_v21 = vmul.f32 %v3735_v50, %v2853_v1  ;;  %v3734_v52 = vadd.f32 1.0, %v5401_v30 }
 0x3ed   : > { %v3736_v32 = vadd.f32 1.0, %v5403_v4 }
 0x3ee   : > { %4323 = vst [vmem:[%s7652_s15 + $0x920] sm:$0xff] %v4029_v21  ;;  %v4028_v47 = vmul.f32 %v3734_v52, %v2852_v28 }
 0x3ef   : > { %v4030_v34 = vmul.f32 %v3736_v32, %v2854_v6 }
 0x3f0   : > { %4322 = vst [vmem:[%s7652_s15 + $0x918] sm:$0xff] %v4028_v47 }
 0x3f1   : > { %4324 = vst [vmem:[%s7652_s15 + $0x928] sm:$0xff] %v4030_v34 }
 0x3f2 PF: > { %s13_s12 = sadd.s32 1, %s5439_s12  }
 0x3f3   : > { %p10_p4 = scmp.ge.s32.totalorder %s13_s12, 4  }
 0x3f5   :  { %12 = sbr.rel (!%p10_p4) target bundleno = 1 (0x1), region = 62 }

</bundles_post_ra>
